<compile_context>
chip_gen: v7x
topology: tpu7x:2x2x1
jax: 0.10.0
libtpu: 0.0.40
codegen_flags: <defaults>
</compile_context>

<pallas_src>
import numpy as np

import jax
import jax.numpy as jnp
from jax.experimental import pallas as pl
from jax.experimental.pallas import tpu as pltpu

LANE = 128


def _round_up(x, m):
    return (x + m - 1) // m * m


# ----------------------------------------------------------------------------
# Pallas kernel: the entire network, VMEM-resident, single invocation.
# ----------------------------------------------------------------------------
def _common_cnn_kernel(x0_ref,
                       s1_ref, w1_ref, sh1_ref,
                       s2_ref, w2_ref, sh2_ref,
                       s3_ref, w3_ref, sh3_ref,
                       s4_ref, w4_ref, sh4_ref,
                       wfc_ref, bfc_ref,
                       o_ref):
    def conv_relu(x_bf16, s_ref, w_ref, sh_ref):
        n_taps, mo, _ = s_ref.shape
        cout = w_ref.shape[2]
        acc = jnp.zeros((mo, cout), jnp.float32)
        for t in range(n_taps):  # static unroll, tiny tap count (9 or 4)
            # In-kernel im2col: 0/1 selection matmul gathers the input rows for
            # tap t (exact in bf16), then the (BN-folded) weight matmul.
            g = jnp.dot(s_ref[t], x_bf16,
                        preferred_element_type=jnp.float32).astype(jnp.bfloat16)
            acc = acc + jnp.dot(g, w_ref[t], preferred_element_type=jnp.float32)
        y = jnp.maximum(acc + sh_ref[...], 0.0)       # folded-BN shift + ReLU (f32)
        return y.astype(jnp.bfloat16)

    x = x0_ref[...]                                   # (N*16*16, Cin)  bf16
    x = conv_relu(x, s1_ref, w1_ref, sh1_ref)         # (N*8*8, 128)
    x = conv_relu(x, s2_ref, w2_ref, sh2_ref)         # (N*4*4, 128)
    x = conv_relu(x, s3_ref, w3_ref, sh3_ref)         # (N*2*2, 128)
    x = conv_relu(x, s4_ref, w4_ref, sh4_ref)         # (8, 256)  (rows == flatten)
    y = jnp.dot(x, wfc_ref[...], preferred_element_type=jnp.float32)
    o_ref[...] = y + bfc_ref[...]                     # lane-dense (8, 128) f32 store


def _full_spec(arr):
    zeros = (0,) * arr.ndim
    return pl.BlockSpec(arr.shape, lambda i, _z=zeros: _z)


def common_cnn_forward(x_nchw, kp, out_dim):
    """x_nchw: (N, C, H, W) f32. kp: arrays from prepare_kernel_params. out_dim: static."""
    N, C, H, W = x_nchw.shape
    # NCHW -> (N*H*W, C) rows, bf16 MXU operand (tiny layout glue before the kernel).
    x0 = jnp.transpose(x_nchw, (0, 2, 3, 1)).reshape(N * H * W, C).astype(jnp.bfloat16)
    inputs = [x0,
              kp["s1"], kp["w1"], kp["sh1"],
              kp["s2"], kp["w2"], kp["sh2"],
              kp["s3"], kp["w3"], kp["sh3"],
              kp["s4"], kp["w4"], kp["sh4"],
              kp["wfc"], kp["bfc"]]
    mo_pad = kp["s4"].shape[1]
    nout_pad = kp["bfc"].shape[1]
    out_full = pl.pallas_call(
        _common_cnn_kernel,
        out_shape=jax.ShapeDtypeStruct((mo_pad, nout_pad), jnp.float32),
        grid=(1,),
        in_specs=[_full_spec(a) for a in inputs],
        out_specs=pl.BlockSpec((mo_pad, nout_pad), lambda i: (0, 0)),
        compiler_params=pltpu.CompilerParams(dimension_semantics=("arbitrary",)),
    )(*inputs)
    return out_full[:N, :out_dim]


# ----------------------------------------------------------------------------
# One-time (init) parameter preparation: selection matrices, BN folding, padding.
# ----------------------------------------------------------------------------
def _selection_matrices(n, h, w, kh, kw, stride, pad, mo_pad=None):
    """0/1 matrices S[tap, out_row, in_row]; out/in rows ordered n*H*W + h*W + w."""
    ho = (h + 2 * pad - kh) // stride + 1
    wo = (w + 2 * pad - kw) // stride + 1
    mi = n * h * w
    mo = n * ho * wo
    mo_out = mo if mo_pad is None else mo_pad
    s = np.zeros((kh * kw, mo_out, mi), np.float32)
    for bi in range(n):
        for oh in range(ho):
            for ow in range(wo):
                r_out = bi * ho * wo + oh * wo + ow
                for ki in range(kh):
                    for kj in range(kw):
                        hi = stride * oh + ki - pad
                        wi = stride * ow + kj - pad
                        if 0 <= hi < h and 0 <= wi < w:
                            s[ki * kw + kj, r_out, bi * h * w + hi * w + wi] = 1.0
    return jnp.asarray(s, jnp.bfloat16), (ho, wo)


def _fold_conv(w_oihw, bias, gamma, beta, mean, var, cin_pad, cout_pad, eps=1e-5):
    """PyTorch (Cout,Cin,kh,kw) -> per-tap (kh*kw, cin_pad, cout_pad) with BN folded in."""
    cout, cin, kh, kw = w_oihw.shape
    w_taps = jnp.transpose(w_oihw, (2, 3, 1, 0)).reshape(kh * kw, cin, cout)
    if gamma is not None:
        scale = gamma / jnp.sqrt(var + eps)
        shift = (bias - mean) * scale + beta
        w_taps = w_taps * scale[None, None, :]
    else:
        shift = bias
    w_p = jnp.zeros((kh * kw, cin_pad, cout_pad), jnp.float32).at[:, :cin, :cout].set(w_taps)
    sh_p = jnp.zeros((1, cout_pad), jnp.float32).at[0, :cout].set(shift)
    return w_p.astype(jnp.bfloat16), sh_p


def prepare_kernel_params(p, n, h, w, input_ch, output_size):
    kp = {}
    # conv1: input_ch -> 32, k3 s2 p1
    kp["s1"], (h1, w1) = _selection_matrices(n, h, w, 3, 3, 2, 1)
    kp["w1"], kp["sh1"] = _fold_conv(p["w1"], p["b1"], p["g1"], p["be1"], p["m1"], p["v1"],
                                     cin_pad=input_ch, cout_pad=LANE)
    # conv2: 32 -> 64, k3 s2 p1
    kp["s2"], (h2, w2) = _selection_matrices(n, h1, w1, 3, 3, 2, 1)
    kp["w2"], kp["sh2"] = _fold_conv(p["w2"], p["b2"], p["g2"], p["be2"], p["m2"], p["v2"],
                                     cin_pad=LANE, cout_pad=LANE)
    # conv3: 64 -> 128, k3 s2 p1
    kp["s3"], (h3, w3) = _selection_matrices(n, h2, w2, 3, 3, 2, 1)
    kp["w3"], kp["sh3"] = _fold_conv(p["w3"], p["b3"], p["g3"], p["be3"], p["m3"], p["v3"],
                                     cin_pad=LANE, cout_pad=LANE)
    # conv4: 128 -> 256, k2 s2 p0, no BN (rows padded to >=8 for a clean output slab)
    mo4_pad = max(8, _round_up(n, 8))
    kp["s4"], (h4, w4) = _selection_matrices(n, h3, w3, 2, 2, 2, 0, mo_pad=mo4_pad)
    kp["w4"], kp["sh4"] = _fold_conv(p["w4"], p["b4"], None, None, None, None,
                                     cin_pad=LANE, cout_pad=256)
    assert h4 == 1 and w4 == 1, (h4, w4)
    # FC head: pre-transposed + lane-padded once at init (no per-call .T, no ones() scale).
    nout_pad = _round_up(output_size, LANE)
    wfc = jnp.zeros((256, nout_pad), jnp.float32).at[:, :output_size].set(p["fc_w"].T)
    bfc = jnp.zeros((1, nout_pad), jnp.float32).at[0, :output_size].set(p["fc_b"])
    kp["wfc"] = wfc.astype(jnp.bfloat16)
    kp["bfc"] = bfc
    return kp


# ----------------------------------------------------------------------------
# Deterministic parameter init (PyTorch layout) + demo run
# ----------------------------------------------------------------------------
def init_params(key, input_ch, output_size):
    keys = jax.random.split(key, 32)
    ki = iter(range(32))

    def conv_w(cout, cin, kh, kw):
        k = keys[next(ki)]
        fan_in = cin * kh * kw
        return jax.random.normal(k, (cout, cin, kh, kw), jnp.float32) / jnp.sqrt(fan_in)

    def vec(nn, scale=0.1):
        return scale * jax.random.normal(keys[next(ki)], (nn,), jnp.float32)

    def bn(nn):
        g = 1.0 + vec(nn)
        be = vec(nn)
        m = vec(nn)
        v = 0.5 + jnp.abs(vec(nn, 0.5))
        return g, be, m, v

    p = {}
    p["w1"], p["b1"] = conv_w(32, input_ch, 3, 3), vec(32)
    p["g1"], p["be1"], p["m1"], p["v1"] = bn(32)
    p["w2"], p["b2"] = conv_w(64, 32, 3, 3), vec(64)
    p["g2"], p["be2"], p["m2"], p["v2"] = bn(64)
    p["w3"], p["b3"] = conv_w(128, 64, 3, 3), vec(128)
    p["g3"], p["be3"], p["m3"], p["v3"] = bn(128)
    p["w4"], p["b4"] = conv_w(256, 128, 2, 2), vec(256)
    p["fc_w"] = jax.random.normal(keys[next(ki)], (output_size, 256), jnp.float32) / 16.0
    p["fc_b"] = vec(output_size)
    return p


if __name__ == "__main__":
    input_ch, output_size = 4, 10
    N, H, W = 2, 16, 16  # 16x16 -> 8 -> 4 -> 2 -> 1 spatial, flatten = 256

    key = jax.random.PRNGKey(0)
    k_x, k_p = jax.random.split(key)
    x = jax.random.normal(k_x, (N, input_ch, H, W), jnp.float32)
    params = init_params(k_p, input_ch, output_size)
    kparams = prepare_kernel_params(params, N, H, W, input_ch, output_size)

    fwd = jax.jit(common_cnn_forward, static_argnums=2)
    out = fwd(x, kparams, output_size)
    out = jax.block_until_ready(out)
    assert out.shape == (N, output_size), out.shape
    print("KERNEL_OK")
</pallas_src>

<mosaic_0001>
module attributes {stable_mosaic.version = 11 : i64} {
  func.func @_common_cnn_kernel(%arg0: i32, %arg1: memref<512x4xbf16, #tpu.memory_space<vmem>>, %arg2: memref<9x128x512xbf16, #tpu.memory_space<vmem>>, %arg3: memref<9x4x128xbf16, #tpu.memory_space<vmem>>, %arg4: memref<1x128xf32, #tpu.memory_space<vmem>>, %arg5: memref<9x32x128xbf16, #tpu.memory_space<vmem>>, %arg6: memref<9x128x128xbf16, #tpu.memory_space<vmem>>, %arg7: memref<1x128xf32, #tpu.memory_space<vmem>>, %arg8: memref<9x8x32xbf16, #tpu.memory_space<vmem>>, %arg9: memref<9x128x128xbf16, #tpu.memory_space<vmem>>, %arg10: memref<1x128xf32, #tpu.memory_space<vmem>>, %arg11: memref<4x8x8xbf16, #tpu.memory_space<vmem>>, %arg12: memref<4x128x256xbf16, #tpu.memory_space<vmem>>, %arg13: memref<1x256xf32, #tpu.memory_space<vmem>>, %arg14: memref<256x128xbf16, #tpu.memory_space<vmem>>, %arg15: memref<1x128xf32, #tpu.memory_space<vmem>>, %arg16: memref<8x128xf32, #tpu.memory_space<vmem>>) attributes {dimension_semantics = [#tpu.dimension_semantics<arbitrary>], iteration_bounds = array<i64: 1>, scalar_prefetch = 0 : i64, scratch_operands = 0 : i64, tpu.core_type = #tpu.core_type<tc>, window_params = [{pipeline_mode = #tpu.pipeline_mode<synchronous>, transform_indices = @transform_0, window_bounds = array<i64: 512, 4>}, {pipeline_mode = #tpu.pipeline_mode<synchronous>, transform_indices = @transform_1, window_bounds = array<i64: 9, 128, 512>}, {pipeline_mode = #tpu.pipeline_mode<synchronous>, transform_indices = @transform_2, window_bounds = array<i64: 9, 4, 128>}, {pipeline_mode = #tpu.pipeline_mode<synchronous>, transform_indices = @transform_3, window_bounds = array<i64: 1, 128>}, {pipeline_mode = #tpu.pipeline_mode<synchronous>, transform_indices = @transform_4, window_bounds = array<i64: 9, 32, 128>}, {pipeline_mode = #tpu.pipeline_mode<synchronous>, transform_indices = @transform_5, window_bounds = array<i64: 9, 128, 128>}, {pipeline_mode = #tpu.pipeline_mode<synchronous>, transform_indices = @transform_6, window_bounds = array<i64: 1, 128>}, {pipeline_mode = #tpu.pipeline_mode<synchronous>, transform_indices = @transform_7, window_bounds = array<i64: 9, 8, 32>}, {pipeline_mode = #tpu.pipeline_mode<synchronous>, transform_indices = @transform_8, window_bounds = array<i64: 9, 128, 128>}, {pipeline_mode = #tpu.pipeline_mode<synchronous>, transform_indices = @transform_9, window_bounds = array<i64: 1, 128>}, {pipeline_mode = #tpu.pipeline_mode<synchronous>, transform_indices = @transform_10, window_bounds = array<i64: 4, 8, 8>}, {pipeline_mode = #tpu.pipeline_mode<synchronous>, transform_indices = @transform_11, window_bounds = array<i64: 4, 128, 256>}, {pipeline_mode = #tpu.pipeline_mode<synchronous>, transform_indices = @transform_12, window_bounds = array<i64: 1, 256>}, {pipeline_mode = #tpu.pipeline_mode<synchronous>, transform_indices = @transform_13, window_bounds = array<i64: 256, 128>}, {pipeline_mode = #tpu.pipeline_mode<synchronous>, transform_indices = @transform_14, window_bounds = array<i64: 1, 128>}, {pipeline_mode = #tpu.pipeline_mode<synchronous>, transform_indices = @transform_15, window_bounds = array<i64: 8, 128>}]} {
    %c0 = arith.constant 0 : index
    %c0_0 = arith.constant 0 : index
    %0 = vector.load %arg1[%c0, %c0_0] : memref<512x4xbf16, #tpu.memory_space<vmem>>, vector<512x4xbf16>
    %cst = arith.constant 0.000000e+00 : f32
    %1 = vector.broadcast %cst : f32 to vector<128x128xf32>
    %c0_1 = arith.constant 0 : index
    %c0_2 = arith.constant 0 : index
    %c0_3 = arith.constant 0 : index
    %2 = vector.load %arg2[%c0_1, %c0_2, %c0_3] : memref<9x128x512xbf16, #tpu.memory_space<vmem>>, vector<1x128x512xbf16>
    %3 = vector.shape_cast %2 : vector<1x128x512xbf16> to vector<128x512xbf16>
    %cst_4 = arith.constant dense<0.000000e+00> : vector<128x4xf32>
    %4 = tpu.matmul %3, %0, %cst_4 {dimension_numbers = #tpu.dot_dimension_numbers<[1], [0], [0], [1], [0, 0, 1, 1], [], []>} : vector<128x512xbf16>, vector<512x4xbf16>, vector<128x4xf32> -> vector<128x4xf32>
    %5 = arith.truncf %4 : vector<128x4xf32> to vector<128x4xbf16>
    %c0_5 = arith.constant 0 : index
    %c0_6 = arith.constant 0 : index
    %c0_7 = arith.constant 0 : index
    %6 = vector.load %arg3[%c0_5, %c0_6, %c0_7] : memref<9x4x128xbf16, #tpu.memory_space<vmem>>, vector<1x4x128xbf16>
    %7 = vector.shape_cast %6 : vector<1x4x128xbf16> to vector<4x128xbf16>
    %cst_8 = arith.constant dense<0.000000e+00> : vector<128x128xf32>
    %8 = tpu.matmul %5, %7, %cst_8 {dimension_numbers = #tpu.dot_dimension_numbers<[1], [0], [0], [1], [0, 0, 1, 1], [], []>} : vector<128x4xbf16>, vector<4x128xbf16>, vector<128x128xf32> -> vector<128x128xf32>
    %9 = arith.addf %1, %8 : vector<128x128xf32>
    %c1 = arith.constant 1 : index
    %c0_9 = arith.constant 0 : index
    %c0_10 = arith.constant 0 : index
    %10 = vector.load %arg2[%c1, %c0_9, %c0_10] : memref<9x128x512xbf16, #tpu.memory_space<vmem>>, vector<1x128x512xbf16>
    %11 = vector.shape_cast %10 : vector<1x128x512xbf16> to vector<128x512xbf16>
    %cst_11 = arith.constant dense<0.000000e+00> : vector<128x4xf32>
    %12 = tpu.matmul %11, %0, %cst_11 {dimension_numbers = #tpu.dot_dimension_numbers<[1], [0], [0], [1], [0, 0, 1, 1], [], []>} : vector<128x512xbf16>, vector<512x4xbf16>, vector<128x4xf32> -> vector<128x4xf32>
    %13 = arith.truncf %12 : vector<128x4xf32> to vector<128x4xbf16>
    %c1_12 = arith.constant 1 : index
    %c0_13 = arith.constant 0 : index
    %c0_14 = arith.constant 0 : index
    %14 = vector.load %arg3[%c1_12, %c0_13, %c0_14] : memref<9x4x128xbf16, #tpu.memory_space<vmem>>, vector<1x4x128xbf16>
    %15 = vector.shape_cast %14 : vector<1x4x128xbf16> to vector<4x128xbf16>
    %cst_15 = arith.constant dense<0.000000e+00> : vector<128x128xf32>
    %16 = tpu.matmul %13, %15, %cst_15 {dimension_numbers = #tpu.dot_dimension_numbers<[1], [0], [0], [1], [0, 0, 1, 1], [], []>} : vector<128x4xbf16>, vector<4x128xbf16>, vector<128x128xf32> -> vector<128x128xf32>
    %17 = arith.addf %9, %16 : vector<128x128xf32>
    %c2 = arith.constant 2 : index
    %c0_16 = arith.constant 0 : index
    %c0_17 = arith.constant 0 : index
    %18 = vector.load %arg2[%c2, %c0_16, %c0_17] : memref<9x128x512xbf16, #tpu.memory_space<vmem>>, vector<1x128x512xbf16>
    %19 = vector.shape_cast %18 : vector<1x128x512xbf16> to vector<128x512xbf16>
    %cst_18 = arith.constant dense<0.000000e+00> : vector<128x4xf32>
    %20 = tpu.matmul %19, %0, %cst_18 {dimension_numbers = #tpu.dot_dimension_numbers<[1], [0], [0], [1], [0, 0, 1, 1], [], []>} : vector<128x512xbf16>, vector<512x4xbf16>, vector<128x4xf32> -> vector<128x4xf32>
    %21 = arith.truncf %20 : vector<128x4xf32> to vector<128x4xbf16>
    %c2_19 = arith.constant 2 : index
    %c0_20 = arith.constant 0 : index
    %c0_21 = arith.constant 0 : index
    %22 = vector.load %arg3[%c2_19, %c0_20, %c0_21] : memref<9x4x128xbf16, #tpu.memory_space<vmem>>, vector<1x4x128xbf16>
    %23 = vector.shape_cast %22 : vector<1x4x128xbf16> to vector<4x128xbf16>
    %cst_22 = arith.constant dense<0.000000e+00> : vector<128x128xf32>
    %24 = tpu.matmul %21, %23, %cst_22 {dimension_numbers = #tpu.dot_dimension_numbers<[1], [0], [0], [1], [0, 0, 1, 1], [], []>} : vector<128x4xbf16>, vector<4x128xbf16>, vector<128x128xf32> -> vector<128x128xf32>
    %25 = arith.addf %17, %24 : vector<128x128xf32>
    %c3 = arith.constant 3 : index
    %c0_23 = arith.constant 0 : index
    %c0_24 = arith.constant 0 : index
    %26 = vector.load %arg2[%c3, %c0_23, %c0_24] : memref<9x128x512xbf16, #tpu.memory_space<vmem>>, vector<1x128x512xbf16>
    %27 = vector.shape_cast %26 : vector<1x128x512xbf16> to vector<128x512xbf16>
    %cst_25 = arith.constant dense<0.000000e+00> : vector<128x4xf32>
    %28 = tpu.matmul %27, %0, %cst_25 {dimension_numbers = #tpu.dot_dimension_numbers<[1], [0], [0], [1], [0, 0, 1, 1], [], []>} : vector<128x512xbf16>, vector<512x4xbf16>, vector<128x4xf32> -> vector<128x4xf32>
    %29 = arith.truncf %28 : vector<128x4xf32> to vector<128x4xbf16>
    %c3_26 = arith.constant 3 : index
    %c0_27 = arith.constant 0 : index
    %c0_28 = arith.constant 0 : index
    %30 = vector.load %arg3[%c3_26, %c0_27, %c0_28] : memref<9x4x128xbf16, #tpu.memory_space<vmem>>, vector<1x4x128xbf16>
    %31 = vector.shape_cast %30 : vector<1x4x128xbf16> to vector<4x128xbf16>
    %cst_29 = arith.constant dense<0.000000e+00> : vector<128x128xf32>
    %32 = tpu.matmul %29, %31, %cst_29 {dimension_numbers = #tpu.dot_dimension_numbers<[1], [0], [0], [1], [0, 0, 1, 1], [], []>} : vector<128x4xbf16>, vector<4x128xbf16>, vector<128x128xf32> -> vector<128x128xf32>
    %33 = arith.addf %25, %32 : vector<128x128xf32>
    %c4 = arith.constant 4 : index
    %c0_30 = arith.constant 0 : index
    %c0_31 = arith.constant 0 : index
    %34 = vector.load %arg2[%c4, %c0_30, %c0_31] : memref<9x128x512xbf16, #tpu.memory_space<vmem>>, vector<1x128x512xbf16>
    %35 = vector.shape_cast %34 : vector<1x128x512xbf16> to vector<128x512xbf16>
    %cst_32 = arith.constant dense<0.000000e+00> : vector<128x4xf32>
    %36 = tpu.matmul %35, %0, %cst_32 {dimension_numbers = #tpu.dot_dimension_numbers<[1], [0], [0], [1], [0, 0, 1, 1], [], []>} : vector<128x512xbf16>, vector<512x4xbf16>, vector<128x4xf32> -> vector<128x4xf32>
    %37 = arith.truncf %36 : vector<128x4xf32> to vector<128x4xbf16>
    %c4_33 = arith.constant 4 : index
    %c0_34 = arith.constant 0 : index
    %c0_35 = arith.constant 0 : index
    %38 = vector.load %arg3[%c4_33, %c0_34, %c0_35] : memref<9x4x128xbf16, #tpu.memory_space<vmem>>, vector<1x4x128xbf16>
    %39 = vector.shape_cast %38 : vector<1x4x128xbf16> to vector<4x128xbf16>
    %cst_36 = arith.constant dense<0.000000e+00> : vector<128x128xf32>
    %40 = tpu.matmul %37, %39, %cst_36 {dimension_numbers = #tpu.dot_dimension_numbers<[1], [0], [0], [1], [0, 0, 1, 1], [], []>} : vector<128x4xbf16>, vector<4x128xbf16>, vector<128x128xf32> -> vector<128x128xf32>
    %41 = arith.addf %33, %40 : vector<128x128xf32>
    %c5 = arith.constant 5 : index
    %c0_37 = arith.constant 0 : index
    %c0_38 = arith.constant 0 : index
    %42 = vector.load %arg2[%c5, %c0_37, %c0_38] : memref<9x128x512xbf16, #tpu.memory_space<vmem>>, vector<1x128x512xbf16>
    %43 = vector.shape_cast %42 : vector<1x128x512xbf16> to vector<128x512xbf16>
    %cst_39 = arith.constant dense<0.000000e+00> : vector<128x4xf32>
    %44 = tpu.matmul %43, %0, %cst_39 {dimension_numbers = #tpu.dot_dimension_numbers<[1], [0], [0], [1], [0, 0, 1, 1], [], []>} : vector<128x512xbf16>, vector<512x4xbf16>, vector<128x4xf32> -> vector<128x4xf32>
    %45 = arith.truncf %44 : vector<128x4xf32> to vector<128x4xbf16>
    %c5_40 = arith.constant 5 : index
    %c0_41 = arith.constant 0 : index
    %c0_42 = arith.constant 0 : index
    %46 = vector.load %arg3[%c5_40, %c0_41, %c0_42] : memref<9x4x128xbf16, #tpu.memory_space<vmem>>, vector<1x4x128xbf16>
    %47 = vector.shape_cast %46 : vector<1x4x128xbf16> to vector<4x128xbf16>
    %cst_43 = arith.constant dense<0.000000e+00> : vector<128x128xf32>
    %48 = tpu.matmul %45, %47, %cst_43 {dimension_numbers = #tpu.dot_dimension_numbers<[1], [0], [0], [1], [0, 0, 1, 1], [], []>} : vector<128x4xbf16>, vector<4x128xbf16>, vector<128x128xf32> -> vector<128x128xf32>
    %49 = arith.addf %41, %48 : vector<128x128xf32>
    %c6 = arith.constant 6 : index
    %c0_44 = arith.constant 0 : index
    %c0_45 = arith.constant 0 : index
    %50 = vector.load %arg2[%c6, %c0_44, %c0_45] : memref<9x128x512xbf16, #tpu.memory_space<vmem>>, vector<1x128x512xbf16>
    %51 = vector.shape_cast %50 : vector<1x128x512xbf16> to vector<128x512xbf16>
    %cst_46 = arith.constant dense<0.000000e+00> : vector<128x4xf32>
    %52 = tpu.matmul %51, %0, %cst_46 {dimension_numbers = #tpu.dot_dimension_numbers<[1], [0], [0], [1], [0, 0, 1, 1], [], []>} : vector<128x512xbf16>, vector<512x4xbf16>, vector<128x4xf32> -> vector<128x4xf32>
    %53 = arith.truncf %52 : vector<128x4xf32> to vector<128x4xbf16>
    %c6_47 = arith.constant 6 : index
    %c0_48 = arith.constant 0 : index
    %c0_49 = arith.constant 0 : index
    %54 = vector.load %arg3[%c6_47, %c0_48, %c0_49] : memref<9x4x128xbf16, #tpu.memory_space<vmem>>, vector<1x4x128xbf16>
    %55 = vector.shape_cast %54 : vector<1x4x128xbf16> to vector<4x128xbf16>
    %cst_50 = arith.constant dense<0.000000e+00> : vector<128x128xf32>
    %56 = tpu.matmul %53, %55, %cst_50 {dimension_numbers = #tpu.dot_dimension_numbers<[1], [0], [0], [1], [0, 0, 1, 1], [], []>} : vector<128x4xbf16>, vector<4x128xbf16>, vector<128x128xf32> -> vector<128x128xf32>
    %57 = arith.addf %49, %56 : vector<128x128xf32>
    %c7 = arith.constant 7 : index
    %c0_51 = arith.constant 0 : index
    %c0_52 = arith.constant 0 : index
    %58 = vector.load %arg2[%c7, %c0_51, %c0_52] : memref<9x128x512xbf16, #tpu.memory_space<vmem>>, vector<1x128x512xbf16>
    %59 = vector.shape_cast %58 : vector<1x128x512xbf16> to vector<128x512xbf16>
    %cst_53 = arith.constant dense<0.000000e+00> : vector<128x4xf32>
    %60 = tpu.matmul %59, %0, %cst_53 {dimension_numbers = #tpu.dot_dimension_numbers<[1], [0], [0], [1], [0, 0, 1, 1], [], []>} : vector<128x512xbf16>, vector<512x4xbf16>, vector<128x4xf32> -> vector<128x4xf32>
    %61 = arith.truncf %60 : vector<128x4xf32> to vector<128x4xbf16>
    %c7_54 = arith.constant 7 : index
    %c0_55 = arith.constant 0 : index
    %c0_56 = arith.constant 0 : index
    %62 = vector.load %arg3[%c7_54, %c0_55, %c0_56] : memref<9x4x128xbf16, #tpu.memory_space<vmem>>, vector<1x4x128xbf16>
    %63 = vector.shape_cast %62 : vector<1x4x128xbf16> to vector<4x128xbf16>
    %cst_57 = arith.constant dense<0.000000e+00> : vector<128x128xf32>
    %64 = tpu.matmul %61, %63, %cst_57 {dimension_numbers = #tpu.dot_dimension_numbers<[1], [0], [0], [1], [0, 0, 1, 1], [], []>} : vector<128x4xbf16>, vector<4x128xbf16>, vector<128x128xf32> -> vector<128x128xf32>
    %65 = arith.addf %57, %64 : vector<128x128xf32>
    %c8 = arith.constant 8 : index
    %c0_58 = arith.constant 0 : index
    %c0_59 = arith.constant 0 : index
    %66 = vector.load %arg2[%c8, %c0_58, %c0_59] : memref<9x128x512xbf16, #tpu.memory_space<vmem>>, vector<1x128x512xbf16>
    %67 = vector.shape_cast %66 : vector<1x128x512xbf16> to vector<128x512xbf16>
    %cst_60 = arith.constant dense<0.000000e+00> : vector<128x4xf32>
    %68 = tpu.matmul %67, %0, %cst_60 {dimension_numbers = #tpu.dot_dimension_numbers<[1], [0], [0], [1], [0, 0, 1, 1], [], []>} : vector<128x512xbf16>, vector<512x4xbf16>, vector<128x4xf32> -> vector<128x4xf32>
    %69 = arith.truncf %68 : vector<128x4xf32> to vector<128x4xbf16>
    %c8_61 = arith.constant 8 : index
    %c0_62 = arith.constant 0 : index
    %c0_63 = arith.constant 0 : index
    %70 = vector.load %arg3[%c8_61, %c0_62, %c0_63] : memref<9x4x128xbf16, #tpu.memory_space<vmem>>, vector<1x4x128xbf16>
    %71 = vector.shape_cast %70 : vector<1x4x128xbf16> to vector<4x128xbf16>
    %cst_64 = arith.constant dense<0.000000e+00> : vector<128x128xf32>
    %72 = tpu.matmul %69, %71, %cst_64 {dimension_numbers = #tpu.dot_dimension_numbers<[1], [0], [0], [1], [0, 0, 1, 1], [], []>} : vector<128x4xbf16>, vector<4x128xbf16>, vector<128x128xf32> -> vector<128x128xf32>
    %73 = arith.addf %65, %72 : vector<128x128xf32>
    %c0_65 = arith.constant 0 : index
    %c0_66 = arith.constant 0 : index
    %74 = vector.load %arg4[%c0_65, %c0_66] : memref<1x128xf32, #tpu.memory_space<vmem>>, vector<1x128xf32>
    %75 = vector.broadcast %74 : vector<1x128xf32> to vector<128x128xf32>
    %76 = arith.addf %73, %75 : vector<128x128xf32>
    %cst_67 = arith.constant 0.000000e+00 : f32
    %77 = vector.broadcast %cst_67 : f32 to vector<128x128xf32>
    %78 = arith.maximumf %76, %77 : vector<128x128xf32>
    %79 = arith.truncf %78 : vector<128x128xf32> to vector<128x128xbf16>
    %cst_68 = arith.constant 0.000000e+00 : f32
    %80 = vector.broadcast %cst_68 : f32 to vector<32x128xf32>
    %c0_69 = arith.constant 0 : index
    %c0_70 = arith.constant 0 : index
    %c0_71 = arith.constant 0 : index
    %81 = vector.load %arg5[%c0_69, %c0_70, %c0_71] : memref<9x32x128xbf16, #tpu.memory_space<vmem>>, vector<1x32x128xbf16>
    %82 = vector.shape_cast %81 : vector<1x32x128xbf16> to vector<32x128xbf16>
    %cst_72 = arith.constant dense<0.000000e+00> : vector<32x128xf32>
    %83 = tpu.matmul %82, %79, %cst_72 {dimension_numbers = #tpu.dot_dimension_numbers<[1], [0], [0], [1], [0, 0, 1, 1], [], []>} : vector<32x128xbf16>, vector<128x128xbf16>, vector<32x128xf32> -> vector<32x128xf32>
    %84 = arith.truncf %83 : vector<32x128xf32> to vector<32x128xbf16>
    %c0_73 = arith.constant 0 : index
    %c0_74 = arith.constant 0 : index
    %c0_75 = arith.constant 0 : index
    %85 = vector.load %arg6[%c0_73, %c0_74, %c0_75] : memref<9x128x128xbf16, #tpu.memory_space<vmem>>, vector<1x128x128xbf16>
    %86 = vector.shape_cast %85 : vector<1x128x128xbf16> to vector<128x128xbf16>
    %cst_76 = arith.constant dense<0.000000e+00> : vector<32x128xf32>
    %87 = tpu.matmul %84, %86, %cst_76 {dimension_numbers = #tpu.dot_dimension_numbers<[1], [0], [0], [1], [0, 0, 1, 1], [], []>} : vector<32x128xbf16>, vector<128x128xbf16>, vector<32x128xf32> -> vector<32x128xf32>
    %88 = arith.addf %80, %87 : vector<32x128xf32>
    %c1_77 = arith.constant 1 : index
    %c0_78 = arith.constant 0 : index
    %c0_79 = arith.constant 0 : index
    %89 = vector.load %arg5[%c1_77, %c0_78, %c0_79] : memref<9x32x128xbf16, #tpu.memory_space<vmem>>, vector<1x32x128xbf16>
    %90 = vector.shape_cast %89 : vector<1x32x128xbf16> to vector<32x128xbf16>
    %cst_80 = arith.constant dense<0.000000e+00> : vector<32x128xf32>
    %91 = tpu.matmul %90, %79, %cst_80 {dimension_numbers = #tpu.dot_dimension_numbers<[1], [0], [0], [1], [0, 0, 1, 1], [], []>} : vector<32x128xbf16>, vector<128x128xbf16>, vector<32x128xf32> -> vector<32x128xf32>
    %92 = arith.truncf %91 : vector<32x128xf32> to vector<32x128xbf16>
    %c1_81 = arith.constant 1 : index
    %c0_82 = arith.constant 0 : index
    %c0_83 = arith.constant 0 : index
    %93 = vector.load %arg6[%c1_81, %c0_82, %c0_83] : memref<9x128x128xbf16, #tpu.memory_space<vmem>>, vector<1x128x128xbf16>
    %94 = vector.shape_cast %93 : vector<1x128x128xbf16> to vector<128x128xbf16>
    %cst_84 = arith.constant dense<0.000000e+00> : vector<32x128xf32>
    %95 = tpu.matmul %92, %94, %cst_84 {dimension_numbers = #tpu.dot_dimension_numbers<[1], [0], [0], [1], [0, 0, 1, 1], [], []>} : vector<32x128xbf16>, vector<128x128xbf16>, vector<32x128xf32> -> vector<32x128xf32>
    %96 = arith.addf %88, %95 : vector<32x128xf32>
    %c2_85 = arith.constant 2 : index
    %c0_86 = arith.constant 0 : index
    %c0_87 = arith.constant 0 : index
    %97 = vector.load %arg5[%c2_85, %c0_86, %c0_87] : memref<9x32x128xbf16, #tpu.memory_space<vmem>>, vector<1x32x128xbf16>
    %98 = vector.shape_cast %97 : vector<1x32x128xbf16> to vector<32x128xbf16>
    %cst_88 = arith.constant dense<0.000000e+00> : vector<32x128xf32>
    %99 = tpu.matmul %98, %79, %cst_88 {dimension_numbers = #tpu.dot_dimension_numbers<[1], [0], [0], [1], [0, 0, 1, 1], [], []>} : vector<32x128xbf16>, vector<128x128xbf16>, vector<32x128xf32> -> vector<32x128xf32>
    %100 = arith.truncf %99 : vector<32x128xf32> to vector<32x128xbf16>
    %c2_89 = arith.constant 2 : index
    %c0_90 = arith.constant 0 : index
    %c0_91 = arith.constant 0 : index
    %101 = vector.load %arg6[%c2_89, %c0_90, %c0_91] : memref<9x128x128xbf16, #tpu.memory_space<vmem>>, vector<1x128x128xbf16>
    %102 = vector.shape_cast %101 : vector<1x128x128xbf16> to vector<128x128xbf16>
    %cst_92 = arith.constant dense<0.000000e+00> : vector<32x128xf32>
    %103 = tpu.matmul %100, %102, %cst_92 {dimension_numbers = #tpu.dot_dimension_numbers<[1], [0], [0], [1], [0, 0, 1, 1], [], []>} : vector<32x128xbf16>, vector<128x128xbf16>, vector<32x128xf32> -> vector<32x128xf32>
    %104 = arith.addf %96, %103 : vector<32x128xf32>
    %c3_93 = arith.constant 3 : index
    %c0_94 = arith.constant 0 : index
    %c0_95 = arith.constant 0 : index
    %105 = vector.load %arg5[%c3_93, %c0_94, %c0_95] : memref<9x32x128xbf16, #tpu.memory_space<vmem>>, vector<1x32x128xbf16>
    %106 = vector.shape_cast %105 : vector<1x32x128xbf16> to vector<32x128xbf16>
    %cst_96 = arith.constant dense<0.000000e+00> : vector<32x128xf32>
    %107 = tpu.matmul %106, %79, %cst_96 {dimension_numbers = #tpu.dot_dimension_numbers<[1], [0], [0], [1], [0, 0, 1, 1], [], []>} : vector<32x128xbf16>, vector<128x128xbf16>, vector<32x128xf32> -> vector<32x128xf32>
    %108 = arith.truncf %107 : vector<32x128xf32> to vector<32x128xbf16>
    %c3_97 = arith.constant 3 : index
    %c0_98 = arith.constant 0 : index
    %c0_99 = arith.constant 0 : index
    %109 = vector.load %arg6[%c3_97, %c0_98, %c0_99] : memref<9x128x128xbf16, #tpu.memory_space<vmem>>, vector<1x128x128xbf16>
    %110 = vector.shape_cast %109 : vector<1x128x128xbf16> to vector<128x128xbf16>
    %cst_100 = arith.constant dense<0.000000e+00> : vector<32x128xf32>
    %111 = tpu.matmul %108, %110, %cst_100 {dimension_numbers = #tpu.dot_dimension_numbers<[1], [0], [0], [1], [0, 0, 1, 1], [], []>} : vector<32x128xbf16>, vector<128x128xbf16>, vector<32x128xf32> -> vector<32x128xf32>
    %112 = arith.addf %104, %111 : vector<32x128xf32>
    %c4_101 = arith.constant 4 : index
    %c0_102 = arith.constant 0 : index
    %c0_103 = arith.constant 0 : index
    %113 = vector.load %arg5[%c4_101, %c0_102, %c0_103] : memref<9x32x128xbf16, #tpu.memory_space<vmem>>, vector<1x32x128xbf16>
    %114 = vector.shape_cast %113 : vector<1x32x128xbf16> to vector<32x128xbf16>
    %cst_104 = arith.constant dense<0.000000e+00> : vector<32x128xf32>
    %115 = tpu.matmul %114, %79, %cst_104 {dimension_numbers = #tpu.dot_dimension_numbers<[1], [0], [0], [1], [0, 0, 1, 1], [], []>} : vector<32x128xbf16>, vector<128x128xbf16>, vector<32x128xf32> -> vector<32x128xf32>
    %116 = arith.truncf %115 : vector<32x128xf32> to vector<32x128xbf16>
    %c4_105 = arith.constant 4 : index
    %c0_106 = arith.constant 0 : index
    %c0_107 = arith.constant 0 : index
    %117 = vector.load %arg6[%c4_105, %c0_106, %c0_107] : memref<9x128x128xbf16, #tpu.memory_space<vmem>>, vector<1x128x128xbf16>
    %118 = vector.shape_cast %117 : vector<1x128x128xbf16> to vector<128x128xbf16>
    %cst_108 = arith.constant dense<0.000000e+00> : vector<32x128xf32>
    %119 = tpu.matmul %116, %118, %cst_108 {dimension_numbers = #tpu.dot_dimension_numbers<[1], [0], [0], [1], [0, 0, 1, 1], [], []>} : vector<32x128xbf16>, vector<128x128xbf16>, vector<32x128xf32> -> vector<32x128xf32>
    %120 = arith.addf %112, %119 : vector<32x128xf32>
    %c5_109 = arith.constant 5 : index
    %c0_110 = arith.constant 0 : index
    %c0_111 = arith.constant 0 : index
    %121 = vector.load %arg5[%c5_109, %c0_110, %c0_111] : memref<9x32x128xbf16, #tpu.memory_space<vmem>>, vector<1x32x128xbf16>
    %122 = vector.shape_cast %121 : vector<1x32x128xbf16> to vector<32x128xbf16>
    %cst_112 = arith.constant dense<0.000000e+00> : vector<32x128xf32>
    %123 = tpu.matmul %122, %79, %cst_112 {dimension_numbers = #tpu.dot_dimension_numbers<[1], [0], [0], [1], [0, 0, 1, 1], [], []>} : vector<32x128xbf16>, vector<128x128xbf16>, vector<32x128xf32> -> vector<32x128xf32>
    %124 = arith.truncf %123 : vector<32x128xf32> to vector<32x128xbf16>
    %c5_113 = arith.constant 5 : index
    %c0_114 = arith.constant 0 : index
    %c0_115 = arith.constant 0 : index
    %125 = vector.load %arg6[%c5_113, %c0_114, %c0_115] : memref<9x128x128xbf16, #tpu.memory_space<vmem>>, vector<1x128x128xbf16>
    %126 = vector.shape_cast %125 : vector<1x128x128xbf16> to vector<128x128xbf16>
    %cst_116 = arith.constant dense<0.000000e+00> : vector<32x128xf32>
    %127 = tpu.matmul %124, %126, %cst_116 {dimension_numbers = #tpu.dot_dimension_numbers<[1], [0], [0], [1], [0, 0, 1, 1], [], []>} : vector<32x128xbf16>, vector<128x128xbf16>, vector<32x128xf32> -> vector<32x128xf32>
    %128 = arith.addf %120, %127 : vector<32x128xf32>
    %c6_117 = arith.constant 6 : index
    %c0_118 = arith.constant 0 : index
    %c0_119 = arith.constant 0 : index
    %129 = vector.load %arg5[%c6_117, %c0_118, %c0_119] : memref<9x32x128xbf16, #tpu.memory_space<vmem>>, vector<1x32x128xbf16>
    %130 = vector.shape_cast %129 : vector<1x32x128xbf16> to vector<32x128xbf16>
    %cst_120 = arith.constant dense<0.000000e+00> : vector<32x128xf32>
    %131 = tpu.matmul %130, %79, %cst_120 {dimension_numbers = #tpu.dot_dimension_numbers<[1], [0], [0], [1], [0, 0, 1, 1], [], []>} : vector<32x128xbf16>, vector<128x128xbf16>, vector<32x128xf32> -> vector<32x128xf32>
    %132 = arith.truncf %131 : vector<32x128xf32> to vector<32x128xbf16>
    %c6_121 = arith.constant 6 : index
    %c0_122 = arith.constant 0 : index
    %c0_123 = arith.constant 0 : index
    %133 = vector.load %arg6[%c6_121, %c0_122, %c0_123] : memref<9x128x128xbf16, #tpu.memory_space<vmem>>, vector<1x128x128xbf16>
    %134 = vector.shape_cast %133 : vector<1x128x128xbf16> to vector<128x128xbf16>
    %cst_124 = arith.constant dense<0.000000e+00> : vector<32x128xf32>
    %135 = tpu.matmul %132, %134, %cst_124 {dimension_numbers = #tpu.dot_dimension_numbers<[1], [0], [0], [1], [0, 0, 1, 1], [], []>} : vector<32x128xbf16>, vector<128x128xbf16>, vector<32x128xf32> -> vector<32x128xf32>
    %136 = arith.addf %128, %135 : vector<32x128xf32>
    %c7_125 = arith.constant 7 : index
    %c0_126 = arith.constant 0 : index
    %c0_127 = arith.constant 0 : index
    %137 = vector.load %arg5[%c7_125, %c0_126, %c0_127] : memref<9x32x128xbf16, #tpu.memory_space<vmem>>, vector<1x32x128xbf16>
    %138 = vector.shape_cast %137 : vector<1x32x128xbf16> to vector<32x128xbf16>
    %cst_128 = arith.constant dense<0.000000e+00> : vector<32x128xf32>
    %139 = tpu.matmul %138, %79, %cst_128 {dimension_numbers = #tpu.dot_dimension_numbers<[1], [0], [0], [1], [0, 0, 1, 1], [], []>} : vector<32x128xbf16>, vector<128x128xbf16>, vector<32x128xf32> -> vector<32x128xf32>
    %140 = arith.truncf %139 : vector<32x128xf32> to vector<32x128xbf16>
    %c7_129 = arith.constant 7 : index
    %c0_130 = arith.constant 0 : index
    %c0_131 = arith.constant 0 : index
    %141 = vector.load %arg6[%c7_129, %c0_130, %c0_131] : memref<9x128x128xbf16, #tpu.memory_space<vmem>>, vector<1x128x128xbf16>
    %142 = vector.shape_cast %141 : vector<1x128x128xbf16> to vector<128x128xbf16>
    %cst_132 = arith.constant dense<0.000000e+00> : vector<32x128xf32>
    %143 = tpu.matmul %140, %142, %cst_132 {dimension_numbers = #tpu.dot_dimension_numbers<[1], [0], [0], [1], [0, 0, 1, 1], [], []>} : vector<32x128xbf16>, vector<128x128xbf16>, vector<32x128xf32> -> vector<32x128xf32>
    %144 = arith.addf %136, %143 : vector<32x128xf32>
    %c8_133 = arith.constant 8 : index
    %c0_134 = arith.constant 0 : index
    %c0_135 = arith.constant 0 : index
    %145 = vector.load %arg5[%c8_133, %c0_134, %c0_135] : memref<9x32x128xbf16, #tpu.memory_space<vmem>>, vector<1x32x128xbf16>
    %146 = vector.shape_cast %145 : vector<1x32x128xbf16> to vector<32x128xbf16>
    %cst_136 = arith.constant dense<0.000000e+00> : vector<32x128xf32>
    %147 = tpu.matmul %146, %79, %cst_136 {dimension_numbers = #tpu.dot_dimension_numbers<[1], [0], [0], [1], [0, 0, 1, 1], [], []>} : vector<32x128xbf16>, vector<128x128xbf16>, vector<32x128xf32> -> vector<32x128xf32>
    %148 = arith.truncf %147 : vector<32x128xf32> to vector<32x128xbf16>
    %c8_137 = arith.constant 8 : index
    %c0_138 = arith.constant 0 : index
    %c0_139 = arith.constant 0 : index
    %149 = vector.load %arg6[%c8_137, %c0_138, %c0_139] : memref<9x128x128xbf16, #tpu.memory_space<vmem>>, vector<1x128x128xbf16>
    %150 = vector.shape_cast %149 : vector<1x128x128xbf16> to vector<128x128xbf16>
    %cst_140 = arith.constant dense<0.000000e+00> : vector<32x128xf32>
    %151 = tpu.matmul %148, %150, %cst_140 {dimension_numbers = #tpu.dot_dimension_numbers<[1], [0], [0], [1], [0, 0, 1, 1], [], []>} : vector<32x128xbf16>, vector<128x128xbf16>, vector<32x128xf32> -> vector<32x128xf32>
    %152 = arith.addf %144, %151 : vector<32x128xf32>
    %c0_141 = arith.constant 0 : index
    %c0_142 = arith.constant 0 : index
    %153 = vector.load %arg7[%c0_141, %c0_142] : memref<1x128xf32, #tpu.memory_space<vmem>>, vector<1x128xf32>
    %154 = vector.broadcast %153 : vector<1x128xf32> to vector<32x128xf32>
    %155 = arith.addf %152, %154 : vector<32x128xf32>
    %cst_143 = arith.constant 0.000000e+00 : f32
    %156 = vector.broadcast %cst_143 : f32 to vector<32x128xf32>
    %157 = arith.maximumf %155, %156 : vector<32x128xf32>
    %158 = arith.truncf %157 : vector<32x128xf32> to vector<32x128xbf16>
    %cst_144 = arith.constant 0.000000e+00 : f32
    %159 = vector.broadcast %cst_144 : f32 to vector<8x128xf32>
    %c0_145 = arith.constant 0 : index
    %c0_146 = arith.constant 0 : index
    %c0_147 = arith.constant 0 : index
    %160 = vector.load %arg8[%c0_145, %c0_146, %c0_147] : memref<9x8x32xbf16, #tpu.memory_space<vmem>>, vector<1x8x32xbf16>
    %161 = vector.shape_cast %160 : vector<1x8x32xbf16> to vector<8x32xbf16>
    %cst_148 = arith.constant dense<0.000000e+00> : vector<8x128xf32>
    %162 = tpu.matmul %161, %158, %cst_148 {dimension_numbers = #tpu.dot_dimension_numbers<[1], [0], [0], [1], [0, 0, 1, 1], [], []>} : vector<8x32xbf16>, vector<32x128xbf16>, vector<8x128xf32> -> vector<8x128xf32>
    %163 = arith.truncf %162 : vector<8x128xf32> to vector<8x128xbf16>
    %c0_149 = arith.constant 0 : index
    %c0_150 = arith.constant 0 : index
    %c0_151 = arith.constant 0 : index
    %164 = vector.load %arg9[%c0_149, %c0_150, %c0_151] : memref<9x128x128xbf16, #tpu.memory_space<vmem>>, vector<1x128x128xbf16>
    %165 = vector.shape_cast %164 : vector<1x128x128xbf16> to vector<128x128xbf16>
    %cst_152 = arith.constant dense<0.000000e+00> : vector<8x128xf32>
    %166 = tpu.matmul %163, %165, %cst_152 {dimension_numbers = #tpu.dot_dimension_numbers<[1], [0], [0], [1], [0, 0, 1, 1], [], []>} : vector<8x128xbf16>, vector<128x128xbf16>, vector<8x128xf32> -> vector<8x128xf32>
    %167 = arith.addf %159, %166 : vector<8x128xf32>
    %c1_153 = arith.constant 1 : index
    %c0_154 = arith.constant 0 : index
    %c0_155 = arith.constant 0 : index
    %168 = vector.load %arg8[%c1_153, %c0_154, %c0_155] : memref<9x8x32xbf16, #tpu.memory_space<vmem>>, vector<1x8x32xbf16>
    %169 = vector.shape_cast %168 : vector<1x8x32xbf16> to vector<8x32xbf16>
    %cst_156 = arith.constant dense<0.000000e+00> : vector<8x128xf32>
    %170 = tpu.matmul %169, %158, %cst_156 {dimension_numbers = #tpu.dot_dimension_numbers<[1], [0], [0], [1], [0, 0, 1, 1], [], []>} : vector<8x32xbf16>, vector<32x128xbf16>, vector<8x128xf32> -> vector<8x128xf32>
    %171 = arith.truncf %170 : vector<8x128xf32> to vector<8x128xbf16>
    %c1_157 = arith.constant 1 : index
    %c0_158 = arith.constant 0 : index
    %c0_159 = arith.constant 0 : index
    %172 = vector.load %arg9[%c1_157, %c0_158, %c0_159] : memref<9x128x128xbf16, #tpu.memory_space<vmem>>, vector<1x128x128xbf16>
    %173 = vector.shape_cast %172 : vector<1x128x128xbf16> to vector<128x128xbf16>
    %cst_160 = arith.constant dense<0.000000e+00> : vector<8x128xf32>
    %174 = tpu.matmul %171, %173, %cst_160 {dimension_numbers = #tpu.dot_dimension_numbers<[1], [0], [0], [1], [0, 0, 1, 1], [], []>} : vector<8x128xbf16>, vector<128x128xbf16>, vector<8x128xf32> -> vector<8x128xf32>
    %175 = arith.addf %167, %174 : vector<8x128xf32>
    %c2_161 = arith.constant 2 : index
    %c0_162 = arith.constant 0 : index
    %c0_163 = arith.constant 0 : index
    %176 = vector.load %arg8[%c2_161, %c0_162, %c0_163] : memref<9x8x32xbf16, #tpu.memory_space<vmem>>, vector<1x8x32xbf16>
    %177 = vector.shape_cast %176 : vector<1x8x32xbf16> to vector<8x32xbf16>
    %cst_164 = arith.constant dense<0.000000e+00> : vector<8x128xf32>
    %178 = tpu.matmul %177, %158, %cst_164 {dimension_numbers = #tpu.dot_dimension_numbers<[1], [0], [0], [1], [0, 0, 1, 1], [], []>} : vector<8x32xbf16>, vector<32x128xbf16>, vector<8x128xf32> -> vector<8x128xf32>
    %179 = arith.truncf %178 : vector<8x128xf32> to vector<8x128xbf16>
    %c2_165 = arith.constant 2 : index
    %c0_166 = arith.constant 0 : index
    %c0_167 = arith.constant 0 : index
    %180 = vector.load %arg9[%c2_165, %c0_166, %c0_167] : memref<9x128x128xbf16, #tpu.memory_space<vmem>>, vector<1x128x128xbf16>
    %181 = vector.shape_cast %180 : vector<1x128x128xbf16> to vector<128x128xbf16>
    %cst_168 = arith.constant dense<0.000000e+00> : vector<8x128xf32>
    %182 = tpu.matmul %179, %181, %cst_168 {dimension_numbers = #tpu.dot_dimension_numbers<[1], [0], [0], [1], [0, 0, 1, 1], [], []>} : vector<8x128xbf16>, vector<128x128xbf16>, vector<8x128xf32> -> vector<8x128xf32>
    %183 = arith.addf %175, %182 : vector<8x128xf32>
    %c3_169 = arith.constant 3 : index
    %c0_170 = arith.constant 0 : index
    %c0_171 = arith.constant 0 : index
    %184 = vector.load %arg8[%c3_169, %c0_170, %c0_171] : memref<9x8x32xbf16, #tpu.memory_space<vmem>>, vector<1x8x32xbf16>
    %185 = vector.shape_cast %184 : vector<1x8x32xbf16> to vector<8x32xbf16>
    %cst_172 = arith.constant dense<0.000000e+00> : vector<8x128xf32>
    %186 = tpu.matmul %185, %158, %cst_172 {dimension_numbers = #tpu.dot_dimension_numbers<[1], [0], [0], [1], [0, 0, 1, 1], [], []>} : vector<8x32xbf16>, vector<32x128xbf16>, vector<8x128xf32> -> vector<8x128xf32>
    %187 = arith.truncf %186 : vector<8x128xf32> to vector<8x128xbf16>
    %c3_173 = arith.constant 3 : index
    %c0_174 = arith.constant 0 : index
    %c0_175 = arith.constant 0 : index
    %188 = vector.load %arg9[%c3_173, %c0_174, %c0_175] : memref<9x128x128xbf16, #tpu.memory_space<vmem>>, vector<1x128x128xbf16>
    %189 = vector.shape_cast %188 : vector<1x128x128xbf16> to vector<128x128xbf16>
    %cst_176 = arith.constant dense<0.000000e+00> : vector<8x128xf32>
    %190 = tpu.matmul %187, %189, %cst_176 {dimension_numbers = #tpu.dot_dimension_numbers<[1], [0], [0], [1], [0, 0, 1, 1], [], []>} : vector<8x128xbf16>, vector<128x128xbf16>, vector<8x128xf32> -> vector<8x128xf32>
    %191 = arith.addf %183, %190 : vector<8x128xf32>
    %c4_177 = arith.constant 4 : index
    %c0_178 = arith.constant 0 : index
    %c0_179 = arith.constant 0 : index
    %192 = vector.load %arg8[%c4_177, %c0_178, %c0_179] : memref<9x8x32xbf16, #tpu.memory_space<vmem>>, vector<1x8x32xbf16>
    %193 = vector.shape_cast %192 : vector<1x8x32xbf16> to vector<8x32xbf16>
    %cst_180 = arith.constant dense<0.000000e+00> : vector<8x128xf32>
    %194 = tpu.matmul %193, %158, %cst_180 {dimension_numbers = #tpu.dot_dimension_numbers<[1], [0], [0], [1], [0, 0, 1, 1], [], []>} : vector<8x32xbf16>, vector<32x128xbf16>, vector<8x128xf32> -> vector<8x128xf32>
    %195 = arith.truncf %194 : vector<8x128xf32> to vector<8x128xbf16>
    %c4_181 = arith.constant 4 : index
    %c0_182 = arith.constant 0 : index
    %c0_183 = arith.constant 0 : index
    %196 = vector.load %arg9[%c4_181, %c0_182, %c0_183] : memref<9x128x128xbf16, #tpu.memory_space<vmem>>, vector<1x128x128xbf16>
    %197 = vector.shape_cast %196 : vector<1x128x128xbf16> to vector<128x128xbf16>
    %cst_184 = arith.constant dense<0.000000e+00> : vector<8x128xf32>
    %198 = tpu.matmul %195, %197, %cst_184 {dimension_numbers = #tpu.dot_dimension_numbers<[1], [0], [0], [1], [0, 0, 1, 1], [], []>} : vector<8x128xbf16>, vector<128x128xbf16>, vector<8x128xf32> -> vector<8x128xf32>
    %199 = arith.addf %191, %198 : vector<8x128xf32>
    %c5_185 = arith.constant 5 : index
    %c0_186 = arith.constant 0 : index
    %c0_187 = arith.constant 0 : index
    %200 = vector.load %arg8[%c5_185, %c0_186, %c0_187] : memref<9x8x32xbf16, #tpu.memory_space<vmem>>, vector<1x8x32xbf16>
    %201 = vector.shape_cast %200 : vector<1x8x32xbf16> to vector<8x32xbf16>
    %cst_188 = arith.constant dense<0.000000e+00> : vector<8x128xf32>
    %202 = tpu.matmul %201, %158, %cst_188 {dimension_numbers = #tpu.dot_dimension_numbers<[1], [0], [0], [1], [0, 0, 1, 1], [], []>} : vector<8x32xbf16>, vector<32x128xbf16>, vector<8x128xf32> -> vector<8x128xf32>
    %203 = arith.truncf %202 : vector<8x128xf32> to vector<8x128xbf16>
    %c5_189 = arith.constant 5 : index
    %c0_190 = arith.constant 0 : index
    %c0_191 = arith.constant 0 : index
    %204 = vector.load %arg9[%c5_189, %c0_190, %c0_191] : memref<9x128x128xbf16, #tpu.memory_space<vmem>>, vector<1x128x128xbf16>
    %205 = vector.shape_cast %204 : vector<1x128x128xbf16> to vector<128x128xbf16>
    %cst_192 = arith.constant dense<0.000000e+00> : vector<8x128xf32>
    %206 = tpu.matmul %203, %205, %cst_192 {dimension_numbers = #tpu.dot_dimension_numbers<[1], [0], [0], [1], [0, 0, 1, 1], [], []>} : vector<8x128xbf16>, vector<128x128xbf16>, vector<8x128xf32> -> vector<8x128xf32>
    %207 = arith.addf %199, %206 : vector<8x128xf32>
    %c6_193 = arith.constant 6 : index
    %c0_194 = arith.constant 0 : index
    %c0_195 = arith.constant 0 : index
    %208 = vector.load %arg8[%c6_193, %c0_194, %c0_195] : memref<9x8x32xbf16, #tpu.memory_space<vmem>>, vector<1x8x32xbf16>
    %209 = vector.shape_cast %208 : vector<1x8x32xbf16> to vector<8x32xbf16>
    %cst_196 = arith.constant dense<0.000000e+00> : vector<8x128xf32>
    %210 = tpu.matmul %209, %158, %cst_196 {dimension_numbers = #tpu.dot_dimension_numbers<[1], [0], [0], [1], [0, 0, 1, 1], [], []>} : vector<8x32xbf16>, vector<32x128xbf16>, vector<8x128xf32> -> vector<8x128xf32>
    %211 = arith.truncf %210 : vector<8x128xf32> to vector<8x128xbf16>
    %c6_197 = arith.constant 6 : index
    %c0_198 = arith.constant 0 : index
    %c0_199 = arith.constant 0 : index
    %212 = vector.load %arg9[%c6_197, %c0_198, %c0_199] : memref<9x128x128xbf16, #tpu.memory_space<vmem>>, vector<1x128x128xbf16>
    %213 = vector.shape_cast %212 : vector<1x128x128xbf16> to vector<128x128xbf16>
    %cst_200 = arith.constant dense<0.000000e+00> : vector<8x128xf32>
    %214 = tpu.matmul %211, %213, %cst_200 {dimension_numbers = #tpu.dot_dimension_numbers<[1], [0], [0], [1], [0, 0, 1, 1], [], []>} : vector<8x128xbf16>, vector<128x128xbf16>, vector<8x128xf32> -> vector<8x128xf32>
    %215 = arith.addf %207, %214 : vector<8x128xf32>
    %c7_201 = arith.constant 7 : index
    %c0_202 = arith.constant 0 : index
    %c0_203 = arith.constant 0 : index
    %216 = vector.load %arg8[%c7_201, %c0_202, %c0_203] : memref<9x8x32xbf16, #tpu.memory_space<vmem>>, vector<1x8x32xbf16>
    %217 = vector.shape_cast %216 : vector<1x8x32xbf16> to vector<8x32xbf16>
    %cst_204 = arith.constant dense<0.000000e+00> : vector<8x128xf32>
    %218 = tpu.matmul %217, %158, %cst_204 {dimension_numbers = #tpu.dot_dimension_numbers<[1], [0], [0], [1], [0, 0, 1, 1], [], []>} : vector<8x32xbf16>, vector<32x128xbf16>, vector<8x128xf32> -> vector<8x128xf32>
    %219 = arith.truncf %218 : vector<8x128xf32> to vector<8x128xbf16>
    %c7_205 = arith.constant 7 : index
    %c0_206 = arith.constant 0 : index
    %c0_207 = arith.constant 0 : index
    %220 = vector.load %arg9[%c7_205, %c0_206, %c0_207] : memref<9x128x128xbf16, #tpu.memory_space<vmem>>, vector<1x128x128xbf16>
    %221 = vector.shape_cast %220 : vector<1x128x128xbf16> to vector<128x128xbf16>
    %cst_208 = arith.constant dense<0.000000e+00> : vector<8x128xf32>
    %222 = tpu.matmul %219, %221, %cst_208 {dimension_numbers = #tpu.dot_dimension_numbers<[1], [0], [0], [1], [0, 0, 1, 1], [], []>} : vector<8x128xbf16>, vector<128x128xbf16>, vector<8x128xf32> -> vector<8x128xf32>
    %223 = arith.addf %215, %222 : vector<8x128xf32>
    %c8_209 = arith.constant 8 : index
    %c0_210 = arith.constant 0 : index
    %c0_211 = arith.constant 0 : index
    %224 = vector.load %arg8[%c8_209, %c0_210, %c0_211] : memref<9x8x32xbf16, #tpu.memory_space<vmem>>, vector<1x8x32xbf16>
    %225 = vector.shape_cast %224 : vector<1x8x32xbf16> to vector<8x32xbf16>
    %cst_212 = arith.constant dense<0.000000e+00> : vector<8x128xf32>
    %226 = tpu.matmul %225, %158, %cst_212 {dimension_numbers = #tpu.dot_dimension_numbers<[1], [0], [0], [1], [0, 0, 1, 1], [], []>} : vector<8x32xbf16>, vector<32x128xbf16>, vector<8x128xf32> -> vector<8x128xf32>
    %227 = arith.truncf %226 : vector<8x128xf32> to vector<8x128xbf16>
    %c8_213 = arith.constant 8 : index
    %c0_214 = arith.constant 0 : index
    %c0_215 = arith.constant 0 : index
    %228 = vector.load %arg9[%c8_213, %c0_214, %c0_215] : memref<9x128x128xbf16, #tpu.memory_space<vmem>>, vector<1x128x128xbf16>
    %229 = vector.shape_cast %228 : vector<1x128x128xbf16> to vector<128x128xbf16>
    %cst_216 = arith.constant dense<0.000000e+00> : vector<8x128xf32>
    %230 = tpu.matmul %227, %229, %cst_216 {dimension_numbers = #tpu.dot_dimension_numbers<[1], [0], [0], [1], [0, 0, 1, 1], [], []>} : vector<8x128xbf16>, vector<128x128xbf16>, vector<8x128xf32> -> vector<8x128xf32>
    %231 = arith.addf %223, %230 : vector<8x128xf32>
    %c0_217 = arith.constant 0 : index
    %c0_218 = arith.constant 0 : index
    %232 = vector.load %arg10[%c0_217, %c0_218] : memref<1x128xf32, #tpu.memory_space<vmem>>, vector<1x128xf32>
    %233 = vector.broadcast %232 : vector<1x128xf32> to vector<8x128xf32>
    %234 = arith.addf %231, %233 : vector<8x128xf32>
    %cst_219 = arith.constant 0.000000e+00 : f32
    %235 = vector.broadcast %cst_219 : f32 to vector<8x128xf32>
    %236 = arith.maximumf %234, %235 : vector<8x128xf32>
    %237 = arith.truncf %236 : vector<8x128xf32> to vector<8x128xbf16>
    %cst_220 = arith.constant 0.000000e+00 : f32
    %238 = vector.broadcast %cst_220 : f32 to vector<8x256xf32>
    %c0_221 = arith.constant 0 : index
    %c0_222 = arith.constant 0 : index
    %c0_223 = arith.constant 0 : index
    %239 = vector.load %arg11[%c0_221, %c0_222, %c0_223] : memref<4x8x8xbf16, #tpu.memory_space<vmem>>, vector<1x8x8xbf16>
    %240 = vector.shape_cast %239 : vector<1x8x8xbf16> to vector<8x8xbf16>
    %cst_224 = arith.constant dense<0.000000e+00> : vector<8x128xf32>
    %241 = tpu.matmul %240, %237, %cst_224 {dimension_numbers = #tpu.dot_dimension_numbers<[1], [0], [0], [1], [0, 0, 1, 1], [], []>} : vector<8x8xbf16>, vector<8x128xbf16>, vector<8x128xf32> -> vector<8x128xf32>
    %242 = arith.truncf %241 : vector<8x128xf32> to vector<8x128xbf16>
    %c0_225 = arith.constant 0 : index
    %c0_226 = arith.constant 0 : index
    %c0_227 = arith.constant 0 : index
    %243 = vector.load %arg12[%c0_225, %c0_226, %c0_227] : memref<4x128x256xbf16, #tpu.memory_space<vmem>>, vector<1x128x256xbf16>
    %244 = vector.shape_cast %243 : vector<1x128x256xbf16> to vector<128x256xbf16>
    %cst_228 = arith.constant dense<0.000000e+00> : vector<8x256xf32>
    %245 = tpu.matmul %242, %244, %cst_228 {dimension_numbers = #tpu.dot_dimension_numbers<[1], [0], [0], [1], [0, 0, 1, 1], [], []>} : vector<8x128xbf16>, vector<128x256xbf16>, vector<8x256xf32> -> vector<8x256xf32>
    %246 = arith.addf %238, %245 : vector<8x256xf32>
    %c1_229 = arith.constant 1 : index
    %c0_230 = arith.constant 0 : index
    %c0_231 = arith.constant 0 : index
    %247 = vector.load %arg11[%c1_229, %c0_230, %c0_231] : memref<4x8x8xbf16, #tpu.memory_space<vmem>>, vector<1x8x8xbf16>
    %248 = vector.shape_cast %247 : vector<1x8x8xbf16> to vector<8x8xbf16>
    %cst_232 = arith.constant dense<0.000000e+00> : vector<8x128xf32>
    %249 = tpu.matmul %248, %237, %cst_232 {dimension_numbers = #tpu.dot_dimension_numbers<[1], [0], [0], [1], [0, 0, 1, 1], [], []>} : vector<8x8xbf16>, vector<8x128xbf16>, vector<8x128xf32> -> vector<8x128xf32>
    %250 = arith.truncf %249 : vector<8x128xf32> to vector<8x128xbf16>
    %c1_233 = arith.constant 1 : index
    %c0_234 = arith.constant 0 : index
    %c0_235 = arith.constant 0 : index
    %251 = vector.load %arg12[%c1_233, %c0_234, %c0_235] : memref<4x128x256xbf16, #tpu.memory_space<vmem>>, vector<1x128x256xbf16>
    %252 = vector.shape_cast %251 : vector<1x128x256xbf16> to vector<128x256xbf16>
    %cst_236 = arith.constant dense<0.000000e+00> : vector<8x256xf32>
    %253 = tpu.matmul %250, %252, %cst_236 {dimension_numbers = #tpu.dot_dimension_numbers<[1], [0], [0], [1], [0, 0, 1, 1], [], []>} : vector<8x128xbf16>, vector<128x256xbf16>, vector<8x256xf32> -> vector<8x256xf32>
    %254 = arith.addf %246, %253 : vector<8x256xf32>
    %c2_237 = arith.constant 2 : index
    %c0_238 = arith.constant 0 : index
    %c0_239 = arith.constant 0 : index
    %255 = vector.load %arg11[%c2_237, %c0_238, %c0_239] : memref<4x8x8xbf16, #tpu.memory_space<vmem>>, vector<1x8x8xbf16>
    %256 = vector.shape_cast %255 : vector<1x8x8xbf16> to vector<8x8xbf16>
    %cst_240 = arith.constant dense<0.000000e+00> : vector<8x128xf32>
    %257 = tpu.matmul %256, %237, %cst_240 {dimension_numbers = #tpu.dot_dimension_numbers<[1], [0], [0], [1], [0, 0, 1, 1], [], []>} : vector<8x8xbf16>, vector<8x128xbf16>, vector<8x128xf32> -> vector<8x128xf32>
    %258 = arith.truncf %257 : vector<8x128xf32> to vector<8x128xbf16>
    %c2_241 = arith.constant 2 : index
    %c0_242 = arith.constant 0 : index
    %c0_243 = arith.constant 0 : index
    %259 = vector.load %arg12[%c2_241, %c0_242, %c0_243] : memref<4x128x256xbf16, #tpu.memory_space<vmem>>, vector<1x128x256xbf16>
    %260 = vector.shape_cast %259 : vector<1x128x256xbf16> to vector<128x256xbf16>
    %cst_244 = arith.constant dense<0.000000e+00> : vector<8x256xf32>
    %261 = tpu.matmul %258, %260, %cst_244 {dimension_numbers = #tpu.dot_dimension_numbers<[1], [0], [0], [1], [0, 0, 1, 1], [], []>} : vector<8x128xbf16>, vector<128x256xbf16>, vector<8x256xf32> -> vector<8x256xf32>
    %262 = arith.addf %254, %261 : vector<8x256xf32>
    %c3_245 = arith.constant 3 : index
    %c0_246 = arith.constant 0 : index
    %c0_247 = arith.constant 0 : index
    %263 = vector.load %arg11[%c3_245, %c0_246, %c0_247] : memref<4x8x8xbf16, #tpu.memory_space<vmem>>, vector<1x8x8xbf16>
    %264 = vector.shape_cast %263 : vector<1x8x8xbf16> to vector<8x8xbf16>
    %cst_248 = arith.constant dense<0.000000e+00> : vector<8x128xf32>
    %265 = tpu.matmul %264, %237, %cst_248 {dimension_numbers = #tpu.dot_dimension_numbers<[1], [0], [0], [1], [0, 0, 1, 1], [], []>} : vector<8x8xbf16>, vector<8x128xbf16>, vector<8x128xf32> -> vector<8x128xf32>
    %266 = arith.truncf %265 : vector<8x128xf32> to vector<8x128xbf16>
    %c3_249 = arith.constant 3 : index
    %c0_250 = arith.constant 0 : index
    %c0_251 = arith.constant 0 : index
    %267 = vector.load %arg12[%c3_249, %c0_250, %c0_251] : memref<4x128x256xbf16, #tpu.memory_space<vmem>>, vector<1x128x256xbf16>
    %268 = vector.shape_cast %267 : vector<1x128x256xbf16> to vector<128x256xbf16>
    %cst_252 = arith.constant dense<0.000000e+00> : vector<8x256xf32>
    %269 = tpu.matmul %266, %268, %cst_252 {dimension_numbers = #tpu.dot_dimension_numbers<[1], [0], [0], [1], [0, 0, 1, 1], [], []>} : vector<8x128xbf16>, vector<128x256xbf16>, vector<8x256xf32> -> vector<8x256xf32>
    %270 = arith.addf %262, %269 : vector<8x256xf32>
    %c0_253 = arith.constant 0 : index
    %c0_254 = arith.constant 0 : index
    %271 = vector.load %arg13[%c0_253, %c0_254] : memref<1x256xf32, #tpu.memory_space<vmem>>, vector<1x256xf32>
    %272 = vector.broadcast %271 : vector<1x256xf32> to vector<8x256xf32>
    %273 = arith.addf %270, %272 : vector<8x256xf32>
    %cst_255 = arith.constant 0.000000e+00 : f32
    %274 = vector.broadcast %cst_255 : f32 to vector<8x256xf32>
    %275 = arith.maximumf %273, %274 : vector<8x256xf32>
    %276 = arith.truncf %275 : vector<8x256xf32> to vector<8x256xbf16>
    %c0_256 = arith.constant 0 : index
    %c0_257 = arith.constant 0 : index
    %277 = vector.load %arg14[%c0_256, %c0_257] : memref<256x128xbf16, #tpu.memory_space<vmem>>, vector<256x128xbf16>
    %cst_258 = arith.constant dense<0.000000e+00> : vector<8x128xf32>
    %278 = tpu.matmul %276, %277, %cst_258 {dimension_numbers = #tpu.dot_dimension_numbers<[1], [0], [0], [1], [0, 0, 1, 1], [], []>} : vector<8x256xbf16>, vector<256x128xbf16>, vector<8x128xf32> -> vector<8x128xf32>
    %c0_259 = arith.constant 0 : index
    %c0_260 = arith.constant 0 : index
    %279 = vector.load %arg15[%c0_259, %c0_260] : memref<1x128xf32, #tpu.memory_space<vmem>>, vector<1x128xf32>
    %280 = vector.broadcast %279 : vector<1x128xf32> to vector<8x128xf32>
    %281 = arith.addf %278, %280 : vector<8x128xf32>
    %c0_261 = arith.constant 0 : index
    %c0_262 = arith.constant 0 : index
    %282 = vector.load %arg16[%c0_261, %c0_262] : memref<8x128xf32, #tpu.memory_space<vmem>>, vector<8x128xf32>
    tpu.vector_store %arg16[%c0_261, %c0_262], %281 {strides = array<i32>} : memref<8x128xf32, #tpu.memory_space<vmem>>, vector<8x128xf32>,
    return
  }
  func.func @transform_0(%arg0: i32) -> (i32, i32) {
    %c0_i32 = arith.constant 0 : i32
    %c0_i32_0 = arith.constant 0 : i32
    %c0_i32_1 = arith.constant 0 : i32
    return %c0_i32, %c0_i32_0 : i32, i32
  }
  func.func @transform_1(%arg0: i32) -> (i32, i32, i32) {
    %c0_i32 = arith.constant 0 : i32
    %c0_i32_0 = arith.constant 0 : i32
    %c0_i32_1 = arith.constant 0 : i32
    %c0_i32_2 = arith.constant 0 : i32
    return %c0_i32, %c0_i32_0, %c0_i32_1 : i32, i32, i32
  }
  func.func @transform_2(%arg0: i32) -> (i32, i32, i32) {
    %c0_i32 = arith.constant 0 : i32
    %c0_i32_0 = arith.constant 0 : i32
    %c0_i32_1 = arith.constant 0 : i32
    %c0_i32_2 = arith.constant 0 : i32
    return %c0_i32, %c0_i32_0, %c0_i32_1 : i32, i32, i32
  }
  func.func @transform_3(%arg0: i32) -> (i32, i32) {
    %c0_i32 = arith.constant 0 : i32
    %c0_i32_0 = arith.constant 0 : i32
    %c0_i32_1 = arith.constant 0 : i32
    return %c0_i32, %c0_i32_0 : i32, i32
  }
  func.func @transform_4(%arg0: i32) -> (i32, i32, i32) {
    %c0_i32 = arith.constant 0 : i32
    %c0_i32_0 = arith.constant 0 : i32
    %c0_i32_1 = arith.constant 0 : i32
    %c0_i32_2 = arith.constant 0 : i32
    return %c0_i32, %c0_i32_0, %c0_i32_1 : i32, i32, i32
  }
  func.func @transform_5(%arg0: i32) -> (i32, i32, i32) {
    %c0_i32 = arith.constant 0 : i32
    %c0_i32_0 = arith.constant 0 : i32
    %c0_i32_1 = arith.constant 0 : i32
    %c0_i32_2 = arith.constant 0 : i32
    return %c0_i32, %c0_i32_0, %c0_i32_1 : i32, i32, i32
  }
  func.func @transform_6(%arg0: i32) -> (i32, i32) {
    %c0_i32 = arith.constant 0 : i32
    %c0_i32_0 = arith.constant 0 : i32
    %c0_i32_1 = arith.constant 0 : i32
    return %c0_i32, %c0_i32_0 : i32, i32
  }
  func.func @transform_7(%arg0: i32) -> (i32, i32, i32) {
    %c0_i32 = arith.constant 0 : i32
    %c0_i32_0 = arith.constant 0 : i32
    %c0_i32_1 = arith.constant 0 : i32
    %c0_i32_2 = arith.constant 0 : i32
    return %c0_i32, %c0_i32_0, %c0_i32_1 : i32, i32, i32
  }
  func.func @transform_8(%arg0: i32) -> (i32, i32, i32) {
    %c0_i32 = arith.constant 0 : i32
    %c0_i32_0 = arith.constant 0 : i32
    %c0_i32_1 = arith.constant 0 : i32
    %c0_i32_2 = arith.constant 0 : i32
    return %c0_i32, %c0_i32_0, %c0_i32_1 : i32, i32, i32
  }
  func.func @transform_9(%arg0: i32) -> (i32, i32) {
    %c0_i32 = arith.constant 0 : i32
    %c0_i32_0 = arith.constant 0 : i32
    %c0_i32_1 = arith.constant 0 : i32
    return %c0_i32, %c0_i32_0 : i32, i32
  }
  func.func @transform_10(%arg0: i32) -> (i32, i32, i32) {
    %c0_i32 = arith.constant 0 : i32
    %c0_i32_0 = arith.constant 0 : i32
    %c0_i32_1 = arith.constant 0 : i32
    %c0_i32_2 = arith.constant 0 : i32
    return %c0_i32, %c0_i32_0, %c0_i32_1 : i32, i32, i32
  }
  func.func @transform_11(%arg0: i32) -> (i32, i32, i32) {
    %c0_i32 = arith.constant 0 : i32
    %c0_i32_0 = arith.constant 0 : i32
    %c0_i32_1 = arith.constant 0 : i32
    %c0_i32_2 = arith.constant 0 : i32
    return %c0_i32, %c0_i32_0, %c0_i32_1 : i32, i32, i32
  }
  func.func @transform_12(%arg0: i32) -> (i32, i32) {
    %c0_i32 = arith.constant 0 : i32
    %c0_i32_0 = arith.constant 0 : i32
    %c0_i32_1 = arith.constant 0 : i32
    return %c0_i32, %c0_i32_0 : i32, i32
  }
  func.func @transform_13(%arg0: i32) -> (i32, i32) {
    %c0_i32 = arith.constant 0 : i32
    %c0_i32_0 = arith.constant 0 : i32
    %c0_i32_1 = arith.constant 0 : i32
    return %c0_i32, %c0_i32_0 : i32, i32
  }
  func.func @transform_14(%arg0: i32) -> (i32, i32) {
    %c0_i32 = arith.constant 0 : i32
    %c0_i32_0 = arith.constant 0 : i32
    %c0_i32_1 = arith.constant 0 : i32
    return %c0_i32, %c0_i32_0 : i32, i32
  }
  func.func @transform_15(%arg0: i32) -> (i32, i32) {
    %c0_i32 = arith.constant 0 : i32
    %c0_i32_0 = arith.constant 0 : i32
    %c0_i32_1 = arith.constant 0 : i32
    return %c0_i32, %c0_i32_0 : i32, i32
  }
}

</mosaic_0001>

<bundles_post_ra>
// kernel: common_cnn_forward.1
= control target key start
LH: loop header
LB: loop body
LE: loop exit
PB: predicated region body
PF: predicated region fallthrough
CT: control target
= control target key end

     0   :  { %20 = vsyncpa [#allocation3], 0  ;;  %s15749_s0 = inlined_call_operand.vmem [shape: bf16[512,4], index: 0, kind: input, shape index: {}]   ;;  %s15750_s1 = inlined_call_operand.hbm [shape: bf16[9,128,512], index: 1, kind: input, shape index: {}]   ;;  %s15751_s2 = inlined_call_operand.hbm [shape: bf16[9,4,128], index: 2, kind: input, shape index: {}]   ;;  %s15752_s3 = inlined_call_operand.hbm [shape: f32[1,128], index: 3, kind: input, shape index: {}]   ;;  %s15753_s4 = inlined_call_operand.hbm [shape: bf16[9,32,128], index: 4, kind: input, shape index: {}]   ;;  %s15754_s5 = inlined_call_operand.hbm [shape: bf16[9,128,128], index: 5, kind: input, shape index: {}]   ;;  %s15755_s6 = inlined_call_operand.hbm [shape: f32[1,128], index: 6, kind: input, shape index: {}]   ;;  %s15756_s7 = inlined_call_operand.hbm [shape: bf16[9,8,32], index: 7, kind: input, shape index: {}]   ;;  %s15757_s8 = inlined_call_operand.hbm [shape: bf16[9,128,128], index: 8, kind: input, shape index: {}]   ;;  %s15758_s9 = inlined_call_operand.hbm [shape: f32[1,128], index: 9, kind: input, shape index: {}]   ;;  %s15759_s10 = inlined_call_operand.hbm [shape: bf16[4,8,8], index: 10, kind: input, shape index: {}]   ;;  %s15760_s11 = inlined_call_operand.hbm [shape: bf16[4,128,256], index: 11, kind: input, shape index: {}]   ;;  %s15761_s12 = inlined_call_operand.hbm [shape: f32[1,256], index: 12, kind: input, shape index: {}]   ;;  %s15762_s13 = inlined_call_operand.hbm [shape: bf16[256,128], index: 13, kind: input, shape index: {}]   ;;  %s15763_s14 = inlined_call_operand.hbm [shape: f32[1,128], index: 14, kind: input, shape index: {}]   ;;  %s15764_s15 = inlined_call_operand.vmem [shape: f32[8,128], index: 15, kind: output, shape index: {}]  }
   0x1   :  { %21 = vsyncpa [#allocation5], 0 }
   0x2   :  { %22 = vsyncpa [#allocation8], 0 }
   0x3   :  { %23 = vsyncpa [#allocation11], 0 }
   0x4   :  { %24 = vsyncpa [#allocation14], 0 }
   0x5   :  { %25 = vsyncpa [#allocation17], 0 }
   0x6   :  { %26 = vsyncpa [#allocation20], 0 }
   0x7   :  { %27 = vsyncpa [#allocation23], 0  ;;  %s13687_s18 = smov [#allocation4]   ;;  %s13363_s22 = scalar_lea.hbm %s15751_s2, 288 }
   0x8   :  { %s47_s19 = sshll.u32 %s13687_s18, 4  ;;  %p13364_p0 = scmp.ne.s32.totalorder %s15751_s2, %s13363_s22  ;;  %s48_s19 = int_to_ptr.vmem [resolvable:$true] %s47_s19 }
   0x9   :  { %p13367_p1 = scmp.lt.u32.totalorder %s13363_s22, %s15751_s2 }
   0xb   :  { %p13369_p2 = pnand %p13367_p1, %p13364_p0 }
   0xd   :  { %13372 = shalt.err (!%p13369_p2)
}
   0xe   :  { %s13373_s27 = scalar_lea.vmem %s48_s19, 288  ;;  %p13378_p4 = scmp.lt.s32.totalorder %s48_s19, %s48_s19 }
   0xf   :  { %p13374_p3 = scmp.ne.s32.totalorder %s48_s19, %s13373_s27  ;;  %p13379_p5 = scmp.lt.s32.totalorder %s13373_s27, %s13373_s27 }
  0x11   :  { %p13380_p6 = por %p13379_p5, %p13378_p4 }
  0x13   :  { %p13381_p7 = pnand %p13380_p6, %p13374_p3 }
  0x15   :  { %13384 = shalt.err (!%p13381_p7)
}
  0x16   :  { %s13688_s28 = smov 32   ;;  %s13689_s29 = smov 2  }
  0x17   :  { %53 = dma.hbm_to_vmem [thread:$0]  %s15751_s2, 288, %s48_s19, [#allocation5], %s13688_s28, %s13688_s28, %s13689_s29  }
  0x18   :  { %s13690_s17 = smov [#allocation7]   ;;  %s13385_s22 = scalar_lea.hbm %s15753_s4, 2304 }
  0x19   :  { %s69_s18 = sshll.u32 %s13690_s17, 4  ;;  %p13386_p8 = scmp.ne.s32.totalorder %s15753_s4, %s13385_s22  ;;  %s70_s18 = int_to_ptr.vmem [resolvable:$true] %s69_s18 }
  0x1a   :  { %p13389_p9 = scmp.lt.u32.totalorder %s13385_s22, %s15753_s4 }
  0x1c   :  { %p13391_p10 = pnand %p13389_p9, %p13386_p8 }
  0x1e   :  { %13394 = shalt.err (!%p13391_p10)
}
  0x1f   :  { %s13395_s27 = scalar_lea.vmem %s70_s18, 2304  ;;  %p13400_p12 = scmp.lt.s32.totalorder %s70_s18, %s70_s18 }
  0x20   :  { %p13396_p11 = scmp.ne.s32.totalorder %s70_s18, %s13395_s27  ;;  %p13401_p13 = scmp.lt.s32.totalorder %s13395_s27, %s13395_s27 }
  0x22   :  { %p13402_p0 = por %p13401_p13, %p13400_p12 }
  0x24   :  { %p13403_p1 = pnand %p13402_p0, %p13396_p11 }
  0x26   :  { %13406 = shalt.err (!%p13403_p1)
}
  0x27   :  { %s13691_s2 = smov 64   ;;  %s13692_s19 = smov 4  }
  0x28   :  { %75 = dma.hbm_to_vmem [thread:$0]  %s15753_s4, 2304, %s70_s18, [#allocation8], %s13691_s2, %s13691_s2, %s13692_s19  }
  0x29   :  { %s13693_s30 = smov [#allocation10]   ;;  %s13694_s17 = smov [#allocation13]  }
  0x2a   :  { %s94_s16 = sshll.u32 %s13693_s30, 4  ;;  %s115_s20 = sshll.u32 %s13694_s17, 4  ;;  %s95_s16 = int_to_ptr.vmem [resolvable:$true] %s94_s16  ;;  %s13819_s20 = int_to_ptr.vmem [resolvable:$true] %s115_s20 }
  0x2b   :  { %s13407_s23 = scalar_lea.hbm %s15755_s6, 16 }
  0x2c   :  { %p13408_p2 = scmp.ne.s32.totalorder %s15755_s6, %s13407_s23  ;;  %p13411_p3 = scmp.lt.u32.totalorder %s13407_s23, %s15755_s6 }
  0x2e   :  { %p13413_p4 = pnand %p13411_p3, %p13408_p2 }
  0x30   :  { %13416 = shalt.err (!%p13413_p4)
}
  0x31   :  { %s13417_s4 = scalar_lea.vmem %s95_s16, 16  ;;  %s13421_s18 = scalar_lea.vmem %s95_s16, 32 }
  0x32   :  { %p13418_p5 = scmp.ne.s32.totalorder %s95_s16, %s13417_s4  ;;  %p13422_p6 = scmp.lt.s32.totalorder %s95_s16, %s95_s16 }
  0x33   :  { %p13423_p7 = scmp.lt.s32.totalorder %s13421_s18, %s13417_s4 }
  0x35   :  { %p13424_p8 = por %p13423_p7, %p13422_p6 }
  0x37   :  { %p13425_p9 = pnand %p13424_p8, %p13418_p5 }
  0x39   :  { %13428 = shalt.err (!%p13425_p9)
}
  0x3a   :  { %97 = dma.hbm_to_vmem [thread:$0]  %s15755_s6, 16, %s95_s16, [#allocation11]  }
  0x3b   :  { %s13429_s21 = scalar_lea.hbm %s15757_s8, 9216 }
  0x3c   :  { %p13430_p10 = scmp.ne.s32.totalorder %s15757_s8, %s13429_s21  ;;  %p13433_p11 = scmp.lt.u32.totalorder %s13429_s21, %s15757_s8 }
  0x3e   :  { %p13435_p12 = pnand %p13433_p11, %p13430_p10 }
  0x40   :  { %13438 = shalt.err (!%p13435_p12)
}
  0x41   :  { %s13439_s26 = scalar_lea.vmem %s13819_s20, 9216  ;;  %p13444_p0 = scmp.lt.s32.totalorder %s13819_s20, %s13819_s20 }
  0x42   :  { %p13440_p13 = scmp.ne.s32.totalorder %s13819_s20, %s13439_s26  ;;  %p13445_p1 = scmp.lt.s32.totalorder %s13439_s26, %s13439_s26 }
  0x44   :  { %p13446_p2 = por %p13445_p1, %p13444_p0 }
  0x46   :  { %p13447_p3 = pnand %p13446_p2, %p13440_p13 }
  0x48   :  { %13450 = shalt.err (!%p13447_p3)
}
  0x49   :  { %121 = dma.hbm_to_vmem [thread:$0]  %s15757_s8, 9216, %s13819_s20, [#allocation14], %s13691_s2, %s13691_s2, %s13692_s19  }
  0x4a   :  { %s13695_s27 = smov [#allocation16]   ;;  %s13696_s18 = smov [#allocation19]  }
  0x4b   :  { %s137_s4 = sshll.u32 %s13695_s27, 4  ;;  %s162_s28 = sshll.u32 %s13696_s18, 4  ;;  %s138_s4 = int_to_ptr.vmem [resolvable:$true] %s137_s4  ;;  %s163_s28 = int_to_ptr.vmem [resolvable:$true] %s162_s28 }
  0x4c   :  { %s13451_s17 = scalar_lea.hbm %s15759_s10, 256 }
  0x4d   :  { %p13452_p4 = scmp.ne.s32.totalorder %s15759_s10, %s13451_s17  ;;  %p13455_p5 = scmp.lt.u32.totalorder %s13451_s17, %s15759_s10 }
  0x4f   :  { %p13457_p6 = pnand %p13455_p5, %p13452_p4 }
  0x51   :  { %13460 = shalt.err (!%p13457_p6)
}
  0x52   :  { %s13461_s8 = scalar_lea.vmem %s138_s4, 256  ;;  %p13466_p8 = scmp.lt.s32.totalorder %s138_s4, %s138_s4 }
  0x53   :  { %p13462_p7 = scmp.ne.s32.totalorder %s138_s4, %s13461_s8  ;;  %p13467_p9 = scmp.lt.s32.totalorder %s13461_s8, %s13461_s8 }
  0x55   :  { %p13468_p10 = por %p13467_p9, %p13466_p8 }
  0x57   :  { %p13469_p11 = pnand %p13468_p10, %p13462_p7 }
  0x59   :  { %13472 = shalt.err (!%p13469_p11)
}
  0x5a   :  { %143 = dma.hbm_to_vmem [thread:$0]  %s15759_s10, 256, %s138_s4, [#allocation17], %s13691_s2, %s13691_s2, %s13692_s19  }
  0x5b   :  { %s13473_s16 = scalar_lea.hbm %s15761_s12, 32 }
  0x5c   :  { %p13474_p12 = scmp.ne.s32.totalorder %s15761_s12, %s13473_s16  ;;  %p13477_p13 = scmp.lt.u32.totalorder %s13473_s16, %s15761_s12 }
  0x5e   :  { %p13479_p0 = pnand %p13477_p13, %p13474_p12 }
  0x60   :  { %13482 = shalt.err (!%p13479_p0)
}
  0x61   :  { %s13483_s17 = scalar_lea.vmem %s163_s28, 32  ;;  %p13488_p2 = scmp.lt.s32.totalorder %s163_s28, %s163_s28 }
  0x62   :  { %p13484_p1 = scmp.ne.s32.totalorder %s163_s28, %s13483_s17  ;;  %p13489_p3 = scmp.lt.s32.totalorder %s13483_s17, %s13483_s17 }
  0x64   :  { %p13490_p4 = por %p13489_p3, %p13488_p2 }
  0x66   :  { %p13491_p5 = pnand %p13490_p4, %p13484_p1 }
  0x68   :  { %13494 = shalt.err (!%p13491_p5)
}
  0x69   :  { %165 = dma.hbm_to_vmem [thread:$0]  %s15761_s12, 32, %s163_s28, [#allocation20]  }
  0x6a   :  { %s13697_s21 = smov [#allocation2]   ;;  %s13495_s8 = scalar_lea.hbm %s15750_s1, 36864 }
  0x6b   :  { %s35_s22 = sshll.u32 %s13697_s21, 4  ;;  %p13496_p6 = scmp.ne.s32.totalorder %s15750_s1, %s13495_s8  ;;  %s36_s22 = int_to_ptr.vmem [resolvable:$true] %s35_s22 }
  0x6c   :  { %p13499_p7 = scmp.lt.u32.totalorder %s13495_s8, %s15750_s1 }
  0x6e   :  { %p13501_p8 = pnand %p13499_p7, %p13496_p6 }
  0x70   :  { %13504 = shalt.err (!%p13501_p8)
}
  0x71   :  { %s13505_s16 = scalar_lea.vmem %s36_s22, 36864  ;;  %p13510_p10 = scmp.lt.s32.totalorder %s36_s22, %s36_s22 }
  0x72   :  { %p13506_p9 = scmp.ne.s32.totalorder %s36_s22, %s13505_s16  ;;  %p13511_p11 = scmp.lt.s32.totalorder %s13505_s16, %s13505_s16 }
  0x74   :  { %p13512_p12 = por %p13511_p11, %p13510_p10 }
  0x76   :  { %p13513_p13 = pnand %p13512_p12, %p13506_p9 }
  0x78   :  { %13516 = shalt.err (!%p13513_p13)
}
  0x79   :  { %s13698_s12 = smov 256   ;;  %s13699_s28 = smov 16  }
  0x7a   :  { %41 = dma.hbm_to_vmem [thread:$0]  %s15750_s1, 36864, %s36_s22, [#allocation3], %s13698_s12, %s13698_s12, %s13699_s28  }
  0x7b   :  { %s13700_s29 = smov [#allocation6]   ;;  %s13701_s17 = smov [#allocation9]  }
  0x7c   :  { %s60_s30 = sshll.u32 %s13700_s29, 4  ;;  %s81_s10 = sshll.u32 %s13701_s17, 4  ;;  %s61_s30 = int_to_ptr.vmem [resolvable:$true] %s60_s30  ;;  %s82_s10 = int_to_ptr.vmem [resolvable:$true] %s81_s10 }
  0x7d   :  { %s13517_s23 = scalar_lea.hbm %s15752_s3, 16 }
  0x7e   :  { %p13518_p0 = scmp.ne.s32.totalorder %s15752_s3, %s13517_s23  ;;  %p13521_p1 = scmp.lt.u32.totalorder %s13517_s23, %s15752_s3 }
  0x80   :  { %p13523_p2 = pnand %p13521_p1, %p13518_p0 }
  0x82   :  { %13526 = shalt.err (!%p13523_p2)
}
  0x83   :  { %s13527_s1 = scalar_lea.vmem %s61_s30, 16  ;;  %s13531_s22 = scalar_lea.vmem %s61_s30, 32 }
  0x84   :  { %p13528_p3 = scmp.ne.s32.totalorder %s61_s30, %s13527_s1  ;;  %p13532_p4 = scmp.lt.s32.totalorder %s61_s30, %s61_s30 }
  0x85   :  { %p13533_p5 = scmp.lt.s32.totalorder %s13531_s22, %s13527_s1 }
  0x87   :  { %p13534_p6 = por %p13533_p5, %p13532_p4 }
  0x89   :  { %p13535_p7 = pnand %p13534_p6, %p13528_p3 }
  0x8b   :  { %13538 = shalt.err (!%p13535_p7)
}
  0x8c   :  { %63 = dma.hbm_to_vmem [thread:$0]  %s15752_s3, 16, %s61_s30, [#allocation5]  }
  0x8d   :  { %s13539_s28 = scalar_lea.hbm %s15754_s5, 9216 }
  0x8e   :  { %p13540_p8 = scmp.ne.s32.totalorder %s15754_s5, %s13539_s28  ;;  %p13543_p9 = scmp.lt.u32.totalorder %s13539_s28, %s15754_s5 }
  0x90   :  { %p13545_p10 = pnand %p13543_p9, %p13540_p8 }
  0x92   :  { %13548 = shalt.err (!%p13545_p10)
}
  0x93   :  { %s13549_s4 = scalar_lea.vmem %s82_s10, 9216  ;;  %p13554_p12 = scmp.lt.s32.totalorder %s82_s10, %s82_s10 }
  0x94   :  { %p13550_p11 = scmp.ne.s32.totalorder %s82_s10, %s13549_s4  ;;  %p13555_p13 = scmp.lt.s32.totalorder %s13549_s4, %s13549_s4 }
  0x96   :  { %p13556_p0 = por %p13555_p13, %p13554_p12 }
  0x98   :  { %p13557_p1 = pnand %p13556_p0, %p13550_p11 }
  0x9a   :  { %13560 = shalt.err (!%p13557_p1)
}
  0x9b   :  { %87 = dma.hbm_to_vmem [thread:$0]  %s15754_s5, 9216, %s82_s10, [#allocation8], %s13691_s2, %s13691_s2, %s13692_s19  }
  0x9c   :  { %s13702_s21 = smov [#allocation12]   ;;  %s13703_s24 = smov [#allocation15]  }
  0x9d   :  { %s103_s23 = sshll.u32 %s13702_s21, 4  ;;  %s128_s8 = sshll.u32 %s13703_s24, 4  ;;  %s104_s23 = int_to_ptr.vmem [resolvable:$true] %s103_s23  ;;  %s129_s8 = int_to_ptr.vmem [resolvable:$true] %s128_s8 }
  0x9e   :  { %s13561_s1 = scalar_lea.hbm %s15756_s7, 576 }
  0x9f   :  { %p13562_p2 = scmp.ne.s32.totalorder %s15756_s7, %s13561_s1  ;;  %p13565_p3 = scmp.lt.u32.totalorder %s13561_s1, %s15756_s7 }
  0xa1   :  { %p13567_p4 = pnand %p13565_p3, %p13562_p2 }
  0xa3   :  { %13570 = shalt.err (!%p13567_p4)
}
  0xa4   :  { %s13571_s5 = scalar_lea.vmem %s104_s23, 576  ;;  %p13576_p6 = scmp.lt.s32.totalorder %s104_s23, %s104_s23 }
  0xa5   :  { %p13572_p5 = scmp.ne.s32.totalorder %s104_s23, %s13571_s5  ;;  %p13577_p7 = scmp.lt.s32.totalorder %s13571_s5, %s13571_s5 }
  0xa7   :  { %p13578_p8 = por %p13577_p7, %p13576_p6 }
  0xa9   :  { %p13579_p9 = pnand %p13578_p8, %p13572_p5 }
  0xab   :  { %13582 = shalt.err (!%p13579_p9)
}
  0xac   :  { %109 = dma.hbm_to_vmem [thread:$0]  %s15756_s7, 576, %s104_s23, [#allocation11], %s13691_s2, %s13691_s2, %s13692_s19  }
  0xad   :  { %s13583_s18 = scalar_lea.hbm %s15758_s9, 16 }
  0xae   :  { %p13584_p10 = scmp.ne.s32.totalorder %s15758_s9, %s13583_s18  ;;  %p13587_p11 = scmp.lt.u32.totalorder %s13583_s18, %s15758_s9 }
  0xb0   :  { %p13589_p12 = pnand %p13587_p11, %p13584_p10 }
  0xb2   :  { %13592 = shalt.err (!%p13589_p12)
}
  0xb3   :  { %s13593_s30 = scalar_lea.vmem %s129_s8, 16  ;;  %s13597_s21 = scalar_lea.vmem %s129_s8, 32 }
  0xb4   :  { %p13594_p13 = scmp.ne.s32.totalorder %s129_s8, %s13593_s30  ;;  %p13598_p0 = scmp.lt.s32.totalorder %s129_s8, %s129_s8 }
  0xb5   :  { %p13599_p1 = scmp.lt.s32.totalorder %s13597_s21, %s13593_s30 }
  0xb7   :  { %p13600_p2 = por %p13599_p1, %p13598_p0 }
  0xb9   :  { %p13601_p3 = pnand %p13600_p2, %p13594_p13 }
  0xbb   :  { %13604 = shalt.err (!%p13601_p3)
}
  0xbc   :  { %131 = dma.hbm_to_vmem [thread:$0]  %s15758_s9, 16, %s129_s8, [#allocation14]  }
  0xbd   :  { %s13704_s24 = smov [#allocation18]   ;;  %s13605_s22 = scalar_lea.hbm %s15760_s11, 8192 }
  0xbe   :  { %s149_s20 = sshll.u32 %s13704_s24, 4  ;;  %p13606_p4 = scmp.ne.s32.totalorder %s15760_s11, %s13605_s22  ;;  %s150_s20 = int_to_ptr.vmem [resolvable:$true] %s149_s20 }
  0xbf   :  { %p13609_p5 = scmp.lt.u32.totalorder %s13605_s22, %s15760_s11 }
  0xc1   :  { %p13611_p6 = pnand %p13609_p5, %p13606_p4 }
  0xc3   :  { %13614 = shalt.err (!%p13611_p6)
}
  0xc4   :  { %s13615_s10 = scalar_lea.vmem %s150_s20, 8192  ;;  %p13620_p8 = scmp.lt.s32.totalorder %s150_s20, %s150_s20 }
  0xc5   :  { %p13616_p7 = scmp.ne.s32.totalorder %s150_s20, %s13615_s10  ;;  %p13621_p9 = scmp.lt.s32.totalorder %s13615_s10, %s13615_s10 }
  0xc7   :  { %p13622_p10 = por %p13621_p9, %p13620_p8 }
  0xc9   :  { %p13623_p11 = pnand %p13622_p10, %p13616_p7 }
  0xcb   :  { %13626 = shalt.err (!%p13623_p11)
}
  0xcc   :  { %s13705_s9 = smov 128   ;;  %s13706_s8 = smov 8  }
  0xcd   :  { %155 = dma.hbm_to_vmem [thread:$0]  %s15760_s11, 8192, %s150_s20, [#allocation17], %s13705_s9, %s13705_s9, %s13706_s8  }
  0xce   :  { %s13707_s27 = smov [#allocation21]   ;;  %s13708_s29 = smov [#allocation22]  }
  0xcf   :  { %s171_s18 = sshll.u32 %s13707_s27, 4  ;;  %s184_s17 = sshll.u32 %s13708_s29, 4  ;;  %s172_s18 = int_to_ptr.vmem [resolvable:$true] %s171_s18  ;;  %s185_s17 = int_to_ptr.vmem [resolvable:$true] %s184_s17 }
  0xd0   :  { %s13627_s30 = scalar_lea.hbm %s15762_s13, 2048 }
  0xd1   :  { %p13628_p12 = scmp.ne.s32.totalorder %s15762_s13, %s13627_s30  ;;  %p13631_p13 = scmp.lt.u32.totalorder %s13627_s30, %s15762_s13 }
  0xd3   :  { %p13633_p0 = pnand %p13631_p13, %p13628_p12 }
  0xd5   :  { %13636 = shalt.err (!%p13633_p0)
}
  0xd6   :  { %s13637_s11 = scalar_lea.vmem %s172_s18, 2048  ;;  %p13642_p2 = scmp.lt.s32.totalorder %s172_s18, %s172_s18 }
  0xd7   :  { %p13638_p1 = scmp.ne.s32.totalorder %s172_s18, %s13637_s11  ;;  %p13643_p3 = scmp.lt.s32.totalorder %s13637_s11, %s13637_s11 }
  0xd9   :  { %p13644_p4 = por %p13643_p3, %p13642_p2 }
  0xdb   :  { %p13645_p5 = pnand %p13644_p4, %p13638_p1 }
  0xdd   :  { %13648 = shalt.err (!%p13645_p5)
}
  0xde   :  { %177 = dma.hbm_to_vmem [thread:$0]  %s15762_s13, 2048, %s172_s18, [#allocation20], %s13691_s2, %s13691_s2, %s13692_s19  }
  0xdf   :  { %s13649_s26 = scalar_lea.hbm %s15763_s14, 16 }
  0xe0   :  { %p13650_p6 = scmp.ne.s32.totalorder %s15763_s14, %s13649_s26  ;;  %p13653_p7 = scmp.lt.u32.totalorder %s13649_s26, %s15763_s14 }
  0xe2   :  { %p13655_p8 = pnand %p13653_p7, %p13650_p6 }
  0xe4   :  { %13658 = shalt.err (!%p13655_p8)
}
  0xe5   :  { %s13659_s9 = scalar_lea.vmem %s185_s17, 16  ;;  %s13663_s8 = scalar_lea.vmem %s185_s17, 32 }
  0xe6   :  { %p13660_p9 = scmp.ne.s32.totalorder %s185_s17, %s13659_s9  ;;  %p13664_p10 = scmp.lt.s32.totalorder %s185_s17, %s185_s17 }
  0xe7   :  { %p13665_p11 = scmp.lt.s32.totalorder %s13663_s8, %s13659_s9 }
  0xe9   :  { %p13666_p12 = por %p13665_p11, %p13664_p10 }
  0xeb   :  { %p13667_p13 = pnand %p13666_p12, %p13660_p9 }
  0xed   :  { %13670 = shalt.err (!%p13667_p13)
}
  0xee   :  { %187 = dma.hbm_to_vmem [thread:$0]  %s15763_s14, 16, %s185_s17, [#allocation23]  }
  0xef   :  { %13671 = dma.done.wait [#allocation3], 36864  }
  0xf0   :  { %13672 = vsyncadd [#allocation3], 4294930432 }
  0xf1   :  { %13673 = dma.done.wait [#allocation5], 304  }
  0xf2   :  { %13674 = vsyncadd [#allocation5], 4294966992 }
  0xf3   :  { %13675 = dma.done.wait [#allocation8], 11520  }
  0xf4   :  { %13676 = vsyncadd [#allocation8], 4294955776 }
  0xf5   :  { %13677 = dma.done.wait [#allocation11], 592  }
  0xf6   :  { %13678 = vsyncadd [#allocation11], 4294966704 }
  0xf7   :  { %13679 = dma.done.wait [#allocation14], 9232  }
  0xf8   :  { %13680 = vsyncadd [#allocation14], 4294958064 }
  0xf9   :  { %13681 = dma.done.wait [#allocation17], 8448  }
  0xfa   :  { %13682 = vsyncadd [#allocation17], 4294958848 }
  0xfb   :  { %13683 = dma.done.wait [#allocation20], 2080  }
  0xfc   :  { %13684 = vsyncadd [#allocation20], 4294965216 }
  0xfd   :  { %13685 = dma.done.wait [#allocation23], 16  }
  0xfe   :  { %13686 = vsyncadd [#allocation23], 4294967280  ;;  %v13988_v0 = vld [vmem:[%s15749_s0 + $0x40] sm:$0xff]   ;;  %v14011_v4 = vld [vmem:[%s15749_s0 + $0x48] sm:$0xff]   ;;  %vm1304_vm0 = vcmask 1041408   ;;  %vm1279_vm1 = vcmask 31744  }
  0xff   :  { %v13993_v1 = vld [vmem:[%s15749_s0 + $0xc0] sm:$0xff]   ;;  %9991 = vmatprep.subr.bf16.mxu0 %v13988_v0  ;;  %v14017_v5 = vld [vmem:[%s15749_s0 + $0xc8] sm:$0xff]   ;;  %v14035_v8 = vld [vmem:[%s15749_s0 + $0x50] sm:$0xff]   ;;  %vm13710_vm2 = vmmov 0   ;;  %vm7017_vm3 = vcmask 261120   ;;  %vm8396_vm4 = vcmask 1043456  }
 0x100   :  { %v13999_v2 = vld [vmem:[%s15749_s0] sm:$0xff]   ;;  %10055 = vmatprep.subr.bf16.mxu1 %v13993_v1  ;;  %v14023_v6 = vld [vmem:[%s15749_s0 + $0x8] sm:$0xff]   ;;  %v14041_v9 = vld [vmem:[%s15749_s0 + $0xd0] sm:$0xff]   ;;  %vm8392_vm5 = vcmask 64512  }
 0x101   :  { %v14005_v3 = vld [vmem:[%s15749_s0 + $0x80] sm:$0xff]   ;;  %9992 = vmatpush3.bf16.msra.mxu0 %v13999_v2  ;;  %v14029_v7 = vld [vmem:[%s15749_s0 + $0x88] sm:$0xff]   ;;  %v14047_v10 = vld [vmem:[%s15749_s0 + $0x10] sm:$0xff]  }
 0x102   :  { %10056 = vmatpush3.bf16.msra.mxu1 %v14005_v3  ;;  %9993 = vmatprep.subr.bf16.mxu0 %v14011_v4  ;;  %v14053_v11 = vld [vmem:[%s15749_s0 + $0x90] sm:$0xff]   ;;  %v14059_v12 = vld [vmem:[%s15749_s0 + $0x58] sm:$0xff]   ;;  %v14083_v16 = vld [vmem:[%s15749_s0 + $0x60] sm:$0xff]  }
 0x103   :  { %10057 = vmatprep.subr.bf16.mxu1 %v14017_v5  ;;  %v14065_v13 = vld [vmem:[%s15749_s0 + $0xd8] sm:$0xff]   ;;  %v14089_v17 = vld [vmem:[%s15749_s0 + $0xe0] sm:$0xff]   ;;  %v14107_v20 = vld [vmem:[%s15749_s0 + $0x68] sm:$0xff]  }
 0x104   :  { %v14071_v14 = vld [vmem:[%s15749_s0 + $0x18] sm:$0xff]   ;;  %v14095_v18 = vld [vmem:[%s15749_s0 + $0x20] sm:$0xff]   ;;  %v14113_v21 = vld [vmem:[%s15749_s0 + $0xe8] sm:$0xff]  }
 0x105   :  { %9994 = vmatpush3.bf16.msra.mxu0 %v14023_v6  ;;  %v14077_v15 = vld [vmem:[%s15749_s0 + $0x98] sm:$0xff]   ;;  %v14101_v19 = vld [vmem:[%s15749_s0 + $0xa0] sm:$0xff]   ;;  %v14119_v22 = vld [vmem:[%s15749_s0 + $0x28] sm:$0xff]  }
 0x106   :  { %10058 = vmatpush3.bf16.msra.mxu1 %v14029_v7  ;;  %9995 = vmatprep.subr.bf16.mxu0 %v14035_v8  ;;  %v14125_v23 = vld [vmem:[%s15749_s0 + $0xa8] sm:$0xff]   ;;  %v14131_v24 = vld [vmem:[%s15749_s0 + $0x70] sm:$0xff]   ;;  %v14155_v28 = vld [vmem:[%s15749_s0 + $0x78] sm:$0xff]  }
 0x107   :  { %10059 = vmatprep.subr.bf16.mxu1 %v14041_v9  ;;  %v14137_v25 = vld [vmem:[%s15749_s0 + $0xf0] sm:$0xff]   ;;  %v14161_v29 = vld [vmem:[%s15749_s0 + $0xf8] sm:$0xff]  }
 0x108   :  { %v14143_v26 = vld [vmem:[%s15749_s0 + $0x30] sm:$0xff]   ;;  %v14167_v30 = vld [vmem:[%s15749_s0 + $0x38] sm:$0xff]  }
 0x109   :  { %9996 = vmatpush3.bf16.msra.mxu0 %v14047_v10  ;;  %v14149_v27 = vld [vmem:[%s15749_s0 + $0xb0] sm:$0xff]   ;;  %v14173_v31 = vld [vmem:[%s15749_s0 + $0xb8] sm:$0xff]  }
 0x10a   :  { %10060 = vmatpush3.bf16.msra.mxu1 %v14053_v11  ;;  %9997 = vmatprep.subr.bf16.mxu0 %v14059_v12  ;;  %v12566_v32 = vld [vmem:[#allocation2] ss:$16 sps:$4 sm:$0xff]   ;;  %v12568_v33 = vld [vmem:[#allocation2 + $0x4] ss:$16 sps:$4 sm:$0xff]   ;;  %v12569_v34 = vld [vmem:[#allocation2 + $0x8] ss:$16 sps:$4 sm:$0xff]  }
 0x10b   :  { %10061 = vmatprep.subr.bf16.mxu1 %v14065_v13  ;;  %v12571_v35 = vld [vmem:[#allocation2 + $0xc] ss:$16 sps:$4 sm:$0xff]   ;;  %711 = vmatprep.mubr.bf16.mxu0 %v12568_v33  ;;  %v12572_v36 = vld [vmem:[#allocation2 + $0x24] ss:$16 sps:$4 sm:$0xff]   ;;  %v12576_v38 = vld [vmem:[#allocation2 + $0x20] ss:$16 sps:$4 sm:$0xff]  }
 0x10c   :  { %808 = vmatprep.mubr.bf16.mxu1 %v12571_v35  ;;  %v12574_v37 = vld [vmem:[#allocation2 + $0x2c] ss:$16 sps:$4 sm:$0xff]   ;;  %v12577_v39 = vld [vmem:[#allocation2 + $0x28] ss:$16 sps:$4 sm:$0xff]   ;;  %v12578_v40 = vld [vmem:[#allocation2 + $0x44] ss:$16 sps:$4 sm:$0xff]  }
 0x10d   :  { %9998 = vmatpush3.bf16.msra.mxu0 %v14071_v14  ;;  %v12580_v41 = vld [vmem:[#allocation2 + $0x4c] ss:$16 sps:$4 sm:$0xff]   ;;  %v12582_v42 = vld [vmem:[#allocation2 + $0x40] ss:$16 sps:$4 sm:$0xff]   ;;  %v12583_v43 = vld [vmem:[#allocation2 + $0x48] ss:$16 sps:$4 sm:$0xff]  }
 0x10e   :  { %10062 = vmatpush3.bf16.msra.mxu1 %v14077_v15  ;;  %9999 = vmatprep.subr.bf16.mxu0 %v14083_v16  ;;  %v12584_v44 = vld [vmem:[#allocation2 + $0x64] ss:$16 sps:$4 sm:$0xff]   ;;  %v12586_v45 = vld [vmem:[#allocation2 + $0x6c] ss:$16 sps:$4 sm:$0xff]   ;;  %v12588_v46 = vld [vmem:[#allocation2 + $0x60] ss:$16 sps:$4 sm:$0xff]  }
 0x10f   :  { %10063 = vmatprep.subr.bf16.mxu1 %v14089_v17  ;;  %v12589_v47 = vld [vmem:[#allocation2 + $0x68] ss:$16 sps:$4 sm:$0xff]   ;;  %v12590_v48 = vld [vmem:[#allocation2 + $0x84] ss:$16 sps:$4 sm:$0xff]   ;;  %v12592_v49 = vld [vmem:[#allocation2 + $0x8c] ss:$16 sps:$4 sm:$0xff]  }
 0x110   :  { %v12594_v50 = vld [vmem:[#allocation2 + $0x80] ss:$16 sps:$4 sm:$0xff]   ;;  %v12595_v51 = vld [vmem:[#allocation2 + $0x88] ss:$16 sps:$4 sm:$0xff]   ;;  %v12596_v52 = vld [vmem:[#allocation2 + $0xa4] ss:$16 sps:$4 sm:$0xff]  }
 0x111   :  { %10000 = vmatpush3.bf16.msra.mxu0 %v14095_v18  ;;  %v12598_v53 = vld [vmem:[#allocation2 + $0xac] ss:$16 sps:$4 sm:$0xff]   ;;  %v12600_v54 = vld [vmem:[#allocation2 + $0xa0] ss:$16 sps:$4 sm:$0xff]   ;;  %v12601_v55 = vld [vmem:[#allocation2 + $0xa8] ss:$16 sps:$4 sm:$0xff]  }
 0x112   :  { %10064 = vmatpush3.bf16.msra.mxu1 %v14101_v19  ;;  %10001 = vmatprep.subr.bf16.mxu0 %v14107_v20  ;;  %v12602_v56 = vld [vmem:[#allocation2 + $0xc4] ss:$16 sps:$4 sm:$0xff]   ;;  %v12604_v57 = vld [vmem:[#allocation2 + $0xcc] ss:$16 sps:$4 sm:$0xff]   ;;  %v12606_v58 = vld [vmem:[#allocation2 + $0xc0] ss:$16 sps:$4 sm:$0xff]  }
 0x113   :  { %10065 = vmatprep.subr.bf16.mxu1 %v14113_v21  ;;  %v12607_v59 = vld [vmem:[#allocation2 + $0xc8] ss:$16 sps:$4 sm:$0xff]   ;;  %v12608_v60 = vld [vmem:[#allocation2 + $0xe4] ss:$16 sps:$4 sm:$0xff]   ;;  %v12610_v61 = vld [vmem:[#allocation2 + $0xec] ss:$16 sps:$4 sm:$0xff]  }
 0x114   :  { %v12612_v62 = vld [vmem:[#allocation2 + $0xe0] ss:$16 sps:$4 sm:$0xff]   ;;  %v12613_v63 = vld [vmem:[#allocation2 + $0xe8] ss:$16 sps:$4 sm:$0xff]  }
 0x115   :  { %10002 = vmatpush3.bf16.msra.mxu0 %v14119_v22  ;;  %v12662_v33 = vld [vmem:[#allocation2 + $0x200] ss:$16 sps:$4 sm:$0xff]  }
 0x116   :  { %10066 = vmatpush3.bf16.msra.mxu1 %v14125_v23  ;;  %10003 = vmatprep.subr.bf16.mxu0 %v14131_v24  ;;  %v13272_v35 = vld [vmem:[%s15749_s0] sm:$0xff]  }
 0x117   :  { %10067 = vmatprep.subr.bf16.mxu1 %v14137_v25 }
 0x119   :  { %10004 = vmatpush3.bf16.msra.mxu0 %v14143_v26 }
 0x11a   :  { %10068 = vmatpush3.bf16.msra.mxu1 %v14149_v27  ;;  %10005 = vmatprep.subr.bf16.mxu0 %v14155_v28 }
 0x11b   :  { %10069 = vmatprep.subr.bf16.mxu1 %v14161_v29 }
 0x11d   :  { %10006 = vmatpush3.bf16.msra.mxu0 %v14167_v30 }
 0x11e   :  { %10070 = vmatpush3.bf16.msra.mxu1 %v14173_v31  ;;  %10119 = vmatprep.subr.bf16.mxu0 %v13988_v0 }
 0x11f   :  { %10183 = vmatprep.subr.bf16.mxu1 %v13993_v1  ;;  %v12616_v1 = vld [vmem:[#allocation2 + $0x104] ss:$16 sps:$4 sm:$0xff]  }
 0x120   :  { %712 = vmatmul.mubr.bf16.vlgmr.msra.gmra.mrb[0].mxu0 %v12566_v32  ;;  %v12664_v32 = vld [vmem:[#allocation2 + $0x204] ss:$16 sps:$4 sm:$0xff]  }
 0x121   :  { %809 = vmatmul.mubr.bf16.vlgmr.msra.gmra.mrb[0].mxu1 %v12569_v34  ;;  %10120 = vmatpush3.bf16.msra.mxu0 %v13999_v2  ;;  %v12665_v34 = vld [vmem:[#allocation2 + $0x224] ss:$16 sps:$4 sm:$0xff]  }
 0x122   :  { %10184 = vmatpush3.bf16.msra.mxu1 %v14005_v3  ;;  %719 = vmatprep.mubr.bf16.mxu0 %v12572_v36  ;;  %v12619_v3 = vld [vmem:[#allocation2 + $0x10c] ss:$16 sps:$4 sm:$0xff]   ;;  %v1278_v36 = vld [vmem:[#allocation4 + $0x2] sm:$0x3] }
 0x123   :  { %816 = vmatprep.mubr.bf16.mxu1 %v12574_v37  ;;  %10121 = vmatprep.subr.bf16.mxu0 %v14011_v4  ;;  %v12667_v37 = vld [vmem:[#allocation2 + $0x220] ss:$16 sps:$4 sm:$0xff]  }
 0x124   :  { %10185 = vmatprep.subr.bf16.mxu1 %v14017_v5  ;;  %v12614_v5 = vld [vmem:[#allocation2 + $0x100] ss:$16 sps:$4 sm:$0xff]  }
 0x125   :  { %10122 = vmatpush3.bf16.msra.mxu0 %v14023_v6 }
 0x126   :  { %10186 = vmatpush3.bf16.msra.mxu1 %v14029_v7  ;;  %10123 = vmatprep.subr.bf16.mxu0 %v14035_v8  ;;  %v12617_v7 = vld [vmem:[#allocation2 + $0x108] ss:$16 sps:$4 sm:$0xff]  }
 0x127   :  { %10187 = vmatprep.subr.bf16.mxu1 %v14041_v9  ;;  %v12620_v9 = vld [vmem:[#allocation2 + $0x124] ss:$16 sps:$4 sm:$0xff]  }
 0x128   :  { %720 = vmatmul.mubr.bf16.gmra.mrb[4].mxu0 %v12576_v38  ;;  %v13273_v38 = vld [vmem:[%s15749_s0 + $0x48] sm:$0xff]  }
 0x129   :  { %817 = vmatmul.mubr.bf16.gmra.mrb[4].mxu1 %v12577_v39  ;;  %727 = vmatprep.mubr.bf16.mxu0 %v12578_v40  ;;  %v1306_v39 = vsel %vm1304_vm0, %v1278_v36, 0  ;;  %v12668_v40 = vld [vmem:[#allocation2 + $0x244] ss:$16 sps:$4 sm:$0xff]  }
 0x12a   :  { %824 = vmatprep.mubr.bf16.mxu1 %v12580_v41  ;;  %10124 = vmatpush3.bf16.msra.mxu0 %v14047_v10  ;;  %v13274_v41 = vld [vmem:[%s15749_s0 + $0x8] sm:$0xff]  }
 0x12b   :  { %10188 = vmatpush3.bf16.msra.mxu1 %v14053_v11  ;;  %10125 = vmatprep.subr.bf16.mxu0 %v14059_v12  ;;  %v12622_v11 = vld [vmem:[#allocation2 + $0x12c] ss:$16 sps:$4 sm:$0xff]  }
 0x12c   :  { %10189 = vmatprep.subr.bf16.mxu1 %v14065_v13  ;;  %v12624_v13 = vld [vmem:[#allocation2 + $0x120] ss:$16 sps:$4 sm:$0xff]  }
 0x12e   :  { %10126 = vmatpush3.bf16.msra.mxu0 %v14071_v14 }
 0x12f   :  { %10190 = vmatpush3.bf16.msra.mxu1 %v14077_v15  ;;  %10127 = vmatprep.subr.bf16.mxu0 %v14083_v16  ;;  %v12625_v15 = vld [vmem:[#allocation2 + $0x128] ss:$16 sps:$4 sm:$0xff]  }
 0x130   :  { %728 = vmatmul.mubr.bf16.gmra.mrb[8].mxu0 %v12582_v42  ;;  %10191 = vmatprep.subr.bf16.mxu1 %v14089_v17  ;;  %v12626_v17 = vld [vmem:[#allocation2 + $0x144] ss:$16 sps:$4 sm:$0xff]  }
 0x131   :  { %825 = vmatmul.mubr.bf16.gmra.mrb[8].mxu1 %v12583_v43  ;;  %735 = vmatprep.mubr.bf16.mxu0 %v12584_v44  ;;  %v13275_v42 = vld [vmem:[%s15749_s0 + $0x50] sm:$0xff]  }
 0x132   :  { %832 = vmatprep.mubr.bf16.mxu1 %v12586_v45  ;;  %10128 = vmatpush3.bf16.msra.mxu0 %v14095_v18  ;;  %v13276_v43 = vld [vmem:[%s15749_s0 + $0x10] sm:$0xff]   ;;  %v13277_v45 = vld [vmem:[%s15749_s0 + $0x58] sm:$0xff]  }
 0x133   :  { %10192 = vmatpush3.bf16.msra.mxu1 %v14101_v19  ;;  %10129 = vmatprep.subr.bf16.mxu0 %v14107_v20  ;;  %v12628_v19 = vld [vmem:[#allocation2 + $0x14c] ss:$16 sps:$4 sm:$0xff]   ;;  %v12670_v44 = vld [vmem:[#allocation2 + $0x240] ss:$16 sps:$4 sm:$0xff]  }
 0x134   :  { %10193 = vmatprep.subr.bf16.mxu1 %v14113_v21  ;;  %v12630_v21 = vld [vmem:[#allocation2 + $0x140] ss:$16 sps:$4 sm:$0xff]  }
 0x136   :  { %10130 = vmatpush3.bf16.msra.mxu0 %v14119_v22 }
 0x137   :  { %10194 = vmatpush3.bf16.msra.mxu1 %v14125_v23  ;;  %10131 = vmatprep.subr.bf16.mxu0 %v14131_v24  ;;  %v12631_v23 = vld [vmem:[#allocation2 + $0x148] ss:$16 sps:$4 sm:$0xff]  }
 0x138   :  { %736 = vmatmul.mubr.bf16.gmra.mrb[12].mxu0 %v12588_v46  ;;  %10195 = vmatprep.subr.bf16.mxu1 %v14137_v25  ;;  %v12632_v25 = vld [vmem:[#allocation2 + $0x164] ss:$16 sps:$4 sm:$0xff]  }
 0x139   :  { %833 = vmatmul.mubr.bf16.gmra.mrb[12].mxu1 %v12589_v47  ;;  %743 = vmatprep.mubr.bf16.mxu0 %v12590_v48  ;;  %v12671_v46 = vld [vmem:[#allocation2 + $0x264] ss:$16 sps:$4 sm:$0xff]   ;;  %v13278_v47 = vld [vmem:[%s15749_s0 + $0x18] sm:$0xff]  }
 0x13a   :  { %840 = vmatprep.mubr.bf16.mxu1 %v12592_v49  ;;  %10132 = vmatpush3.bf16.msra.mxu0 %v14143_v26  ;;  %v13279_v48 = vld [vmem:[%s15749_s0 + $0x60] sm:$0xff]  }
 0x13b   :  { %10196 = vmatpush3.bf16.msra.mxu1 %v14149_v27  ;;  %10133 = vmatprep.subr.bf16.mxu0 %v14155_v28  ;;  %v12652_v27 = vld [vmem:[#allocation2 + $0x1cc] ss:$16 sps:$4 sm:$0xff]   ;;  %v13280_v49 = vld [vmem:[%s15749_s0 + $0x20] sm:$0xff]  }
 0x13c   :  { %10197 = vmatprep.subr.bf16.mxu1 %v14161_v29  ;;  %v12655_v29 = vld [vmem:[#allocation2 + $0x1c8] ss:$16 sps:$4 sm:$0xff]  }
 0x13e   :  { %10134 = vmatpush3.bf16.msra.mxu0 %v14167_v30 }
 0x13f   :  { %10198 = vmatpush3.bf16.msra.mxu1 %v14173_v31  ;;  %v12658_v31 = vld [vmem:[#allocation2 + $0x1ec] ss:$16 sps:$4 sm:$0xff]   ;;  %12500 = vmatprep.subr.msk.bf16.mxu0 %vm1304_vm0, %v1278_v36 }
 0x140   :  { %744 = vmatmul.mubr.bf16.gmra.mrb[16].mxu0 %v12594_v50  ;;  %10265 = vmatprep.subr.bf16.mxu1 %v13988_v0  ;;  %v12673_v50 = vld [vmem:[#allocation2 + $0x260] ss:$16 sps:$4 sm:$0xff]  }
 0x141   :  { %841 = vmatmul.mubr.bf16.gmra.mrb[16].mxu1 %v12595_v51  ;;  %751 = vmatprep.mubr.bf16.mxu0 %v12596_v52  ;;  %v13281_v51 = vld [vmem:[%s15749_s0 + $0x68] sm:$0xff]   ;;  %v12674_v52 = vld [vmem:[#allocation2 + $0x284] ss:$16 sps:$4 sm:$0xff]  }
 0x142   :  { %848 = vmatprep.mubr.bf16.mxu1 %v12598_v53  ;;  %v13282_v53 = vld [vmem:[%s15749_s0 + $0x28] sm:$0xff]  }
 0x148   :  { %752 = vmatmul.mubr.bf16.gmra.mrb[20].mxu0 %v12600_v54  ;;  %v13283_v54 = vld [vmem:[%s15749_s0 + $0x70] sm:$0xff]  }
 0x149   :  { %849 = vmatmul.mubr.bf16.gmra.mrb[20].mxu1 %v12601_v55  ;;  %759 = vmatprep.mubr.bf16.mxu0 %v12602_v56  ;;  %v13284_v55 = vld [vmem:[%s15749_s0 + $0x30] sm:$0xff]  }
 0x14a   :  { %856 = vmatprep.mubr.bf16.mxu1 %v12604_v57  ;;  %v12676_v56 = vld [vmem:[#allocation2 + $0x280] ss:$16 sps:$4 sm:$0xff]   ;;  %v13285_v57 = vld [vmem:[%s15749_s0 + $0x78] sm:$0xff]  }
 0x150   :  { %760 = vmatmul.mubr.bf16.gmra.mrb[24].mxu0 %v12606_v58  ;;  %v12677_v58 = vld [vmem:[#allocation2 + $0x2a4] ss:$16 sps:$4 sm:$0xff]  }
 0x151   :  { %857 = vmatmul.mubr.bf16.gmra.mrb[24].mxu1 %v12607_v59  ;;  %767 = vmatprep.mubr.bf16.mxu0 %v12608_v60  ;;  %v13286_v59 = vld [vmem:[%s15749_s0 + $0x38] sm:$0xff]   ;;  %v14276_v60 = vld [vmem:[%s15749_s0 + $0xc0] sm:$0xff]  }
 0x152   :  { %864 = vmatprep.mubr.bf16.mxu1 %v12610_v61  ;;  %v12679_v61 = vld [vmem:[#allocation2 + $0x2a0] ss:$16 sps:$4 sm:$0xff]  }
 0x158   :  { %768 = vmatmul.mubr.bf16.gmra.mrb[28].mxu0 %v12612_v62  ;;  %v12680_v62 = vld [vmem:[#allocation2 + $0x2c4] ss:$16 sps:$4 sm:$0xff]  }
 0x159   :  { %865 = vmatmul.mubr.bf16.gmra.mrb[28].mxu1 %v12613_v63  ;;  %1107 = vmatprep.mubr.bf16.mxu0 %v12616_v1  ;;  %v12682_v63 = vld [vmem:[#allocation2 + $0x2c0] ss:$16 sps:$4 sm:$0xff]   ;;  %v12683_v1 = vld [vmem:[#allocation2 + $0x2e4] ss:$16 sps:$4 sm:$0xff]  }
 0x15a   :  { %1204 = vmatprep.mubr.bf16.mxu1 %v12619_v3  ;;  %v12685_v3 = vld [vmem:[#allocation2 + $0x2e0] ss:$16 sps:$4 sm:$0xff]  }
 0x160   :  { %1108 = vmatmul.mubr.bf16.vlgmr.msra.gmra.mrb[32].mxu0 %v12614_v5  ;;  %v12688_v5 = vld [vmem:[#allocation2 + $0x304] ss:$16 sps:$4 sm:$0xff]  }
 0x161   :  { %1205 = vmatmul.mubr.bf16.vlgmr.msra.gmra.mrb[32].mxu1 %v12617_v7  ;;  %1115 = vmatprep.mubr.bf16.mxu0 %v12620_v9  ;;  %v12686_v7 = vld [vmem:[#allocation2 + $0x300] ss:$16 sps:$4 sm:$0xff]   ;;  %v12689_v9 = vld [vmem:[#allocation2 + $0x324] ss:$16 sps:$4 sm:$0xff]  }
 0x162   :  { %1212 = vmatprep.mubr.bf16.mxu1 %v12622_v11  ;;  %10266 = vmatpush3.bf16.msra.mxu1 %v13999_v2  ;;  %v12634_v2 = vld [vmem:[#allocation2 + $0x16c] ss:$16 sps:$4 sm:$0xff]   ;;  %v14282_v11 = vld [vmem:[%s15749_s0 + $0x80] sm:$0xff]  }
 0x163   :  { %10267 = vmatprep.subr.bf16.mxu1 %v14011_v4  ;;  %v12636_v4 = vld [vmem:[#allocation2 + $0x160] ss:$16 sps:$4 sm:$0xff]   ;;  %11543 = vmatpush3.bf16.msra.mxu0 %v1306_v39 }
 0x166   :  { %10268 = vmatpush3.bf16.msra.mxu1 %v14023_v6  ;;  %v12637_v6 = vld [vmem:[#allocation2 + $0x168] ss:$16 sps:$4 sm:$0xff]  }
 0x167   :  { %10269 = vmatprep.subr.bf16.mxu1 %v14035_v8  ;;  %v12638_v8 = vld [vmem:[#allocation2 + $0x184] ss:$16 sps:$4 sm:$0xff]  }
 0x168   :  { %1116 = vmatmul.mubr.bf16.gmra.mrb[36].mxu0 %v12624_v13  ;;  %v14285_v13 = vld [vmem:[#allocation4] sm:$0x3] }
 0x169   :  { %1213 = vmatmul.mubr.bf16.gmra.mrb[36].mxu1 %v12625_v15  ;;  %1123 = vmatprep.mubr.bf16.mxu0 %v12626_v17  ;;  %v12691_v15 = vld [vmem:[#allocation2 + $0x320] ss:$16 sps:$4 sm:$0xff]   ;;  %v14290_v17 = vld [vmem:[%s15749_s0 + $0xc8] sm:$0xff]  }
 0x16a   :  { %1220 = vmatprep.mubr.bf16.mxu1 %v12628_v19  ;;  %10270 = vmatpush3.bf16.msra.mxu1 %v14047_v10  ;;  %v12640_v10 = vld [vmem:[#allocation2 + $0x18c] ss:$16 sps:$4 sm:$0xff]   ;;  %v12692_v19 = vld [vmem:[#allocation2 + $0x344] ss:$16 sps:$4 sm:$0xff]  }
 0x16b   :  { %10271 = vmatprep.subr.bf16.mxu1 %v14059_v12  ;;  %v12642_v12 = vld [vmem:[#allocation2 + $0x180] ss:$16 sps:$4 sm:$0xff]   ;;  %12501 = vmatprep.subr.msk.bf16.mxu0 %vm1304_vm0, %v14285_v13 }
 0x16e   :  { %10272 = vmatpush3.bf16.msra.mxu1 %v14071_v14  ;;  %v12643_v14 = vld [vmem:[#allocation2 + $0x188] ss:$16 sps:$4 sm:$0xff]  }
 0x16f   :  { %10273 = vmatprep.subr.bf16.mxu1 %v14083_v16  ;;  %v12644_v16 = vld [vmem:[#allocation2 + $0x1a4] ss:$16 sps:$4 sm:$0xff]  }
 0x170   :  { %1124 = vmatmul.mubr.bf16.gmra.mrb[40].mxu0 %v12630_v21  ;;  %v14298_v21 = vld [vmem:[%s15749_s0 + $0x88] sm:$0xff]  }
 0x171   :  { %1221 = vmatmul.mubr.bf16.gmra.mrb[40].mxu1 %v12631_v23  ;;  %1131 = vmatprep.mubr.bf16.mxu0 %v12632_v25  ;;  %v14304_v23 = vld [vmem:[%s15749_s0 + $0xd0] sm:$0xff]  }
 0x172   :  { %1228 = vmatprep.mubr.bf16.mxu1 %v12634_v2  ;;  %10274 = vmatpush3.bf16.msra.mxu1 %v14095_v18  ;;  %v12646_v18 = vld [vmem:[#allocation2 + $0x1ac] ss:$16 sps:$4 sm:$0xff]   ;;  %v14310_v25 = vld [vmem:[%s15749_s0 + $0x90] sm:$0xff]  }
 0x173   :  { %10275 = vmatprep.subr.bf16.mxu1 %v14107_v20  ;;  %v12648_v20 = vld [vmem:[#allocation2 + $0x1a0] ss:$16 sps:$4 sm:$0xff]  }
 0x174   :  { %v12694_v2 = vld [vmem:[#allocation2 + $0x340] ss:$16 sps:$4 sm:$0xff]  }
 0x176   :  { %10276 = vmatpush3.bf16.msra.mxu1 %v14119_v22  ;;  %v12649_v22 = vld [vmem:[#allocation2 + $0x1a8] ss:$16 sps:$4 sm:$0xff]  }
 0x177   :  { %10277 = vmatprep.subr.bf16.mxu1 %v14131_v24  ;;  %v12650_v24 = vld [vmem:[#allocation2 + $0x1c4] ss:$16 sps:$4 sm:$0xff]  }
 0x178   :  { %1132 = vmatmul.mubr.bf16.gmra.mrb[44].mxu0 %v12636_v4  ;;  %v14316_v4 = vld [vmem:[%s15749_s0 + $0xd8] sm:$0xff]  }
 0x179   :  { %1229 = vmatmul.mubr.bf16.gmra.mrb[44].mxu1 %v12637_v6  ;;  %1139 = vmatprep.mubr.bf16.mxu0 %v12638_v8  ;;  %v12695_v6 = vld [vmem:[#allocation2 + $0x364] ss:$16 sps:$4 sm:$0xff]   ;;  %v14322_v8 = vld [vmem:[%s15749_s0 + $0x98] sm:$0xff]  }
 0x17a   :  { %1236 = vmatprep.mubr.bf16.mxu1 %v12640_v10  ;;  %10278 = vmatpush3.bf16.msra.mxu1 %v14143_v26  ;;  %v12654_v26 = vld [vmem:[#allocation2 + $0x1c0] ss:$16 sps:$4 sm:$0xff]  }
 0x17b   :  { %10279 = vmatprep.subr.bf16.mxu1 %v14155_v28  ;;  %v12656_v28 = vld [vmem:[#allocation2 + $0x1e4] ss:$16 sps:$4 sm:$0xff]  }
 0x17c   :  { %v14328_v10 = vld [vmem:[%s15749_s0 + $0xe0] sm:$0xff]  }
 0x17e   :  { %10280 = vmatpush3.bf16.msra.mxu1 %v14167_v30  ;;  %v12661_v30 = vld [vmem:[#allocation2 + $0x1e8] ss:$16 sps:$4 sm:$0xff]  }
 0x17f   :  { %10402 = vmatprep.subr.bf16.mxu1 %v13988_v0  ;;  %v12660_v0 = vld [vmem:[#allocation2 + $0x1e0] ss:$16 sps:$4 sm:$0xff]  }
 0x180   :  { %1140 = vmatmul.mubr.bf16.gmra.mrb[48].mxu0 %v12642_v12  ;;  %v14334_v12 = vld [vmem:[%s15749_s0 + $0xa0] sm:$0xff]  }
 0x181   :  { %1237 = vmatmul.mubr.bf16.gmra.mrb[48].mxu1 %v12643_v14  ;;  %1147 = vmatprep.mubr.bf16.mxu0 %v12644_v16  ;;  %v12697_v16 = vld [vmem:[#allocation2 + $0x360] ss:$16 sps:$4 sm:$0xff]  }
 0x182   :  { %1244 = vmatprep.mubr.bf16.mxu1 %v12646_v18  ;;  %v14340_v18 = vld [vmem:[%s15749_s0 + $0xe8] sm:$0xff]  }
 0x188   :  { %1148 = vmatmul.mubr.bf16.gmra.mrb[52].mxu0 %v12648_v20 }
 0x189   :  { %1245 = vmatmul.mubr.bf16.gmra.mrb[52].mxu1 %v12649_v22  ;;  %1155 = vmatprep.mubr.bf16.mxu0 %v12650_v24  ;;  %v12698_v24 = vld [vmem:[#allocation2 + $0x384] ss:$16 sps:$4 sm:$0xff]  }
 0x18a   :  { %1252 = vmatprep.mubr.bf16.mxu1 %v12652_v27 }
 0x190   :  { %1156 = vmatmul.mubr.bf16.gmra.mrb[56].mxu0 %v12654_v26 }
 0x191   :  { %1253 = vmatmul.mubr.bf16.gmra.mrb[56].mxu1 %v12655_v29  ;;  %1163 = vmatprep.mubr.bf16.mxu0 %v12656_v28 }
 0x192   :  { %1260 = vmatprep.mubr.bf16.mxu1 %v12658_v31 }
 0x198   :  { %1164 = vmatmul.mubr.bf16.gmra.mrb[60].mxu0 %v12660_v0 }
 0x199   :  { %1261 = vmatmul.mubr.bf16.gmra.mrb[60].mxu1 %v12661_v30  ;;  %v14346_v30 = vld [vmem:[%s15749_s0 + $0xa8] sm:$0xff]  }
 0x19a   :  { %1754 = vmatprep.mubr.bf16.mxu1 %v12664_v32 }
 0x1a1   :  { %1755 = vmatmul.mubr.bf16.vlgmr.msra.gmra.mrb[64].mxu1 %v12662_v33 }
 0x1a2   :  { %1762 = vmatprep.mubr.bf16.mxu1 %v12665_v34  ;;  %10403 = vmatpush3.bf16.msra.mxu1 %v13272_v35  ;;  %v14352_v34 = vld [vmem:[%s15749_s0 + $0xf0] sm:$0xff]  }
 0x1a3   :  { %10404 = vmatprep.subr.bf16.mxu1 %v13273_v38  ;;  %v14362_v38 = vld [vmem:[%s15749_s0 + $0xb0] sm:$0xff]  }
 0x1a6   :  { %10405 = vmatpush3.bf16.msra.mxu1 %v13274_v41  ;;  %v14368_v41 = vld [vmem:[%s15749_s0 + $0xf8] sm:$0xff]  }
 0x1a7   :  { %10406 = vmatprep.subr.bf16.mxu1 %v13275_v42 }
 0x1a9   :  { %1763 = vmatmul.mubr.bf16.gmra.mrb[68].mxu1 %v12667_v37 }
 0x1aa   :  { %1770 = vmatprep.mubr.bf16.mxu1 %v12668_v40  ;;  %10407 = vmatpush3.bf16.msra.mxu1 %v13276_v43  ;;  %v12700_v40 = vld [vmem:[#allocation2 + $0x380] ss:$16 sps:$4 sm:$0xff]  }
 0x1ab   :  { %10408 = vmatprep.subr.bf16.mxu1 %v13277_v45 }
 0x1ae   :  { %10409 = vmatpush3.bf16.msra.mxu1 %v13278_v47 }
 0x1af   :  { %10410 = vmatprep.subr.bf16.mxu1 %v13279_v48 }
 0x1b1   :  { %1771 = vmatmul.mubr.bf16.gmra.mrb[72].mxu1 %v12670_v44  ;;  %v12701_v44 = vld [vmem:[#allocation2 + $0x3a4] ss:$16 sps:$4 sm:$0xff]  }
 0x1b2   :  { %1778 = vmatprep.mubr.bf16.mxu1 %v12671_v46  ;;  %10411 = vmatpush3.bf16.msra.mxu1 %v13280_v49 }
 0x1b3   :  { %10412 = vmatprep.subr.bf16.mxu1 %v13281_v51 }
 0x1b6   :  { %10413 = vmatpush3.bf16.msra.mxu1 %v13282_v53 }
 0x1b7   :  { %10414 = vmatprep.subr.bf16.mxu1 %v13283_v54 }
 0x1b9   :  { %1779 = vmatmul.mubr.bf16.gmra.mrb[76].mxu1 %v12673_v50 }
 0x1ba   :  { %1786 = vmatprep.mubr.bf16.mxu1 %v12674_v52  ;;  %10415 = vmatpush3.bf16.msra.mxu1 %v13284_v55  ;;  %v14376_v52 = vld [vmem:[%s15749_s0 + $0xb8] sm:$0xff]  }
 0x1bb   :  { %10416 = vmatprep.subr.bf16.mxu1 %v13285_v57 }
 0x1be   :  { %10417 = vmatpush3.bf16.msra.mxu1 %v13286_v59  ;;  %v12703_v59 = vld [vmem:[#allocation2 + $0x3a0] ss:$16 sps:$4 sm:$0xff]  }
 0x1bf   :  { %10466 = vmatprep.subr.bf16.mxu1 %v14276_v60 }
 0x1c1   :  { %1787 = vmatmul.mubr.bf16.gmra.mrb[80].mxu1 %v12676_v56 }
 0x1c2   :  { %1794 = vmatprep.mubr.bf16.mxu1 %v12677_v58 }
 0x1c9   :  { %1795 = vmatmul.mubr.bf16.gmra.mrb[84].mxu1 %v12679_v61 }
 0x1ca   :  { %1802 = vmatprep.mubr.bf16.mxu1 %v12680_v62 }
 0x1d1   :  { %1803 = vmatmul.mubr.bf16.gmra.mrb[88].mxu1 %v12682_v63 }
 0x1d2   :  { %1810 = vmatprep.mubr.bf16.mxu1 %v12683_v1  ;;  %v12704_v1 = vld [vmem:[#allocation2 + $0x3c4] ss:$16 sps:$4 sm:$0xff]  }
 0x1d9   :  { %1811 = vmatmul.mubr.bf16.gmra.mrb[92].mxu1 %v12685_v3 }
 0x1da   :  { %2291 = vmatprep.mubr.bf16.mxu1 %v12688_v5 }
 0x1e1   :  { %2292 = vmatmul.mubr.bf16.vlgmr.msra.gmra.mrb[96].mxu1 %v12686_v7 }
 0x1e2   :  { %2299 = vmatprep.mubr.bf16.mxu1 %v12689_v9  ;;  %10467 = vmatpush3.bf16.msra.mxu1 %v14282_v11 }
 0x1e3   :  { %10468 = vmatprep.subr.bf16.mxu1 %v14290_v17 }
 0x1e6   :  { %10469 = vmatpush3.bf16.msra.mxu1 %v14298_v21 }
 0x1e7   :  { %10470 = vmatprep.subr.bf16.mxu1 %v14304_v23 }
 0x1e9   :  { %2300 = vmatmul.mubr.bf16.gmra.mrb[100].mxu1 %v12691_v15 }
 0x1ea   :  { %2307 = vmatprep.mubr.bf16.mxu1 %v12692_v19  ;;  %10471 = vmatpush3.bf16.msra.mxu1 %v14310_v25 }
 0x1eb   :  { %10472 = vmatprep.subr.bf16.mxu1 %v14316_v4 }
 0x1ee   :  { %10473 = vmatpush3.bf16.msra.mxu1 %v14322_v8 }
 0x1ef   :  { %10474 = vmatprep.subr.bf16.mxu1 %v14328_v10 }
 0x1f1   :  { %2308 = vmatmul.mubr.bf16.gmra.mrb[104].mxu1 %v12694_v2 }
 0x1f2   :  { %2315 = vmatprep.mubr.bf16.mxu1 %v12695_v6  ;;  %10475 = vmatpush3.bf16.msra.mxu1 %v14334_v12 }
 0x1f3   :  { %v10007_v14 = vpop.f32.mrb[0].mxu0  ;;  %10476 = vmatprep.subr.bf16.mxu1 %v14340_v18 }
 0x1f4   :  { %v10071_v20 = vpop.f32.mrb[0].mxu1  ;;  %v10008_v22 = vpop.f32.mrb[1].mxu0 }
 0x1f5   :  { %v10009_v27 = vadd.f32 %v10008_v22, %v10007_v14  ;;  %v10072_v26 = vpop.f32.mrb[1].mxu1  ;;  %v10010_v29 = vpop.f32.mrb[2].mxu0  ;;  %v12706_v22 = vld [vmem:[#allocation2 + $0x3c0] ss:$16 sps:$4 sm:$0xff]  }
 0x1f6   :  { %v10073_v28 = vadd.f32 %v10072_v26, %v10071_v20  ;;  %v10074_v31 = vpop.f32.mrb[2].mxu1  ;;  %v10011_v0 = vpop.f32.mrb[3].mxu0  ;;  %10477 = vmatpush3.bf16.msra.mxu1 %v14346_v30  ;;  %v12707_v26 = vld [vmem:[#allocation2 + $0x3e4] ss:$16 sps:$4 sm:$0xff]  }
 0x1f7   :  { %v10012_v32 = vadd.f32 %v10011_v0, %v10010_v29  ;;  %v10075_v33 = vpop.f32.mrb[3].mxu1  ;;  %10478 = vmatprep.subr.bf16.mxu1 %v14352_v34 }
 0x1f8   :  { %v14355_v35 = vadd.f32 %v10073_v28, %v10009_v27  ;;  %v10076_v36 = vadd.f32 %v10075_v33, %v10074_v31 }
 0x1f9   :  { %2316 = vmatmul.mubr.bf16.gmra.mrb[108].mxu1 %v12697_v16 }
 0x1fa   :  { %v14357_v37 = vadd.f32 %v10076_v36, %v10012_v32  ;;  %2323 = vmatprep.mubr.bf16.mxu1 %v12698_v24  ;;  %10479 = vmatpush3.bf16.msra.mxu1 %v14362_v38 }
 0x1fb   :  { %v10013_v39 = vpop.f32.mrb[4].mxu0  ;;  %10480 = vmatprep.subr.bf16.mxu1 %v14368_v41 }
 0x1fc   :  { %v10077_v42 = vpop.f32.mrb[4].mxu1  ;;  %v10014_v43 = vpop.f32.mrb[5].mxu0  ;;  %v873_v45 = vpack.c.bf16 %v14357_v37, %v14355_v35  ;;  %v13305_v35 = vld [vmem:[%s15749_s0 + $0x80] sm:$0xff]  }
 0x1fd   :  { %v10015_v46 = vadd.f32 %v10014_v43, %v10013_v39  ;;  %v10078_v47 = vpop.f32.mrb[5].mxu1  ;;  %v10016_v48 = vpop.f32.mrb[6].mxu0 }
 0x1fe   :  { %v10079_v49 = vadd.f32 %v10078_v47, %v10077_v42  ;;  %v10080_v50 = vpop.f32.mrb[6].mxu1  ;;  %v10017_v51 = vpop.f32.mrb[7].mxu0  ;;  %10481 = vmatpush3.bf16.msra.mxu1 %v14376_v52  ;;  %v12709_v47 = vld [vmem:[#allocation2 + $0x3e0] ss:$16 sps:$4 sm:$0xff]  }
 0x1ff   :  { %v10018_v53 = vadd.f32 %v10017_v51, %v10016_v48  ;;  %v10081_v54 = vpop.f32.mrb[7].mxu1  ;;  %10603 = vmatprep.subr.bf16.mxu1 %v14276_v60 }
 0x200   :  { %v14380_v55 = vadd.f32 %v10079_v49, %v10015_v46  ;;  %v10082_v56 = vadd.f32 %v10081_v54, %v10080_v50  ;;  %v12712_v50 = vld [vmem:[#allocation2 + $0x30c] ss:$16 sps:$4 sm:$0xff]  }
 0x201   :  { %2324 = vmatmul.mubr.bf16.gmra.mrb[112].mxu1 %v12700_v40 }
 0x202   :  { %v14382_v57 = vadd.f32 %v10082_v56, %v10018_v53  ;;  %2331 = vmatprep.mubr.bf16.mxu1 %v12701_v44 }
 0x203   :  { %v10019_v58 = vpop.f32.mrb[8].mxu0 }
 0x204   :  { %v874_v61 = vpack.c.bf16 %v14382_v57, %v14380_v55  ;;  %v10083_v62 = vpop.f32.mrb[8].mxu1  ;;  %v10020_v63 = vpop.f32.mrb[9].mxu0  ;;  %v13307_v57 = vld [vmem:[%s15749_s0 + $0x88] sm:$0xff]  }
 0x205   :  { %v10021_v3 = vadd.f32 %v10020_v63, %v10019_v58  ;;  %v10084_v5 = vpop.f32.mrb[9].mxu1  ;;  %v10022_v7 = vpop.f32.mrb[10].mxu0 }
 0x206   :  { %v10085_v9 = vadd.f32 %v10084_v5, %v10083_v62  ;;  %v10086_v60 = vpop.f32.mrb[10].mxu1  ;;  %v10023_v15 = vpop.f32.mrb[11].mxu0 }
 0x207   :  { %v10024_v19 = vadd.f32 %v10023_v15, %v10022_v7  ;;  %v10087_v2 = vpop.f32.mrb[11].mxu1 }
 0x208   :  { %v14386_v6 = vadd.f32 %v10085_v9, %v10021_v3  ;;  %v10088_v14 = vadd.f32 %v10087_v2, %v10086_v60  ;;  %v12710_v60 = vld [vmem:[#allocation2 + $0x308] ss:$16 sps:$4 sm:$0xff]  }
 0x209   :  { %2332 = vmatmul.mubr.bf16.gmra.mrb[116].mxu1 %v12703_v59 }
 0x20a   :  { %v14388_v16 = vadd.f32 %v10088_v14, %v10024_v19  ;;  %2339 = vmatprep.mubr.bf16.mxu1 %v12704_v1 }
 0x20b   :  { %v10025_v20 = vpop.f32.mrb[12].mxu0 }
 0x20c   :  { %v10089_v24 = vpop.f32.mrb[12].mxu1  ;;  %v10026_v27 = vpop.f32.mrb[13].mxu0  ;;  %v875_v29 = vpack.c.bf16 %v14388_v16, %v14386_v6 }
 0x20d   :  { %v10027_v28 = vadd.f32 %v10026_v27, %v10025_v20  ;;  %v10090_v31 = vpop.f32.mrb[13].mxu1  ;;  %v10028_v0 = vpop.f32.mrb[14].mxu0 }
 0x20e   :  { %v10091_v32 = vadd.f32 %v10090_v31, %v10089_v24  ;;  %v10092_v33 = vpop.f32.mrb[14].mxu1  ;;  %v10029_v36 = vpop.f32.mrb[15].mxu0 }
 0x20f   :  { %v10030_v39 = vadd.f32 %v10029_v36, %v10028_v0  ;;  %v10093_v40 = vpop.f32.mrb[15].mxu1 }
 0x210   :  { %v14392_v42 = vadd.f32 %v10091_v32, %v10027_v28  ;;  %v10094_v43 = vadd.f32 %v10093_v40, %v10092_v33  ;;  %v12713_v28 = vld [vmem:[#allocation2 + $0x32c] ss:$16 sps:$4 sm:$0xff]   ;;  %v12715_v40 = vld [vmem:[#allocation2 + $0x328] ss:$16 sps:$4 sm:$0xff]  }
 0x211   :  { %2340 = vmatmul.mubr.bf16.gmra.mrb[120].mxu1 %v12706_v22 }
 0x212   :  { %v14394_v44 = vadd.f32 %v10094_v43, %v10030_v39  ;;  %2347 = vmatprep.mubr.bf16.mxu1 %v12707_v26 }
 0x213   :  { %v10031_v46 = vpop.f32.mrb[16].mxu0 }
 0x214   :  { %v10095_v48 = vpop.f32.mrb[16].mxu1  ;;  %v10032_v49 = vpop.f32.mrb[17].mxu0  ;;  %v876_v51 = vpack.c.bf16 %v14394_v44, %v14392_v42  ;;  %v13310_v42 = vld [vmem:[%s15749_s0 + $0xd8] sm:$0xff]  }
 0x215   :  { %v10033_v53 = vadd.f32 %v10032_v49, %v10031_v46  ;;  %v10096_v54 = vpop.f32.mrb[17].mxu1  ;;  %v10034_v56 = vpop.f32.mrb[18].mxu0 }
 0x216   :  { %v10097_v58 = vadd.f32 %v10096_v54, %v10095_v48  ;;  %v10098_v59 = vpop.f32.mrb[18].mxu1  ;;  %v10035_v62 = vpop.f32.mrb[19].mxu0 }
 0x217   :  { %v10036_v63 = vadd.f32 %v10035_v62, %v10034_v56  ;;  %v10099_v1 = vpop.f32.mrb[19].mxu1 }
 0x218   :  { %v14398_v3 = vadd.f32 %v10097_v58, %v10033_v53  ;;  %v10100_v5 = vadd.f32 %v10099_v1, %v10098_v59  ;;  %v12716_v58 = vld [vmem:[#allocation2 + $0x34c] ss:$16 sps:$4 sm:$0xff]  }
 0x219   :  { %2348 = vmatmul.mubr.bf16.gmra.mrb[124].mxu1 %v12709_v47 }
 0x21a   :  { %v14400_v7 = vadd.f32 %v10100_v5, %v10036_v63  ;;  %2388 = vmatprep.mubr.bf16.mxu1 %v12712_v50  ;;  %v12718_v5 = vld [vmem:[#allocation2 + $0x348] ss:$16 sps:$4 sm:$0xff]  }
 0x21b   :  { %v10037_v9 = vpop.f32.mrb[20].mxu0 }
 0x21c   :  { %v10101_v15 = vpop.f32.mrb[20].mxu1  ;;  %v10038_v19 = vpop.f32.mrb[21].mxu0  ;;  %v877_v2 = vpack.c.bf16 %v14400_v7, %v14398_v3  ;;  %v13312_v3 = vld [vmem:[%s15749_s0 + $0xe0] sm:$0xff]  }
 0x21d   :  { %v10039_v14 = vadd.f32 %v10038_v19, %v10037_v9  ;;  %v10102_v20 = vpop.f32.mrb[21].mxu1  ;;  %v10040_v22 = vpop.f32.mrb[22].mxu0 }
 0x21e   :  { %v10103_v24 = vadd.f32 %v10102_v20, %v10101_v15  ;;  %v10104_v27 = vpop.f32.mrb[22].mxu1  ;;  %v10041_v26 = vpop.f32.mrb[23].mxu0 }
 0x21f   :  { %v10042_v31 = vadd.f32 %v10041_v26, %v10040_v22  ;;  %v10105_v0 = vpop.f32.mrb[23].mxu1 }
 0x220   :  { %v14404_v32 = vadd.f32 %v10103_v24, %v10039_v14  ;;  %v10106_v33 = vadd.f32 %v10105_v0, %v10104_v27  ;;  %v12719_v24 = vld [vmem:[#allocation2 + $0x36c] ss:$16 sps:$4 sm:$0xff]   ;;  %v12721_v0 = vld [vmem:[#allocation2 + $0x368] ss:$16 sps:$4 sm:$0xff]  }
 0x221   :  { %2389 = vmatmul.mubr.bf16.vlgmr.msra.gmra.mrb[128].mxu1 %v12710_v60 }
 0x222   :  { %v14406_v36 = vadd.f32 %v10106_v33, %v10042_v31  ;;  %2396 = vmatprep.mubr.bf16.mxu1 %v12713_v28  ;;  %10604 = vmatpush3.bf16.msra.mxu1 %v14282_v11 }
 0x223   :  { %v10043_v39 = vpop.f32.mrb[24].mxu0  ;;  %10605 = vmatprep.subr.bf16.mxu1 %v14290_v17 }
 0x224   :  { %v10107_v43 = vpop.f32.mrb[24].mxu1  ;;  %v10044_v46 = vpop.f32.mrb[25].mxu0  ;;  %v878_v47 = vpack.c.bf16 %v14406_v36, %v14404_v32  ;;  %v13314_v32 = vld [vmem:[%s15749_s0 + $0xe8] sm:$0xff]  }
 0x225   :  { %v10045_v48 = vadd.f32 %v10044_v46, %v10043_v39  ;;  %v10108_v49 = vpop.f32.mrb[25].mxu1  ;;  %v10046_v50 = vpop.f32.mrb[26].mxu0 }
 0x226   :  { %v10109_v53 = vadd.f32 %v10108_v49, %v10107_v43  ;;  %v10110_v54 = vpop.f32.mrb[26].mxu1  ;;  %v10047_v56 = vpop.f32.mrb[27].mxu0  ;;  %10606 = vmatpush3.bf16.msra.mxu1 %v14298_v21 }
 0x227   :  { %v10048_v59 = vadd.f32 %v10047_v56, %v10046_v50  ;;  %v10111_v11 = vpop.f32.mrb[27].mxu1  ;;  %10607 = vmatprep.subr.bf16.mxu1 %v14304_v23  ;;  %v12722_v50 = vld [vmem:[#allocation2 + $0x38c] ss:$16 sps:$4 sm:$0xff]  }
 0x228   :  { %v14414_v62 = vadd.f32 %v10109_v53, %v10045_v48  ;;  %v10112_v17 = vadd.f32 %v10111_v11, %v10110_v54 }
 0x229   :  { %2397 = vmatmul.mubr.bf16.gmra.mrb[132].mxu1 %v12715_v40 }
 0x22a   :  { %v14416_v63 = vadd.f32 %v10112_v17, %v10048_v59  ;;  %2404 = vmatprep.mubr.bf16.mxu1 %v12716_v58  ;;  %10608 = vmatpush3.bf16.msra.mxu1 %v14310_v25 }
 0x22b   :  { %v10049_v1 = vpop.f32.mrb[28].mxu0  ;;  %10609 = vmatprep.subr.bf16.mxu1 %v14316_v4 }
 0x22c   :  { %v10113_v9 = vpop.f32.mrb[28].mxu1  ;;  %v10050_v60 = vpop.f32.mrb[29].mxu0  ;;  %v879_v21 = vpack.c.bf16 %v14416_v63, %v14414_v62 }
 0x22d   :  { %v10051_v15 = vadd.f32 %v10050_v60, %v10049_v1  ;;  %v10114_v23 = vpop.f32.mrb[29].mxu1  ;;  %v10052_v19 = vpop.f32.mrb[30].mxu0  ;;  %v12724_v60 = vld [vmem:[#allocation2 + $0x388] ss:$16 sps:$4 sm:$0xff]  }
 0x22e   :  { %v10115_v14 = vadd.f32 %v10114_v23, %v10113_v9  ;;  %v10116_v20 = vpop.f32.mrb[30].mxu1  ;;  %v10053_v22 = vpop.f32.mrb[31].mxu0  ;;  %10610 = vmatpush3.bf16.msra.mxu1 %v14322_v8 }
 0x22f   :  { %v10054_v27 = vadd.f32 %v10053_v22, %v10052_v19  ;;  %v10117_v25 = vpop.f32.mrb[31].mxu1  ;;  %10611 = vmatprep.subr.bf16.mxu1 %v14328_v10 }
 0x230   :  { %v14424_v26 = vadd.f32 %v10115_v14, %v10051_v15  ;;  %v10118_v4 = vadd.f32 %v10117_v25, %v10116_v20  ;;  %v12728_v14 = vld [vmem:[#allocation2 + $0x3ac] ss:$16 sps:$4 sm:$0xff]  }
 0x231   :  { %2405 = vmatmul.mubr.bf16.gmra.mrb[136].mxu1 %v12718_v5 }
 0x232   :  { %v14426_v28 = vadd.f32 %v10118_v4, %v10054_v27  ;;  %2412 = vmatprep.mubr.bf16.mxu1 %v12719_v24  ;;  %10612 = vmatpush3.bf16.msra.mxu1 %v14334_v12  ;;  %v14441_v24 = vld [vmem:[%s15749_s0 + $0x40] sm:$0xff]  }
 0x233   :  { %v10135_v31 = vpop.f32.mrb[32].mxu0  ;;  %10613 = vmatprep.subr.bf16.mxu1 %v14340_v18 }
 0x234   :  { %v10199_v33 = vpop.f32.mrb[32].mxu1  ;;  %v10136_v39 = vpop.f32.mrb[33].mxu0  ;;  %v880_v8 = vpack.c.bf16 %v14426_v28, %v14424_v26 }
 0x235   :  { %v10137_v40 = vadd.f32 %v10136_v39, %v10135_v31  ;;  %v10200_v10 = vpop.f32.mrb[33].mxu1  ;;  %v10138_v43 = vpop.f32.mrb[34].mxu0 }
 0x236   :  { %v10201_v46 = vadd.f32 %v10200_v10, %v10199_v33  ;;  %v10202_v48 = vpop.f32.mrb[34].mxu1  ;;  %v10139_v49 = vpop.f32.mrb[35].mxu0  ;;  %10614 = vmatpush3.bf16.msra.mxu1 %v14346_v30 }
 0x237   :  { %v10140_v53 = vadd.f32 %v10139_v49, %v10138_v43  ;;  %v10203_v12 = vpop.f32.mrb[35].mxu1  ;;  %10615 = vmatprep.subr.bf16.mxu1 %v14352_v34 }
 0x238   :  { %v1207_v54 = vadd.f32 %v10201_v46, %v10137_v40  ;;  %v10204_v18 = vadd.f32 %v10203_v12, %v10202_v48  ;;  %v1430_v40 = vsel %vm1304_vm0, %v14285_v13, 0  ;;  %v12730_v48 = vld [vmem:[#allocation2 + $0x3a8] ss:$16 sps:$4 sm:$0xff]   ;;  %v12734_v12 = vld [vmem:[#allocation2 + $0x3cc] ss:$16 sps:$4 sm:$0xff]  }
 0x239   :  { %2413 = vmatmul.mubr.bf16.gmra.mrb[140].mxu1 %v12721_v0 }
 0x23a   :  { %v1210_v56 = vadd.f32 %v10204_v18, %v10140_v53  ;;  %2420 = vmatprep.mubr.bf16.mxu1 %v12722_v50  ;;  %10616 = vmatpush3.bf16.msra.mxu1 %v14362_v38 }
 0x23b   :  { %v10141_v58 = vpop.f32.mrb[36].mxu0  ;;  %10617 = vmatprep.subr.bf16.mxu1 %v14368_v41 }
 0x23c   :  { %v10205_v59 = vpop.f32.mrb[36].mxu1  ;;  %v10142_v11 = vpop.f32.mrb[37].mxu0  ;;  %v1269_v17 = vpack.c.bf16 %v1210_v56, %v1207_v54 }
 0x23d   :  { %v10143_v1 = vadd.f32 %v10142_v11, %v10141_v58  ;;  %v10206_v5 = vpop.f32.mrb[37].mxu1  ;;  %v10144_v9 = vpop.f32.mrb[38].mxu0 }
 0x23e   :  { %v10207_v15 = vadd.f32 %v10206_v5, %v10205_v59  ;;  %v10208_v23 = vpop.f32.mrb[38].mxu1  ;;  %11544 = vmatprep.mubr.msk.bf16.mxu0 %vm1279_vm1, %v1269_v17  ;;  %v10145_v19 = vpop.f32.mrb[39].mxu0  ;;  %10618 = vmatpush3.bf16.msra.mxu1 %v14376_v52  ;;  %v14450_v59 = vld [vmem:[%s15749_s0 + $0xc0] sm:$0xff]  }
 0x23f   :  { %v10146_v20 = vadd.f32 %v10145_v19, %v10144_v9  ;;  %v10209_v22 = vpop.f32.mrb[39].mxu1  ;;  %10676 = vmatprep.subr.bf16.mxu1 %v14441_v24  ;;  %15766 = vst [vmem:[#allocation32_spill] sm:$0xff] %v14450_v59 }
 0x240   :  { %v1215_v27 = vadd.f32 %v10207_v15, %v10143_v1  ;;  %v10210_v25 = vadd.f32 %v10209_v22, %v10208_v23  ;;  %v12736_v23 = vld [vmem:[#allocation2 + $0x3c8] ss:$16 sps:$4 sm:$0xff]   ;;  %v12740_v22 = vld [vmem:[#allocation2 + $0x3ec] ss:$16 sps:$4 sm:$0xff]  }
 0x241   :  { %2421 = vmatmul.mubr.bf16.gmra.mrb[144].mxu1 %v12724_v60 }
 0x242   :  { %v1218_v4 = vadd.f32 %v10210_v25, %v10146_v20  ;;  %2428 = vmatprep.mubr.bf16.mxu1 %v12728_v14 }
 0x243   :  { %v10147_v31 = vpop.f32.mrb[40].mxu0 }
 0x244   :  { %v1270_v0 = vpack.c.bf16 %v1218_v4, %v1215_v27  ;;  %v10211_v33 = vpop.f32.mrb[40].mxu1  ;;  %v10148_v39 = vpop.f32.mrb[41].mxu0 }
 0x245   :  { %v10149_v10 = vadd.f32 %v10148_v39, %v10147_v31  ;;  %v10212_v43 = vpop.f32.mrb[41].mxu1  ;;  %v10150_v46 = vpop.f32.mrb[42].mxu0 }
 0x246   :  { %v10213_v49 = vadd.f32 %v10212_v43, %v10211_v33  ;;  %v10214_v50 = vpop.f32.mrb[42].mxu1  ;;  %11545 = vmatmul.mubr.msk.bf16.vlgmr.msra.gmra.mrb[64].mxu0 %vm1279_vm1, %v1270_v0  ;;  %v10151_v53 = vpop.f32.mrb[43].mxu0 }
 0x247   :  { %v10152_v54 = vadd.f32 %v10151_v53, %v10150_v46  ;;  %v10215_v18 = vpop.f32.mrb[43].mxu1  ;;  %11561 = vmatpush3.bf16.msra.mxu0 %v1430_v40 }
 0x248   :  { %v1223_v56 = vadd.f32 %v10213_v49, %v10149_v10  ;;  %v10216_v58 = vadd.f32 %v10215_v18, %v10214_v50  ;;  %10329 = vmatprep.subr.bf16.mxu0 %v14450_v59  ;;  %v12742_v49 = vld [vmem:[#allocation2 + $0x3e8] ss:$16 sps:$4 sm:$0xff]  }
 0x249   :  { %2429 = vmatmul.mubr.bf16.gmra.mrb[148].mxu1 %v12730_v48 }
 0x24a   :  { %v1226_v13 = vadd.f32 %v10216_v58, %v10152_v54  ;;  %2436 = vmatprep.mubr.bf16.mxu1 %v12734_v12 }
 0x24b   :  { %v10153_v11 = vpop.f32.mrb[44].mxu0 }
 0x24c   :  { %v10217_v17 = vpop.f32.mrb[44].mxu1  ;;  %v10154_v1 = vpop.f32.mrb[45].mxu0  ;;  %v1271_v5 = vpack.c.bf16 %v1226_v13, %v1223_v56 }
 0x24d   :  { %v10155_v9 = vadd.f32 %v10154_v1, %v10153_v11  ;;  %v10218_v60 = vpop.f32.mrb[45].mxu1  ;;  %v10156_v15 = vpop.f32.mrb[46].mxu0 }
 0x24e   :  { %v10219_v19 = vadd.f32 %v10218_v60, %v10217_v17  ;;  %v10220_v14 = vpop.f32.mrb[46].mxu1  ;;  %11548 = vmatprep.mubr.msk.bf16.mxu0 %vm1279_vm1, %v1271_v5  ;;  %v10157_v20 = vpop.f32.mrb[47].mxu0 }
 0x24f   :  { %v10158_v27 = vadd.f32 %v10157_v20, %v10156_v15  ;;  %v10221_v25 = vpop.f32.mrb[47].mxu1 }
 0x250   :  { %v1231_v4 = vadd.f32 %v10219_v19, %v10155_v9  ;;  %v10222_v31 = vadd.f32 %v10221_v25, %v10220_v14 }
 0x251   :  { %2437 = vmatmul.mubr.bf16.gmra.mrb[152].mxu1 %v12736_v23 }
 0x252   :  { %v1234_v0 = vadd.f32 %v10222_v31, %v10158_v27  ;;  %2444 = vmatprep.mubr.bf16.mxu1 %v12740_v22 }
 0x253   :  { %v10159_v33 = vpop.f32.mrb[48].mxu0 }
 0x254   :  { %v10223_v39 = vpop.f32.mrb[48].mxu1  ;;  %v10160_v40 = vpop.f32.mrb[49].mxu0  ;;  %v1272_v10 = vpack.c.bf16 %v1234_v0, %v1231_v4 }
 0x255   :  { %v10161_v43 = vadd.f32 %v10160_v40, %v10159_v33  ;;  %v10224_v46 = vpop.f32.mrb[49].mxu1  ;;  %v10162_v48 = vpop.f32.mrb[50].mxu0 }
 0x256   :  { %v10225_v50 = vadd.f32 %v10224_v46, %v10223_v39  ;;  %v10226_v53 = vpop.f32.mrb[50].mxu1  ;;  %11549 = vmatmul.mubr.msk.bf16.gmra.mrb[68].mxu0 %vm1279_vm1, %v1272_v10  ;;  %v10163_v12 = vpop.f32.mrb[51].mxu0 }
 0x257   :  { %v10164_v54 = vadd.f32 %v10163_v12, %v10162_v48  ;;  %v10227_v18 = vpop.f32.mrb[51].mxu1 }
 0x258   :  { %v1239_v56 = vadd.f32 %v10225_v50, %v10161_v43  ;;  %v10228_v58 = vadd.f32 %v10227_v18, %v10226_v53 }
 0x259   :  { %2445 = vmatmul.mubr.bf16.gmra.mrb[156].mxu1 %v12742_v49 }
 0x25a   :  { %v1242_v13 = vadd.f32 %v10228_v58, %v10164_v54 }
 0x25b   :  { %v10165_v11 = vpop.f32.mrb[52].mxu0 }
 0x25c   :  { %v10229_v17 = vpop.f32.mrb[52].mxu1  ;;  %v10166_v1 = vpop.f32.mrb[53].mxu0  ;;  %v1273_v5 = vpack.c.bf16 %v1242_v13, %v1239_v56 }
 0x25d   :  { %v10167_v9 = vadd.f32 %v10166_v1, %v10165_v11  ;;  %v10230_v60 = vpop.f32.mrb[53].mxu1  ;;  %v10168_v15 = vpop.f32.mrb[54].mxu0 }
 0x25e   :  { %v10231_v23 = vadd.f32 %v10230_v60, %v10229_v17  ;;  %v10232_v19 = vpop.f32.mrb[54].mxu1  ;;  %11552 = vmatprep.mubr.msk.bf16.mxu0 %vm1279_vm1, %v1273_v5  ;;  %v10169_v14 = vpop.f32.mrb[55].mxu0 }
 0x25f   :  { %v10170_v20 = vadd.f32 %v10169_v14, %v10168_v15  ;;  %v10233_v22 = vpop.f32.mrb[55].mxu1 }
 0x260   :  { %v1247_v27 = vadd.f32 %v10231_v23, %v10167_v9  ;;  %v10234_v25 = vadd.f32 %v10233_v22, %v10232_v19 }
 0x262   :  { %v1250_v4 = vadd.f32 %v10234_v25, %v10170_v20 }
 0x263   :  { %v10171_v31 = vpop.f32.mrb[56].mxu0 }
 0x264   :  { %v10235_v0 = vpop.f32.mrb[56].mxu1  ;;  %v10172_v33 = vpop.f32.mrb[57].mxu0  ;;  %v1274_v39 = vpack.c.bf16 %v1250_v4, %v1247_v27 }
 0x265   :  { %v10173_v40 = vadd.f32 %v10172_v33, %v10171_v31  ;;  %v10236_v10 = vpop.f32.mrb[57].mxu1  ;;  %v10174_v43 = vpop.f32.mrb[58].mxu0 }
 0x266   :  { %v10237_v46 = vadd.f32 %v10236_v10, %v10235_v0  ;;  %v10238_v48 = vpop.f32.mrb[58].mxu1  ;;  %11553 = vmatmul.mubr.msk.bf16.gmra.mrb[72].mxu0 %vm1279_vm1, %v1274_v39  ;;  %v10175_v49 = vpop.f32.mrb[59].mxu0 }
 0x267   :  { %v10176_v50 = vadd.f32 %v10175_v49, %v10174_v43  ;;  %v10239_v53 = vpop.f32.mrb[59].mxu1  ;;  %v13309_v49 = vld [vmem:[%s15749_s0 + $0x90] sm:$0xff]  }
 0x268   :  { %v1255_v12 = vadd.f32 %v10237_v46, %v10173_v40  ;;  %v10240_v54 = vadd.f32 %v10239_v53, %v10238_v48 }
 0x26a   :  { %v1258_v18 = vadd.f32 %v10240_v54, %v10176_v50  ;;  %v13313_v54 = vld [vmem:[%s15749_s0 + $0xa0] sm:$0xff]  }
 0x26b   :  { %v10177_v56 = vpop.f32.mrb[60].mxu0 }
 0x26c   :  { %v10241_v58 = vpop.f32.mrb[60].mxu1  ;;  %v10178_v13 = vpop.f32.mrb[61].mxu0  ;;  %v1275_v11 = vpack.c.bf16 %v1258_v18, %v1255_v12 }
 0x26d   :  { %v10179_v17 = vadd.f32 %v10178_v13, %v10177_v56  ;;  %v10242_v1 = vpop.f32.mrb[61].mxu1  ;;  %v10180_v5 = vpop.f32.mrb[62].mxu0  ;;  %v1925_v13 = vld [vmem:[#allocation4 + $0x4] sm:$0x3] }
 0x26e   :  { %v10243_v9 = vadd.f32 %v10242_v1, %v10241_v58  ;;  %v10244_v60 = vpop.f32.mrb[62].mxu1  ;;  %11556 = vmatprep.mubr.msk.bf16.mxu0 %vm1279_vm1, %v1275_v11  ;;  %v10181_v15 = vpop.f32.mrb[63].mxu0  ;;  %v12731_v11 = vld [vmem:[#allocation2 + $0x22c] ss:$16 sps:$4 sm:$0xff]   ;;  %v1951_v26 = vsel %vm1304_vm0, %v1925_v13, 0 }
 0x26f   :  { %v10182_v23 = vadd.f32 %v10181_v15, %v10180_v5  ;;  %v10245_v19 = vpop.f32.mrb[63].mxu1  ;;  %v12733_v5 = vld [vmem:[#allocation2 + $0x228] ss:$16 sps:$4 sm:$0xff]  }
 0x270   :  { %v1263_v14 = vadd.f32 %v10243_v9, %v10179_v17  ;;  %v10246_v20 = vadd.f32 %v10245_v19, %v10244_v60  ;;  %v12737_v9 = vld [vmem:[#allocation2 + $0x24c] ss:$16 sps:$4 sm:$0xff]  }
 0x272   :  { %v1266_v22 = vadd.f32 %v10246_v20, %v10182_v23  ;;  %v12739_v20 = vld [vmem:[#allocation2 + $0x248] ss:$16 sps:$4 sm:$0xff]  }
 0x274   :  { %v1276_v27 = vpack.c.bf16 %v1266_v22, %v1263_v14  ;;  %v10281_v25 = vpop.f32.mrb[64].mxu1  ;;  %v12743_v22 = vld [vmem:[#allocation2 + $0x26c] ss:$16 sps:$4 sm:$0xff]  }
 0x275   :  { %v10282_v4 = vpop.f32.mrb[65].mxu1 }
 0x276   :  { %11557 = vmatmul.mubr.msk.bf16.gmra.mrb[76].mxu0 %vm1279_vm1, %v1276_v27  ;;  %v14459_v31 = vadd.f32 %v10282_v4, %v10281_v25  ;;  %v10284_v0 = vpop.f32.mrb[66].mxu1 }
 0x277   :  { %11562 = vmatprep.mubr.msk.bf16.mxu0 %vm1279_vm1, %v873_v45  ;;  %v10285_v33 = vpop.f32.mrb[67].mxu1  ;;  %v13306_v45 = vld [vmem:[%s15749_s0 + $0xc8] sm:$0xff]  }
 0x278   :  { %v14465_v39 = vadd.f32 %v10285_v33, %v10284_v0 }
 0x27c   :  { %v10287_v40 = vpop.f32.mrb[68].mxu1 }
 0x27d   :  { %v10288_v10 = vpop.f32.mrb[69].mxu1 }
 0x27e   :  { %11563 = vmatmul.mubr.msk.bf16.vlgmr.msra.gmra.mrb[64].mxu0 %vm1279_vm1, %v874_v61  ;;  %v14471_v43 = vadd.f32 %v10288_v10, %v10287_v40  ;;  %v10290_v46 = vpop.f32.mrb[70].mxu1  ;;  %v13308_v61 = vld [vmem:[%s15749_s0 + $0xd0] sm:$0xff]   ;;  %v12745_v10 = vld [vmem:[#allocation2 + $0x268] ss:$16 sps:$4 sm:$0xff]  }
 0x27f   :  { %11566 = vmatprep.mubr.msk.bf16.mxu0 %vm1279_vm1, %v875_v29  ;;  %10330 = vmatpush3.bf16.msra.mxu0 %v13305_v35  ;;  %v10291_v37 = vpop.f32.mrb[71].mxu1 }
 0x280   :  { %10331 = vmatprep.subr.bf16.mxu0 %v13306_v45  ;;  %v14483_v55 = vadd.f32 %v10291_v37, %v10290_v46  ;;  %v12746_v46 = vld [vmem:[#allocation2 + $0x28c] ss:$16 sps:$4 sm:$0xff]  }
 0x283   :  { %10332 = vmatpush3.bf16.msra.mxu0 %v13307_v57 }
 0x284   :  { %10333 = vmatprep.subr.bf16.mxu0 %v13308_v61  ;;  %v10293_v6 = vpop.f32.mrb[72].mxu1 }
 0x285   :  { %v10294_v16 = vpop.f32.mrb[73].mxu1 }
 0x286   :  { %11567 = vmatmul.mubr.msk.bf16.gmra.mrb[68].mxu0 %vm1279_vm1, %v876_v51  ;;  %v14495_v29 = vadd.f32 %v10294_v16, %v10293_v6  ;;  %v10296_v48 = vpop.f32.mrb[74].mxu1  ;;  %v13311_v51 = vld [vmem:[%s15749_s0 + $0x98] sm:$0xff]  }
 0x287   :  { %11570 = vmatprep.mubr.msk.bf16.mxu0 %vm1279_vm1, %v877_v2  ;;  %10334 = vmatpush3.bf16.msra.mxu0 %v13309_v49  ;;  %v10297_v50 = vpop.f32.mrb[75].mxu1  ;;  %v12748_v16 = vld [vmem:[#allocation2 + $0x288] ss:$16 sps:$4 sm:$0xff]  }
 0x288   :  { %10335 = vmatprep.subr.bf16.mxu0 %v13310_v42  ;;  %v14507_v44 = vadd.f32 %v10297_v50, %v10296_v48  ;;  %v12749_v48 = vld [vmem:[#allocation2 + $0x2ac] ss:$16 sps:$4 sm:$0xff]  }
 0x28b   :  { %10336 = vmatpush3.bf16.msra.mxu0 %v13311_v51 }
 0x28c   :  { %10337 = vmatprep.subr.bf16.mxu0 %v13312_v3  ;;  %v10299_v7 = vpop.f32.mrb[76].mxu1 }
 0x28d   :  { %v10300_v2 = vpop.f32.mrb[77].mxu1 }
 0x28e   :  { %11571 = vmatmul.mubr.msk.bf16.gmra.mrb[72].mxu0 %vm1279_vm1, %v878_v47  ;;  %v14519_v53 = vadd.f32 %v10300_v2, %v10299_v7  ;;  %v10302_v12 = vpop.f32.mrb[78].mxu1  ;;  %v12727_v47 = vld [vmem:[#allocation2 + $0x20c] ss:$16 sps:$4 sm:$0xff]   ;;  %v12751_v2 = vld [vmem:[#allocation2 + $0x2a8] ss:$16 sps:$4 sm:$0xff]  }
 0x28f   :  { %11574 = vmatprep.mubr.msk.bf16.mxu0 %vm1279_vm1, %v879_v21  ;;  %10338 = vmatpush3.bf16.msra.mxu0 %v13313_v54  ;;  %v10303_v18 = vpop.f32.mrb[79].mxu1 }
 0x290   :  { %10339 = vmatprep.subr.bf16.mxu0 %v13314_v32  ;;  %v14531_v36 = vadd.f32 %v10303_v18, %v10302_v12  ;;  %v12752_v12 = vld [vmem:[#allocation2 + $0x2cc] ss:$16 sps:$4 sm:$0xff]  }
 0x293   :  { %10340 = vmatpush3.bf16.msra.mxu0 %v14346_v30 }
 0x294   :  { %10341 = vmatprep.subr.bf16.mxu0 %v14352_v34  ;;  %v10305_v62 = vpop.f32.mrb[80].mxu1  ;;  %v12725_v34 = vld [vmem:[#allocation2 + $0x208] ss:$16 sps:$4 sm:$0xff]  }
 0x295   :  { %v10306_v63 = vpop.f32.mrb[81].mxu1 }
 0x296   :  { %11575 = vmatmul.mubr.msk.bf16.gmra.mrb[76].mxu0 %vm1279_vm1, %v880_v8  ;;  %v14539_v21 = vadd.f32 %v10306_v63, %v10305_v62  ;;  %v10308_v56 = vpop.f32.mrb[82].mxu1 }
 0x297   :  { %10342 = vmatpush3.bf16.msra.mxu0 %v14362_v38  ;;  %1851 = vmatprep.mubr.bf16.mxu0 %v12727_v47  ;;  %v10309_v58 = vpop.f32.mrb[83].mxu1 }
 0x298   :  { %10343 = vmatprep.subr.bf16.mxu0 %v14368_v41  ;;  %v14543_v30 = vadd.f32 %v10309_v58, %v10308_v56  ;;  %v12754_v56 = vld [vmem:[#allocation2 + $0x2c8] ss:$16 sps:$4 sm:$0xff]   ;;  %v12755_v58 = vld [vmem:[#allocation2 + $0x2ec] ss:$16 sps:$4 sm:$0xff]  }
 0x29b   :  { %10344 = vmatpush3.bf16.msra.mxu0 %v14376_v52 }
 0x29c   :  { %v10311_v17 = vpop.f32.mrb[84].mxu1  ;;  %12502 = vmatprep.subr.msk.bf16.mxu0 %vm1304_vm0, %v1925_v13 }
 0x29d   :  { %v10312_v28 = vpop.f32.mrb[85].mxu1 }
 0x29e   :  { %1852 = vmatmul.mubr.bf16.vlgmr.msra.gmra.mrb[80].mxu0 %v12725_v34  ;;  %v14548_v8 = vadd.f32 %v10312_v28, %v10311_v17  ;;  %v10314_v38 = vpop.f32.mrb[86].mxu1 }
 0x29f   :  { %1859 = vmatprep.mubr.bf16.mxu0 %v12731_v11  ;;  %v10315_v1 = vpop.f32.mrb[87].mxu1  ;;  %11579 = vmatpush3.bf16.msra.mxu0 %v1951_v26 }
 0x2a0   :  { %v14550_v41 = vadd.f32 %v10315_v1, %v10314_v38  ;;  %v12757_v38 = vld [vmem:[#allocation2 + $0x2e8] ss:$16 sps:$4 sm:$0xff]  }
 0x2a4   :  { %v10317_v60 = vpop.f32.mrb[88].mxu1 }
 0x2a5   :  { %v10318_v52 = vpop.f32.mrb[89].mxu1 }
 0x2a6   :  { %1860 = vmatmul.mubr.bf16.gmra.mrb[84].mxu0 %v12733_v5  ;;  %v14552_v15 = vadd.f32 %v10318_v52, %v10317_v60  ;;  %v10320_v23 = vpop.f32.mrb[90].mxu1 }
 0x2a7   :  { %1867 = vmatprep.mubr.bf16.mxu0 %v12737_v9  ;;  %v10321_v19 = vpop.f32.mrb[91].mxu1 }
 0x2a8   :  { %v14554_v14 = vadd.f32 %v10321_v19, %v10320_v23 }
 0x2ac   :  { %v10323_v27 = vpop.f32.mrb[92].mxu1 }
 0x2ad   :  { %v10324_v25 = vpop.f32.mrb[93].mxu1 }
 0x2ae   :  { %1868 = vmatmul.mubr.bf16.gmra.mrb[88].mxu0 %v12739_v20  ;;  %v14556_v4 = vadd.f32 %v10324_v25, %v10323_v27  ;;  %v10326_v0 = vpop.f32.mrb[94].mxu1 }
 0x2af   :  { %1875 = vmatprep.mubr.bf16.mxu0 %v12743_v22  ;;  %v10327_v33 = vpop.f32.mrb[95].mxu1 }
 0x2b0   :  { %v14558_v40 = vadd.f32 %v10327_v33, %v10326_v0 }
 0x2b4   :  { %v10418_v35 = vpop.f32.mrb[96].mxu1 }
 0x2b5   :  { %v10419_v37 = vpop.f32.mrb[97].mxu1 }
 0x2b6   :  { %1876 = vmatmul.mubr.bf16.gmra.mrb[92].mxu0 %v12745_v10  ;;  %v14560_v45 = vadd.f32 %v10419_v37, %v10418_v35  ;;  %v10421_v57 = vpop.f32.mrb[98].mxu1 }
 0x2b7   :  { %1883 = vmatprep.mubr.bf16.mxu0 %v12746_v46  ;;  %v10422_v61 = vpop.f32.mrb[99].mxu1 }
 0x2b8   :  { %v14562_v6 = vadd.f32 %v10422_v61, %v10421_v57 }
 0x2bc   :  { %v10424_v49 = vpop.f32.mrb[100].mxu1 }
 0x2bd   :  { %v10425_v50 = vpop.f32.mrb[101].mxu1 }
 0x2be   :  { %1884 = vmatmul.mubr.bf16.gmra.mrb[96].mxu0 %v12748_v16  ;;  %v10427_v42 = vpop.f32.mrb[102].mxu1  ;;  %v14564_v51 = vadd.f32 %v10425_v50, %v10424_v49 }
 0x2bf   :  { %1891 = vmatprep.mubr.bf16.mxu0 %v12749_v48  ;;  %v10428_v3 = vpop.f32.mrb[103].mxu1 }
 0x2c0   :  { %v14566_v7 = vadd.f32 %v10428_v3, %v10427_v42 }
 0x2c4   :  { %v10430_v54 = vpop.f32.mrb[104].mxu1 }
 0x2c5   :  { %v10431_v18 = vpop.f32.mrb[105].mxu1 }
 0x2c6   :  { %1892 = vmatmul.mubr.bf16.gmra.mrb[100].mxu0 %v12751_v2  ;;  %v14568_v32 = vadd.f32 %v10431_v18, %v10430_v54  ;;  %v10433_v47 = vpop.f32.mrb[106].mxu1 }
 0x2c7   :  { %1899 = vmatprep.mubr.bf16.mxu0 %v12752_v12  ;;  %v10434_v62 = vpop.f32.mrb[107].mxu1 }
 0x2c8   :  { %v10435_v63 = vadd.f32 %v10434_v62, %v10433_v47 }
 0x2cc   :  { %v10436_v13 = vpop.f32.mrb[108].mxu1 }
 0x2cd   :  { %v10437_v34 = vpop.f32.mrb[109].mxu1 }
 0x2ce   :  { %1900 = vmatmul.mubr.bf16.gmra.mrb[104].mxu0 %v12754_v56  ;;  %v14570_v11 = vadd.f32 %v10437_v34, %v10436_v13  ;;  %v10439_v17 = vpop.f32.mrb[110].mxu1 }
 0x2cf   :  { %1907 = vmatprep.mubr.bf16.mxu0 %v12755_v58  ;;  %v10440_v26 = vpop.f32.mrb[111].mxu1 }
 0x2d0   :  { %v10441_v28 = vadd.f32 %v10440_v26, %v10439_v17 }
 0x2d4   :  { %v10442_v1 = vpop.f32.mrb[112].mxu1 }
 0x2d5   :  { %v10443_v5 = vpop.f32.mrb[113].mxu1 }
 0x2d6   :  { %1908 = vmatmul.mubr.bf16.gmra.mrb[108].mxu0 %v12757_v38  ;;  %v14572_v9 = vadd.f32 %v10443_v5, %v10442_v1  ;;  %v10445_v60 = vpop.f32.mrb[114].mxu1 }
 0x2d7   :  { %v10446_v52 = vpop.f32.mrb[115].mxu1 }
 0x2d8   :  { %v10447_v23 = vadd.f32 %v10446_v52, %v10445_v60 }
 0x2dc   :  { %v10448_v19 = vpop.f32.mrb[116].mxu1 }
 0x2dd   :  { %v10449_v20 = vpop.f32.mrb[117].mxu1 }
 0x2de   :  { %v14574_v22 = vadd.f32 %v10449_v20, %v10448_v19  ;;  %v10451_v27 = vpop.f32.mrb[118].mxu1 }
 0x2df   :  { %v10452_v25 = vpop.f32.mrb[119].mxu1 }
 0x2e0   :  { %v14576_v0 = vadd.f32 %v10452_v25, %v10451_v27 }
 0x2e4   :  { %v10454_v33 = vpop.f32.mrb[120].mxu1 }
 0x2e5   :  { %v10455_v10 = vpop.f32.mrb[121].mxu1 }
 0x2e6   :  { %v14578_v46 = vadd.f32 %v10455_v10, %v10454_v33  ;;  %v10457_v35 = vpop.f32.mrb[122].mxu1 }
 0x2e7   :  { %v10458_v37 = vpop.f32.mrb[123].mxu1 }
 0x2e8   :  { %v14580_v57 = vadd.f32 %v10458_v37, %v10457_v35 }
 0x2ec   :  { %v10460_v61 = vpop.f32.mrb[124].mxu1 }
 0x2ed   :  { %v10461_v16 = vpop.f32.mrb[125].mxu1 }
 0x2ee   :  { %v14582_v48 = vadd.f32 %v10461_v16, %v10460_v61  ;;  %v10463_v49 = vpop.f32.mrb[126].mxu1 }
 0x2ef   :  { %v10464_v50 = vpop.f32.mrb[127].mxu1 }
 0x2f0   :  { %v14584_v42 = vadd.f32 %v10464_v50, %v10463_v49 }
 0x2f4   :  { %v10482_v3 = vpop.f32.mrb[128].mxu1 }
 0x2f5   :  { %v10483_v2 = vpop.f32.mrb[129].mxu1 }
 0x2f6   :  { %v10484_v12 = vadd.f32 %v10483_v2, %v10482_v3  ;;  %v10485_v54 = vpop.f32.mrb[130].mxu1 }
 0x2f7   :  { %v10486_v18 = vpop.f32.mrb[131].mxu1 }
 0x2f8   :  { %v14587_v47 = vadd.f32 %v10484_v12, %v14560_v45  ;;  %v10487_v62 = vadd.f32 %v10486_v18, %v10485_v54 }
 0x2fa   :  { %v14590_v56 = vadd.f32 %v10487_v62, %v14562_v6 }
 0x2fc   :  { %v10488_v58 = vpop.f32.mrb[132].mxu1 }
 0x2fd   :  { %v10489_v34 = vpop.f32.mrb[133].mxu1 }
 0x2fe   :  { %v10490_v17 = vadd.f32 %v10489_v34, %v10488_v58  ;;  %v10491_v26 = vpop.f32.mrb[134].mxu1 }
 0x2ff   :  { %v10492_v38 = vpop.f32.mrb[135].mxu1 }
 0x300   :  { %v14595_v1 = vadd.f32 %v10490_v17, %v14564_v51  ;;  %v10493_v5 = vadd.f32 %v10492_v38, %v10491_v26 }
 0x302   :  { %v14598_v60 = vadd.f32 %v10493_v5, %v14566_v7 }
 0x304   :  { %v10494_v6 = vpop.f32.mrb[136].mxu1 }
 0x305   :  { %v10495_v52 = vpop.f32.mrb[137].mxu1 }
 0x306   :  { %v10496_v19 = vadd.f32 %v10495_v52, %v10494_v6  ;;  %v10497_v20 = vpop.f32.mrb[138].mxu1 }
 0x307   :  { %v10498_v27 = vpop.f32.mrb[139].mxu1 }
 0x308   :  { %v14603_v25 = vadd.f32 %v10496_v19, %v14568_v32  ;;  %v10499_v33 = vadd.f32 %v10498_v27, %v10497_v20  ;;  %v14626_v19 = vld [vmem:[#allocation4 + $0x6] sm:$0x3]  ;;  %v14739_v20 = vld [vmem:[%s15749_s0 + $0x38] sm:$0xff]  }
 0x309   :  { %12503 = vmatprep.subr.msk.bf16.mxu0 %vm1304_vm0, %v14626_v19 }
 0x30a   :  { %v14605_v10 = vadd.f32 %v10499_v33, %v10435_v63 }
 0x30c   :  { %v10500_v51 = vpop.f32.mrb[140].mxu1 }
 0x30d   :  { %v10501_v7 = vpop.f32.mrb[141].mxu1 }
 0x30e   :  { %v10502_v37 = vadd.f32 %v10501_v7, %v10500_v51  ;;  %v10503_v61 = vpop.f32.mrb[142].mxu1 }
 0x30f   :  { %v10504_v16 = vpop.f32.mrb[143].mxu1 }
 0x310   :  { %v14610_v49 = vadd.f32 %v10502_v37, %v14570_v11  ;;  %v10505_v50 = vadd.f32 %v10504_v16, %v10503_v61 }
 0x312   :  { %v14612_v3 = vadd.f32 %v10505_v50, %v10441_v28 }
 0x314   :  { %v10506_v2 = vpop.f32.mrb[144].mxu1 }
 0x315   :  { %v10507_v63 = vpop.f32.mrb[145].mxu1 }
 0x316   :  { %v10508_v12 = vadd.f32 %v10507_v63, %v10506_v2  ;;  %v10509_v54 = vpop.f32.mrb[146].mxu1 }
 0x317   :  { %v10510_v18 = vpop.f32.mrb[147].mxu1 }
 0x318   :  { %v14617_v62 = vadd.f32 %v10508_v12, %v14572_v9  ;;  %v10511_v58 = vadd.f32 %v10510_v18, %v10509_v54 }
 0x31a   :  { %v14619_v34 = vadd.f32 %v10511_v58, %v10447_v23 }
 0x31c   :  { %v10512_v17 = vpop.f32.mrb[148].mxu1 }
 0x31d   :  { %v10513_v28 = vpop.f32.mrb[149].mxu1 }
 0x31e   :  { %v10514_v26 = vadd.f32 %v10513_v28, %v10512_v17  ;;  %v10515_v38 = vpop.f32.mrb[150].mxu1  ;;  %v12760_v17 = vld [vmem:[#allocation2 + $0x40c] ss:$16 sps:$4 sm:$0xff]   ;;  %v14654_v28 = vld [vmem:[%s15749_s0] sm:$0xff]  }
 0x31f   :  { %v10516_v5 = vpop.f32.mrb[151].mxu1  ;;  %2925 = vmatprep.mubr.bf16.mxu1 %v12760_v17 }
 0x320   :  { %v14624_v6 = vadd.f32 %v10514_v26, %v14574_v22  ;;  %v10517_v52 = vadd.f32 %v10516_v5, %v10515_v38  ;;  %v12766_v26 = vld [vmem:[#allocation2 + $0x428] ss:$16 sps:$4 sm:$0xff]   ;;  %v14672_v5 = vld [vmem:[%s15749_s0 + $0x50] sm:$0xff]  }
 0x321   :  { %v14666_v38 = vld [vmem:[%s15749_s0 + $0x8] sm:$0xff]  }
 0x322   :  { %v14629_v9 = vadd.f32 %v10517_v52, %v14576_v0  ;;  %v14678_v52 = vld [vmem:[%s15749_s0 + $0x10] sm:$0xff]  }
 0x324   :  { %v10518_v23 = vpop.f32.mrb[152].mxu1 }
 0x325   :  { %v10519_v27 = vpop.f32.mrb[153].mxu1 }
 0x326   :  { %v10520_v33 = vadd.f32 %v10519_v27, %v10518_v23  ;;  %v10521_v51 = vpop.f32.mrb[154].mxu1  ;;  %v14684_v23 = vld [vmem:[%s15749_s0 + $0x58] sm:$0xff]  }
 0x327   :  { %v10522_v7 = vpop.f32.mrb[155].mxu1  ;;  %v12770_v27 = vld [vmem:[#allocation2 + $0x44c] ss:$16 sps:$4 sm:$0xff]  }
 0x328   :  { %v14636_v22 = vadd.f32 %v10520_v33, %v14578_v46  ;;  %v10523_v37 = vadd.f32 %v10522_v7, %v10521_v51  ;;  %v12772_v33 = vld [vmem:[#allocation2 + $0x448] ss:$16 sps:$4 sm:$0xff]   ;;  %v14696_v7 = vld [vmem:[%s15749_s0 + $0x60] sm:$0xff]  }
 0x329   :  { %v14690_v51 = vld [vmem:[%s15749_s0 + $0x18] sm:$0xff]  }
 0x32a   :  { %v14639_v61 = vadd.f32 %v10523_v37, %v14580_v57  ;;  %v12758_v57 = vld [vmem:[#allocation2 + $0x408] ss:$16 sps:$4 sm:$0xff]   ;;  %v14702_v37 = vld [vmem:[%s15749_s0 + $0x20] sm:$0xff]  }
 0x32b   :  { %2926 = vmatmul.mubr.bf16.vlgmr.msra.gmra.mrb[160].mxu1 %v12758_v57  ;;  %v14726_v57 = vld [vmem:[%s15749_s0 + $0x30] sm:$0xff]  }
 0x32c   :  { %v10524_v0 = vpop.f32.mrb[156].mxu1  ;;  %10677 = vmatpush3.bf16.msra.mxu1 %v14654_v28 }
 0x32d   :  { %v10525_v50 = vpop.f32.mrb[157].mxu1 }
 0x32e   :  { %v10526_v2 = vadd.f32 %v10525_v50, %v10524_v0  ;;  %v10527_v63 = vpop.f32.mrb[158].mxu1  ;;  %v14708_v0 = vld [vmem:[%s15749_s0 + $0x68] sm:$0xff]  }
 0x32f   :  { %v10528_v12 = vpop.f32.mrb[159].mxu1  ;;  %v12776_v50 = vld [vmem:[#allocation2 + $0x46c] ss:$16 sps:$4 sm:$0xff]  }
 0x330   :  { %v14644_v54 = vadd.f32 %v10526_v2, %v14582_v48  ;;  %v10529_v18 = vadd.f32 %v10528_v12, %v10527_v63  ;;  %v14660_v48 = vld [vmem:[%s15749_s0 + $0x48] sm:$0xff]   ;;  %v14720_v12 = vld [vmem:[%s15749_s0 + $0x70] sm:$0xff]  }
 0x331   :  { %10678 = vmatprep.subr.bf16.mxu1 %v14660_v48  ;;  %v12778_v2 = vld [vmem:[#allocation2 + $0x468] ss:$16 sps:$4 sm:$0xff]  }
 0x332   :  { %v14647_v58 = vadd.f32 %v10529_v18, %v14584_v42  ;;  %v12764_v42 = vld [vmem:[#allocation2 + $0x42c] ss:$16 sps:$4 sm:$0xff]   ;;  %10679 = vmatpush3.bf16.msra.mxu1 %v14666_v38 }
 0x333   :  { %2933 = vmatprep.mubr.bf16.mxu1 %v12764_v42  ;;  %10680 = vmatprep.subr.bf16.mxu1 %v14672_v5  ;;  %v14714_v63 = vld [vmem:[%s15749_s0 + $0x28] sm:$0xff]   ;;  %v14732_v42 = vld [vmem:[%s15749_s0 + $0x78] sm:$0xff]  }
 0x334   :  { %2934 = vmatmul.mubr.bf16.gmra.mrb[164].mxu1 %v12766_v26 }
 0x335   :  { %2941 = vmatprep.mubr.bf16.mxu1 %v12770_v27 }
 0x336   :  { %10681 = vmatpush3.bf16.msra.mxu1 %v14678_v52 }
 0x337   :  { %10682 = vmatprep.subr.bf16.mxu1 %v14684_v23 }
 0x33a   :  { %10683 = vmatpush3.bf16.msra.mxu1 %v14690_v51 }
 0x33b   :  { %10684 = vmatprep.subr.bf16.mxu1 %v14696_v7 }
 0x33c   :  { %2942 = vmatmul.mubr.bf16.gmra.mrb[168].mxu1 %v12772_v33  ;;  %v12782_v33 = vld [vmem:[#allocation2 + $0x48c] ss:$16 sps:$4 sm:$0xff]  }
 0x33d   :  { %2949 = vmatprep.mubr.bf16.mxu1 %v12776_v50 }
 0x33e   :  { %10685 = vmatpush3.bf16.msra.mxu1 %v14702_v37 }
 0x33f   :  { %10686 = vmatprep.subr.bf16.mxu1 %v14708_v0 }
 0x342   :  { %10687 = vmatpush3.bf16.msra.mxu1 %v14714_v63 }
 0x343   :  { %10688 = vmatprep.subr.bf16.mxu1 %v14720_v12 }
 0x344   :  { %2950 = vmatmul.mubr.bf16.gmra.mrb[172].mxu1 %v12778_v2  ;;  %v12784_v2 = vld [vmem:[#allocation2 + $0x488] ss:$16 sps:$4 sm:$0xff]  }
 0x345   :  { %2957 = vmatprep.mubr.bf16.mxu1 %v12782_v33 }
 0x346   :  { %10689 = vmatpush3.bf16.msra.mxu1 %v14726_v57 }
 0x347   :  { %10690 = vmatprep.subr.bf16.mxu1 %v14732_v42 }
 0x34a   :  { %10691 = vmatpush3.bf16.msra.mxu1 %v14739_v20 }
 0x34b   :  { %10813 = vmatprep.subr.bf16.mxu1 %v14441_v24 }
 0x34c   :  { %2958 = vmatmul.mubr.bf16.gmra.mrb[176].mxu1 %v12784_v2  ;;  %v12794_v2 = vld [vmem:[#allocation2 + $0x4cc] ss:$16 sps:$4 sm:$0xff]  }
 0x371   :  { %v10345_v18 = vpop.f32.mrb[80].mxu0 }
 0x372   :  { %v10346_v17 = vpop.f32.mrb[81].mxu0 }
 0x373   :  { %v10347_v26 = vadd.f32 %v10346_v17, %v10345_v18  ;;  %v10348_v27 = vpop.f32.mrb[82].mxu0 }
 0x374   :  { %v10349_v50 = vpop.f32.mrb[83].mxu0 }
 0x375   :  { %v1854_v46 = vadd.f32 %v10347_v26, %v14459_v31  ;;  %v10350_v16 = vadd.f32 %v10349_v50, %v10348_v27  ;;  %v12788_v31 = vld [vmem:[#allocation2 + $0x4ac] ss:$16 sps:$4 sm:$0xff]   ;;  %v12790_v27 = vld [vmem:[#allocation2 + $0x4a8] ss:$16 sps:$4 sm:$0xff]  }
 0x376   :  { %2965 = vmatprep.mubr.bf16.mxu1 %v12788_v31 }
 0x377   :  { %v1857_v11 = vadd.f32 %v10350_v16, %v14465_v39  ;;  %2966 = vmatmul.mubr.bf16.gmra.mrb[180].mxu1 %v12790_v27 }
 0x378   :  { %2973 = vmatprep.mubr.bf16.mxu1 %v12794_v2 }
 0x379   :  { %v10351_v18 = vpop.f32.mrb[84].mxu0  ;;  %v1916_v17 = vpack.c.bf16 %v1857_v11, %v1854_v46  ;;  %v2488_v11 = vsel %vm1304_vm0, %v14626_v19, 0 }
 0x37a   :  { %v10352_v32 = vpop.f32.mrb[85].mxu0 }
 0x37b   :  { %v10353_v35 = vadd.f32 %v10352_v32, %v10351_v18  ;;  %v10354_v45 = vpop.f32.mrb[86].mxu0  ;;  %11580 = vmatprep.mubr.msk.bf16.mxu0 %vm1279_vm1, %v1916_v17  ;;  %v12796_v17 = vld [vmem:[#allocation2 + $0x4c8] ss:$16 sps:$4 sm:$0xff]  }
 0x37c   :  { %v10355_v26 = vpop.f32.mrb[87].mxu0 }
 0x37d   :  { %v1862_v33 = vadd.f32 %v10353_v35, %v14471_v43  ;;  %v10356_v50 = vadd.f32 %v10355_v26, %v10354_v45 }
 0x37f   :  { %v1865_v13 = vadd.f32 %v10356_v50, %v14483_v55  ;;  %2974 = vmatmul.mubr.bf16.gmra.mrb[184].mxu1 %v12796_v17 }
 0x381   :  { %v1917_v59 = vpack.c.bf16 %v1865_v13, %v1862_v33  ;;  %v10357_v39 = vpop.f32.mrb[88].mxu0  ;;  %v12802_v33 = vld [vmem:[#allocation2 + $0x4e8] ss:$16 sps:$4 sm:$0xff]  }
 0x382   :  { %v10358_v16 = vpop.f32.mrb[89].mxu0 }
 0x383   :  { %v10359_v32 = vadd.f32 %v10358_v16, %v10357_v39  ;;  %v10360_v46 = vpop.f32.mrb[90].mxu0  ;;  %11581 = vmatmul.mubr.msk.bf16.vlgmr.msra.gmra.mrb[64].mxu0 %vm1279_vm1, %v1917_v59  ;;  %v12800_v59 = vld [vmem:[#allocation2 + $0x4ec] ss:$16 sps:$4 sm:$0xff]  }
 0x384   :  { %v10361_v18 = vpop.f32.mrb[91].mxu0  ;;  %11597 = vmatpush3.bf16.msra.mxu0 %v2488_v11  ;;  %2981 = vmatprep.mubr.bf16.mxu1 %v12800_v59 }
 0x385   :  { %v1870_v43 = vadd.f32 %v10359_v32, %v14495_v29  ;;  %v10362_v45 = vadd.f32 %v10361_v18, %v10360_v46  ;;  %10539 = vmatprep.subr.bf16.mxu0 %v14441_v24 }
 0x387   :  { %v1873_v55 = vadd.f32 %v10362_v45, %v14507_v44  ;;  %2982 = vmatmul.mubr.bf16.gmra.mrb[188].mxu1 %v12802_v33 }
 0x389   :  { %v1918_v13 = vpack.c.bf16 %v1873_v55, %v1870_v43  ;;  %v10363_v35 = vpop.f32.mrb[92].mxu0 }
 0x38a   :  { %v10364_v19 = vpop.f32.mrb[93].mxu0 }
 0x38b   :  { %v10365_v31 = vadd.f32 %v10364_v19, %v10363_v35  ;;  %v10366_v26 = vpop.f32.mrb[94].mxu0  ;;  %11584 = vmatprep.mubr.msk.bf16.mxu0 %vm1279_vm1, %v1918_v13 }
 0x38c   :  { %v10367_v27 = vpop.f32.mrb[95].mxu0 }
 0x38d   :  { %v1878_v50 = vadd.f32 %v10365_v31, %v14519_v53  ;;  %v10368_v29 = vadd.f32 %v10367_v27, %v10366_v26 }
 0x38f   :  { %v1881_v24 = vadd.f32 %v10368_v29, %v14531_v36 }
 0x391   :  { %v1919_v39 = vpack.c.bf16 %v1881_v24, %v1878_v50  ;;  %v10369_v44 = vpop.f32.mrb[96].mxu0 }
 0x392   :  { %v10370_v11 = vpop.f32.mrb[97].mxu0 }
 0x393   :  { %v10371_v16 = vadd.f32 %v10370_v11, %v10369_v44  ;;  %v10372_v32 = vpop.f32.mrb[98].mxu0  ;;  %11585 = vmatmul.mubr.msk.bf16.gmra.mrb[68].mxu0 %vm1279_vm1, %v1919_v39 }
 0x394   :  { %v10373_v46 = vpop.f32.mrb[99].mxu0 }
 0x395   :  { %v1886_v2 = vadd.f32 %v10371_v16, %v14539_v21  ;;  %v10374_v18 = vadd.f32 %v10373_v46, %v10372_v32 }
 0x397   :  { %v1889_v17 = vadd.f32 %v10374_v18, %v14543_v30 }
 0x399   :  { %v1920_v43 = vpack.c.bf16 %v1889_v17, %v1886_v2  ;;  %v10375_v53 = vpop.f32.mrb[100].mxu0  ;;  %v15769_v17 = vpack.c.bf16 %v14605_v10, %v14603_v25  ;;  %v2999_v25 = vld [vmem:[#allocation4 + $0x8] sm:$0x3]  ;;  %v12761_v10 = vld [vmem:[#allocation2 + $0x400] ss:$16 sps:$4 sm:$0xff]  }
 0x39a   :  { %v10376_v45 = vpop.f32.mrb[101].mxu0 }
 0x39b   :  { %v10377_v55 = vadd.f32 %v10376_v45, %v10375_v53  ;;  %v10378_v13 = vpop.f32.mrb[102].mxu0  ;;  %11588 = vmatprep.mubr.msk.bf16.mxu0 %vm1279_vm1, %v1920_v43  ;;  %v12791_v43 = vld [vmem:[#allocation2 + $0x4a4] ss:$16 sps:$4 sm:$0xff]   ;;  %v12793_v53 = vld [vmem:[#allocation2 + $0x4a0] ss:$16 sps:$4 sm:$0xff]  }
 0x39c   :  { %v10379_v36 = vpop.f32.mrb[103].mxu0  ;;  %v12797_v45 = vld [vmem:[#allocation2 + $0x4c4] ss:$16 sps:$4 sm:$0xff]  }
 0x39d   :  { %v1894_v35 = vadd.f32 %v10377_v55, %v14548_v8  ;;  %v10380_v19 = vadd.f32 %v10379_v36, %v10378_v13  ;;  %v12799_v55 = vld [vmem:[#allocation2 + $0x4c0] ss:$16 sps:$4 sm:$0xff]   ;;  %v12803_v13 = vld [vmem:[#allocation2 + $0x4e4] ss:$16 sps:$4 sm:$0xff]  }
 0x39e   :  { %v12805_v36 = vld [vmem:[#allocation2 + $0x4e0] ss:$16 sps:$4 sm:$0xff]  }
 0x39f   :  { %v1897_v31 = vadd.f32 %v10380_v19, %v14550_v41 }
 0x3a1   :  { %v1921_v26 = vpack.c.bf16 %v1897_v31, %v1894_v35  ;;  %v10381_v59 = vpop.f32.mrb[104].mxu0 }
 0x3a2   :  { %v10382_v27 = vpop.f32.mrb[105].mxu0 }
 0x3a3   :  { %v10383_v21 = vadd.f32 %v10382_v27, %v10381_v59  ;;  %v10384_v33 = vpop.f32.mrb[106].mxu0  ;;  %11589 = vmatmul.mubr.msk.bf16.gmra.mrb[72].mxu0 %vm1279_vm1, %v1921_v26 }
 0x3a4   :  { %v10385_v30 = vpop.f32.mrb[107].mxu0 }
 0x3a5   :  { %v1902_v50 = vadd.f32 %v10383_v21, %v14552_v15  ;;  %v10386_v29 = vadd.f32 %v10385_v30, %v10384_v33  ;;  %v15767_v15 = vpack.c.bf16 %v14590_v56, %v14587_v47  ;;  %v15772_v47 = vpack.c.bf16 %v14629_v9, %v14624_v6  ;;  %v12773_v6 = vld [vmem:[#allocation2 + $0x444] ss:$16 sps:$4 sm:$0xff]   ;;  %v12775_v9 = vld [vmem:[#allocation2 + $0x440] ss:$16 sps:$4 sm:$0xff]  }
 0x3a6   :  { %v15773_v56 = vpack.c.bf16 %v14639_v61, %v14636_v22  ;;  %v12779_v22 = vld [vmem:[#allocation2 + $0x464] ss:$16 sps:$4 sm:$0xff]   ;;  %v12781_v61 = vld [vmem:[#allocation2 + $0x460] ss:$16 sps:$4 sm:$0xff]  }
 0x3a7   :  { %v1905_v24 = vadd.f32 %v10386_v29, %v14554_v14  ;;  %v15768_v14 = vpack.c.bf16 %v14598_v60, %v14595_v1  ;;  %v12763_v1 = vld [vmem:[#allocation2 + $0x404] ss:$16 sps:$4 sm:$0xff]   ;;  %v15774_v60 = vpack.c.bf16 %v14647_v58, %v14644_v54  ;;  %v12787_v58 = vld [vmem:[#allocation2 + $0x480] ss:$16 sps:$4 sm:$0xff]  }
 0x3a8   :  { %v12785_v54 = vld [vmem:[#allocation2 + $0x484] ss:$16 sps:$4 sm:$0xff]  }
 0x3a9   :  { %v1922_v39 = vpack.c.bf16 %v1905_v24, %v1902_v50  ;;  %v10387_v44 = vpop.f32.mrb[108].mxu0 }
 0x3aa   :  { %v10388_v11 = vpop.f32.mrb[109].mxu0 }
 0x3ab   :  { %v10389_v8 = vadd.f32 %v10388_v11, %v10387_v44  ;;  %v10390_v16 = vpop.f32.mrb[110].mxu0  ;;  %11592 = vmatprep.mubr.msk.bf16.mxu0 %vm1279_vm1, %v1922_v39 }
 0x3ac   :  { %v10391_v41 = vpop.f32.mrb[111].mxu0 }
 0x3ad   :  { %v1910_v32 = vadd.f32 %v10389_v8, %v14556_v4  ;;  %v10392_v46 = vadd.f32 %v10391_v41, %v10390_v16  ;;  %v15770_v4 = vpack.c.bf16 %v14612_v3, %v14610_v49  ;;  %v12767_v49 = vld [vmem:[#allocation2 + $0x424] ss:$16 sps:$4 sm:$0xff]   ;;  %v3025_v3 = vsel %vm1304_vm0, %v2999_v25, 0 }
 0x3af   :  { %v1913_v2 = vadd.f32 %v10392_v46, %v14558_v40  ;;  %v15771_v40 = vpack.c.bf16 %v14619_v34, %v14617_v62  ;;  %v15775_v62 = vld [vmem:[#allocation32_spill] sm:$0xff] }
 0x3b0   :  { %v12769_v34 = vld [vmem:[#allocation2 + $0x420] ss:$16 sps:$4 sm:$0xff]  }
 0x3b1   :  { %v1923_v18 = vpack.c.bf16 %v1913_v2, %v1910_v32 }
 0x3b3   :  { %11593 = vmatmul.mubr.msk.bf16.gmra.mrb[76].mxu0 %vm1279_vm1, %v1923_v18 }
 0x3b4   :  { %11598 = vmatprep.mubr.msk.bf16.mxu0 %vm1279_vm1, %v15767_v15 }
 0x3bb   :  { %11599 = vmatmul.mubr.msk.bf16.vlgmr.msra.gmra.mrb[64].mxu0 %vm1279_vm1, %v15768_v14 }
 0x3bc   :  { %11602 = vmatprep.mubr.msk.bf16.mxu0 %vm1279_vm1, %v15769_v17  ;;  %10540 = vmatpush3.bf16.msra.mxu0 %v14654_v28 }
 0x3bd   :  { %10541 = vmatprep.subr.bf16.mxu0 %v14660_v48 }
 0x3c0   :  { %10542 = vmatpush3.bf16.msra.mxu0 %v14666_v38 }
 0x3c1   :  { %10543 = vmatprep.subr.bf16.mxu0 %v14672_v5 }
 0x3c3   :  { %11603 = vmatmul.mubr.msk.bf16.gmra.mrb[68].mxu0 %vm1279_vm1, %v15770_v4 }
 0x3c4   :  { %11606 = vmatprep.mubr.msk.bf16.mxu0 %vm1279_vm1, %v15771_v40  ;;  %10544 = vmatpush3.bf16.msra.mxu0 %v14678_v52 }
 0x3c5   :  { %10545 = vmatprep.subr.bf16.mxu0 %v14684_v23 }
 0x3c8   :  { %10546 = vmatpush3.bf16.msra.mxu0 %v14690_v51 }
 0x3c9   :  { %10547 = vmatprep.subr.bf16.mxu0 %v14696_v7 }
 0x3cb   :  { %11607 = vmatmul.mubr.msk.bf16.gmra.mrb[72].mxu0 %vm1279_vm1, %v15772_v47 }
 0x3cc   :  { %11610 = vmatprep.mubr.msk.bf16.mxu0 %vm1279_vm1, %v15773_v56  ;;  %10548 = vmatpush3.bf16.msra.mxu0 %v14702_v37 }
 0x3cd   :  { %10549 = vmatprep.subr.bf16.mxu0 %v14708_v0 }
 0x3d0   :  { %10550 = vmatpush3.bf16.msra.mxu0 %v14714_v63 }
 0x3d1   :  { %10551 = vmatprep.subr.bf16.mxu0 %v14720_v12 }
 0x3d3   :  { %11611 = vmatmul.mubr.msk.bf16.gmra.mrb[76].mxu0 %vm1279_vm1, %v15774_v60 }
 0x3d4   :  { %10552 = vmatpush3.bf16.msra.mxu0 %v14726_v57  ;;  %2828 = vmatprep.mubr.bf16.mxu0 %v12763_v1 }
 0x3d5   :  { %10553 = vmatprep.subr.bf16.mxu0 %v14732_v42 }
 0x3d8   :  { %10554 = vmatpush3.bf16.msra.mxu0 %v14739_v20 }
 0x3d9   :  { %12504 = vmatprep.subr.msk.bf16.mxu0 %vm1304_vm0, %v2999_v25 }
 0x3db   :  { %2829 = vmatmul.mubr.bf16.vlgmr.msra.gmra.mrb[112].mxu0 %v12761_v10 }
 0x3dc   :  { %2836 = vmatprep.mubr.bf16.mxu0 %v12767_v49  ;;  %11615 = vmatpush3.bf16.msra.mxu0 %v3025_v3 }
 0x3dd   :  { %10740 = vmatprep.subr.bf16.mxu0 %v15775_v62 }
 0x3e3   :  { %2837 = vmatmul.mubr.bf16.gmra.mrb[116].mxu0 %v12769_v34 }
 0x3e4   :  { %2844 = vmatprep.mubr.bf16.mxu0 %v12773_v6 }
 0x3eb   :  { %2845 = vmatmul.mubr.bf16.gmra.mrb[120].mxu0 %v12775_v9 }
 0x3ec   :  { %2852 = vmatprep.mubr.bf16.mxu0 %v12779_v22 }
 0x3f3   :  { %2853 = vmatmul.mubr.bf16.gmra.mrb[124].mxu0 %v12781_v61 }
 0x3f4   :  { %2860 = vmatprep.mubr.bf16.mxu0 %v12785_v54 }
 0x3fb   :  { %2861 = vmatmul.mubr.bf16.gmra.mrb[128].mxu0 %v12787_v58 }
 0x3fc   :  { %2868 = vmatprep.mubr.bf16.mxu0 %v12791_v43 }
 0x3fe   :  { %v10619_v35 = vpop.f32.mrb[160].mxu1 }
 0x3ff   :  { %v10620_v19 = vpop.f32.mrb[161].mxu1 }
 0x400   :  { %v14819_v31 = vadd.f32 %v10620_v19, %v10619_v35  ;;  %v10622_v26 = vpop.f32.mrb[162].mxu1  ;;  %v12808_v35 = vld [vmem:[#allocation2 + $0x504] ss:$16 sps:$4 sm:$0xff]  }
 0x401   :  { %v10623_v59 = vpop.f32.mrb[163].mxu1  ;;  %3365 = vmatprep.mubr.bf16.mxu1 %v12808_v35  ;;  %v12812_v19 = vld [vmem:[#allocation2 + $0x524] ss:$16 sps:$4 sm:$0xff]  }
 0x402   :  { %v14821_v27 = vadd.f32 %v10623_v59, %v10622_v26  ;;  %v12814_v26 = vld [vmem:[#allocation2 + $0x520] ss:$16 sps:$4 sm:$0xff]   ;;  %v12818_v59 = vld [vmem:[#allocation2 + $0x544] ss:$16 sps:$4 sm:$0xff]  }
 0x403   :  { %2869 = vmatmul.mubr.bf16.gmra.mrb[132].mxu0 %v12793_v53  ;;  %v12860_v35 = vld [vmem:[#allocation2 + $0x644] ss:$16 sps:$4 sm:$0xff]  }
 0x404   :  { %2876 = vmatprep.mubr.bf16.mxu0 %v12797_v45 }
 0x407   :  { %v10625_v21 = vpop.f32.mrb[164].mxu1 }
 0x408   :  { %v10626_v33 = vpop.f32.mrb[165].mxu1 }
 0x409   :  { %v10628_v30 = vpop.f32.mrb[166].mxu1  ;;  %v14823_v50 = vadd.f32 %v10626_v33, %v10625_v21  ;;  %v12820_v21 = vld [vmem:[#allocation2 + $0x540] ss:$16 sps:$4 sm:$0xff]   ;;  %v12824_v33 = vld [vmem:[#allocation2 + $0x564] ss:$16 sps:$4 sm:$0xff]  }
 0x40a   :  { %v10629_v29 = vpop.f32.mrb[167].mxu1 }
 0x40b   :  { %2877 = vmatmul.mubr.bf16.gmra.mrb[136].mxu0 %v12799_v55  ;;  %v14825_v24 = vadd.f32 %v10629_v29, %v10628_v30  ;;  %v12826_v30 = vld [vmem:[#allocation2 + $0x560] ss:$16 sps:$4 sm:$0xff]   ;;  %v12830_v29 = vld [vmem:[#allocation2 + $0x584] ss:$16 sps:$4 sm:$0xff]  }
 0x40c   :  { %2884 = vmatprep.mubr.bf16.mxu0 %v12803_v13 }
 0x40f   :  { %v10631_v39 = vpop.f32.mrb[168].mxu1 }
 0x410   :  { %v10632_v44 = vpop.f32.mrb[169].mxu1 }
 0x411   :  { %v10634_v11 = vpop.f32.mrb[170].mxu1  ;;  %v14827_v8 = vadd.f32 %v10632_v44, %v10631_v39  ;;  %v12832_v39 = vld [vmem:[#allocation2 + $0x580] ss:$16 sps:$4 sm:$0xff]  }
 0x412   :  { %v10635_v16 = vpop.f32.mrb[171].mxu1  ;;  %v13330_v44 = vld [vmem:[%s15749_s0 + $0x40] sm:$0xff]  }
 0x413   :  { %2885 = vmatmul.mubr.bf16.gmra.mrb[140].mxu0 %v12805_v36  ;;  %v14829_v41 = vadd.f32 %v10635_v16, %v10634_v11  ;;  %v12806_v36 = vld [vmem:[#allocation2 + $0x500] ss:$16 sps:$4 sm:$0xff]   ;;  %v12836_v11 = vld [vmem:[#allocation2 + $0x5a4] ss:$16 sps:$4 sm:$0xff]  }
 0x414   :  { %3366 = vmatmul.mubr.bf16.vlgmr.msra.gmra.mrb[192].mxu1 %v12806_v36  ;;  %v12838_v16 = vld [vmem:[#allocation2 + $0x5a0] ss:$16 sps:$4 sm:$0xff]  }
 0x415   :  { %10814 = vmatpush3.bf16.msra.mxu1 %v14654_v28  ;;  %3373 = vmatprep.mubr.bf16.mxu1 %v12812_v19 }
 0x416   :  { %10815 = vmatprep.subr.bf16.mxu1 %v14660_v48 }
 0x417   :  { %v10637_v32 = vpop.f32.mrb[172].mxu1 }
 0x418   :  { %v10638_v46 = vpop.f32.mrb[173].mxu1 }
 0x419   :  { %v10640_v2 = vpop.f32.mrb[174].mxu1  ;;  %v14831_v18 = vadd.f32 %v10638_v46, %v10637_v32  ;;  %10816 = vmatpush3.bf16.msra.mxu1 %v14666_v38  ;;  %v12842_v32 = vld [vmem:[#allocation2 + $0x5c4] ss:$16 sps:$4 sm:$0xff]   ;;  %v12844_v46 = vld [vmem:[#allocation2 + $0x5c0] ss:$16 sps:$4 sm:$0xff]  }
 0x41a   :  { %v10641_v15 = vpop.f32.mrb[175].mxu1  ;;  %10817 = vmatprep.subr.bf16.mxu1 %v14672_v5 }
 0x41b   :  { %v14833_v14 = vadd.f32 %v10641_v15, %v10640_v2  ;;  %v12848_v2 = vld [vmem:[#allocation2 + $0x5e4] ss:$16 sps:$4 sm:$0xff]   ;;  %v12850_v15 = vld [vmem:[#allocation2 + $0x5e0] ss:$16 sps:$4 sm:$0xff]  }
 0x41c   :  { %3374 = vmatmul.mubr.bf16.gmra.mrb[196].mxu1 %v12814_v26 }
 0x41d   :  { %10818 = vmatpush3.bf16.msra.mxu1 %v14678_v52  ;;  %3381 = vmatprep.mubr.bf16.mxu1 %v12818_v59 }
 0x41e   :  { %10819 = vmatprep.subr.bf16.mxu1 %v14684_v23 }
 0x41f   :  { %v10643_v17 = vpop.f32.mrb[176].mxu1 }
 0x420   :  { %v10644_v4 = vpop.f32.mrb[177].mxu1 }
 0x421   :  { %v10646_v40 = vpop.f32.mrb[178].mxu1  ;;  %v14835_v47 = vadd.f32 %v10644_v4, %v10643_v17  ;;  %10820 = vmatpush3.bf16.msra.mxu1 %v14690_v51 }
 0x422   :  { %v10647_v56 = vpop.f32.mrb[179].mxu1  ;;  %10821 = vmatprep.subr.bf16.mxu1 %v14696_v7 }
 0x423   :  { %v14837_v1 = vadd.f32 %v10647_v56, %v10646_v40 }
 0x424   :  { %3382 = vmatmul.mubr.bf16.gmra.mrb[200].mxu1 %v12820_v21  ;;  %v12862_v21 = vld [vmem:[#allocation2 + $0x640] ss:$16 sps:$4 sm:$0xff]  }
 0x425   :  { %10822 = vmatpush3.bf16.msra.mxu1 %v14702_v37  ;;  %3389 = vmatprep.mubr.bf16.mxu1 %v12824_v33 }
 0x426   :  { %10823 = vmatprep.subr.bf16.mxu1 %v14708_v0 }
 0x429   :  { %10824 = vmatpush3.bf16.msra.mxu1 %v14714_v63 }
 0x42a   :  { %10825 = vmatprep.subr.bf16.mxu1 %v14720_v12 }
 0x42c   :  { %3390 = vmatmul.mubr.bf16.gmra.mrb[204].mxu1 %v12826_v30  ;;  %v14893_v30 = vld [vmem:[%s15749_s0 + $0xc8] sm:$0xff]  }
 0x42d   :  { %10826 = vmatpush3.bf16.msra.mxu1 %v14726_v57  ;;  %3397 = vmatprep.mubr.bf16.mxu1 %v12830_v29 }
 0x42e   :  { %10827 = vmatprep.subr.bf16.mxu1 %v14732_v42 }
 0x431   :  { %10828 = vmatpush3.bf16.msra.mxu1 %v14739_v20 }
 0x432   :  { %10950 = vmatprep.subr.bf16.mxu1 %v13330_v44 }
 0x434   :  { %3398 = vmatmul.mubr.bf16.gmra.mrb[208].mxu1 %v12832_v39  ;;  %v14908_v39 = vld [vmem:[%s15749_s0 + $0xd0] sm:$0xff]  }
 0x435   :  { %3405 = vmatprep.mubr.bf16.mxu1 %v12836_v11 }
 0x43c   :  { %3406 = vmatmul.mubr.bf16.gmra.mrb[212].mxu1 %v12838_v16  ;;  %v12866_v16 = vld [vmem:[#allocation2 + $0x684] ss:$16 sps:$4 sm:$0xff]  }
 0x43d   :  { %3413 = vmatprep.mubr.bf16.mxu1 %v12842_v32 }
 0x444   :  { %3414 = vmatmul.mubr.bf16.gmra.mrb[216].mxu1 %v12844_v46 }
 0x445   :  { %3421 = vmatprep.mubr.bf16.mxu1 %v12848_v2 }
 0x44a   :  { %v10649_v60 = vpop.f32.mrb[180].mxu1 }
 0x44b   :  { %v10650_v25 = vpop.f32.mrb[181].mxu1 }
 0x44c   :  { %v10652_v10 = vpop.f32.mrb[182].mxu1  ;;  %v14839_v49 = vadd.f32 %v10650_v25, %v10649_v60  ;;  %3422 = vmatmul.mubr.bf16.gmra.mrb[220].mxu1 %v12850_v15  ;;  %v12854_v60 = vld [vmem:[#allocation2 + $0x600] ss:$16 sps:$4 sm:$0xff]   ;;  %v12856_v25 = vld [vmem:[#allocation2 + $0x604] ss:$16 sps:$4 sm:$0xff]   ;;  %v14924_v15 = vld [vmem:[%s15749_s0 + $0xd8] sm:$0xff]  }
 0x44d   :  { %v10653_v3 = vpop.f32.mrb[183].mxu1  ;;  %3902 = vmatprep.mubr.bf16.mxu1 %v12856_v25 }
 0x44e   :  { %v14841_v62 = vadd.f32 %v10653_v3, %v10652_v10  ;;  %v12857_v3 = vld [vmem:[#allocation2 + $0x624] ss:$16 sps:$4 sm:$0xff]  }
 0x452   :  { %v10655_v34 = vpop.f32.mrb[184].mxu1 }
 0x453   :  { %v10656_v6 = vpop.f32.mrb[185].mxu1 }
 0x454   :  { %v10658_v9 = vpop.f32.mrb[186].mxu1  ;;  %v14843_v22 = vadd.f32 %v10656_v6, %v10655_v34  ;;  %3903 = vmatmul.mubr.bf16.vlgmr.msra.gmra.mrb[224].mxu1 %v12854_v60  ;;  %v12869_v60 = vld [vmem:[#allocation2 + $0x6a4] ss:$16 sps:$4 sm:$0xff]  }
 0x455   :  { %v10659_v61 = vpop.f32.mrb[187].mxu1  ;;  %3910 = vmatprep.mubr.bf16.mxu1 %v12857_v3  ;;  %10951 = vmatpush3.bf16.msra.mxu1 %v14654_v28 }
 0x456   :  { %v14845_v54 = vadd.f32 %v10659_v61, %v10658_v9  ;;  %10952 = vmatprep.subr.bf16.mxu1 %v14660_v48 }
 0x459   :  { %10953 = vmatpush3.bf16.msra.mxu1 %v14666_v38 }
 0x45a   :  { %v10661_v58 = vpop.f32.mrb[188].mxu1  ;;  %10954 = vmatprep.subr.bf16.mxu1 %v14672_v5  ;;  %v12863_v5 = vld [vmem:[#allocation2 + $0x664] ss:$16 sps:$4 sm:$0xff]  }
 0x45b   :  { %v10662_v43 = vpop.f32.mrb[189].mxu1 }
 0x45c   :  { %v10664_v53 = vpop.f32.mrb[190].mxu1  ;;  %v14847_v45 = vadd.f32 %v10662_v43, %v10661_v58 }
 0x45d   :  { %v10665_v55 = vpop.f32.mrb[191].mxu1  ;;  %10955 = vmatpush3.bf16.msra.mxu1 %v14678_v52 }
 0x45e   :  { %v14849_v13 = vadd.f32 %v10665_v55, %v10664_v53  ;;  %v12859_v53 = vld [vmem:[#allocation2 + $0x620] ss:$16 sps:$4 sm:$0xff]   ;;  %10956 = vmatprep.subr.bf16.mxu1 %v14684_v23 }
 0x45f   :  { %3911 = vmatmul.mubr.bf16.gmra.mrb[228].mxu1 %v12859_v53  ;;  %v12871_v53 = vld [vmem:[#allocation2 + $0x6a0] ss:$16 sps:$4 sm:$0xff]  }
 0x460   :  { %3918 = vmatprep.mubr.bf16.mxu1 %v12860_v35 }
 0x461   :  { %10957 = vmatpush3.bf16.msra.mxu1 %v14690_v51 }
 0x462   :  { %10958 = vmatprep.subr.bf16.mxu1 %v14696_v7  ;;  %v14901_v7 = vld [vmem:[%s15749_s0 + $0x88] sm:$0xff]  }
 0x465   :  { %10959 = vmatpush3.bf16.msra.mxu1 %v14702_v37  ;;  %v12865_v37 = vld [vmem:[#allocation2 + $0x660] ss:$16 sps:$4 sm:$0xff]  }
 0x466   :  { %10960 = vmatprep.subr.bf16.mxu1 %v14708_v0  ;;  %v14916_v0 = vld [vmem:[%s15749_s0 + $0x90] sm:$0xff]  }
 0x467   :  { %3919 = vmatmul.mubr.bf16.gmra.mrb[232].mxu1 %v12862_v21 }
 0x468   :  { %3926 = vmatprep.mubr.bf16.mxu1 %v12863_v5 }
 0x469   :  { %10961 = vmatpush3.bf16.msra.mxu1 %v14714_v63 }
 0x46a   :  { %10962 = vmatprep.subr.bf16.mxu1 %v14720_v12  ;;  %v14932_v12 = vld [vmem:[%s15749_s0 + $0x98] sm:$0xff]  }
 0x46d   :  { %10963 = vmatpush3.bf16.msra.mxu1 %v14726_v57  ;;  %v12868_v57 = vld [vmem:[#allocation2 + $0x680] ss:$16 sps:$4 sm:$0xff]  }
 0x46e   :  { %10964 = vmatprep.subr.bf16.mxu1 %v14732_v42  ;;  %v14947_v42 = vld [vmem:[%s15749_s0 + $0xa0] sm:$0xff]  }
 0x46f   :  { %3927 = vmatmul.mubr.bf16.gmra.mrb[236].mxu1 %v12865_v37 }
 0x470   :  { %3934 = vmatprep.mubr.bf16.mxu1 %v12866_v16 }
 0x471   :  { %10965 = vmatpush3.bf16.msra.mxu1 %v14739_v20  ;;  %v14960_v20 = vld [vmem:[%s15749_s0 + $0xe8] sm:$0xff]  }
 0x477   :  { %3935 = vmatmul.mubr.bf16.gmra.mrb[240].mxu1 %v12868_v57  ;;  %v12809_v57 = vld [vmem:[#allocation2 + $0x508] ss:$16 sps:$4 sm:$0xff]  }
 0x478   :  { %3942 = vmatprep.mubr.bf16.mxu1 %v12869_v60  ;;  %v12817_v60 = vld [vmem:[#allocation2 + $0x528] ss:$16 sps:$4 sm:$0xff]  }
 0x47f   :  { %3943 = vmatmul.mubr.bf16.gmra.mrb[244].mxu1 %v12871_v53  ;;  %v12833_v53 = vld [vmem:[#allocation2 + $0x58c] ss:$16 sps:$4 sm:$0xff]  }
 0x4ae   :  { %v10555_v17 = vpop.f32.mrb[112].mxu0 }
 0x4af   :  { %v10556_v4 = vpop.f32.mrb[113].mxu0 }
 0x4b0   :  { %v10557_v40 = vadd.f32 %v10556_v4, %v10555_v17  ;;  %v10558_v56 = vpop.f32.mrb[114].mxu0  ;;  %v14939_v4 = vld [vmem:[%s15749_s0 + $0xe0] sm:$0xff]  }
 0x4b1   :  { %v10559_v10 = vpop.f32.mrb[115].mxu0 }
 0x4b2   :  { %v2928_v34 = vadd.f32 %v14819_v31, %v10557_v40  ;;  %v10560_v6 = vadd.f32 %v10559_v10, %v10558_v56  ;;  %v14953_v10 = vld [vmem:[%s15749_s0 + $0xc0] sm:$0xff]  }
 0x4b3   :  { %11014 = vmatprep.subr.bf16.mxu1 %v14953_v10 }
 0x4b4   :  { %v2931_v9 = vadd.f32 %v14821_v27, %v10560_v6 }
 0x4b6   :  { %v2990_v61 = vpack.c.bf16 %v2931_v9, %v2928_v34  ;;  %v10561_v58 = vpop.f32.mrb[116].mxu0  ;;  %v14967_v9 = vld [vmem:[%s15749_s0 + $0xa8] sm:$0xff]  }
 0x4b7   :  { %v10562_v43 = vpop.f32.mrb[117].mxu0 }
 0x4b8   :  { %v10563_v55 = vadd.f32 %v10562_v43, %v10561_v58  ;;  %v10564_v36 = vpop.f32.mrb[118].mxu0  ;;  %11616 = vmatprep.mubr.msk.bf16.mxu0 %vm1279_vm1, %v2990_v61  ;;  %v14973_v58 = vld [vmem:[%s15749_s0 + $0xf0] sm:$0xff]  }
 0x4b9   :  { %v10565_v31 = vpop.f32.mrb[119].mxu0 }
 0x4ba   :  { %v2936_v27 = vadd.f32 %v14823_v50, %v10563_v55  ;;  %v10566_v19 = vadd.f32 %v10565_v31, %v10564_v36  ;;  %v12872_v36 = vld [vmem:[#allocation2 + $0x6c4] ss:$16 sps:$4 sm:$0xff]  }
 0x4bb   :  { %v14980_v31 = vld [vmem:[%s15749_s0 + $0xb0] sm:$0xff]   ;;  %3950 = vmatprep.mubr.bf16.mxu1 %v12872_v36  ;;  %v12841_v36 = vld [vmem:[#allocation2 + $0x5a8] ss:$16 sps:$4 sm:$0xff]  }
 0x4bc   :  { %v2939_v28 = vadd.f32 %v14825_v24, %v10566_v19  ;;  %v14885_v24 = vld [vmem:[%s15749_s0 + $0x80] sm:$0xff]  }
 0x4be   :  { %v2991_v48 = vpack.c.bf16 %v2939_v28, %v2936_v27  ;;  %v10567_v26 = vpop.f32.mrb[120].mxu0  ;;  %v14987_v28 = vld [vmem:[%s15749_s0 + $0xf8] sm:$0xff]  }
 0x4bf   :  { %v10568_v59 = vpop.f32.mrb[121].mxu0 }
 0x4c0   :  { %v10569_v33 = vadd.f32 %v10568_v59, %v10567_v26  ;;  %v10570_v38 = vpop.f32.mrb[122].mxu0  ;;  %11617 = vmatmul.mubr.msk.bf16.vlgmr.msra.gmra.mrb[64].mxu0 %vm1279_vm1, %v2991_v48  ;;  %v3536_v48 = vld [vmem:[#allocation4 + $0xa] sm:$0x3]  ;;  %v14994_v59 = vld [vmem:[%s15749_s0 + $0xb8] sm:$0xff]  }
 0x4c1   :  { %v10571_v50 = vpop.f32.mrb[123].mxu0  ;;  %10741 = vmatpush3.bf16.msra.mxu0 %v14885_v24 }
 0x4c2   :  { %v2944_v52 = vadd.f32 %v14827_v8, %v10569_v33  ;;  %v10572_v23 = vadd.f32 %v10571_v50, %v10570_v38  ;;  %10742 = vmatprep.subr.bf16.mxu0 %v14893_v30  ;;  %v12874_v38 = vld [vmem:[#allocation2 + $0x6c0] ss:$16 sps:$4 sm:$0xff]  }
 0x4c3   :  { %3951 = vmatmul.mubr.bf16.gmra.mrb[248].mxu1 %v12874_v38 }
 0x4c4   :  { %v2947_v51 = vadd.f32 %v14829_v41, %v10572_v23 }
 0x4c5   :  { %10743 = vmatpush3.bf16.msra.mxu0 %v14901_v7 }
 0x4c6   :  { %v2992_v8 = vpack.c.bf16 %v2947_v51, %v2944_v52  ;;  %v10573_v29 = vpop.f32.mrb[124].mxu0  ;;  %10744 = vmatprep.subr.bf16.mxu0 %v14908_v39  ;;  %v12875_v52 = vld [vmem:[#allocation2 + $0x6e4] ss:$16 sps:$4 sm:$0xff]  }
 0x4c7   :  { %v10574_v41 = vpop.f32.mrb[125].mxu0  ;;  %3958 = vmatprep.mubr.bf16.mxu1 %v12875_v52  ;;  %v12890_v52 = vld [vmem:[#allocation2 + $0x780] ss:$16 sps:$4 sm:$0xff]  }
 0x4c8   :  { %v10575_v44 = vadd.f32 %v10574_v41, %v10573_v29  ;;  %v10576_v11 = vpop.f32.mrb[126].mxu0  ;;  %11620 = vmatprep.mubr.msk.bf16.mxu0 %vm1279_vm1, %v2992_v8 }
 0x4c9   :  { %v10577_v32 = vpop.f32.mrb[127].mxu0  ;;  %10745 = vmatpush3.bf16.msra.mxu0 %v14916_v0 }
 0x4ca   :  { %v2952_v46 = vadd.f32 %v14831_v18, %v10575_v44  ;;  %v10578_v2 = vadd.f32 %v10577_v32, %v10576_v11  ;;  %10746 = vmatprep.subr.bf16.mxu0 %v14924_v15  ;;  %v12877_v44 = vld [vmem:[#allocation2 + $0x6e0] ss:$16 sps:$4 sm:$0xff]   ;;  %v12880_v32 = vld [vmem:[#allocation2 + $0x704] ss:$16 sps:$4 sm:$0xff]  }
 0x4cb   :  { %3959 = vmatmul.mubr.bf16.gmra.mrb[252].mxu1 %v12877_v44  ;;  %v12893_v44 = vld [vmem:[#allocation2 + $0x7a0] ss:$16 sps:$4 sm:$0xff]  }
 0x4cc   :  { %v2955_v63 = vadd.f32 %v14833_v14, %v10578_v2  ;;  %4439 = vmatprep.mubr.bf16.mxu1 %v12880_v32 }
 0x4cd   :  { %10747 = vmatpush3.bf16.msra.mxu0 %v14932_v12 }
 0x4ce   :  { %v2993_v18 = vpack.c.bf16 %v2955_v63, %v2952_v46  ;;  %v10579_v17 = vpop.f32.mrb[128].mxu0  ;;  %10748 = vmatprep.subr.bf16.mxu0 %v14939_v4 }
 0x4cf   :  { %v10580_v14 = vpop.f32.mrb[129].mxu0 }
 0x4d0   :  { %v10581_v40 = vadd.f32 %v10580_v14, %v10579_v17  ;;  %v10582_v56 = vpop.f32.mrb[130].mxu0  ;;  %11621 = vmatmul.mubr.msk.bf16.gmra.mrb[68].mxu0 %vm1279_vm1, %v2993_v18  ;;  %v12811_v18 = vld [vmem:[#allocation2 + $0x50c] ss:$16 sps:$4 sm:$0xff]   ;;  %v12878_v17 = vld [vmem:[#allocation2 + $0x700] ss:$16 sps:$4 sm:$0xff]  }
 0x4d1   :  { %v10583_v25 = vpop.f32.mrb[131].mxu0  ;;  %10749 = vmatpush3.bf16.msra.mxu0 %v14947_v42  ;;  %v12883_v14 = vld [vmem:[#allocation2 + $0x724] ss:$16 sps:$4 sm:$0xff]  }
 0x4d2   :  { %v2960_v3 = vadd.f32 %v14835_v47, %v10581_v40  ;;  %v10584_v34 = vadd.f32 %v10583_v25, %v10582_v56  ;;  %10750 = vmatprep.subr.bf16.mxu0 %v14960_v20  ;;  %v12815_v40 = vld [vmem:[#allocation2 + $0x52c] ss:$16 sps:$4 sm:$0xff]   ;;  %v12881_v56 = vld [vmem:[#allocation2 + $0x720] ss:$16 sps:$4 sm:$0xff]  }
 0x4d3   :  { %4440 = vmatmul.mubr.bf16.vlgmr.msra.gmra.mrb[0].mxu1 %v12878_v17  ;;  %v12821_v25 = vld [vmem:[#allocation2 + $0x54c] ss:$16 sps:$4 sm:$0xff]  }
 0x4d4   :  { %v2963_v6 = vadd.f32 %v14837_v1, %v10584_v34  ;;  %4447 = vmatprep.mubr.bf16.mxu1 %v12883_v14  ;;  %11015 = vmatpush3.bf16.msra.mxu1 %v14885_v24  ;;  %v12889_v34 = vld [vmem:[#allocation2 + $0x764] ss:$16 sps:$4 sm:$0xff]  }
 0x4d5   :  { %10751 = vmatpush3.bf16.msra.mxu0 %v14967_v9  ;;  %11016 = vmatprep.subr.bf16.mxu1 %v14893_v30 }
 0x4d6   :  { %v2994_v47 = vpack.c.bf16 %v2963_v6, %v2960_v3  ;;  %v10585_v61 = vpop.f32.mrb[132].mxu0  ;;  %10752 = vmatprep.subr.bf16.mxu0 %v14973_v58  ;;  %v12884_v3 = vld [vmem:[#allocation2 + $0x740] ss:$16 sps:$4 sm:$0xff]   ;;  %v12823_v6 = vld [vmem:[#allocation2 + $0x548] ss:$16 sps:$4 sm:$0xff]  }
 0x4d7   :  { %v10586_v43 = vpop.f32.mrb[133].mxu0 }
 0x4d8   :  { %v10587_v1 = vadd.f32 %v10586_v43, %v10585_v61  ;;  %v10588_v55 = vpop.f32.mrb[134].mxu0  ;;  %11624 = vmatprep.mubr.msk.bf16.mxu0 %vm1279_vm1, %v2994_v47  ;;  %11017 = vmatpush3.bf16.msra.mxu1 %v14901_v7  ;;  %v12827_v47 = vld [vmem:[#allocation2 + $0x56c] ss:$16 sps:$4 sm:$0xff]   ;;  %v12887_v61 = vld [vmem:[#allocation2 + $0x760] ss:$16 sps:$4 sm:$0xff]  }
 0x4d9   :  { %v10589_v35 = vpop.f32.mrb[135].mxu0  ;;  %10753 = vmatpush3.bf16.msra.mxu0 %v14980_v31  ;;  %11018 = vmatprep.subr.bf16.mxu1 %v14908_v39  ;;  %v12829_v43 = vld [vmem:[#allocation2 + $0x568] ss:$16 sps:$4 sm:$0xff]  }
 0x4da   :  { %v2968_v27 = vadd.f32 %v14839_v49, %v10587_v1  ;;  %v10590_v19 = vadd.f32 %v10589_v35, %v10588_v55  ;;  %10754 = vmatprep.subr.bf16.mxu0 %v14987_v28  ;;  %v12835_v1 = vld [vmem:[#allocation2 + $0x588] ss:$16 sps:$4 sm:$0xff]   ;;  %v12839_v55 = vld [vmem:[#allocation2 + $0x5ac] ss:$16 sps:$4 sm:$0xff]  }
 0x4db   :  { %4448 = vmatmul.mubr.bf16.gmra.mrb[4].mxu1 %v12881_v56  ;;  %v12845_v35 = vld [vmem:[#allocation2 + $0x5cc] ss:$16 sps:$4 sm:$0xff]  }
 0x4dc   :  { %v2971_v26 = vadd.f32 %v14841_v62, %v10590_v19  ;;  %11019 = vmatpush3.bf16.msra.mxu1 %v14916_v0  ;;  %v12851_v19 = vld [vmem:[#allocation2 + $0x5ec] ss:$16 sps:$4 sm:$0xff]  }
 0x4dd   :  { %10755 = vmatpush3.bf16.msra.mxu0 %v14994_v59  ;;  %11020 = vmatprep.subr.bf16.mxu1 %v14924_v15 }
 0x4de   :  { %v2995_v49 = vpack.c.bf16 %v2971_v26, %v2968_v27  ;;  %v10591_v21 = vpop.f32.mrb[136].mxu0  ;;  %12505 = vmatprep.subr.msk.bf16.mxu0 %vm1304_vm0, %v3536_v48  ;;  %v12847_v27 = vld [vmem:[#allocation2 + $0x5c8] ss:$16 sps:$4 sm:$0xff]  }
 0x4df   :  { %v10592_v33 = vpop.f32.mrb[137].mxu0 }
 0x4e0   :  { %v10593_v5 = vadd.f32 %v10592_v33, %v10591_v21  ;;  %v10594_v50 = vpop.f32.mrb[138].mxu0  ;;  %11625 = vmatmul.mubr.msk.bf16.gmra.mrb[72].mxu0 %vm1279_vm1, %v2995_v49  ;;  %11021 = vmatpush3.bf16.msra.mxu1 %v14932_v12 }
 0x4e1   :  { %v10595_v62 = vpop.f32.mrb[139].mxu0  ;;  %11022 = vmatprep.subr.bf16.mxu1 %v14939_v4 }
 0x4e2   :  { %v2976_v23 = vadd.f32 %v14843_v22, %v10593_v5  ;;  %v10596_v51 = vadd.f32 %v10595_v62, %v10594_v50  ;;  %v12892_v5 = vld [vmem:[#allocation2 + $0x784] ss:$16 sps:$4 sm:$0xff]  }
 0x4e4   :  { %v2979_v8 = vadd.f32 %v14845_v54, %v10596_v51  ;;  %11023 = vmatpush3.bf16.msra.mxu1 %v14947_v42 }
 0x4e5   :  { %11024 = vmatprep.subr.bf16.mxu1 %v14960_v20 }
 0x4e6   :  { %v2996_v29 = vpack.c.bf16 %v2979_v8, %v2976_v23  ;;  %v10597_v41 = vpop.f32.mrb[140].mxu0 }
 0x4e7   :  { %v10598_v37 = vpop.f32.mrb[141].mxu0  ;;  %v10692_v26 = vpop.f32.mrb[192].mxu1 }
 0x4e8   :  { %v10599_v11 = vadd.f32 %v10598_v37, %v10597_v41  ;;  %v10600_v16 = vpop.f32.mrb[142].mxu0  ;;  %11628 = vmatprep.mubr.msk.bf16.mxu0 %vm1279_vm1, %v2996_v29  ;;  %11025 = vmatpush3.bf16.msra.mxu1 %v14967_v9  ;;  %v10693_v49 = vpop.f32.mrb[193].mxu1  ;;  %v12895_v41 = vld [vmem:[#allocation2 + $0x7a4] ss:$16 sps:$4 sm:$0xff]  }
 0x4e9   :  { %v10601_v46 = vpop.f32.mrb[143].mxu0  ;;  %11026 = vmatprep.subr.bf16.mxu1 %v14973_v58  ;;  %v15023_v21 = vadd.f32 %v10693_v49, %v10692_v26  ;;  %v10695_v33 = vpop.f32.mrb[194].mxu1 }
 0x4ea   :  { %v2984_v2 = vadd.f32 %v14847_v45, %v10599_v11  ;;  %v10602_v63 = vadd.f32 %v10601_v46, %v10600_v16  ;;  %v3562_v45 = vsel %vm1304_vm0, %v3536_v48, 0  ;;  %v12853_v48 = vld [vmem:[#allocation2 + $0x5e8] ss:$16 sps:$4 sm:$0xff]  }
 0x4ec   :  { %v2987_v22 = vadd.f32 %v14849_v13, %v10602_v63  ;;  %v12886_v13 = vld [vmem:[#allocation2 + $0x744] ss:$16 sps:$4 sm:$0xff]   ;;  %11027 = vmatpush3.bf16.msra.mxu1 %v14980_v31 }
 0x4ed   :  { %4455 = vmatprep.mubr.bf16.mxu1 %v12886_v13  ;;  %11028 = vmatprep.subr.bf16.mxu1 %v14987_v28  ;;  %v12898_v63 = vld [vmem:[#allocation2 + $0x7c4] ss:$16 sps:$4 sm:$0xff]   ;;  %v12899_v13 = vld [vmem:[#allocation2 + $0x7e0] ss:$16 sps:$4 sm:$0xff]  }
 0x4ee   :  { %v2997_v54 = vpack.c.bf16 %v2987_v22, %v2984_v2  ;;  %4456 = vmatmul.mubr.bf16.gmra.mrb[8].mxu1 %v12884_v3 }
 0x4ef   :  { %4463 = vmatprep.mubr.bf16.mxu1 %v12889_v34 }
 0x4f0   :  { %11629 = vmatmul.mubr.msk.bf16.gmra.mrb[76].mxu0 %vm1279_vm1, %v2997_v54  ;;  %11029 = vmatpush3.bf16.msra.mxu1 %v14994_v59 }
 0x4f1   :  { %3462 = vmatprep.mubr.bf16.mxu0 %v12811_v18  ;;  %11151 = vmatprep.subr.bf16.mxu1 %v14953_v10  ;;  %v12896_v18 = vld [vmem:[#allocation2 + $0x7c0] ss:$16 sps:$4 sm:$0xff]  }
 0x4f6   :  { %4464 = vmatmul.mubr.bf16.gmra.mrb[12].mxu1 %v12887_v61 }
 0x4f7   :  { %4471 = vmatprep.mubr.bf16.mxu1 %v12892_v5 }
 0x4f8   :  { %3463 = vmatmul.mubr.bf16.vlgmr.msra.gmra.mrb[144].mxu0 %v12809_v57 }
 0x4f9   :  { %3470 = vmatprep.mubr.bf16.mxu0 %v12815_v40  ;;  %11633 = vmatpush3.bf16.msra.mxu0 %v3562_v45  ;;  %v12901_v45 = vld [vmem:[#allocation2 + $0x7e4] ss:$16 sps:$4 sm:$0xff]  }
 0x4fa   :  { %10877 = vmatprep.subr.bf16.mxu0 %v14953_v10  ;;  %v10696_v10 = vpop.f32.mrb[195].mxu1 }
 0x4fb   :  { %v15025_v38 = vadd.f32 %v10696_v10, %v10695_v33  ;;  %v10698_v50 = vpop.f32.mrb[196].mxu1 }
 0x4fc   :  { %v10699_v62 = vpop.f32.mrb[197].mxu1 }
 0x4fd   :  { %v10701_v23 = vpop.f32.mrb[198].mxu1  ;;  %v15027_v51 = vadd.f32 %v10699_v62, %v10698_v50  ;;  %v12910_v50 = vld [vmem:[#allocation2 + $0x74c] ss:$16 sps:$4 sm:$0xff]   ;;  %v12908_v62 = vld [vmem:[#allocation2 + $0x748] ss:$16 sps:$4 sm:$0xff]  }
 0x4fe   :  { %4472 = vmatmul.mubr.bf16.gmra.mrb[16].mxu1 %v12890_v52  ;;  %v10702_v8 = vpop.f32.mrb[199].mxu1 }
 0x4ff   :  { %v15029_v29 = vadd.f32 %v10702_v8, %v10701_v23  ;;  %v10704_v37 = vpop.f32.mrb[200].mxu1  ;;  %4479 = vmatprep.mubr.bf16.mxu1 %v12895_v41 }
 0x500   :  { %3471 = vmatmul.mubr.bf16.gmra.mrb[148].mxu0 %v12817_v60  ;;  %v10705_v11 = vpop.f32.mrb[201].mxu1 }
 0x501   :  { %3478 = vmatprep.mubr.bf16.mxu0 %v12821_v25  ;;  %v10707_v16 = vpop.f32.mrb[202].mxu1  ;;  %v15031_v32 = vadd.f32 %v10705_v11, %v10704_v37  ;;  %v12913_v11 = vld [vmem:[#allocation2 + $0x76c] ss:$16 sps:$4 sm:$0xff]  }
 0x502   :  { %v10708_v46 = vpop.f32.mrb[203].mxu1 }
 0x503   :  { %v15033_v2 = vadd.f32 %v10708_v46, %v10707_v16  ;;  %v10710_v22 = vpop.f32.mrb[204].mxu1  ;;  %v12911_v16 = vld [vmem:[#allocation2 + $0x768] ss:$16 sps:$4 sm:$0xff]   ;;  %v12916_v46 = vld [vmem:[#allocation2 + $0x78c] ss:$16 sps:$4 sm:$0xff]  }
 0x504   :  { %v10711_v54 = vpop.f32.mrb[205].mxu1 }
 0x505   :  { %v10713_v17 = vpop.f32.mrb[206].mxu1  ;;  %v15035_v14 = vadd.f32 %v10711_v54, %v10710_v22  ;;  %v12922_v22 = vld [vmem:[#allocation2 + $0x7ac] ss:$16 sps:$4 sm:$0xff]  }
 0x506   :  { %4480 = vmatmul.mubr.bf16.gmra.mrb[20].mxu1 %v12893_v44  ;;  %v10714_v57 = vpop.f32.mrb[207].mxu1  ;;  %v12928_v54 = vld [vmem:[#allocation2 + $0x7cc] ss:$16 sps:$4 sm:$0xff]  }
 0x507   :  { %4487 = vmatprep.mubr.bf16.mxu1 %v12898_v63  ;;  %v15037_v40 = vadd.f32 %v10714_v57, %v10713_v17  ;;  %v10716_v56 = vpop.f32.mrb[208].mxu1  ;;  %v12914_v63 = vld [vmem:[#allocation2 + $0x788] ss:$16 sps:$4 sm:$0xff]   ;;  %v12934_v57 = vld [vmem:[#allocation2 + $0x7ec] ss:$16 sps:$4 sm:$0xff]  }
 0x508   :  { %3479 = vmatmul.mubr.bf16.gmra.mrb[152].mxu0 %v12823_v6  ;;  %v10717_v60 = vpop.f32.mrb[209].mxu1  ;;  %v12926_v17 = vld [vmem:[#allocation2 + $0x7c8] ss:$16 sps:$4 sm:$0xff]  }
 0x509   :  { %3486 = vmatprep.mubr.bf16.mxu0 %v12827_v47  ;;  %v10719_v25 = vpop.f32.mrb[210].mxu1  ;;  %v15039_v3 = vadd.f32 %v10717_v60, %v10716_v56  ;;  %v12904_v47 = vld [vmem:[#allocation2 + $0x70c] ss:$16 sps:$4 sm:$0xff]  }
 0x50a   :  { %v10720_v34 = vpop.f32.mrb[211].mxu1 }
 0x50b   :  { %v15041_v6 = vadd.f32 %v10720_v34, %v10719_v25 }
 0x50e   :  { %4488 = vmatmul.mubr.bf16.gmra.mrb[24].mxu1 %v12896_v18  ;;  %v12920_v18 = vld [vmem:[#allocation2 + $0x7a8] ss:$16 sps:$4 sm:$0xff]  }
 0x50f   :  { %4495 = vmatprep.mubr.bf16.mxu1 %v12901_v45  ;;  %v10722_v61 = vpop.f32.mrb[212].mxu1  ;;  %v12932_v45 = vld [vmem:[#allocation2 + $0x7e8] ss:$16 sps:$4 sm:$0xff]  }
 0x510   :  { %3487 = vmatmul.mubr.bf16.gmra.mrb[156].mxu0 %v12829_v43  ;;  %v12902_v43 = vld [vmem:[#allocation2 + $0x708] ss:$16 sps:$4 sm:$0xff]  }
 0x511   :  { %3494 = vmatprep.mubr.bf16.mxu0 %v12833_v53  ;;  %v10723_v53 = vpop.f32.mrb[213].mxu1 }
 0x516   :  { %4496 = vmatmul.mubr.bf16.gmra.mrb[28].mxu1 %v12899_v13 }
 0x517   :  { %4536 = vmatprep.mubr.bf16.mxu1 %v12904_v47 }
 0x518   :  { %3495 = vmatmul.mubr.bf16.gmra.mrb[160].mxu0 %v12835_v1  ;;  %v10725_v1 = vpop.f32.mrb[214].mxu1 }
 0x519   :  { %3502 = vmatprep.mubr.bf16.mxu0 %v12839_v55  ;;  %v15043_v55 = vadd.f32 %v10723_v53, %v10722_v61 }
 0x51e   :  { %4537 = vmatmul.mubr.bf16.vlgmr.msra.gmra.mrb[32].mxu1 %v12902_v43 }
 0x51f   :  { %11152 = vmatpush3.bf16.msra.mxu1 %v14885_v24 }
 0x520   :  { %3503 = vmatmul.mubr.bf16.gmra.mrb[164].mxu0 %v12841_v36  ;;  %v10726_v36 = vpop.f32.mrb[215].mxu1  ;;  %11153 = vmatprep.subr.bf16.mxu1 %v14893_v30 }
 0x521   :  { %3510 = vmatprep.mubr.bf16.mxu0 %v12845_v35  ;;  %v15046_v35 = vadd.f32 %v10726_v36, %v10725_v1 }
 0x523   :  { %11154 = vmatpush3.bf16.msra.mxu1 %v14901_v7 }
 0x524   :  { %11155 = vmatprep.subr.bf16.mxu1 %v14908_v39 }
 0x527   :  { %11156 = vmatpush3.bf16.msra.mxu1 %v14916_v0 }
 0x528   :  { %3511 = vmatmul.mubr.bf16.gmra.mrb[168].mxu0 %v12847_v27  ;;  %v12907_v27 = vld [vmem:[#allocation2 + $0x72c] ss:$16 sps:$4 sm:$0xff]   ;;  %11157 = vmatprep.subr.bf16.mxu1 %v14924_v15 }
 0x529   :  { %3518 = vmatprep.mubr.bf16.mxu0 %v12851_v19  ;;  %v10728_v19 = vpop.f32.mrb[216].mxu1  ;;  %4544 = vmatprep.mubr.bf16.mxu1 %v12907_v27 }
 0x52a   :  { %v10729_v26 = vpop.f32.mrb[217].mxu1 }
 0x52b   :  { %v10731_v49 = vpop.f32.mrb[218].mxu1  ;;  %v15051_v33 = vadd.f32 %v10729_v26, %v10728_v19  ;;  %11158 = vmatpush3.bf16.msra.mxu1 %v14932_v12 }
 0x52c   :  { %v10732_v10 = vpop.f32.mrb[219].mxu1  ;;  %11159 = vmatprep.subr.bf16.mxu1 %v14939_v4 }
 0x52d   :  { %v15054_v5 = vadd.f32 %v10732_v10, %v10731_v49  ;;  %v10734_v52 = vpop.f32.mrb[220].mxu1 }
 0x52e   :  { %v10735_v23 = vpop.f32.mrb[221].mxu1 }
 0x52f   :  { %v10737_v8 = vpop.f32.mrb[222].mxu1  ;;  %v15059_v41 = vadd.f32 %v10735_v23, %v10734_v52  ;;  %11160 = vmatpush3.bf16.msra.mxu1 %v14947_v42 }
 0x530   :  { %3519 = vmatmul.mubr.bf16.gmra.mrb[172].mxu0 %v12853_v48  ;;  %v12905_v48 = vld [vmem:[#allocation2 + $0x728] ss:$16 sps:$4 sm:$0xff]   ;;  %v10738_v37 = vpop.f32.mrb[223].mxu1  ;;  %11161 = vmatprep.subr.bf16.mxu1 %v14960_v20 }
 0x531   :  { %4545 = vmatmul.mubr.bf16.gmra.mrb[36].mxu1 %v12905_v48  ;;  %v15062_v44 = vadd.f32 %v10738_v37, %v10737_v8  ;;  %v10829_v34 = vpop.f32.mrb[224].mxu1 }
 0x532   :  { %4552 = vmatprep.mubr.bf16.mxu1 %v12910_v50  ;;  %v10830_v61 = vpop.f32.mrb[225].mxu1 }
 0x533   :  { %11162 = vmatpush3.bf16.msra.mxu1 %v14967_v9  ;;  %v15071_v1 = vadd.f32 %v10830_v61, %v10829_v34  ;;  %v10832_v36 = vpop.f32.mrb[226].mxu1 }
 0x534   :  { %11163 = vmatprep.subr.bf16.mxu1 %v14973_v58  ;;  %v10833_v27 = vpop.f32.mrb[227].mxu1 }
 0x535   :  { %v15074_v48 = vadd.f32 %v10833_v27, %v10832_v36  ;;  %v10835_v26 = vpop.f32.mrb[228].mxu1 }
 0x536   :  { %v10836_v49 = vpop.f32.mrb[229].mxu1 }
 0x537   :  { %11164 = vmatpush3.bf16.msra.mxu1 %v14980_v31  ;;  %v15076_v52 = vadd.f32 %v10836_v49, %v10835_v26 }
 0x538   :  { %11165 = vmatprep.subr.bf16.mxu1 %v14987_v28 }
 0x539   :  { %4553 = vmatmul.mubr.bf16.gmra.mrb[40].mxu1 %v12908_v62  ;;  %v10838_v62 = vpop.f32.mrb[230].mxu1 }
 0x53a   :  { %4560 = vmatprep.mubr.bf16.mxu1 %v12913_v11  ;;  %v10839_v8 = vpop.f32.mrb[231].mxu1 }
 0x53b   :  { %11166 = vmatpush3.bf16.msra.mxu1 %v14994_v59  ;;  %v15079_v11 = vadd.f32 %v10839_v8, %v10838_v62 }
 0x541   :  { %4561 = vmatmul.mubr.bf16.gmra.mrb[44].mxu1 %v12911_v16  ;;  %v10841_v16 = vpop.f32.mrb[232].mxu1 }
 0x542   :  { %4568 = vmatprep.mubr.bf16.mxu1 %v12916_v46 }
 0x549   :  { %4569 = vmatmul.mubr.bf16.gmra.mrb[48].mxu1 %v12914_v63 }
 0x54a   :  { %4576 = vmatprep.mubr.bf16.mxu1 %v12922_v22 }
 0x551   :  { %4577 = vmatmul.mubr.bf16.gmra.mrb[52].mxu1 %v12920_v18 }
 0x552   :  { %4584 = vmatprep.mubr.bf16.mxu1 %v12928_v54 }
 0x559   :  { %4585 = vmatmul.mubr.bf16.gmra.mrb[56].mxu1 %v12926_v17 }
 0x55a   :  { %4592 = vmatprep.mubr.bf16.mxu1 %v12934_v57 }
 0x561   :  { %4593 = vmatmul.mubr.bf16.gmra.mrb[60].mxu1 %v12932_v45 }
 0x5cb   :  { %v10756_v56 = vpop.f32.mrb[144].mxu0 }
 0x5cc   :  { %v10757_v13 = vpop.f32.mrb[145].mxu0 }
 0x5cd   :  { %v10758_v60 = vadd.f32 %v10757_v13, %v10756_v56  ;;  %v10759_v25 = vpop.f32.mrb[146].mxu0 }
 0x5ce   :  { %v10760_v47 = vpop.f32.mrb[147].mxu0 }
 0x5cf   :  { %v3465_v43 = vadd.f32 %v10758_v60, %v15023_v21  ;;  %v10761_v53 = vadd.f32 %v10760_v47, %v10759_v25 }
 0x5d1   :  { %v3468_v19 = vadd.f32 %v10761_v53, %v15025_v38  ;;  %v10842_v38 = vpop.f32.mrb[233].mxu1 }
 0x5d2   :  { %v15082_v18 = vadd.f32 %v10842_v38, %v10841_v16  ;;  %v10844_v54 = vpop.f32.mrb[234].mxu1 }
 0x5d3   :  { %v3527_v10 = vpack.c.bf16 %v3468_v19, %v3465_v43  ;;  %v10762_v50 = vpop.f32.mrb[148].mxu0  ;;  %v10845_v17 = vpop.f32.mrb[235].mxu1 }
 0x5d4   :  { %v10763_v23 = vpop.f32.mrb[149].mxu0  ;;  %v15085_v45 = vadd.f32 %v10845_v17, %v10844_v54  ;;  %v10847_v56 = vpop.f32.mrb[236].mxu1 }
 0x5d5   :  { %v10764_v37 = vadd.f32 %v10763_v23, %v10762_v50  ;;  %v10765_v21 = vpop.f32.mrb[150].mxu0  ;;  %11634 = vmatprep.mubr.msk.bf16.mxu0 %vm1279_vm1, %v3527_v10  ;;  %v10848_v13 = vpop.f32.mrb[237].mxu1 }
 0x5d6   :  { %v10766_v46 = vpop.f32.mrb[151].mxu0  ;;  %v15087_v34 = vadd.f32 %v10848_v13, %v10847_v56  ;;  %v10850_v47 = vpop.f32.mrb[238].mxu1 }
 0x5d7   :  { %v3473_v63 = vadd.f32 %v10764_v37, %v15027_v51  ;;  %v10767_v22 = vadd.f32 %v10766_v46, %v10765_v21  ;;  %v10851_v43 = vpop.f32.mrb[239].mxu1 }
 0x5d8   :  { %v15090_v36 = vadd.f32 %v10851_v43, %v10850_v47  ;;  %v10853_v27 = vpop.f32.mrb[240].mxu1 }
 0x5d9   :  { %v3476_v57 = vadd.f32 %v10767_v22, %v15029_v29  ;;  %v10854_v29 = vpop.f32.mrb[241].mxu1 }
 0x5da   :  { %v15095_v10 = vadd.f32 %v10854_v29, %v10853_v27  ;;  %v10856_v50 = vpop.f32.mrb[242].mxu1 }
 0x5db   :  { %v3528_v60 = vpack.c.bf16 %v3476_v57, %v3473_v63  ;;  %v10768_v25 = vpop.f32.mrb[152].mxu0  ;;  %v10857_v62 = vpop.f32.mrb[243].mxu1 }
 0x5dc   :  { %v10769_v61 = vpop.f32.mrb[153].mxu0  ;;  %v15098_v8 = vadd.f32 %v10857_v62, %v10856_v50  ;;  %v10859_v37 = vpop.f32.mrb[244].mxu1 }
 0x5dd   :  { %v10770_v53 = vadd.f32 %v10769_v61, %v10768_v25  ;;  %v10771_v51 = vpop.f32.mrb[154].mxu0  ;;  %11635 = vmatmul.mubr.msk.bf16.vlgmr.msra.gmra.mrb[64].mxu0 %vm1279_vm1, %v3528_v60  ;;  %v10860_v21 = vpop.f32.mrb[245].mxu1 }
 0x5de   :  { %v10772_v19 = vpop.f32.mrb[155].mxu0  ;;  %10878 = vmatpush3.bf16.msra.mxu0 %v14885_v24  ;;  %v10862_v46 = vpop.f32.mrb[246].mxu1 }
 0x5df   :  { %v3481_v26 = vadd.f32 %v10770_v53, %v15031_v32  ;;  %v10773_v49 = vadd.f32 %v10772_v19, %v10771_v51  ;;  %10879 = vmatprep.subr.bf16.mxu0 %v14893_v30  ;;  %v15102_v32 = vadd.f32 %v10860_v21, %v10859_v37  ;;  %v10863_v38 = vpop.f32.mrb[247].mxu1 }
 0x5e0   :  { %v10865_v54 = vpop.f32.mrb[248].mxu1 }
 0x5e1   :  { %v3484_v23 = vadd.f32 %v10773_v49, %v15033_v2  ;;  %v15105_v2 = vadd.f32 %v10863_v38, %v10862_v46 }
 0x5e2   :  { %10880 = vmatpush3.bf16.msra.mxu0 %v14901_v7  ;;  %v10866_v7 = vpop.f32.mrb[249].mxu1 }
 0x5e3   :  { %v3529_v16 = vpack.c.bf16 %v3484_v23, %v3481_v26  ;;  %v10774_v24 = vpop.f32.mrb[156].mxu0  ;;  %10881 = vmatprep.subr.bf16.mxu0 %v14908_v39  ;;  %v15110_v39 = vadd.f32 %v10866_v7, %v10865_v54  ;;  %v10868_v13 = vpop.f32.mrb[250].mxu1 }
 0x5e4   :  { %v10775_v30 = vpop.f32.mrb[157].mxu0  ;;  %v10869_v60 = vpop.f32.mrb[251].mxu1 }
 0x5e5   :  { %v10776_v63 = vadd.f32 %v10775_v30, %v10774_v24  ;;  %v10777_v22 = vpop.f32.mrb[158].mxu0  ;;  %11638 = vmatprep.mubr.msk.bf16.mxu0 %vm1279_vm1, %v3529_v16  ;;  %v15113_v47 = vadd.f32 %v10869_v60, %v10868_v13  ;;  %v10871_v61 = vpop.f32.mrb[252].mxu1 }
 0x5e6   :  { %v10778_v17 = vpop.f32.mrb[159].mxu0  ;;  %10882 = vmatpush3.bf16.msra.mxu0 %v14916_v0  ;;  %v10872_v43 = vpop.f32.mrb[253].mxu1 }
 0x5e7   :  { %v3489_v57 = vadd.f32 %v10776_v63, %v15035_v14  ;;  %v10779_v56 = vadd.f32 %v10778_v17, %v10777_v22  ;;  %10883 = vmatprep.subr.bf16.mxu0 %v14924_v15  ;;  %v15117_v14 = vadd.f32 %v10872_v43, %v10871_v61  ;;  %v10874_v51 = vpop.f32.mrb[254].mxu1 }
 0x5e8   :  { %v10875_v27 = vpop.f32.mrb[255].mxu1 }
 0x5e9   :  { %v3492_v25 = vadd.f32 %v10779_v56, %v15037_v40  ;;  %v15120_v40 = vadd.f32 %v10875_v27, %v10874_v51  ;;  %v10966_v26 = vpop.f32.mrb[0].mxu1 }
 0x5ea   :  { %10884 = vmatpush3.bf16.msra.mxu0 %v14932_v12  ;;  %v10967_v12 = vpop.f32.mrb[1].mxu1 }
 0x5eb   :  { %v3530_v53 = vpack.c.bf16 %v3492_v25, %v3489_v57  ;;  %v10780_v0 = vpop.f32.mrb[160].mxu0  ;;  %10885 = vmatprep.subr.bf16.mxu0 %v14939_v4  ;;  %v15125_v4 = vadd.f32 %v10967_v12, %v10966_v26  ;;  %v10969_v23 = vpop.f32.mrb[2].mxu1  ;;  %v4073_v25 = vld [vmem:[#allocation4 + $0xc] sm:$0x3] }
 0x5ec   :  { %v10781_v15 = vpop.f32.mrb[161].mxu0  ;;  %v10970_v37 = vpop.f32.mrb[3].mxu1 }
 0x5ed   :  { %v10782_v19 = vadd.f32 %v10781_v15, %v10780_v0  ;;  %v10783_v29 = vpop.f32.mrb[162].mxu0  ;;  %11639 = vmatmul.mubr.msk.bf16.gmra.mrb[68].mxu0 %vm1279_vm1, %v3530_v53  ;;  %v15128_v16 = vadd.f32 %v10970_v37, %v10969_v23  ;;  %v10972_v24 = vpop.f32.mrb[4].mxu1 }
 0x5ee   :  { %v10784_v49 = vpop.f32.mrb[163].mxu0  ;;  %10886 = vmatpush3.bf16.msra.mxu0 %v14947_v42  ;;  %v10973_v46 = vpop.f32.mrb[5].mxu1 }
 0x5ef   :  { %v3497_v50 = vadd.f32 %v10782_v19, %v15039_v3  ;;  %v10785_v62 = vadd.f32 %v10784_v49, %v10783_v29  ;;  %10887 = vmatprep.subr.bf16.mxu0 %v14960_v20  ;;  %v15132_v3 = vadd.f32 %v10973_v46, %v10972_v24  ;;  %v10975_v38 = vpop.f32.mrb[6].mxu1 }
 0x5f0   :  { %v10976_v63 = vpop.f32.mrb[7].mxu1 }
 0x5f1   :  { %v3500_v21 = vadd.f32 %v10785_v62, %v15041_v6  ;;  %v15135_v6 = vadd.f32 %v10976_v63, %v10975_v38  ;;  %v10978_v17 = vpop.f32.mrb[8].mxu1  ;;  %v12919_v38 = vld [vmem:[#allocation2 + $0x60c] ss:$16 sps:$4 sm:$0xff]   ;;  %v4099_v63 = vsel %vm1304_vm0, %v4073_v25, 0 }
 0x5f2   :  { %10888 = vmatpush3.bf16.msra.mxu0 %v14967_v9  ;;  %v10979_v9 = vpop.f32.mrb[9].mxu1 }
 0x5f3   :  { %v3531_v30 = vpack.c.bf16 %v3500_v21, %v3497_v50  ;;  %v10786_v42 = vpop.f32.mrb[164].mxu0  ;;  %10889 = vmatprep.subr.bf16.mxu0 %v14973_v58  ;;  %v15140_v58 = vadd.f32 %v10979_v9, %v10978_v17  ;;  %v10981_v13 = vpop.f32.mrb[10].mxu1  ;;  %v12935_v17 = vld [vmem:[#allocation2 + $0x66c] ss:$16 sps:$4 sm:$0xff]  }
 0x5f4   :  { %v10787_v20 = vpop.f32.mrb[165].mxu0  ;;  %v10982_v60 = vpop.f32.mrb[11].mxu1 }
 0x5f5   :  { %v10788_v22 = vadd.f32 %v10787_v20, %v10786_v42  ;;  %v10789_v54 = vpop.f32.mrb[166].mxu0  ;;  %11642 = vmatprep.mubr.msk.bf16.mxu0 %vm1279_vm1, %v3531_v30  ;;  %v15143_v43 = vadd.f32 %v10982_v60, %v10981_v13  ;;  %v10984_v53 = vpop.f32.mrb[12].mxu1  ;;  %v12937_v13 = vld [vmem:[#allocation2 + $0x668] ss:$16 sps:$4 sm:$0xff]  }
 0x5f6   :  { %v10790_v7 = vpop.f32.mrb[167].mxu0  ;;  %10890 = vmatpush3.bf16.msra.mxu0 %v14980_v31  ;;  %v10985_v0 = vpop.f32.mrb[13].mxu1 }
 0x5f7   :  { %v3505_v57 = vadd.f32 %v10788_v22, %v15043_v55  ;;  %v10791_v56 = vadd.f32 %v10790_v7, %v10789_v54  ;;  %10891 = vmatprep.subr.bf16.mxu0 %v14987_v28  ;;  %v15146_v15 = vadd.f32 %v10985_v0, %v10984_v53  ;;  %v10987_v55 = vpop.f32.mrb[14].mxu1  ;;  %v12925_v22 = vld [vmem:[#allocation2 + $0x628] ss:$16 sps:$4 sm:$0xff]   ;;  %v12929_v54 = vld [vmem:[#allocation2 + $0x64c] ss:$16 sps:$4 sm:$0xff]  }
 0x5f8   :  { %v10988_v27 = vpop.f32.mrb[15].mxu1 }
 0x5f9   :  { %v3508_v61 = vadd.f32 %v10791_v56, %v15046_v35  ;;  %v15150_v35 = vadd.f32 %v10988_v27, %v10987_v55  ;;  %v12940_v55 = vld [vmem:[#allocation2 + $0x688] ss:$16 sps:$4 sm:$0xff]   ;;  %v12941_v27 = vld [vmem:[#allocation2 + $0x6ac] ss:$16 sps:$4 sm:$0xff]  }
 0x5fa   :  { %10892 = vmatpush3.bf16.msra.mxu0 %v14994_v59 }
 0x5fb   :  { %v3532_v31 = vpack.c.bf16 %v3508_v61, %v3505_v57  ;;  %v10792_v51 = vpop.f32.mrb[168].mxu0  ;;  %12506 = vmatprep.subr.msk.bf16.mxu0 %vm1304_vm0, %v4073_v25  ;;  %v12938_v25 = vld [vmem:[#allocation2 + $0x68c] ss:$16 sps:$4 sm:$0xff]  }
 0x5fc   :  { %v10793_v28 = vpop.f32.mrb[169].mxu0 }
 0x5fd   :  { %v10794_v19 = vadd.f32 %v10793_v28, %v10792_v51  ;;  %v10795_v29 = vpop.f32.mrb[170].mxu0  ;;  %11643 = vmatmul.mubr.msk.bf16.gmra.mrb[72].mxu0 %vm1279_vm1, %v3532_v31 }
 0x5fe   :  { %v10796_v26 = vpop.f32.mrb[171].mxu0 }
 0x5ff   :  { %v3513_v49 = vadd.f32 %v10794_v19, %v15051_v33  ;;  %v10797_v59 = vadd.f32 %v10796_v26, %v10795_v29  ;;  %v12917_v33 = vld [vmem:[#allocation2 + $0x608] ss:$16 sps:$4 sm:$0xff]  }
 0x601   :  { %v3516_v12 = vadd.f32 %v10797_v59, %v15054_v5  ;;  %v12923_v5 = vld [vmem:[#allocation2 + $0x62c] ss:$16 sps:$4 sm:$0xff]  }
 0x603   :  { %v3533_v50 = vpack.c.bf16 %v3516_v12, %v3513_v49  ;;  %v10798_v62 = vpop.f32.mrb[172].mxu0  ;;  %v12943_v12 = vld [vmem:[#allocation2 + $0x6a8] ss:$16 sps:$4 sm:$0xff]  }
 0x604   :  { %v10799_v23 = vpop.f32.mrb[173].mxu0 }
 0x605   :  { %v10800_v37 = vadd.f32 %v10799_v23, %v10798_v62  ;;  %v10801_v21 = vpop.f32.mrb[174].mxu0  ;;  %11646 = vmatprep.mubr.msk.bf16.mxu0 %vm1279_vm1, %v3533_v50  ;;  %v12944_v62 = vld [vmem:[#allocation2 + $0x6cc] ss:$16 sps:$4 sm:$0xff]  }
 0x606   :  { %v10802_v24 = vpop.f32.mrb[175].mxu0 }
 0x607   :  { %v3521_v46 = vadd.f32 %v10800_v37, %v15059_v41  ;;  %v10803_v30 = vadd.f32 %v10802_v24, %v10801_v21  ;;  %v12931_v41 = vld [vmem:[#allocation2 + $0x648] ss:$16 sps:$4 sm:$0xff]  }
 0x609   :  { %v3524_v42 = vadd.f32 %v10803_v30, %v15062_v44  ;;  %v10990_v44 = vpop.f32.mrb[16].mxu1  ;;  %v12946_v30 = vld [vmem:[#allocation2 + $0x6c8] ss:$16 sps:$4 sm:$0xff]  }
 0x60a   :  { %v10991_v7 = vpop.f32.mrb[17].mxu1 }
 0x60b   :  { %v3534_v20 = vpack.c.bf16 %v3524_v42, %v3521_v46  ;;  %v15159_v9 = vadd.f32 %v10991_v7, %v10990_v44  ;;  %v10993_v57 = vpop.f32.mrb[18].mxu1 }
 0x60c   :  { %v10994_v56 = vpop.f32.mrb[19].mxu1 }
 0x60d   :  { %11647 = vmatmul.mubr.msk.bf16.gmra.mrb[76].mxu0 %vm1279_vm1, %v3534_v20  ;;  %v15161_v60 = vadd.f32 %v10994_v56, %v10993_v57  ;;  %v10996_v61 = vpop.f32.mrb[20].mxu1 }
 0x60e   :  { %3999 = vmatprep.mubr.bf16.mxu0 %v12919_v38  ;;  %v10997_v53 = vpop.f32.mrb[21].mxu1  ;;  %v12947_v38 = vld [vmem:[#allocation2 + $0x6ec] ss:$16 sps:$4 sm:$0xff]  }
 0x60f   :  { %v15163_v0 = vadd.f32 %v10997_v53, %v10996_v61  ;;  %v10999_v31 = vpop.f32.mrb[22].mxu1 }
 0x610   :  { %v11000_v51 = vpop.f32.mrb[23].mxu1 }
 0x611   :  { %v15165_v28 = vadd.f32 %v11000_v51, %v10999_v31  ;;  %v11002_v19 = vpop.f32.mrb[24].mxu1 }
 0x612   :  { %v11003_v29 = vpop.f32.mrb[25].mxu1 }
 0x613   :  { %v15167_v26 = vadd.f32 %v11003_v29, %v11002_v19  ;;  %v11005_v49 = vpop.f32.mrb[26].mxu1 }
 0x614   :  { %v11006_v59 = vpop.f32.mrb[27].mxu1 }
 0x615   :  { %4000 = vmatmul.mubr.bf16.vlgmr.msra.gmra.mrb[176].mxu0 %v12917_v33  ;;  %v15169_v50 = vadd.f32 %v11006_v59, %v11005_v49  ;;  %v11008_v23 = vpop.f32.mrb[28].mxu1 }
 0x616   :  { %4007 = vmatprep.mubr.bf16.mxu0 %v12923_v5  ;;  %11651 = vmatpush3.bf16.msra.mxu0 %v4099_v63  ;;  %v11009_v37 = vpop.f32.mrb[29].mxu1 }
 0x617   :  { %v15171_v21 = vadd.f32 %v11009_v37, %v11008_v23  ;;  %v11011_v24 = vpop.f32.mrb[30].mxu1 }
 0x618   :  { %v11012_v46 = vpop.f32.mrb[31].mxu1 }
 0x619   :  { %v15173_v42 = vadd.f32 %v11012_v46, %v11011_v24  ;;  %v11030_v20 = vpop.f32.mrb[32].mxu1 }
 0x61a   :  { %v11031_v33 = vpop.f32.mrb[33].mxu1 }
 0x61b   :  { %v11032_v5 = vadd.f32 %v11031_v33, %v11030_v20  ;;  %v11033_v63 = vpop.f32.mrb[34].mxu1 }
 0x61d   :  { %4008 = vmatmul.mubr.bf16.gmra.mrb[180].mxu0 %v12925_v22  ;;  %v11034_v22 = vpop.f32.mrb[35].mxu1 }
 0x61e   :  { %4015 = vmatprep.mubr.bf16.mxu0 %v12929_v54  ;;  %v12949_v54 = vld [vmem:[#allocation2 + $0x6e8] ss:$16 sps:$4 sm:$0xff]   ;;  %v11036_v57 = vpop.f32.mrb[36].mxu1 }
 0x61f   :  { %v11037_v56 = vpop.f32.mrb[37].mxu1 }
 0x625   :  { %4016 = vmatmul.mubr.bf16.gmra.mrb[184].mxu0 %v12931_v41  ;;  %v15176_v41 = vadd.f32 %v11032_v5, %v15125_v4 }
 0x626   :  { %4023 = vmatprep.mubr.bf16.mxu0 %v12935_v17  ;;  %v11035_v17 = vadd.f32 %v11034_v22, %v11033_v63 }
 0x628   :  { %v15179_v44 = vadd.f32 %v11035_v17, %v15128_v16 }
 0x62a   :  { %v4601_v7 = vpack.c.bf16 %v15179_v44, %v15176_v41  ;;  %v13352_v41 = vld [vmem:[%s15749_s0 + $0x10] sm:$0xff]   ;;  %v13353_v44 = vld [vmem:[%s15749_s0 + $0x58] sm:$0xff]  }
 0x62d   :  { %4024 = vmatmul.mubr.bf16.gmra.mrb[188].mxu0 %v12937_v13  ;;  %v11038_v13 = vadd.f32 %v11037_v56, %v11036_v57 }
 0x62e   :  { %4031 = vmatprep.mubr.bf16.mxu0 %v12938_v25  ;;  %v11039_v25 = vpop.f32.mrb[38].mxu1 }
 0x62f   :  { %v11040_v61 = vpop.f32.mrb[39].mxu1  ;;  %v15184_v53 = vadd.f32 %v11038_v13, %v15132_v3 }
 0x630   :  { %v11041_v31 = vadd.f32 %v11040_v61, %v11039_v25  ;;  %v11042_v51 = vpop.f32.mrb[40].mxu1 }
 0x632   :  { %v15187_v4 = vadd.f32 %v11041_v31, %v15135_v6 }
 0x634   :  { %v4602_v16 = vpack.c.bf16 %v15187_v4, %v15184_v53  ;;  %v13355_v53 = vld [vmem:[%s15749_s0 + $0x60] sm:$0xff]  }
 0x635   :  { %4032 = vmatmul.mubr.bf16.gmra.mrb[192].mxu0 %v12940_v55  ;;  %v11043_v55 = vpop.f32.mrb[41].mxu1  ;;  %v13356_v4 = vld [vmem:[%s15749_s0 + $0x20] sm:$0xff]  }
 0x636   :  { %4039 = vmatprep.mubr.bf16.mxu0 %v12941_v27  ;;  %v11044_v27 = vadd.f32 %v11043_v55, %v11042_v51  ;;  %v11045_v19 = vpop.f32.mrb[42].mxu1 }
 0x637   :  { %v11046_v29 = vpop.f32.mrb[43].mxu1 }
 0x638   :  { %v15192_v49 = vadd.f32 %v11044_v27, %v15140_v58  ;;  %v11047_v59 = vadd.f32 %v11046_v29, %v11045_v19  ;;  %v11048_v6 = vpop.f32.mrb[44].mxu1 }
 0x63d   :  { %4040 = vmatmul.mubr.bf16.gmra.mrb[196].mxu0 %v12943_v12  ;;  %v15195_v12 = vadd.f32 %v11047_v59, %v15143_v43 }
 0x63e   :  { %4047 = vmatprep.mubr.bf16.mxu0 %v12944_v62  ;;  %v11049_v62 = vpop.f32.mrb[45].mxu1 }
 0x63f   :  { %v4603_v3 = vpack.c.bf16 %v15195_v12, %v15192_v49  ;;  %v11050_v23 = vadd.f32 %v11049_v62, %v11048_v6  ;;  %v11051_v37 = vpop.f32.mrb[46].mxu1  ;;  %v13358_v49 = vld [vmem:[%s15749_s0 + $0x28] sm:$0xff]   ;;  %v12955_v12 = vld [vmem:[#allocation2 + $0x804] ss:$16 sps:$4 sm:$0xff]  }
 0x640   :  { %v11052_v24 = vpop.f32.mrb[47].mxu1 }
 0x641   :  { %v15200_v46 = vadd.f32 %v11050_v23, %v15146_v15  ;;  %v11054_v43 = vpop.f32.mrb[48].mxu1 }
 0x642   :  { %v11055_v20 = vpop.f32.mrb[49].mxu1 }
 0x643   :  { %v11056_v33 = vadd.f32 %v11055_v20, %v11054_v43  ;;  %v11057_v5 = vpop.f32.mrb[50].mxu1 }
 0x644   :  { %v11058_v63 = vpop.f32.mrb[51].mxu1 }
 0x645   :  { %4048 = vmatmul.mubr.bf16.gmra.mrb[200].mxu0 %v12946_v30  ;;  %v11053_v30 = vadd.f32 %v11052_v24, %v11051_v37  ;;  %v15208_v22 = vadd.f32 %v11056_v33, %v15159_v9 }
 0x646   :  { %4055 = vmatprep.mubr.bf16.mxu0 %v12947_v38 }
 0x647   :  { %v15203_v38 = vadd.f32 %v11053_v30, %v15150_v35  ;;  %v11060_v35 = vpop.f32.mrb[52].mxu1 }
 0x648   :  { %v11061_v57 = vpop.f32.mrb[53].mxu1 }
 0x649   :  { %v4604_v58 = vpack.c.bf16 %v15203_v38, %v15200_v46  ;;  %v11063_v56 = vpop.f32.mrb[54].mxu1  ;;  %v11062_v13 = vadd.f32 %v11061_v57, %v11060_v35  ;;  %v12956_v35 = vld [vmem:[#allocation2 + $0x828] ss:$16 sps:$4 sm:$0xff]   ;;  %v12964_v57 = vld [vmem:[#allocation2 + $0x84c] ss:$16 sps:$4 sm:$0xff]   ;;  %v13360_v46 = vld [vmem:[%s15749_s0 + $0x30] sm:$0xff]  }
 0x64a   :  { %v11064_v25 = vpop.f32.mrb[55].mxu1  ;;  %v13361_v38 = vld [vmem:[%s15749_s0 + $0x78] sm:$0xff]  }
 0x64b   :  { %v11065_v61 = vadd.f32 %v11064_v25, %v11063_v56  ;;  %v15216_v31 = vadd.f32 %v11062_v13, %v15163_v0  ;;  %v12968_v56 = vld [vmem:[#allocation2 + $0x868] ss:$16 sps:$4 sm:$0xff]  }
 0x64d   :  { %4056 = vmatmul.mubr.bf16.gmra.mrb[204].mxu0 %v12949_v54  ;;  %v11059_v54 = vadd.f32 %v11058_v63, %v11057_v5  ;;  %v15219_v51 = vadd.f32 %v11065_v61, %v15165_v28  ;;  %v12950_v5 = vld [vmem:[#allocation2 + $0x808] ss:$16 sps:$4 sm:$0xff]   ;;  %v12952_v63 = vld [vmem:[#allocation2 + $0x80c] ss:$16 sps:$4 sm:$0xff]  }
 0x64e   :  { %5073 = vmatprep.mubr.bf16.mxu1 %v12952_v63 }
 0x64f   :  { %v15211_v17 = vadd.f32 %v11059_v54, %v15161_v60  ;;  %v4606_v9 = vpack.c.bf16 %v15219_v51, %v15216_v31  ;;  %v11066_v60 = vpop.f32.mrb[56].mxu1  ;;  %5074 = vmatmul.mubr.bf16.vlgmr.msra.gmra.mrb[64].mxu1 %v12950_v5  ;;  %v12958_v54 = vld [vmem:[#allocation2 + $0x82c] ss:$16 sps:$4 sm:$0xff]   ;;  %v12961_v51 = vld [vmem:[#allocation2 + $0x820] ss:$16 sps:$4 sm:$0xff]  }
 0x650   :  { %v11067_v55 = vpop.f32.mrb[57].mxu1  ;;  %5081 = vmatprep.mubr.bf16.mxu1 %v12958_v54  ;;  %v12982_v5 = vld [vmem:[#allocation2 + $0x8ac] ss:$16 sps:$4 sm:$0xff]   ;;  %v12980_v54 = vld [vmem:[#allocation2 + $0x8a8] ss:$16 sps:$4 sm:$0xff]  }
 0x651   :  { %v4605_v15 = vpack.c.bf16 %v15211_v17, %v15208_v22  ;;  %v11069_v27 = vpop.f32.mrb[58].mxu1  ;;  %v11068_v19 = vadd.f32 %v11067_v55, %v11066_v60  ;;  %v12976_v55 = vld [vmem:[#allocation2 + $0x88c] ss:$16 sps:$4 sm:$0xff]   ;;  %v12953_v22 = vld [vmem:[#allocation2 + $0x800] ss:$16 sps:$4 sm:$0xff]  }
 0x652   :  { %v11070_v29 = vpop.f32.mrb[59].mxu1  ;;  %v13362_v17 = vld [vmem:[%s15749_s0 + $0x38] sm:$0xff]  }
 0x653   :  { %v11071_v59 = vadd.f32 %v11070_v29, %v11069_v27  ;;  %v15224_v6 = vadd.f32 %v11068_v19, %v15167_v26  ;;  %v11072_v28 = vpop.f32.mrb[60].mxu1  ;;  %v12974_v19 = vld [vmem:[#allocation2 + $0x888] ss:$16 sps:$4 sm:$0xff]  }
 0x654   :  { %v11073_v23 = vpop.f32.mrb[61].mxu1 }
 0x655   :  { %v15227_v62 = vadd.f32 %v11071_v59, %v15169_v50  ;;  %v11075_v37 = vpop.f32.mrb[62].mxu1  ;;  %v11074_v24 = vadd.f32 %v11073_v23, %v11072_v28  ;;  %v4610_v50 = vld [vmem:[#allocation4 + $0xe] sm:$0x3] }
 0x656   :  { %v11076_v30 = vpop.f32.mrb[63].mxu1  ;;  %12507 = vmatprep.subr.msk.bf16.mxu0 %vm1304_vm0, %v4610_v50 }
 0x657   :  { %v4607_v0 = vpack.c.bf16 %v15227_v62, %v15224_v6  ;;  %v11077_v43 = vadd.f32 %v11076_v30, %v11075_v37  ;;  %v15232_v20 = vadd.f32 %v11074_v24, %v15171_v21  ;;  %5082 = vmatmul.mubr.bf16.gmra.mrb[68].mxu1 %v12956_v35  ;;  %v12962_v21 = vld [vmem:[#allocation2 + $0x848] ss:$16 sps:$4 sm:$0xff]   ;;  %v12967_v6 = vld [vmem:[#allocation2 + $0x840] ss:$16 sps:$4 sm:$0xff]   ;;  %v12971_v62 = vld [vmem:[#allocation2 + $0x864] ss:$16 sps:$4 sm:$0xff]  }
 0x658   :  { %5089 = vmatprep.mubr.bf16.mxu1 %v12964_v57 }
 0x659   :  { %v15235_v33 = vadd.f32 %v11077_v43, %v15173_v42  ;;  %v12970_v42 = vld [vmem:[#allocation2 + $0x86c] ss:$16 sps:$4 sm:$0xff]  }
 0x65b   :  { %v4608_v26 = vpack.c.bf16 %v15235_v33, %v15232_v20  ;;  %v12977_v20 = vld [vmem:[#allocation2 + $0x884] ss:$16 sps:$4 sm:$0xff]   ;;  %v12979_v33 = vld [vmem:[#allocation2 + $0x880] ss:$16 sps:$4 sm:$0xff]  }
 0x65f   :  { %5090 = vmatmul.mubr.bf16.gmra.mrb[72].mxu1 %v12962_v21 }
 0x660   :  { %5097 = vmatprep.mubr.bf16.mxu1 %v12970_v42  ;;  %v4636_v42 = vsel %vm1304_vm0, %v4610_v50, 0 }
 0x667   :  { %5098 = vmatmul.mubr.bf16.gmra.mrb[76].mxu1 %v12968_v56 }
 0x668   :  { %5105 = vmatprep.mubr.bf16.mxu1 %v12976_v55  ;;  %v12986_v55 = vld [vmem:[#allocation2 + $0x8c8] ss:$16 sps:$4 sm:$0xff]  }
 0x66f   :  { %5106 = vmatmul.mubr.bf16.gmra.mrb[80].mxu1 %v12974_v19 }
 0x670   :  { %5113 = vmatprep.mubr.bf16.mxu1 %v12982_v5 }
 0x677   :  { %5114 = vmatmul.mubr.bf16.gmra.mrb[84].mxu1 %v12980_v54 }
 0x6e8   :  { %v10893_v13 = vpop.f32.mrb[176].mxu0 }
 0x6e9   :  { %v10894_v25 = vpop.f32.mrb[177].mxu0 }
 0x6ea   :  { %v10895_v61 = vadd.f32 %v10894_v25, %v10893_v13  ;;  %v10896_v60 = vpop.f32.mrb[178].mxu0 }
 0x6eb   :  { %v10897_v27 = vpop.f32.mrb[179].mxu0 }
 0x6ec   :  { %v4002_v29 = vadd.f32 %v10895_v61, %v15071_v1  ;;  %v10898_v59 = vadd.f32 %v10897_v27, %v10896_v60  ;;  %v12988_v61 = vld [vmem:[#allocation2 + $0x8cc] ss:$16 sps:$4 sm:$0xff]  }
 0x6ed   :  { %5121 = vmatprep.mubr.bf16.mxu1 %v12988_v61 }
 0x6ee   :  { %v4005_v28 = vadd.f32 %v10898_v59, %v15074_v48  ;;  %5122 = vmatmul.mubr.bf16.gmra.mrb[88].mxu1 %v12986_v55 }
 0x6f0   :  { %v4064_v23 = vpack.c.bf16 %v4005_v28, %v4002_v29  ;;  %v10899_v37 = vpop.f32.mrb[180].mxu0 }
 0x6f1   :  { %v10900_v24 = vpop.f32.mrb[181].mxu0 }
 0x6f2   :  { %v10901_v30 = vadd.f32 %v10900_v24, %v10899_v37  ;;  %v10902_v43 = vpop.f32.mrb[182].mxu0  ;;  %11652 = vmatprep.mubr.msk.bf16.mxu0 %vm1279_vm1, %v4064_v23  ;;  %v12994_v37 = vld [vmem:[#allocation2 + $0x8ec] ss:$16 sps:$4 sm:$0xff]  }
 0x6f3   :  { %v10903_v63 = vpop.f32.mrb[183].mxu0  ;;  %5129 = vmatprep.mubr.bf16.mxu1 %v12994_v37 }
 0x6f4   :  { %v4010_v35 = vadd.f32 %v10901_v30, %v15076_v52  ;;  %v10904_v57 = vadd.f32 %v10903_v63, %v10902_v43 }
 0x6f6   :  { %v4013_v1 = vadd.f32 %v10904_v57, %v15079_v11  ;;  %v13347_v11 = vld [vmem:[%s15749_s0 + $0x40] sm:$0xff]  }
 0x6f8   :  { %v4065_v21 = vpack.c.bf16 %v4013_v1, %v4010_v35  ;;  %v10905_v48 = vpop.f32.mrb[184].mxu0 }
 0x6f9   :  { %v10906_v56 = vpop.f32.mrb[185].mxu0 }
 0x6fa   :  { %v10907_v13 = vadd.f32 %v10906_v56, %v10905_v48  ;;  %v10908_v25 = vpop.f32.mrb[186].mxu0  ;;  %11653 = vmatmul.mubr.msk.bf16.vlgmr.msra.gmra.mrb[64].mxu0 %vm1279_vm1, %v4065_v21 }
 0x6fb   :  { %v10909_v60 = vpop.f32.mrb[187].mxu0  ;;  %11669 = vmatpush3.bf16.msra.mxu0 %v4636_v42 }
 0x6fc   :  { %v4018_v52 = vadd.f32 %v10907_v13, %v15082_v18  ;;  %v10910_v27 = vadd.f32 %v10909_v60, %v10908_v25  ;;  %11087 = vmatprep.subr.bf16.mxu0 %v13347_v11  ;;  %v12992_v18 = vld [vmem:[#allocation2 + $0x8e8] ss:$16 sps:$4 sm:$0xff]  }
 0x6fd   :  { %5130 = vmatmul.mubr.bf16.gmra.mrb[92].mxu1 %v12992_v18 }
 0x6fe   :  { %v4021_v50 = vadd.f32 %v10910_v27, %v15085_v45 }
 0x700   :  { %v4066_v19 = vpack.c.bf16 %v4021_v50, %v4018_v52  ;;  %v10911_v29 = vpop.f32.mrb[188].mxu0 }
 0x701   :  { %v10912_v59 = vpop.f32.mrb[189].mxu0 }
 0x702   :  { %v10913_v28 = vadd.f32 %v10912_v59, %v10911_v29  ;;  %v10914_v23 = vpop.f32.mrb[190].mxu0  ;;  %11656 = vmatprep.mubr.msk.bf16.mxu0 %vm1279_vm1, %v4066_v19 }
 0x703   :  { %v10915_v24 = vpop.f32.mrb[191].mxu0 }
 0x704   :  { %v4026_v30 = vadd.f32 %v10913_v28, %v15087_v34  ;;  %v10916_v43 = vadd.f32 %v10915_v24, %v10914_v23 }
 0x706   :  { %v4029_v5 = vadd.f32 %v10916_v43, %v15090_v36 }
 0x708   :  { %v4067_v63 = vpack.c.bf16 %v4029_v5, %v4026_v30  ;;  %v10917_v45 = vpop.f32.mrb[192].mxu0 }
 0x709   :  { %v10918_v54 = vpop.f32.mrb[193].mxu0 }
 0x70a   :  { %v10919_v35 = vadd.f32 %v10918_v54, %v10917_v45  ;;  %v10920_v57 = vpop.f32.mrb[194].mxu0  ;;  %11657 = vmatmul.mubr.msk.bf16.gmra.mrb[68].mxu0 %vm1279_vm1, %v4067_v63  ;;  %v12985_v45 = vld [vmem:[#allocation2 + $0x8a0] ss:$16 sps:$4 sm:$0xff]   ;;  %v12989_v54 = vld [vmem:[#allocation2 + $0x8c4] ss:$16 sps:$4 sm:$0xff]  }
 0x70b   :  { %v10921_v1 = vpop.f32.mrb[195].mxu0 }
 0x70c   :  { %v4034_v21 = vadd.f32 %v10919_v35, %v15095_v10  ;;  %v10922_v48 = vadd.f32 %v10921_v1, %v10920_v57  ;;  %v12991_v35 = vld [vmem:[#allocation2 + $0x8c0] ss:$16 sps:$4 sm:$0xff]   ;;  %v12995_v57 = vld [vmem:[#allocation2 + $0x8e4] ss:$16 sps:$4 sm:$0xff]  }
 0x70d   :  { %v12997_v1 = vld [vmem:[#allocation2 + $0x8e0] ss:$16 sps:$4 sm:$0xff]  }
 0x70e   :  { %v4037_v42 = vadd.f32 %v10922_v48, %v15098_v8 }
 0x710   :  { %v4068_v56 = vpack.c.bf16 %v4037_v42, %v4034_v21  ;;  %v10923_v34 = vpop.f32.mrb[196].mxu0 }
 0x711   :  { %v10924_v13 = vpop.f32.mrb[197].mxu0 }
 0x712   :  { %v10925_v25 = vadd.f32 %v10924_v13, %v10923_v34  ;;  %v10926_v61 = vpop.f32.mrb[198].mxu0  ;;  %11660 = vmatprep.mubr.msk.bf16.mxu0 %vm1279_vm1, %v4068_v56 }
 0x713   :  { %v10927_v36 = vpop.f32.mrb[199].mxu0 }
 0x714   :  { %v4042_v60 = vadd.f32 %v10925_v25, %v15102_v32  ;;  %v10928_v55 = vadd.f32 %v10927_v36, %v10926_v61 }
 0x716   :  { %v4045_v52 = vadd.f32 %v10928_v55, %v15105_v2 }
 0x718   :  { %v4069_v27 = vpack.c.bf16 %v4045_v52, %v4042_v60  ;;  %v10929_v11 = vpop.f32.mrb[200].mxu0 }
 0x719   :  { %v10930_v50 = vpop.f32.mrb[201].mxu0 }
 0x71a   :  { %v10931_v10 = vadd.f32 %v10930_v50, %v10929_v11  ;;  %v10932_v19 = vpop.f32.mrb[202].mxu0  ;;  %11661 = vmatmul.mubr.msk.bf16.gmra.mrb[72].mxu0 %vm1279_vm1, %v4069_v27 }
 0x71b   :  { %v10933_v8 = vpop.f32.mrb[203].mxu0 }
 0x71c   :  { %v4050_v29 = vadd.f32 %v10931_v10, %v15110_v39  ;;  %v10934_v59 = vadd.f32 %v10933_v8, %v10932_v19  ;;  %v13348_v39 = vld [vmem:[%s15749_s0] sm:$0xff]  }
 0x71e   :  { %v4053_v28 = vadd.f32 %v10934_v59, %v15113_v47  ;;  %v13349_v47 = vld [vmem:[%s15749_s0 + $0x48] sm:$0xff]  }
 0x720   :  { %v4070_v23 = vpack.c.bf16 %v4053_v28, %v4050_v29  ;;  %v10935_v37 = vpop.f32.mrb[204].mxu0 }
 0x721   :  { %v10936_v24 = vpop.f32.mrb[205].mxu0 }
 0x722   :  { %v10937_v32 = vadd.f32 %v10936_v24, %v10935_v37  ;;  %v10938_v18 = vpop.f32.mrb[206].mxu0  ;;  %11664 = vmatprep.mubr.msk.bf16.mxu0 %vm1279_vm1, %v4070_v23  ;;  %v11167_v21 = vpop.f32.mrb[64].mxu1 }
 0x723   :  { %v10939_v2 = vpop.f32.mrb[207].mxu0  ;;  %v11168_v48 = vpop.f32.mrb[65].mxu1 }
 0x724   :  { %v4058_v30 = vadd.f32 %v10937_v32, %v15117_v14  ;;  %v10940_v43 = vadd.f32 %v10939_v2, %v10938_v18  ;;  %v13350_v14 = vld [vmem:[%s15749_s0 + $0x8] sm:$0xff]   ;;  %v11169_v42 = vadd.f32 %v11168_v48, %v11167_v21  ;;  %v11170_v56 = vpop.f32.mrb[66].mxu1 }
 0x725   :  { %v11171_v34 = vpop.f32.mrb[67].mxu1 }
 0x726   :  { %v4061_v5 = vadd.f32 %v10940_v43, %v15120_v40  ;;  %v13351_v40 = vld [vmem:[%s15749_s0 + $0x50] sm:$0xff]   ;;  %v11172_v13 = vadd.f32 %v11171_v34, %v11170_v56 }
 0x728   :  { %v4071_v63 = vpack.c.bf16 %v4061_v5, %v4058_v30 }
 0x72a   :  { %11665 = vmatmul.mubr.msk.bf16.gmra.mrb[76].mxu0 %vm1279_vm1, %v4071_v63  ;;  %v11173_v25 = vpop.f32.mrb[68].mxu1 }
 0x72b   :  { %11670 = vmatprep.mubr.msk.bf16.mxu0 %vm1279_vm1, %v4601_v7  ;;  %v13354_v7 = vld [vmem:[%s15749_s0 + $0x18] sm:$0xff]   ;;  %v11174_v61 = vpop.f32.mrb[69].mxu1 }
 0x72c   :  { %v11176_v36 = vpop.f32.mrb[70].mxu1  ;;  %v11175_v60 = vadd.f32 %v11174_v61, %v11173_v25 }
 0x72d   :  { %v11177_v55 = vpop.f32.mrb[71].mxu1 }
 0x72e   :  { %v11178_v52 = vadd.f32 %v11177_v55, %v11176_v36 }
 0x732   :  { %11671 = vmatmul.mubr.msk.bf16.vlgmr.msra.gmra.mrb[64].mxu0 %vm1279_vm1, %v4602_v16  ;;  %v13357_v16 = vld [vmem:[%s15749_s0 + $0x68] sm:$0xff]   ;;  %v11179_v27 = vpop.f32.mrb[72].mxu1 }
 0x733   :  { %11674 = vmatprep.mubr.msk.bf16.mxu0 %vm1279_vm1, %v4603_v3  ;;  %11088 = vmatpush3.bf16.msra.mxu0 %v13348_v39  ;;  %v13359_v3 = vld [vmem:[%s15749_s0 + $0x70] sm:$0xff]   ;;  %v11180_v11 = vpop.f32.mrb[73].mxu1 }
 0x734   :  { %11089 = vmatprep.subr.bf16.mxu0 %v13349_v47  ;;  %v11182_v50 = vpop.f32.mrb[74].mxu1  ;;  %v11181_v10 = vadd.f32 %v11180_v11, %v11179_v27 }
 0x735   :  { %v11183_v19 = vpop.f32.mrb[75].mxu1 }
 0x736   :  { %v11184_v8 = vadd.f32 %v11183_v19, %v11182_v50 }
 0x737   :  { %11090 = vmatpush3.bf16.msra.mxu0 %v13350_v14 }
 0x738   :  { %11091 = vmatprep.subr.bf16.mxu0 %v13351_v40 }
 0x73a   :  { %11675 = vmatmul.mubr.msk.bf16.gmra.mrb[68].mxu0 %vm1279_vm1, %v4604_v58  ;;  %v5147_v58 = vld [vmem:[#allocation4 + $0x10] sm:$0x3]  ;;  %v11185_v29 = vpop.f32.mrb[76].mxu1 }
 0x73b   :  { %11678 = vmatprep.mubr.msk.bf16.mxu0 %vm1279_vm1, %v4605_v15  ;;  %11092 = vmatpush3.bf16.msra.mxu0 %v13352_v41  ;;  %v12959_v15 = vld [vmem:[#allocation2 + $0x824] ss:$16 sps:$4 sm:$0xff]   ;;  %v5173_v31 = vsel %vm1304_vm0, %v5147_v58, 0  ;;  %v11186_v59 = vpop.f32.mrb[77].mxu1 }
 0x73c   :  { %11093 = vmatprep.subr.bf16.mxu0 %v13353_v44  ;;  %v11188_v28 = vpop.f32.mrb[78].mxu1  ;;  %v11187_v23 = vadd.f32 %v11186_v59, %v11185_v29 }
 0x73d   :  { %v11189_v37 = vpop.f32.mrb[79].mxu1 }
 0x73e   :  { %v11190_v24 = vadd.f32 %v11189_v37, %v11188_v28 }
 0x73f   :  { %11094 = vmatpush3.bf16.msra.mxu0 %v13354_v7 }
 0x740   :  { %11095 = vmatprep.subr.bf16.mxu0 %v13355_v53 }
 0x742   :  { %11679 = vmatmul.mubr.msk.bf16.gmra.mrb[72].mxu0 %vm1279_vm1, %v4606_v9  ;;  %v12965_v9 = vld [vmem:[#allocation2 + $0x844] ss:$16 sps:$4 sm:$0xff]   ;;  %v11191_v32 = vpop.f32.mrb[80].mxu1 }
 0x743   :  { %11682 = vmatprep.mubr.msk.bf16.mxu0 %vm1279_vm1, %v4607_v0  ;;  %11096 = vmatpush3.bf16.msra.mxu0 %v13356_v4  ;;  %v12973_v0 = vld [vmem:[#allocation2 + $0x860] ss:$16 sps:$4 sm:$0xff]   ;;  %v11192_v18 = vpop.f32.mrb[81].mxu1 }
 0x744   :  { %11097 = vmatprep.subr.bf16.mxu0 %v13357_v16  ;;  %v11194_v2 = vpop.f32.mrb[82].mxu1  ;;  %v15347_v30 = vadd.f32 %v11192_v18, %v11191_v32 }
 0x745   :  { %v11195_v43 = vpop.f32.mrb[83].mxu1 }
 0x746   :  { %v15349_v5 = vadd.f32 %v11195_v43, %v11194_v2 }
 0x747   :  { %11098 = vmatpush3.bf16.msra.mxu0 %v13358_v49 }
 0x748   :  { %11099 = vmatprep.subr.bf16.mxu0 %v13359_v3 }
 0x74a   :  { %11683 = vmatmul.mubr.msk.bf16.gmra.mrb[76].mxu0 %vm1279_vm1, %v4608_v26  ;;  %v12983_v26 = vld [vmem:[#allocation2 + $0x8a4] ss:$16 sps:$4 sm:$0xff]   ;;  %v11197_v63 = vpop.f32.mrb[84].mxu1 }
 0x74b   :  { %11100 = vmatpush3.bf16.msra.mxu0 %v13360_v46  ;;  %4976 = vmatprep.mubr.bf16.mxu0 %v12955_v12  ;;  %v11198_v39 = vpop.f32.mrb[85].mxu1 }
 0x74c   :  { %11101 = vmatprep.subr.bf16.mxu0 %v13361_v38  ;;  %v11200_v47 = vpop.f32.mrb[86].mxu1  ;;  %v15351_v14 = vadd.f32 %v11198_v39, %v11197_v63 }
 0x74d   :  { %v11201_v40 = vpop.f32.mrb[87].mxu1 }
 0x74e   :  { %v15353_v41 = vadd.f32 %v11201_v40, %v11200_v47 }
 0x74f   :  { %11102 = vmatpush3.bf16.msra.mxu0 %v13362_v17 }
 0x750   :  { %12508 = vmatprep.subr.msk.bf16.mxu0 %vm1304_vm0, %v5147_v58 }
 0x752   :  { %4977 = vmatmul.mubr.bf16.vlgmr.msra.gmra.mrb[208].mxu0 %v12953_v22 }
 0x753   :  { %4984 = vmatprep.mubr.bf16.mxu0 %v12959_v15  ;;  %11687 = vmatpush3.bf16.msra.mxu0 %v5173_v31 }
 0x75a   :  { %4985 = vmatmul.mubr.bf16.gmra.mrb[212].mxu0 %v12961_v51 }
 0x75b   :  { %4992 = vmatprep.mubr.bf16.mxu0 %v12965_v9 }
 0x762   :  { %4993 = vmatmul.mubr.bf16.gmra.mrb[216].mxu0 %v12967_v6 }
 0x763   :  { %5000 = vmatprep.mubr.bf16.mxu0 %v12971_v62 }
 0x76a   :  { %5001 = vmatmul.mubr.bf16.gmra.mrb[220].mxu0 %v12973_v0 }
 0x76b   :  { %5008 = vmatprep.mubr.bf16.mxu0 %v12977_v20 }
 0x772   :  { %5009 = vmatmul.mubr.bf16.gmra.mrb[224].mxu0 %v12979_v33 }
 0x773   :  { %5016 = vmatprep.mubr.bf16.mxu0 %v12983_v26 }
 0x77a   :  { %5017 = vmatmul.mubr.bf16.gmra.mrb[228].mxu0 %v12985_v45 }
 0x77b   :  { %5024 = vmatprep.mubr.bf16.mxu0 %v12989_v54 }
 0x782   :  { %5025 = vmatmul.mubr.bf16.gmra.mrb[232].mxu0 %v12991_v35 }
 0x783   :  { %5032 = vmatprep.mubr.bf16.mxu0 %v12995_v57 }
 0x78a   :  { %5033 = vmatmul.mubr.bf16.gmra.mrb[236].mxu0 %v12997_v1 }
 0x7c1   :  { %v11203_v44 = vpop.f32.mrb[88].mxu1 }
 0x7c2   :  { %v11204_v7 = vpop.f32.mrb[89].mxu1 }
 0x7c3   :  { %v11206_v53 = vpop.f32.mrb[90].mxu1  ;;  %v15355_v4 = vadd.f32 %v11204_v7, %v11203_v44 }
 0x7c4   :  { %v11207_v16 = vpop.f32.mrb[91].mxu1 }
 0x7c5   :  { %v15357_v49 = vadd.f32 %v11207_v16, %v11206_v53 }
 0x7d0   :  { %v11209_v12 = vpop.f32.mrb[92].mxu1 }
 0x7d1   :  { %v11210_v3 = vpop.f32.mrb[93].mxu1 }
 0x7d2   :  { %v11212_v46 = vpop.f32.mrb[94].mxu1  ;;  %v15359_v38 = vadd.f32 %v11210_v3, %v11209_v12 }
 0x7d3   :  { %v11213_v58 = vpop.f32.mrb[95].mxu1 }
 0x7d4   :  { %v15361_v22 = vadd.f32 %v11213_v58, %v11212_v46 }
 0x825   :  { %v11103_v17 = vpop.f32.mrb[208].mxu0 }
 0x826   :  { %v11104_v15 = vpop.f32.mrb[209].mxu0 }
 0x827   :  { %v11105_v31 = vadd.f32 %v11104_v15, %v11103_v17  ;;  %v11106_v51 = vpop.f32.mrb[210].mxu0 }
 0x828   :  { %v11107_v9 = vpop.f32.mrb[211].mxu0 }
 0x829   :  { %v5076_v6 = vadd.f32 %v11169_v42, %v11105_v31  ;;  %v11108_v62 = vadd.f32 %v11107_v9, %v11106_v51 }
 0x82b   :  { %v5079_v0 = vadd.f32 %v11172_v13, %v11108_v62 }
 0x82d   :  { %v5138_v20 = vpack.c.bf16 %v5079_v0, %v5076_v6  ;;  %v11109_v33 = vpop.f32.mrb[212].mxu0 }
 0x82e   :  { %v11110_v26 = vpop.f32.mrb[213].mxu0 }
 0x82f   :  { %v11111_v45 = vadd.f32 %v11110_v26, %v11109_v33  ;;  %v11112_v54 = vpop.f32.mrb[214].mxu0  ;;  %11688 = vmatprep.mubr.msk.bf16.mxu0 %vm1279_vm1, %v5138_v20 }
 0x830   :  { %v11113_v35 = vpop.f32.mrb[215].mxu0 }
 0x831   :  { %v5084_v57 = vadd.f32 %v11175_v60, %v11111_v45  ;;  %v11114_v1 = vadd.f32 %v11113_v35, %v11112_v54  ;;  %v13000_v54 = vld [vmem:[#allocation7] sm:$0xff]  }
 0x832   :  { %11720 = vmatprep.mubr.bf16.mxu1 %v13000_v54  ;;  %v13013_v54 = vld [vmem:[#allocation9 + $0x48] sm:$0xff]  }
 0x833   :  { %v5087_v21 = vadd.f32 %v11178_v52, %v11114_v1 }
 0x835   :  { %v5139_v48 = vpack.c.bf16 %v5087_v21, %v5084_v57  ;;  %v11115_v56 = vpop.f32.mrb[216].mxu0 }
 0x836   :  { %v11116_v34 = vpop.f32.mrb[217].mxu0 }
 0x837   :  { %v11117_v25 = vadd.f32 %v11116_v34, %v11115_v56  ;;  %v11118_v61 = vpop.f32.mrb[218].mxu0  ;;  %11689 = vmatmul.mubr.msk.bf16.vlgmr.msra.gmra.mrb[64].mxu0 %vm1279_vm1, %v5139_v48 }
 0x838   :  { %v11119_v42 = vpop.f32.mrb[219].mxu0 }
 0x839   :  { %v5092_v13 = vadd.f32 %v11181_v10, %v11117_v25  ;;  %v11120_v36 = vadd.f32 %v11119_v42, %v11118_v61 }
 0x83b   :  { %v5095_v55 = vadd.f32 %v11184_v8, %v11120_v36 }
 0x83d   :  { %v5140_v27 = vpack.c.bf16 %v5095_v55, %v5092_v13  ;;  %v11121_v11 = vpop.f32.mrb[220].mxu0 }
 0x83e   :  { %v11122_v50 = vpop.f32.mrb[221].mxu0 }
 0x83f   :  { %v11123_v19 = vadd.f32 %v11122_v50, %v11121_v11  ;;  %v11124_v29 = vpop.f32.mrb[222].mxu0  ;;  %11692 = vmatprep.mubr.msk.bf16.mxu0 %vm1279_vm1, %v5140_v27 }
 0x840   :  { %v11125_v60 = vpop.f32.mrb[223].mxu0 }
 0x841   :  { %v5100_v52 = vadd.f32 %v11187_v23, %v11123_v19  ;;  %v11126_v59 = vadd.f32 %v11125_v60, %v11124_v29 }
 0x843   :  { %v5103_v28 = vadd.f32 %v11190_v24, %v11126_v59 }
 0x845   :  { %v5141_v37 = vpack.c.bf16 %v5103_v28, %v5100_v52  ;;  %v11127_v32 = vpop.f32.mrb[224].mxu0 }
 0x846   :  { %v11128_v18 = vpop.f32.mrb[225].mxu0 }
 0x847   :  { %v11129_v2 = vadd.f32 %v11128_v18, %v11127_v32  ;;  %v11130_v43 = vpop.f32.mrb[226].mxu0  ;;  %11693 = vmatmul.mubr.msk.bf16.gmra.mrb[68].mxu0 %vm1279_vm1, %v5141_v37 }
 0x848   :  { %v11131_v10 = vpop.f32.mrb[227].mxu0 }
 0x849   :  { %v5108_v8 = vadd.f32 %v15347_v30, %v11129_v2  ;;  %v11132_v63 = vadd.f32 %v11131_v10, %v11130_v43 }
 0x84b   :  { %v5111_v39 = vadd.f32 %v15349_v5, %v11132_v63 }
 0x84d   :  { %v5142_v47 = vpack.c.bf16 %v5111_v39, %v5108_v8  ;;  %v11133_v40 = vpop.f32.mrb[228].mxu0 }
 0x84e   :  { %v11134_v44 = vpop.f32.mrb[229].mxu0 }
 0x84f   :  { %v11135_v7 = vadd.f32 %v11134_v44, %v11133_v40  ;;  %v11136_v23 = vpop.f32.mrb[230].mxu0  ;;  %11696 = vmatprep.mubr.msk.bf16.mxu0 %vm1279_vm1, %v5142_v47 }
 0x850   :  { %v11137_v24 = vpop.f32.mrb[231].mxu0 }
 0x851   :  { %v5116_v53 = vadd.f32 %v15351_v14, %v11135_v7  ;;  %v11138_v16 = vadd.f32 %v11137_v24, %v11136_v23 }
 0x853   :  { %v5119_v12 = vadd.f32 %v15353_v41, %v11138_v16 }
 0x855   :  { %v5143_v3 = vpack.c.bf16 %v5119_v12, %v5116_v53  ;;  %v11139_v46 = vpop.f32.mrb[232].mxu0 }
 0x856   :  { %v11140_v58 = vpop.f32.mrb[233].mxu0 }
 0x857   :  { %v11141_v30 = vadd.f32 %v11140_v58, %v11139_v46  ;;  %v11142_v17 = vpop.f32.mrb[234].mxu0  ;;  %11697 = vmatmul.mubr.msk.bf16.gmra.mrb[72].mxu0 %vm1279_vm1, %v5143_v3 }
 0x858   :  { %v11143_v5 = vpop.f32.mrb[235].mxu0 }
 0x859   :  { %v5124_v15 = vadd.f32 %v15355_v4, %v11141_v30  ;;  %v11144_v31 = vadd.f32 %v11143_v5, %v11142_v17  ;;  %v12998_v4 = vld [vmem:[#allocation7 + $0x10] sm:$0xff]  }
 0x85b   :  { %v5127_v51 = vadd.f32 %v15357_v49, %v11144_v31  ;;  %v15379_v49 = vld [vmem:[#allocation6] ss:$0 sm:$0xff] }
 0x85d   :  { %v5144_v9 = vpack.c.bf16 %v5127_v51, %v5124_v15  ;;  %v11145_v6 = vpop.f32.mrb[236].mxu0 }
 0x85e   :  { %v11146_v62 = vpop.f32.mrb[237].mxu0 }
 0x85f   :  { %v11147_v14 = vadd.f32 %v11146_v62, %v11145_v6  ;;  %v11148_v0 = vpop.f32.mrb[238].mxu0  ;;  %11700 = vmatprep.mubr.msk.bf16.mxu0 %vm1279_vm1, %v5144_v9 }
 0x860   :  { %v11149_v41 = vpop.f32.mrb[239].mxu0 }
 0x861   :  { %v5132_v20 = vadd.f32 %v15359_v38, %v11147_v14  ;;  %v11150_v33 = vadd.f32 %v11149_v41, %v11148_v0  ;;  %v12999_v41 = vld [vmem:[#allocation7 + $0x18] sm:$0xff]  }
 0x863   :  { %v5135_v26 = vadd.f32 %v15361_v22, %v11150_v33  ;;  %v13002_v33 = vld [vmem:[#allocation7 + $0x20] sm:$0xff]  }
 0x865   :  { %v5145_v45 = vpack.c.bf16 %v5135_v26, %v5132_v20  ;;  %v13001_v20 = vld [vmem:[#allocation7 + $0x8] sm:$0xff]  }
 0x866   :  { %v13003_v26 = vld [vmem:[#allocation7 + $0x28] sm:$0xff]  }
 0x867   :  { %11701 = vmatmul.mubr.msk.bf16.gmra.mrb[76].mxu0 %vm1279_vm1, %v5145_v45  ;;  %v13004_v45 = vld [vmem:[#allocation7 + $0x30] sm:$0xff]  }
 0x868   :  { %11740 = vmatprep.mubr.bf16.mxu0 %v12998_v4  ;;  %v13012_v4 = vld [vmem:[#allocation9 + $0x40] sm:$0xff]  }
 0x90a   :  { %v11690_v35 = vpop.f32.mrb[64].mxu0 }
 0x90b   :  { %v5297_v57 = vadd.f32 %v11690_v35, %v15379_v49  ;;  %v5209_v1 = vpop.f32.mrb[65].mxu0  ;;  %v13006_v35 = vld [vmem:[#allocation7 + $0x40] sm:$0xff]  }
 0x90c   :  { %v5295_v21 = vadd.f32 %v15379_v49, %v5209_v1  ;;  %v11691_v48 = vpop.f32.mrb[66].mxu0  ;;  %v13017_v1 = vld [vmem:[#allocation9 + $0x58] sm:$0xff]  }
 0x90d   :  { %v5298_v38 = vadd.f32 %v11691_v48, %v15379_v49  ;;  %v5212_v56 = vpop.f32.mrb[67].mxu0  ;;  %v5313_v34 = vmax.f32 %v5297_v57, 0.0  ;;  %v13015_v57 = vld [vmem:[#allocation9 + $0x50] sm:$0xff]   ;;  %v13019_v48 = vld [vmem:[#allocation9 + $0x68] sm:$0xff]  }
 0x90e   :  { %v5296_v22 = vadd.f32 %v15379_v49, %v5212_v56  ;;  %v5311_v61 = vmax.f32 %v5295_v21, 0.0  ;;  %v13018_v21 = vld [vmem:[#allocation9 + $0x60] sm:$0xff]   ;;  %v13021_v56 = vld [vmem:[#allocation9 + $0x78] sm:$0xff]  }
 0x90f   :  { %v5314_v25 = vmax.f32 %v5298_v38, 0.0  ;;  %v13020_v38 = vld [vmem:[#allocation9 + $0x70] sm:$0xff]  }
 0x910   :  { %v5312_v42 = vmax.f32 %v5296_v22, 0.0  ;;  %v15490_v22 = vld [vmem:[#allocation9] sm:$0xff]  }
 0x911   :  { %v15385_v13 = vpack.c.bf16 %v5314_v25, %v5313_v34  ;;  %v13007_v34 = vld [vmem:[#allocation7 + $0x48] sm:$0xff]   ;;  %v13008_v25 = vld [vmem:[#allocation7 + $0x50] sm:$0xff]  }
 0x912   :  { %v15387_v36 = vpack.c.bf16 %v5312_v42, %v5311_v61  ;;  %v13009_v61 = vld [vmem:[#allocation7 + $0x58] sm:$0xff]   ;;  %v13010_v42 = vld [vmem:[#allocation7 + $0x60] sm:$0xff]  }
 0x914   :  { %11704 = vmatprep.subr.bf16.mxu1 %v15387_v36  ;;  %11724 = vmatprep.subr.bf16.mxu0 %v15387_v36 }
 0x915   :  { %11705 = vmatpush3.bf16.msra.mxu1 %v15387_v36  ;;  %11725 = vmatpush3.bf16.msra.mxu0 %v15387_v36 }
 0x916   :  { %11706 = vmatprep.subr.bf16.mxu1 %v15385_v13  ;;  %11726 = vmatprep.subr.bf16.mxu0 %v15385_v13 }
 0x919   :  { %11707 = vmatpush3.bf16.msra.mxu1 %v15385_v13  ;;  %11727 = vmatpush3.bf16.msra.mxu0 %v15385_v13 }
 0x91a   :  { %v11694_v55 = vpop.f32.mrb[68].mxu0 }
 0x91b   :  { %v5301_v27 = vadd.f32 %v11694_v55, %v15379_v49  ;;  %v5225_v11 = vpop.f32.mrb[69].mxu0  ;;  %v13011_v55 = vld [vmem:[#allocation7 + $0x68] sm:$0xff]  }
 0x91c   :  { %v5299_v50 = vadd.f32 %v15379_v49, %v5225_v11  ;;  %v11695_v19 = vpop.f32.mrb[70].mxu0  ;;  %v13016_v11 = vld [vmem:[#allocation7 + $0x78] sm:$0xff]  }
 0x91d   :  { %v5302_v29 = vadd.f32 %v11695_v19, %v15379_v49  ;;  %v5228_v60 = vpop.f32.mrb[71].mxu0  ;;  %v5317_v59 = vmax.f32 %v5301_v27, 0.0  ;;  %v13014_v27 = vld [vmem:[#allocation7 + $0x70] sm:$0xff]  }
 0x91e   :  { %v5300_v52 = vadd.f32 %v15379_v49, %v5228_v60  ;;  %v5315_v37 = vmax.f32 %v5299_v50, 0.0  ;;  %v13031_v50 = vld [vmem:[#allocation7 + $0x80] sm:$0xff]  }
 0x91f   :  { %v5318_v28 = vmax.f32 %v5302_v29, 0.0 }
 0x920   :  { %v5316_v32 = vmax.f32 %v5300_v52, 0.0 }
 0x921   :  { %v15401_v18 = vpack.c.bf16 %v5318_v28, %v5317_v59 }
 0x922   :  { %v15403_v2 = vpack.c.bf16 %v5316_v32, %v5315_v37 }
 0x924   :  { %11708 = vmatprep.subr.bf16.mxu1 %v15403_v2  ;;  %11728 = vmatprep.subr.bf16.mxu0 %v15403_v2 }
 0x925   :  { %11709 = vmatpush3.bf16.msra.mxu1 %v15403_v2  ;;  %11729 = vmatpush3.bf16.msra.mxu0 %v15403_v2 }
 0x926   :  { %11710 = vmatprep.subr.bf16.mxu1 %v15401_v18  ;;  %11730 = vmatprep.subr.bf16.mxu0 %v15401_v18 }
 0x929   :  { %11711 = vmatpush3.bf16.msra.mxu1 %v15401_v18  ;;  %11731 = vmatpush3.bf16.msra.mxu0 %v15401_v18 }
 0x92a   :  { %v11698_v43 = vpop.f32.mrb[72].mxu0 }
 0x92b   :  { %v5305_v10 = vadd.f32 %v11698_v43, %v15379_v49  ;;  %v5241_v8 = vpop.f32.mrb[73].mxu0  ;;  %v13023_v43 = vld [vmem:[#allocation9 + $0x8] sm:$0xff]  }
 0x92c   :  { %v5303_v63 = vadd.f32 %v15379_v49, %v5241_v8  ;;  %v11699_v39 = vpop.f32.mrb[74].mxu0  ;;  %v13032_v8 = vld [vmem:[#allocation7 + $0x88] sm:$0xff]  }
 0x92d   :  { %v5306_v47 = vadd.f32 %v11699_v39, %v15379_v49  ;;  %v5244_v40 = vpop.f32.mrb[75].mxu0  ;;  %v5321_v7 = vmax.f32 %v5305_v10, 0.0  ;;  %v13024_v10 = vld [vmem:[#allocation9 + $0x10] sm:$0xff]   ;;  %v13026_v39 = vld [vmem:[#allocation9 + $0x20] sm:$0xff]  }
 0x92e   :  { %v5304_v44 = vadd.f32 %v15379_v49, %v5244_v40  ;;  %v5319_v24 = vmax.f32 %v5303_v63, 0.0  ;;  %v13025_v63 = vld [vmem:[#allocation9 + $0x18] sm:$0xff]   ;;  %v13028_v40 = vld [vmem:[#allocation9 + $0x30] sm:$0xff]  }
 0x92f   :  { %v5322_v23 = vmax.f32 %v5306_v47, 0.0  ;;  %v13027_v47 = vld [vmem:[#allocation9 + $0x28] sm:$0xff]  }
 0x930   :  { %v5320_v53 = vmax.f32 %v5304_v44, 0.0  ;;  %v13029_v44 = vld [vmem:[#allocation9 + $0x38] sm:$0xff]  }
 0x931   :  { %v15417_v16 = vpack.c.bf16 %v5322_v23, %v5321_v7  ;;  %v13030_v23 = vld [vmem:[#allocation9 + $0x80] sm:$0xff]  }
 0x932   :  { %v15419_v12 = vpack.c.bf16 %v5320_v53, %v5319_v24 }
 0x934   :  { %11712 = vmatprep.subr.bf16.mxu1 %v15419_v12  ;;  %11732 = vmatprep.subr.bf16.mxu0 %v15419_v12 }
 0x935   :  { %11713 = vmatpush3.bf16.msra.mxu1 %v15419_v12  ;;  %11733 = vmatpush3.bf16.msra.mxu0 %v15419_v12 }
 0x936   :  { %11714 = vmatprep.subr.bf16.mxu1 %v15417_v16  ;;  %11734 = vmatprep.subr.bf16.mxu0 %v15417_v16 }
 0x939   :  { %11715 = vmatpush3.bf16.msra.mxu1 %v15417_v16  ;;  %11735 = vmatpush3.bf16.msra.mxu0 %v15417_v16 }
 0x93a   :  { %v11702_v3 = vpop.f32.mrb[76].mxu0 }
 0x93b   :  { %v5309_v46 = vadd.f32 %v11702_v3, %v15379_v49  ;;  %v5257_v58 = vpop.f32.mrb[77].mxu0 }
 0x93c   :  { %v5307_v30 = vadd.f32 %v15379_v49, %v5257_v58  ;;  %v11703_v17 = vpop.f32.mrb[78].mxu0  ;;  %v13034_v58 = vld [vmem:[#allocation9 + $0x90] sm:$0xff]  }
 0x93d   :  { %v5310_v5 = vadd.f32 %v11703_v17, %v15379_v49  ;;  %v5260_v15 = vpop.f32.mrb[79].mxu0  ;;  %v5325_v51 = vmax.f32 %v5309_v46, 0.0  ;;  %v13033_v46 = vld [vmem:[#allocation9 + $0x88] sm:$0xff]   ;;  %v13036_v17 = vld [vmem:[#allocation9 + $0xa0] sm:$0xff]  }
 0x93e   :  { %v5308_v31 = vadd.f32 %v15379_v49, %v5260_v15  ;;  %v5323_v6 = vmax.f32 %v5307_v30, 0.0  ;;  %v13005_v49 = vld [vmem:[#allocation7 + $0x38] sm:$0xff]   ;;  %v13035_v30 = vld [vmem:[#allocation9 + $0x98] sm:$0xff]   ;;  %v13038_v15 = vld [vmem:[#allocation9 + $0xb0] sm:$0xff]  }
 0x93f   :  { %v5326_v9 = vmax.f32 %v5310_v5, 0.0  ;;  %v13037_v5 = vld [vmem:[#allocation9 + $0xa8] sm:$0xff]  }
 0x940   :  { %v5324_v62 = vmax.f32 %v5308_v31, 0.0  ;;  %v13039_v31 = vld [vmem:[#allocation9 + $0xb8] sm:$0xff]  }
 0x941   :  { %v15433_v14 = vpack.c.bf16 %v5326_v9, %v5325_v51  ;;  %v13040_v9 = vld [vmem:[#allocation9 + $0xc0] sm:$0xff]  }
 0x942   :  { %v15435_v0 = vpack.c.bf16 %v5324_v62, %v5323_v6 }
 0x944   :  { %11716 = vmatprep.subr.bf16.mxu1 %v15435_v0  ;;  %11736 = vmatprep.subr.bf16.mxu0 %v15435_v0 }
 0x945   :  { %11717 = vmatpush3.bf16.msra.mxu1 %v15435_v0  ;;  %11737 = vmatpush3.bf16.msra.mxu0 %v15435_v0 }
 0x946   :  { %11718 = vmatprep.subr.bf16.mxu1 %v15433_v14  ;;  %11738 = vmatprep.subr.bf16.mxu0 %v15433_v14 }
 0x949   :  { %11719 = vmatpush3.bf16.msra.mxu1 %v15433_v14  ;;  %11739 = vmatpush3.bf16.msra.mxu0 %v15433_v14 }
 0x94a   :  { %11784 = vmatprep.subr.bf16.mxu0 %v15387_v36  ;;  %11744 = vmatprep.subr.bf16.mxu1 %v13012_v4 }
 0x94c   :  { %11741 = vmatmul.mubr.bf16.vlgmr.msra.gmra.mrb[240].mxu0 %v12999_v41  ;;  %11721 = vmatmul.mubr.bf16.vlgmr.msra.gmra.mrb[96].mxu1 %v13001_v20  ;;  %v13041_v20 = vld [vmem:[#allocation9 + $0xc8] sm:$0xff]  }
 0x94d   :  { %11785 = vmatpush3.bf16.msra.mxu0 %v15387_v36  ;;  %11800 = vmatprep.mubr.bf16.mxu0 %v13002_v33  ;;  %v13042_v33 = vld [vmem:[#allocation9 + $0xd0] sm:$0xff]  }
 0x94e   :  { %11786 = vmatprep.subr.bf16.mxu0 %v15385_v13  ;;  %11745 = vmatpush3.bf16.msra.mxu1 %v13012_v4  ;;  %v13045_v4 = vld [vmem:[#allocation9 + $0xe8] sm:$0xff]  }
 0x94f   :  { %11746 = vmatprep.subr.bf16.mxu1 %v13013_v54 }
 0x951   :  { %11787 = vmatpush3.bf16.msra.mxu0 %v15385_v13 }
 0x952   :  { %11788 = vmatprep.subr.bf16.mxu0 %v15403_v2  ;;  %11747 = vmatpush3.bf16.msra.mxu1 %v13013_v54  ;;  %v13046_v54 = vld [vmem:[#allocation9 + $0xf0] sm:$0xff]  }
 0x953   :  { %11748 = vmatprep.subr.bf16.mxu1 %v13015_v57 }
 0x955   :  { %11789 = vmatpush3.bf16.msra.mxu0 %v15403_v2 }
 0x956   :  { %11790 = vmatprep.subr.bf16.mxu0 %v15401_v18  ;;  %11749 = vmatpush3.bf16.msra.mxu1 %v13015_v57  ;;  %v13048_v57 = vld [vmem:[#allocation9 + $0x100] sm:$0xff]  }
 0x957   :  { %11750 = vmatprep.subr.bf16.mxu1 %v13017_v1 }
 0x959   :  { %11791 = vmatpush3.bf16.msra.mxu0 %v15401_v18 }
 0x95a   :  { %11792 = vmatprep.subr.bf16.mxu0 %v15419_v12  ;;  %11751 = vmatpush3.bf16.msra.mxu1 %v13017_v1 }
 0x95b   :  { %11752 = vmatprep.subr.bf16.mxu1 %v13018_v21 }
 0x95d   :  { %11793 = vmatpush3.bf16.msra.mxu0 %v15419_v12 }
 0x95e   :  { %11794 = vmatprep.subr.bf16.mxu0 %v15417_v16  ;;  %11753 = vmatpush3.bf16.msra.mxu1 %v13018_v21 }
 0x95f   :  { %11754 = vmatprep.subr.bf16.mxu1 %v13019_v48 }
 0x961   :  { %11795 = vmatpush3.bf16.msra.mxu0 %v15417_v16 }
 0x962   :  { %11796 = vmatprep.subr.bf16.mxu0 %v15435_v0  ;;  %11755 = vmatpush3.bf16.msra.mxu1 %v13019_v48 }
 0x963   :  { %11756 = vmatprep.subr.bf16.mxu1 %v13020_v38 }
 0x965   :  { %11797 = vmatpush3.bf16.msra.mxu0 %v15435_v0 }
 0x966   :  { %11798 = vmatprep.subr.bf16.mxu0 %v15433_v14  ;;  %11757 = vmatpush3.bf16.msra.mxu1 %v13020_v38 }
 0x967   :  { %11758 = vmatprep.subr.bf16.mxu1 %v13021_v56 }
 0x969   :  { %11799 = vmatpush3.bf16.msra.mxu0 %v15433_v14 }
 0x96a   :  { %11824 = vmatprep.subr.bf16.mxu0 %v15387_v36  ;;  %11759 = vmatpush3.bf16.msra.mxu1 %v13021_v56 }
 0x96b   :  { %11764 = vmatprep.subr.bf16.mxu1 %v15490_v22 }
 0x96c   :  { %11801 = vmatmul.mubr.bf16.vlgmr.msra.gmra.mrb[244].mxu0 %v13003_v26  ;;  %v13043_v26 = vld [vmem:[#allocation9 + $0xd8] sm:$0xff]  }
 0x96d   :  { %11825 = vmatpush3.bf16.msra.mxu0 %v15387_v36  ;;  %11840 = vmatprep.mubr.bf16.mxu0 %v13004_v45  ;;  %v13044_v45 = vld [vmem:[#allocation9 + $0xe0] sm:$0xff]  }
 0x96e   :  { %11826 = vmatprep.subr.bf16.mxu0 %v15385_v13 }
 0x971   :  { %11827 = vmatpush3.bf16.msra.mxu0 %v15385_v13 }
 0x972   :  { %11828 = vmatprep.subr.bf16.mxu0 %v15403_v2 }
 0x975   :  { %11829 = vmatpush3.bf16.msra.mxu0 %v15403_v2 }
 0x976   :  { %11830 = vmatprep.subr.bf16.mxu0 %v15401_v18 }
 0x979   :  { %11831 = vmatpush3.bf16.msra.mxu0 %v15401_v18 }
 0x97a   :  { %11832 = vmatprep.subr.bf16.mxu0 %v15419_v12 }
 0x97d   :  { %11833 = vmatpush3.bf16.msra.mxu0 %v15419_v12 }
 0x97e   :  { %11834 = vmatprep.subr.bf16.mxu0 %v15417_v16 }
 0x981   :  { %11835 = vmatpush3.bf16.msra.mxu0 %v15417_v16 }
 0x982   :  { %11836 = vmatprep.subr.bf16.mxu0 %v15435_v0 }
 0x985   :  { %11837 = vmatpush3.bf16.msra.mxu0 %v15435_v0 }
 0x986   :  { %11838 = vmatprep.subr.bf16.mxu0 %v15433_v14 }
 0x989   :  { %11839 = vmatpush3.bf16.msra.mxu0 %v15433_v14 }
 0x98a   :  { %11864 = vmatprep.subr.bf16.mxu0 %v15387_v36 }
 0x98c   :  { %11841 = vmatmul.mubr.bf16.vlgmr.msra.gmra.mrb[248].mxu0 %v13005_v49  ;;  %v13047_v49 = vld [vmem:[#allocation9 + $0xf8] sm:$0xff]  }
 0x98d   :  { %11865 = vmatpush3.bf16.msra.mxu0 %v15387_v36  ;;  %11880 = vmatprep.mubr.bf16.mxu0 %v13006_v35 }
 0x98e   :  { %11866 = vmatprep.subr.bf16.mxu0 %v15385_v13 }
 0x991   :  { %11867 = vmatpush3.bf16.msra.mxu0 %v15385_v13 }
 0x992   :  { %11868 = vmatprep.subr.bf16.mxu0 %v15403_v2 }
 0x995   :  { %11869 = vmatpush3.bf16.msra.mxu0 %v15403_v2 }
 0x996   :  { %11870 = vmatprep.subr.bf16.mxu0 %v15401_v18 }
 0x999   :  { %11871 = vmatpush3.bf16.msra.mxu0 %v15401_v18 }
 0x99a   :  { %11872 = vmatprep.subr.bf16.mxu0 %v15419_v12 }
 0x99d   :  { %11873 = vmatpush3.bf16.msra.mxu0 %v15419_v12 }
 0x99e   :  { %11874 = vmatprep.subr.bf16.mxu0 %v15417_v16 }
 0x9a1   :  { %11875 = vmatpush3.bf16.msra.mxu0 %v15417_v16 }
 0x9a2   :  { %11876 = vmatprep.subr.bf16.mxu0 %v15435_v0 }
 0x9a5   :  { %11877 = vmatpush3.bf16.msra.mxu0 %v15435_v0 }
 0x9a6   :  { %11878 = vmatprep.subr.bf16.mxu0 %v15433_v14 }
 0x9a9   :  { %11879 = vmatpush3.bf16.msra.mxu0 %v15433_v14 }
 0x9aa   :  { %11904 = vmatprep.subr.bf16.mxu0 %v15387_v36 }
 0x9ac   :  { %11881 = vmatmul.mubr.bf16.vlgmr.msra.gmra.mrb[252].mxu0 %v13007_v34  ;;  %v13050_v34 = vld [vmem:[#allocation9 + $0x110] sm:$0xff]  }
 0x9ad   :  { %11905 = vmatpush3.bf16.msra.mxu0 %v15387_v36  ;;  %11920 = vmatprep.mubr.bf16.mxu0 %v13008_v25  ;;  %v13051_v25 = vld [vmem:[#allocation9 + $0x118] sm:$0xff]  }
 0x9ae   :  { %11906 = vmatprep.subr.bf16.mxu0 %v15385_v13 }
 0x9b1   :  { %11907 = vmatpush3.bf16.msra.mxu0 %v15385_v13 }
 0x9b2   :  { %11908 = vmatprep.subr.bf16.mxu0 %v15403_v2 }
 0x9b5   :  { %11909 = vmatpush3.bf16.msra.mxu0 %v15403_v2 }
 0x9b6   :  { %11910 = vmatprep.subr.bf16.mxu0 %v15401_v18 }
 0x9b9   :  { %11911 = vmatpush3.bf16.msra.mxu0 %v15401_v18 }
 0x9ba   :  { %11912 = vmatprep.subr.bf16.mxu0 %v15419_v12 }
 0x9bd   :  { %11913 = vmatpush3.bf16.msra.mxu0 %v15419_v12 }
 0x9be   :  { %11914 = vmatprep.subr.bf16.mxu0 %v15417_v16 }
 0x9c1   :  { %11915 = vmatpush3.bf16.msra.mxu0 %v15417_v16 }
 0x9c2   :  { %11916 = vmatprep.subr.bf16.mxu0 %v15435_v0 }
 0x9c5   :  { %11917 = vmatpush3.bf16.msra.mxu0 %v15435_v0 }
 0x9c6   :  { %11918 = vmatprep.subr.bf16.mxu0 %v15433_v14 }
 0x9c9   :  { %11919 = vmatpush3.bf16.msra.mxu0 %v15433_v14 }
 0x9ca   :  { %11944 = vmatprep.subr.bf16.mxu0 %v15387_v36 }
 0x9cc   :  { %11921 = vmatmul.mubr.bf16.vlgmr.msra.gmra.mrb[0].mxu0 %v13009_v61  ;;  %v13052_v61 = vld [vmem:[#allocation9 + $0x120] sm:$0xff]  }
 0x9cd   :  { %11945 = vmatpush3.bf16.msra.mxu0 %v15387_v36  ;;  %11960 = vmatprep.mubr.bf16.mxu0 %v13010_v42  ;;  %v13053_v42 = vld [vmem:[#allocation9 + $0x128] sm:$0xff]  }
 0x9ce   :  { %11946 = vmatprep.subr.bf16.mxu0 %v15385_v13 }
 0x9d1   :  { %11947 = vmatpush3.bf16.msra.mxu0 %v15385_v13 }
 0x9d2   :  { %11948 = vmatprep.subr.bf16.mxu0 %v15403_v2 }
 0x9d5   :  { %11949 = vmatpush3.bf16.msra.mxu0 %v15403_v2 }
 0x9d6   :  { %11950 = vmatprep.subr.bf16.mxu0 %v15401_v18 }
 0x9d9   :  { %11951 = vmatpush3.bf16.msra.mxu0 %v15401_v18 }
 0x9da   :  { %11952 = vmatprep.subr.bf16.mxu0 %v15419_v12 }
 0x9dd   :  { %11953 = vmatpush3.bf16.msra.mxu0 %v15419_v12 }
 0x9de   :  { %11954 = vmatprep.subr.bf16.mxu0 %v15417_v16 }
 0x9e1   :  { %11955 = vmatpush3.bf16.msra.mxu0 %v15417_v16 }
 0x9e2   :  { %11956 = vmatprep.subr.bf16.mxu0 %v15435_v0 }
 0x9e5   :  { %11957 = vmatpush3.bf16.msra.mxu0 %v15435_v0 }
 0x9e6   :  { %11958 = vmatprep.subr.bf16.mxu0 %v15433_v14 }
 0x9e9   :  { %11959 = vmatpush3.bf16.msra.mxu0 %v15433_v14 }
 0x9ea   :  { %11984 = vmatprep.subr.bf16.mxu0 %v15387_v36 }
 0x9ec   :  { %11961 = vmatmul.mubr.bf16.vlgmr.msra.gmra.mrb[4].mxu0 %v13011_v55  ;;  %v13054_v55 = vld [vmem:[#allocation9 + $0x130] sm:$0xff]  }
 0x9ed   :  { %11985 = vmatpush3.bf16.msra.mxu0 %v15387_v36  ;;  %12000 = vmatprep.mubr.bf16.mxu0 %v13014_v27  ;;  %v13055_v27 = vld [vmem:[#allocation9 + $0x138] sm:$0xff]  }
 0x9ee   :  { %11986 = vmatprep.subr.bf16.mxu0 %v15385_v13 }
 0x9f1   :  { %11987 = vmatpush3.bf16.msra.mxu0 %v15385_v13 }
 0x9f2   :  { %11988 = vmatprep.subr.bf16.mxu0 %v15403_v2 }
 0x9f5   :  { %11989 = vmatpush3.bf16.msra.mxu0 %v15403_v2 }
 0x9f6   :  { %11990 = vmatprep.subr.bf16.mxu0 %v15401_v18 }
 0x9f9   :  { %11991 = vmatpush3.bf16.msra.mxu0 %v15401_v18 }
 0x9fa   :  { %11992 = vmatprep.subr.bf16.mxu0 %v15419_v12 }
 0x9fd   :  { %11993 = vmatpush3.bf16.msra.mxu0 %v15419_v12 }
 0x9fe   :  { %11994 = vmatprep.subr.bf16.mxu0 %v15417_v16 }
 0xa01   :  { %11995 = vmatpush3.bf16.msra.mxu0 %v15417_v16 }
 0xa02   :  { %11996 = vmatprep.subr.bf16.mxu0 %v15435_v0 }
 0xa05   :  { %11997 = vmatpush3.bf16.msra.mxu0 %v15435_v0 }
 0xa06   :  { %11998 = vmatprep.subr.bf16.mxu0 %v15433_v14 }
 0xa09   :  { %11999 = vmatpush3.bf16.msra.mxu0 %v15433_v14 }
 0xa0a   :  { %12024 = vmatprep.subr.bf16.mxu0 %v15387_v36 }
 0xa0c   :  { %12001 = vmatmul.mubr.bf16.vlgmr.msra.gmra.mrb[8].mxu0 %v13016_v11 }
 0xa0d   :  { %12025 = vmatpush3.bf16.msra.mxu0 %v15387_v36  ;;  %12040 = vmatprep.mubr.bf16.mxu0 %v13031_v50  ;;  %v13056_v50 = vld [vmem:[#allocation9 + $0x140] sm:$0xff]  }
 0xa0e   :  { %12026 = vmatprep.subr.bf16.mxu0 %v15385_v13 }
 0xa11   :  { %12027 = vmatpush3.bf16.msra.mxu0 %v15385_v13 }
 0xa12   :  { %12028 = vmatprep.subr.bf16.mxu0 %v15403_v2 }
 0xa15   :  { %12029 = vmatpush3.bf16.msra.mxu0 %v15403_v2 }
 0xa16   :  { %12030 = vmatprep.subr.bf16.mxu0 %v15401_v18 }
 0xa19   :  { %12031 = vmatpush3.bf16.msra.mxu0 %v15401_v18 }
 0xa1a   :  { %12032 = vmatprep.subr.bf16.mxu0 %v15419_v12 }
 0xa1d   :  { %12033 = vmatpush3.bf16.msra.mxu0 %v15419_v12 }
 0xa1e   :  { %12034 = vmatprep.subr.bf16.mxu0 %v15417_v16 }
 0xa1f   :  { %v11742_v36 = vpop.f32.mrb[240].mxu0  ;;  %v11722_v19 = vpop.f32.mrb[96].mxu1 }
 0xa20   :  { %v5469_v29 = vpop.f32.mrb[241].mxu0  ;;  %v5385_v60 = vpop.f32.mrb[97].mxu1 }
 0xa21   :  { %v11743_v52 = vpop.f32.mrb[242].mxu0  ;;  %12035 = vmatpush3.bf16.msra.mxu0 %v15417_v16  ;;  %v11723_v13 = vpop.f32.mrb[98].mxu1 }
 0xa22   :  { %v5485_v59 = vpack.c.bf16 %v11743_v52, %v11742_v36  ;;  %v5472_v28 = vpop.f32.mrb[243].mxu0  ;;  %12036 = vmatprep.subr.bf16.mxu0 %v15435_v0  ;;  %v5401_v37 = vpack.c.bf16 %v11723_v13, %v11722_v19  ;;  %v5388_v32 = vpop.f32.mrb[99].mxu1  ;;  %v13057_v13 = vld [vmem:[#allocation9 + $0x148] sm:$0xff]  }
 0xa23   :  { %v5484_v18 = vpack.c.bf16 %v5472_v28, %v5469_v29  ;;  %v5400_v2 = vpack.c.bf16 %v5388_v32, %v5385_v60  ;;  %v13059_v28 = vld [vmem:[#allocation9 + $0x158] sm:$0xff]   ;;  %v13061_v32 = vld [vmem:[#allocation9 + $0x168] sm:$0xff]  }
 0xa25   :  { %11760 = vmatprep.mubr.bf16.mxu1 %v5484_v18  ;;  %12037 = vmatpush3.bf16.msra.mxu0 %v15435_v0  ;;  %v13062_v18 = vld [vmem:[#allocation9 + $0x170] sm:$0xff]  }
 0xa26   :  { %11761 = vmatmul.mubr.bf16.vlgmr.msra.gmra.mrb[100].mxu1 %v5485_v59  ;;  %12038 = vmatprep.subr.bf16.mxu0 %v15433_v14  ;;  %v13058_v59 = vld [vmem:[#allocation9 + $0x150] sm:$0xff]  }
 0xa27   :  { %11765 = vmatpush3.bf16.msra.mxu1 %v15490_v22  ;;  %11780 = vmatprep.mubr.bf16.mxu1 %v5400_v2  ;;  %v13049_v22 = vld [vmem:[#allocation9 + $0x108] sm:$0xff]   ;;  %v13063_v2 = vld [vmem:[#allocation9 + $0x178] sm:$0xff]  }
 0xa28   :  { %11766 = vmatprep.subr.bf16.mxu1 %v13023_v43 }
 0xa29   :  { %12039 = vmatpush3.bf16.msra.mxu0 %v15433_v14 }
 0xa2b   :  { %11767 = vmatpush3.bf16.msra.mxu1 %v13023_v43 }
 0xa2c   :  { %11768 = vmatprep.subr.bf16.mxu1 %v13024_v10  ;;  %12041 = vmatmul.mubr.bf16.vlgmr.msra.gmra.mrb[12].mxu0 %v13032_v8 }
 0xa2f   :  { %11769 = vmatpush3.bf16.msra.mxu1 %v13024_v10  ;;  %v13064_v10 = vld [vmem:[#allocation9 + $0x180] sm:$0xff]  }
 0xa30   :  { %11770 = vmatprep.subr.bf16.mxu1 %v13025_v63 }
 0xa33   :  { %11771 = vmatpush3.bf16.msra.mxu1 %v13025_v63 }
 0xa34   :  { %11772 = vmatprep.subr.bf16.mxu1 %v13026_v39 }
 0xa37   :  { %11773 = vmatpush3.bf16.msra.mxu1 %v13026_v39 }
 0xa38   :  { %11774 = vmatprep.subr.bf16.mxu1 %v13027_v47 }
 0xa3b   :  { %11775 = vmatpush3.bf16.msra.mxu1 %v13027_v47 }
 0xa3c   :  { %11776 = vmatprep.subr.bf16.mxu1 %v13028_v40 }
 0xa3f   :  { %11777 = vmatpush3.bf16.msra.mxu1 %v13028_v40  ;;  %v11802_v7 = vpop.f32.mrb[244].mxu0 }
 0xa40   :  { %11778 = vmatprep.subr.bf16.mxu1 %v13029_v44  ;;  %v5748_v24 = vpop.f32.mrb[245].mxu0 }
 0xa41   :  { %v11803_v53 = vpop.f32.mrb[246].mxu0 }
 0xa42   :  { %v5764_v16 = vpack.c.bf16 %v11803_v53, %v11802_v7  ;;  %v5751_v12 = vpop.f32.mrb[247].mxu0  ;;  %v13066_v7 = vld [vmem:[#allocation9 + $0x190] sm:$0xff]   ;;  %v13069_v53 = vld [vmem:[#allocation9 + $0x1a8] sm:$0xff]  }
 0xa43   :  { %11779 = vmatpush3.bf16.msra.mxu1 %v13029_v44  ;;  %v5763_v3 = vpack.c.bf16 %v5751_v12, %v5748_v24  ;;  %v13065_v44 = vld [vmem:[#allocation9 + $0x188] sm:$0xff]   ;;  %v13068_v24 = vld [vmem:[#allocation9 + $0x1a0] sm:$0xff]   ;;  %v13071_v12 = vld [vmem:[#allocation9 + $0x1b8] sm:$0xff]  }
 0xa44   :  { %11804 = vmatprep.subr.bf16.mxu1 %v13030_v23 }
 0xa46   :  { %11781 = vmatmul.mubr.bf16.vlgmr.msra.gmra.mrb[100].mxu1 %v5401_v37  ;;  %v13060_v37 = vld [vmem:[#allocation9 + $0x160] sm:$0xff]  }
 0xa47   :  { %11805 = vmatpush3.bf16.msra.mxu1 %v13030_v23  ;;  %11820 = vmatprep.mubr.bf16.mxu1 %v5763_v3  ;;  %v13067_v23 = vld [vmem:[#allocation9 + $0x198] sm:$0xff]  }
 0xa48   :  { %11806 = vmatprep.subr.bf16.mxu1 %v13033_v46 }
 0xa4b   :  { %11807 = vmatpush3.bf16.msra.mxu1 %v13033_v46  ;;  %v13072_v46 = vld [vmem:[#allocation9 + $0x1c0] sm:$0xff]  }
 0xa4c   :  { %11808 = vmatprep.subr.bf16.mxu1 %v13034_v58 }
 0xa4f   :  { %11809 = vmatpush3.bf16.msra.mxu1 %v13034_v58 }
 0xa50   :  { %11810 = vmatprep.subr.bf16.mxu1 %v13035_v30 }
 0xa53   :  { %11811 = vmatpush3.bf16.msra.mxu1 %v13035_v30 }
 0xa54   :  { %11812 = vmatprep.subr.bf16.mxu1 %v13036_v17 }
 0xa57   :  { %11813 = vmatpush3.bf16.msra.mxu1 %v13036_v17 }
 0xa58   :  { %11814 = vmatprep.subr.bf16.mxu1 %v13037_v5 }
 0xa5b   :  { %11815 = vmatpush3.bf16.msra.mxu1 %v13037_v5 }
 0xa5c   :  { %11816 = vmatprep.subr.bf16.mxu1 %v13038_v15 }
 0xa5f   :  { %11817 = vmatpush3.bf16.msra.mxu1 %v13038_v15  ;;  %v11842_v51 = vpop.f32.mrb[248].mxu0 }
 0xa60   :  { %11818 = vmatprep.subr.bf16.mxu1 %v13039_v31  ;;  %v5934_v6 = vpop.f32.mrb[249].mxu0 }
 0xa61   :  { %v11843_v62 = vpop.f32.mrb[250].mxu0 }
 0xa62   :  { %v5950_v14 = vpack.c.bf16 %v11843_v62, %v11842_v51  ;;  %v5937_v0 = vpop.f32.mrb[251].mxu0  ;;  %v13074_v51 = vld [vmem:[#allocation9 + $0x1d0] sm:$0xff]   ;;  %v13077_v62 = vld [vmem:[#allocation9 + $0x1e8] sm:$0xff]  }
 0xa63   :  { %11819 = vmatpush3.bf16.msra.mxu1 %v13039_v31  ;;  %v5949_v41 = vpack.c.bf16 %v5937_v0, %v5934_v6  ;;  %v13073_v31 = vld [vmem:[#allocation9 + $0x1c8] sm:$0xff]   ;;  %v13076_v6 = vld [vmem:[#allocation9 + $0x1e0] sm:$0xff]   ;;  %v13079_v0 = vld [vmem:[#allocation9 + $0x1f8] sm:$0xff]  }
 0xa64   :  { %11844 = vmatprep.subr.bf16.mxu1 %v13040_v9 }
 0xa66   :  { %11821 = vmatmul.mubr.bf16.vlgmr.msra.gmra.mrb[100].mxu1 %v5764_v16  ;;  %v13070_v16 = vld [vmem:[#allocation9 + $0x1b0] sm:$0xff]  }
 0xa67   :  { %11845 = vmatpush3.bf16.msra.mxu1 %v13040_v9  ;;  %11860 = vmatprep.mubr.bf16.mxu1 %v5949_v41  ;;  %v13075_v9 = vld [vmem:[#allocation9 + $0x1d8] sm:$0xff]  }
 0xa68   :  { %11846 = vmatprep.subr.bf16.mxu1 %v13041_v20 }
 0xa6b   :  { %11847 = vmatpush3.bf16.msra.mxu1 %v13041_v20  ;;  %v13080_v20 = vld [vmem:[#allocation9 + $0x200] sm:$0xff]  }
 0xa6c   :  { %11848 = vmatprep.subr.bf16.mxu1 %v13042_v33 }
 0xa6f   :  { %11849 = vmatpush3.bf16.msra.mxu1 %v13042_v33 }
 0xa70   :  { %11850 = vmatprep.subr.bf16.mxu1 %v13043_v26 }
 0xa73   :  { %11851 = vmatpush3.bf16.msra.mxu1 %v13043_v26 }
 0xa74   :  { %11852 = vmatprep.subr.bf16.mxu1 %v13044_v45 }
 0xa77   :  { %11853 = vmatpush3.bf16.msra.mxu1 %v13044_v45 }
 0xa78   :  { %11854 = vmatprep.subr.bf16.mxu1 %v13045_v4 }
 0xa7b   :  { %11855 = vmatpush3.bf16.msra.mxu1 %v13045_v4 }
 0xa7c   :  { %11856 = vmatprep.subr.bf16.mxu1 %v13046_v54 }
 0xa7f   :  { %11857 = vmatpush3.bf16.msra.mxu1 %v13046_v54  ;;  %v11882_v35 = vpop.f32.mrb[252].mxu0 }
 0xa80   :  { %11858 = vmatprep.subr.bf16.mxu1 %v13047_v49  ;;  %v6120_v1 = vpop.f32.mrb[253].mxu0 }
 0xa81   :  { %v11883_v21 = vpop.f32.mrb[254].mxu0 }
 0xa82   :  { %v6136_v48 = vpack.c.bf16 %v11883_v21, %v11882_v35  ;;  %v6123_v38 = vpop.f32.mrb[255].mxu0  ;;  %v13082_v35 = vld [vmem:[#allocation9 + $0x210] sm:$0xff]   ;;  %v13085_v21 = vld [vmem:[#allocation9 + $0x228] sm:$0xff]  }
 0xa83   :  { %11859 = vmatpush3.bf16.msra.mxu1 %v13047_v49  ;;  %v6135_v56 = vpack.c.bf16 %v6123_v38, %v6120_v1  ;;  %v13081_v49 = vld [vmem:[#allocation9 + $0x208] sm:$0xff]   ;;  %v13084_v1 = vld [vmem:[#allocation9 + $0x220] sm:$0xff]   ;;  %v13087_v38 = vld [vmem:[#allocation9 + $0x238] sm:$0xff]  }
 0xa84   :  { %11884 = vmatprep.subr.bf16.mxu1 %v13048_v57 }
 0xa86   :  { %11861 = vmatmul.mubr.bf16.vlgmr.msra.gmra.mrb[100].mxu1 %v5950_v14  ;;  %v13078_v14 = vld [vmem:[#allocation9 + $0x1f0] sm:$0xff]  }
 0xa87   :  { %11885 = vmatpush3.bf16.msra.mxu1 %v13048_v57  ;;  %11900 = vmatprep.mubr.bf16.mxu1 %v6135_v56  ;;  %v13083_v57 = vld [vmem:[#allocation9 + $0x218] sm:$0xff]   ;;  %v13709_v56 = vmov 0.0  }
 0xa88   :  { %11886 = vmatprep.subr.bf16.mxu1 %v13049_v22  ;;  %12072 = vmatprep.subr.bf16.mxu0 %v13709_v56 }
 0xa89   :  { %12076 = vmatprep.mubr.msk.bf16.mxu0 %vm13710_vm2, %v13709_v56 }
 0xa8b   :  { %11887 = vmatpush3.bf16.msra.mxu1 %v13049_v22  ;;  %v9823_v22 = vld [vmem:[#allocation10] ss:$0 sm:$0xff] }
 0xa8c   :  { %11888 = vmatprep.subr.bf16.mxu1 %v13050_v34 }
 0xa8f   :  { %11889 = vmatpush3.bf16.msra.mxu1 %v13050_v34 }
 0xa90   :  { %11890 = vmatprep.subr.bf16.mxu1 %v13051_v25 }
 0xa93   :  { %11891 = vmatpush3.bf16.msra.mxu1 %v13051_v25 }
 0xa94   :  { %11892 = vmatprep.subr.bf16.mxu1 %v13052_v61 }
 0xa97   :  { %11893 = vmatpush3.bf16.msra.mxu1 %v13052_v61 }
 0xa98   :  { %11894 = vmatprep.subr.bf16.mxu1 %v13053_v42 }
 0xa9b   :  { %11895 = vmatpush3.bf16.msra.mxu1 %v13053_v42 }
 0xa9c   :  { %11896 = vmatprep.subr.bf16.mxu1 %v13054_v55 }
 0xa9f   :  { %11897 = vmatpush3.bf16.msra.mxu1 %v13054_v55  ;;  %v11922_v11 = vpop.f32.mrb[0].mxu0 }
 0xaa0   :  { %11898 = vmatprep.subr.bf16.mxu1 %v13055_v27  ;;  %v6306_v36 = vpop.f32.mrb[1].mxu0 }
 0xaa1   :  { %v11923_v19 = vpop.f32.mrb[2].mxu0 }
 0xaa2   :  { %v6322_v29 = vpack.c.bf16 %v11923_v19, %v11922_v11  ;;  %v6309_v60 = vpop.f32.mrb[3].mxu0 }
 0xaa3   :  { %11899 = vmatpush3.bf16.msra.mxu1 %v13055_v27  ;;  %v6321_v52 = vpack.c.bf16 %v6309_v60, %v6306_v36 }
 0xaa4   :  { %11924 = vmatprep.subr.bf16.mxu1 %v13056_v50 }
 0xaa6   :  { %11901 = vmatmul.mubr.bf16.vlgmr.msra.gmra.mrb[100].mxu1 %v6136_v48  ;;  %v13086_v48 = vld [vmem:[#allocation9 + $0x230] sm:$0xff]  }
 0xaa7   :  { %11925 = vmatpush3.bf16.msra.mxu1 %v13056_v50  ;;  %11940 = vmatprep.mubr.bf16.mxu1 %v6321_v52 }
 0xaa8   :  { %11926 = vmatprep.subr.bf16.mxu1 %v13057_v13 }
 0xaab   :  { %11927 = vmatpush3.bf16.msra.mxu1 %v13057_v13 }
 0xaac   :  { %11928 = vmatprep.subr.bf16.mxu1 %v13058_v59 }
 0xaaf   :  { %11929 = vmatpush3.bf16.msra.mxu1 %v13058_v59  ;;  %v7016_v59 = vld [vmem:[#allocation12] sm:$0xf] }
 0xab0   :  { %11930 = vmatprep.subr.bf16.mxu1 %v13059_v28 }
 0xab3   :  { %11931 = vmatpush3.bf16.msra.mxu1 %v13059_v28  ;;  %v7079_v28 = vld [vmem:[#allocation12 + $0x4] sm:$0xf] }
 0xab4   :  { %11932 = vmatprep.subr.bf16.mxu1 %v13060_v37 }
 0xab7   :  { %11933 = vmatpush3.bf16.msra.mxu1 %v13060_v37  ;;  %v13088_v37 = vld [vmem:[#allocation13 + $0x40] sm:$0xff]  }
 0xab8   :  { %11934 = vmatprep.subr.bf16.mxu1 %v13061_v32 }
 0xabb   :  { %11935 = vmatpush3.bf16.msra.mxu1 %v13061_v32  ;;  %v13089_v32 = vld [vmem:[#allocation13] sm:$0xff]  }
 0xabc   :  { %11936 = vmatprep.subr.bf16.mxu1 %v13062_v18 }
 0xabf   :  { %11937 = vmatpush3.bf16.msra.mxu1 %v13062_v18  ;;  %v11962_v43 = vpop.f32.mrb[4].mxu0  ;;  %v13090_v18 = vld [vmem:[#allocation13 + $0x48] sm:$0xff]  }
 0xac0   :  { %11938 = vmatprep.subr.bf16.mxu1 %v13063_v2  ;;  %v6492_v8 = vpop.f32.mrb[5].mxu0 }
 0xac1   :  { %v11963_v63 = vpop.f32.mrb[6].mxu0 }
 0xac2   :  { %v6508_v39 = vpack.c.bf16 %v11963_v63, %v11962_v43  ;;  %v6495_v47 = vpop.f32.mrb[7].mxu0  ;;  %v13092_v43 = vld [vmem:[#allocation13 + $0x50] sm:$0xff]   ;;  %v13095_v63 = vld [vmem:[#allocation13 + $0x18] sm:$0xff]  }
 0xac3   :  { %11939 = vmatpush3.bf16.msra.mxu1 %v13063_v2  ;;  %v6507_v40 = vpack.c.bf16 %v6495_v47, %v6492_v8  ;;  %v13091_v2 = vld [vmem:[#allocation13 + $0x8] sm:$0xff]   ;;  %v13094_v8 = vld [vmem:[#allocation13 + $0x58] sm:$0xff]   ;;  %v13097_v47 = vld [vmem:[#allocation13 + $0x20] sm:$0xff]  }
 0xac4   :  { %11964 = vmatprep.subr.bf16.mxu1 %v13064_v10 }
 0xac6   :  { %11941 = vmatmul.mubr.bf16.vlgmr.msra.gmra.mrb[100].mxu1 %v6322_v29 }
 0xac7   :  { %11965 = vmatpush3.bf16.msra.mxu1 %v13064_v10  ;;  %11980 = vmatprep.mubr.bf16.mxu1 %v6507_v40  ;;  %v13093_v10 = vld [vmem:[#allocation13 + $0x10] sm:$0xff]   ;;  %v13098_v40 = vld [vmem:[#allocation13 + $0x68] sm:$0xff]  }
 0xac8   :  { %11966 = vmatprep.subr.bf16.mxu1 %v13065_v44 }
 0xacb   :  { %11967 = vmatpush3.bf16.msra.mxu1 %v13065_v44  ;;  %v13099_v44 = vld [vmem:[#allocation13 + $0x28] sm:$0xff]  }
 0xacc   :  { %11968 = vmatprep.subr.bf16.mxu1 %v13066_v7 }
 0xacf   :  { %11969 = vmatpush3.bf16.msra.mxu1 %v13066_v7  ;;  %v13100_v7 = vld [vmem:[#allocation13 + $0x70] sm:$0xff]  }
 0xad0   :  { %11970 = vmatprep.subr.bf16.mxu1 %v13067_v23 }
 0xad3   :  { %11971 = vmatpush3.bf16.msra.mxu1 %v13067_v23  ;;  %v13101_v23 = vld [vmem:[#allocation13 + $0x30] sm:$0xff]  }
 0xad4   :  { %11972 = vmatprep.subr.bf16.mxu1 %v13068_v24 }
 0xad7   :  { %11973 = vmatpush3.bf16.msra.mxu1 %v13068_v24  ;;  %v13102_v24 = vld [vmem:[#allocation13 + $0x78] sm:$0xff]  }
 0xad8   :  { %11974 = vmatprep.subr.bf16.mxu1 %v13069_v53 }
 0xadb   :  { %11975 = vmatpush3.bf16.msra.mxu1 %v13069_v53  ;;  %v13103_v53 = vld [vmem:[#allocation13 + $0x38] sm:$0xff]  }
 0xadc   :  { %11976 = vmatprep.subr.bf16.mxu1 %v13070_v16 }
 0xadf   :  { %11977 = vmatpush3.bf16.msra.mxu1 %v13070_v16  ;;  %v12002_v3 = vpop.f32.mrb[8].mxu0 }
 0xae0   :  { %11978 = vmatprep.subr.bf16.mxu1 %v13071_v12  ;;  %v6678_v58 = vpop.f32.mrb[9].mxu0 }
 0xae1   :  { %v12003_v30 = vpop.f32.mrb[10].mxu0 }
 0xae2   :  { %v6694_v17 = vpack.c.bf16 %v12003_v30, %v12002_v3  ;;  %v6681_v5 = vpop.f32.mrb[11].mxu0 }
 0xae3   :  { %11979 = vmatpush3.bf16.msra.mxu1 %v13071_v12  ;;  %v6693_v15 = vpack.c.bf16 %v6681_v5, %v6678_v58 }
 0xae4   :  { %12004 = vmatprep.subr.bf16.mxu1 %v13072_v46 }
 0xae6   :  { %11981 = vmatmul.mubr.bf16.vlgmr.msra.gmra.mrb[100].mxu1 %v6508_v39  ;;  %v13096_v39 = vld [vmem:[#allocation13 + $0x60] sm:$0xff]  }
 0xae7   :  { %12005 = vmatpush3.bf16.msra.mxu1 %v13072_v46  ;;  %12020 = vmatprep.mubr.bf16.mxu1 %v6693_v15 }
 0xae8   :  { %12006 = vmatprep.subr.bf16.mxu1 %v13073_v31 }
 0xaeb   :  { %12007 = vmatpush3.bf16.msra.mxu1 %v13073_v31 }
 0xaec   :  { %12008 = vmatprep.subr.bf16.mxu1 %v13074_v51 }
 0xaef   :  { %12009 = vmatpush3.bf16.msra.mxu1 %v13074_v51  ;;  %v7318_v51 = vld [vmem:[#allocation12 + $0x8] sm:$0xf] }
 0xaf0   :  { %12010 = vmatprep.subr.bf16.mxu1 %v13075_v9 }
 0xaf3   :  { %12011 = vmatpush3.bf16.msra.mxu1 %v13075_v9  ;;  %v7470_v9 = vld [vmem:[#allocation12 + $0xc] sm:$0xf] }
 0xaf4   :  { %12012 = vmatprep.subr.bf16.mxu1 %v13076_v6 }
 0xaf7   :  { %12013 = vmatpush3.bf16.msra.mxu1 %v13076_v6  ;;  %v13104_v6 = vld [vmem:[#allocation13 + $0x80] sm:$0xff]  }
 0xaf8   :  { %12014 = vmatprep.subr.bf16.mxu1 %v13077_v62 }
 0xafb   :  { %12015 = vmatpush3.bf16.msra.mxu1 %v13077_v62  ;;  %v13105_v62 = vld [vmem:[#allocation13 + $0xc0] sm:$0xff]  }
 0xafc   :  { %12016 = vmatprep.subr.bf16.mxu1 %v13078_v14 }
 0xaff   :  { %12017 = vmatpush3.bf16.msra.mxu1 %v13078_v14  ;;  %v12042_v41 = vpop.f32.mrb[12].mxu0  ;;  %v13106_v14 = vld [vmem:[#allocation13 + $0x88] sm:$0xff]  }
 0xb00   :  { %12018 = vmatprep.subr.bf16.mxu1 %v13079_v0  ;;  %v6864_v33 = vpop.f32.mrb[13].mxu0 }
 0xb01   :  { %v12043_v26 = vpop.f32.mrb[14].mxu0 }
 0xb02   :  { %v6880_v45 = vpack.c.bf16 %v12043_v26, %v12042_v41  ;;  %v6867_v4 = vpop.f32.mrb[15].mxu0  ;;  %v13108_v41 = vld [vmem:[#allocation13 + $0x90] sm:$0xff]   ;;  %v13111_v26 = vld [vmem:[#allocation13 + $0xd8] sm:$0xff]  }
 0xb03   :  { %12019 = vmatpush3.bf16.msra.mxu1 %v13079_v0  ;;  %v6879_v54 = vpack.c.bf16 %v6867_v4, %v6864_v33  ;;  %v13107_v0 = vld [vmem:[#allocation13 + $0xc8] sm:$0xff]   ;;  %v13110_v33 = vld [vmem:[#allocation13 + $0x98] sm:$0xff]   ;;  %v13113_v4 = vld [vmem:[#allocation13 + $0xe0] sm:$0xff]  }
 0xb04   :  { %12044 = vmatprep.subr.bf16.mxu1 %v13080_v20 }
 0xb06   :  { %12021 = vmatmul.mubr.bf16.vlgmr.msra.gmra.mrb[100].mxu1 %v6694_v17 }
 0xb07   :  { %12045 = vmatpush3.bf16.msra.mxu1 %v13080_v20  ;;  %12060 = vmatprep.mubr.bf16.mxu1 %v6879_v54  ;;  %v13109_v20 = vld [vmem:[#allocation13 + $0xd0] sm:$0xff]   ;;  %v13114_v54 = vld [vmem:[#allocation13 + $0xa8] sm:$0xff]  }
 0xb08   :  { %12046 = vmatprep.subr.bf16.mxu1 %v13081_v49 }
 0xb0b   :  { %12047 = vmatpush3.bf16.msra.mxu1 %v13081_v49  ;;  %v13115_v49 = vld [vmem:[#allocation13 + $0xe8] sm:$0xff]  }
 0xb0c   :  { %12048 = vmatprep.subr.bf16.mxu1 %v13082_v35 }
 0xb0f   :  { %12049 = vmatpush3.bf16.msra.mxu1 %v13082_v35  ;;  %v13116_v35 = vld [vmem:[#allocation13 + $0xb0] sm:$0xff]  }
 0xb10   :  { %12050 = vmatprep.subr.bf16.mxu1 %v13083_v57 }
 0xb13   :  { %12051 = vmatpush3.bf16.msra.mxu1 %v13083_v57  ;;  %v13117_v57 = vld [vmem:[#allocation13 + $0xf0] sm:$0xff]  }
 0xb14   :  { %12052 = vmatprep.subr.bf16.mxu1 %v13084_v1 }
 0xb17   :  { %12053 = vmatpush3.bf16.msra.mxu1 %v13084_v1  ;;  %v13118_v1 = vld [vmem:[#allocation13 + $0xb8] sm:$0xff]  }
 0xb18   :  { %12054 = vmatprep.subr.bf16.mxu1 %v13085_v21 }
 0xb1b   :  { %12055 = vmatpush3.bf16.msra.mxu1 %v13085_v21  ;;  %v13119_v21 = vld [vmem:[#allocation13 + $0xf8] sm:$0xff]  }
 0xb1c   :  { %12056 = vmatprep.subr.bf16.mxu1 %v13086_v48 }
 0xb1f   :  { %12057 = vmatpush3.bf16.msra.mxu1 %v13086_v48 }
 0xb20   :  { %12058 = vmatprep.subr.bf16.mxu1 %v13087_v38 }
 0xb23   :  { %12059 = vmatpush3.bf16.msra.mxu1 %v13087_v38 }
 0xb24   :  { %12064 = vmatprep.subr.bf16.mxu1 %v13709_v56 }
 0xb26   :  { %12061 = vmatmul.mubr.bf16.vlgmr.msra.gmra.mrb[100].mxu1 %v6880_v45  ;;  %v13112_v45 = vld [vmem:[#allocation13 + $0xa0] sm:$0xff]  }
 0xb27   :  { %12068 = vmatprep.mubr.msk.bf16.mxu1 %vm13710_vm2, %v13709_v56 }
 0xbf9   :  { %v12062_v34 = vpop.f32.mrb[100].mxu1 }
 0xbfa   :  { %v7008_v25 = vadd.f32 %v12062_v34, %v9823_v22  ;;  %v6980_v61 = vpop.f32.mrb[101].mxu1 }
 0xbfb   :  { %v7006_v42 = vadd.f32 %v9823_v22, %v6980_v61  ;;  %v12063_v55 = vpop.f32.mrb[102].mxu1 }
 0xbfc   :  { %v7009_v27 = vadd.f32 %v12063_v55, %v9823_v22  ;;  %v6983_v11 = vpop.f32.mrb[103].mxu1  ;;  %v7012_v36 = vmax.f32 %v7008_v25, 0.0 }
 0xbfd   :  { %v7007_v50 = vadd.f32 %v9823_v22, %v6983_v11  ;;  %v7010_v29 = vmax.f32 %v7006_v42, 0.0 }
 0xbfe   :  { %v7013_v19 = vmax.f32 %v7009_v27, 0.0 }
 0xbff   :  { %v7011_v60 = vmax.f32 %v7007_v50, 0.0 }
 0xc00   :  { %v15567_v52 = vpack.c.bf16 %v7013_v19, %v7012_v36 }
 0xc01   :  { %v15569_v13 = vpack.c.bf16 %v7011_v60, %v7010_v29 }
 0xc03   :  { %12065 = vmatpush3.bf16.msra.mxu1 %v15569_v13  ;;  %12073 = vmatpush3.bf16.msra.mxu0 %v15569_v13 }
 0xc04   :  { %12066 = vmatprep.subr.bf16.mxu1 %v13709_v56  ;;  %12074 = vmatprep.subr.bf16.mxu0 %v13709_v56 }
 0xc07   :  { %12067 = vmatpush3.bf16.msra.mxu1 %v15567_v52  ;;  %12075 = vmatpush3.bf16.msra.mxu0 %v15567_v52 }
 0xc08   :  { %12080 = vmatprep.subr.bf16.mxu0 %v13709_v56  ;;  %12100 = vmatprep.subr.bf16.mxu1 %v13709_v56 }
 0xc0a   :  { %12069 = vmatmul.mubr.msk.bf16.vlgmr.msra.gmra.mrb[104].mxu1 %vm7017_vm3, %v7016_v59  ;;  %12077 = vmatmul.mubr.msk.bf16.vlgmr.msra.gmra.mrb[16].mxu0 %vm7017_vm3, %v7079_v28 }
 0xc0b   :  { %12081 = vmatpush3.bf16.msra.mxu0 %v13088_v37  ;;  %12101 = vmatpush3.bf16.msra.mxu1 %v13089_v32 }
 0xc0c   :  { %12082 = vmatprep.subr.bf16.mxu0 %v13709_v56  ;;  %12102 = vmatprep.subr.bf16.mxu1 %v13709_v56 }
 0xc0d   :  { %12096 = vmatprep.mubr.msk.bf16.mxu0 %vm13710_vm2, %v13709_v56  ;;  %12116 = vmatprep.mubr.msk.bf16.mxu1 %vm13710_vm2, %v13709_v56 }
 0xc0f   :  { %12083 = vmatpush3.bf16.msra.mxu0 %v13090_v18  ;;  %12103 = vmatpush3.bf16.msra.mxu1 %v13091_v2  ;;  %v7622_v18 = vld [vmem:[#allocation12 + $0x10] sm:$0xf]  ;;  %v7774_v2 = vld [vmem:[#allocation12 + $0x14] sm:$0xf] }
 0xc10   :  { %12084 = vmatprep.subr.bf16.mxu0 %v13709_v56  ;;  %12104 = vmatprep.subr.bf16.mxu1 %v13709_v56 }
 0xc13   :  { %12085 = vmatpush3.bf16.msra.mxu0 %v13092_v43  ;;  %12105 = vmatpush3.bf16.msra.mxu1 %v13093_v10  ;;  %v13120_v43 = vld [vmem:[#allocation13 + $0x100] sm:$0xff]  }
 0xc14   :  { %12086 = vmatprep.subr.bf16.mxu0 %v13709_v56  ;;  %12106 = vmatprep.subr.bf16.mxu1 %v13709_v56  ;;  %v13121_v10 = vld [vmem:[#allocation13 + $0x140] sm:$0xff]  }
 0xc17   :  { %12087 = vmatpush3.bf16.msra.mxu0 %v13094_v8  ;;  %12107 = vmatpush3.bf16.msra.mxu1 %v13095_v63  ;;  %v13122_v8 = vld [vmem:[#allocation13 + $0x108] sm:$0xff]  }
 0xc18   :  { %12088 = vmatprep.subr.bf16.mxu0 %v13709_v56  ;;  %12108 = vmatprep.subr.bf16.mxu1 %v13709_v56  ;;  %v13123_v63 = vld [vmem:[#allocation13 + $0x148] sm:$0xff]  }
 0xc1b   :  { %12089 = vmatpush3.bf16.msra.mxu0 %v13096_v39  ;;  %12109 = vmatpush3.bf16.msra.mxu1 %v13097_v47  ;;  %v13124_v39 = vld [vmem:[#allocation13 + $0x110] sm:$0xff]  }
 0xc1c   :  { %12090 = vmatprep.subr.bf16.mxu0 %v13709_v56  ;;  %12110 = vmatprep.subr.bf16.mxu1 %v13709_v56  ;;  %v13125_v47 = vld [vmem:[#allocation13 + $0x150] sm:$0xff]  }
 0xc1f   :  { %12091 = vmatpush3.bf16.msra.mxu0 %v13098_v40  ;;  %12111 = vmatpush3.bf16.msra.mxu1 %v13099_v44  ;;  %v13126_v40 = vld [vmem:[#allocation13 + $0x118] sm:$0xff]  }
 0xc20   :  { %12092 = vmatprep.subr.bf16.mxu0 %v13709_v56  ;;  %12112 = vmatprep.subr.bf16.mxu1 %v13709_v56  ;;  %v13127_v44 = vld [vmem:[#allocation13 + $0x158] sm:$0xff]  }
 0xc23   :  { %12093 = vmatpush3.bf16.msra.mxu0 %v13100_v7  ;;  %12113 = vmatpush3.bf16.msra.mxu1 %v13101_v23  ;;  %v13128_v7 = vld [vmem:[#allocation13 + $0x120] sm:$0xff]  }
 0xc24   :  { %12094 = vmatprep.subr.bf16.mxu0 %v13709_v56  ;;  %12114 = vmatprep.subr.bf16.mxu1 %v13709_v56  ;;  %v13129_v23 = vld [vmem:[#allocation13 + $0x160] sm:$0xff]  }
 0xc27   :  { %12095 = vmatpush3.bf16.msra.mxu0 %v13102_v24  ;;  %12115 = vmatpush3.bf16.msra.mxu1 %v13103_v53  ;;  %v13130_v24 = vld [vmem:[#allocation13 + $0x128] sm:$0xff]  }
 0xc28   :  { %12120 = vmatprep.subr.bf16.mxu0 %v13709_v56  ;;  %12148 = vmatprep.subr.bf16.mxu1 %v13709_v56  ;;  %v13131_v53 = vld [vmem:[#allocation13 + $0x168] sm:$0xff]  }
 0xcdd   :  { %v7055_v16 = vpop.f32.mrb[104].mxu1  ;;  %v7117_v12 = vpop.f32.mrb[16].mxu0 }
 0xcde   :  { %v7061_v3 = vpack.c.bf16 %v7055_v16, %v7055_v16  ;;  %v7123_v46 = vpack.c.bf16 %v7117_v12, %v7117_v12  ;;  %v12078_v58 = vpop.f32.mrb[17].mxu0  ;;  %v12070_v30 = vpop.f32.mrb[105].mxu1  ;;  %v13132_v16 = vld [vmem:[#allocation13 + $0x130] sm:$0xff]  }
 0xcdf   :  { %v7120_v17 = vpop.f32.mrb[18].mxu0  ;;  %v7058_v5 = vpop.f32.mrb[106].mxu1  ;;  %v13133_v12 = vld [vmem:[#allocation13 + $0x170] sm:$0xff]  }
 0xce0   :  { %v12079_v15 = vpop.f32.mrb[19].mxu0  ;;  %12097 = vmatmul.mubr.bf16.vlgmr.msra.gmra.mrb[20].mxu0 %v7123_v46  ;;  %12117 = vmatmul.mubr.bf16.vlgmr.msra.gmra.mrb[108].mxu1 %v7061_v3  ;;  %v12071_v31 = vpop.f32.mrb[107].mxu1  ;;  %v13134_v3 = vld [vmem:[#allocation13 + $0x138] sm:$0xff]  }
 0xce1   :  { %12121 = vmatpush3.bf16.msra.mxu0 %v15569_v13  ;;  %12149 = vmatpush3.bf16.msra.mxu1 %v15569_v13  ;;  %v13135_v46 = vld [vmem:[#allocation13 + $0x178] sm:$0xff]  }
 0xce2   :  { %12122 = vmatprep.subr.bf16.mxu0 %v13709_v56  ;;  %12150 = vmatprep.subr.bf16.mxu1 %v13709_v56 }
 0xce3   :  { %12124 = vmatprep.mubr.msk.bf16.mxu0 %vm13710_vm2, %v13709_v56  ;;  %12152 = vmatprep.mubr.msk.bf16.mxu1 %vm13710_vm2, %v13709_v56 }
 0xce5   :  { %12123 = vmatpush3.bf16.msra.mxu0 %v15567_v52  ;;  %12151 = vmatpush3.bf16.msra.mxu1 %v15567_v52 }
 0xce6   :  { %12128 = vmatprep.subr.bf16.mxu0 %v13709_v56  ;;  %12156 = vmatprep.subr.bf16.mxu1 %v13709_v56 }
 0xce8   :  { %12125 = vmatmul.mubr.msk.bf16.vlgmr.msra.gmra.mrb[24].mxu0 %vm7017_vm3, %v7318_v51  ;;  %12153 = vmatmul.mubr.msk.bf16.vlgmr.msra.gmra.mrb[112].mxu1 %vm7017_vm3, %v7470_v9 }
 0xce9   :  { %12129 = vmatpush3.bf16.msra.mxu0 %v13104_v6  ;;  %12157 = vmatpush3.bf16.msra.mxu1 %v13105_v62 }
 0xcea   :  { %12130 = vmatprep.subr.bf16.mxu0 %v13709_v56  ;;  %12158 = vmatprep.subr.bf16.mxu1 %v13709_v56 }
 0xceb   :  { %12144 = vmatprep.mubr.msk.bf16.mxu0 %vm13710_vm2, %v13709_v56  ;;  %12172 = vmatprep.mubr.msk.bf16.mxu1 %vm13710_vm2, %v13709_v56 }
 0xced   :  { %12131 = vmatpush3.bf16.msra.mxu0 %v13106_v14  ;;  %12159 = vmatpush3.bf16.msra.mxu1 %v13107_v0 }
 0xcee   :  { %12132 = vmatprep.subr.bf16.mxu0 %v13709_v56  ;;  %12160 = vmatprep.subr.bf16.mxu1 %v13709_v56 }
 0xcf1   :  { %12133 = vmatpush3.bf16.msra.mxu0 %v13108_v41  ;;  %12161 = vmatpush3.bf16.msra.mxu1 %v13109_v20 }
 0xcf2   :  { %12134 = vmatprep.subr.bf16.mxu0 %v13709_v56  ;;  %12162 = vmatprep.subr.bf16.mxu1 %v13709_v56 }
 0xcf5   :  { %12135 = vmatpush3.bf16.msra.mxu0 %v13110_v33  ;;  %12163 = vmatpush3.bf16.msra.mxu1 %v13111_v26 }
 0xcf6   :  { %12136 = vmatprep.subr.bf16.mxu0 %v13709_v56  ;;  %12164 = vmatprep.subr.bf16.mxu1 %v13709_v56 }
 0xcf9   :  { %12137 = vmatpush3.bf16.msra.mxu0 %v13112_v45  ;;  %12165 = vmatpush3.bf16.msra.mxu1 %v13113_v4 }
 0xcfa   :  { %12138 = vmatprep.subr.bf16.mxu0 %v13709_v56  ;;  %12166 = vmatprep.subr.bf16.mxu1 %v13709_v56 }
 0xcfd   :  { %12139 = vmatpush3.bf16.msra.mxu0 %v13114_v54  ;;  %12167 = vmatpush3.bf16.msra.mxu1 %v13115_v49 }
 0xcfe   :  { %12140 = vmatprep.subr.bf16.mxu0 %v13709_v56  ;;  %12168 = vmatprep.subr.bf16.mxu1 %v13709_v56 }
 0xd01   :  { %12141 = vmatpush3.bf16.msra.mxu0 %v13116_v35  ;;  %12169 = vmatpush3.bf16.msra.mxu1 %v13117_v57  ;;  %v7926_v35 = vld [vmem:[#allocation12 + $0x18] sm:$0xf]  ;;  %v8078_v57 = vld [vmem:[#allocation12 + $0x1c] sm:$0xf] }
 0xd02   :  { %12142 = vmatprep.subr.bf16.mxu0 %v13709_v56  ;;  %12170 = vmatprep.subr.bf16.mxu1 %v13709_v56 }
 0xd05   :  { %12143 = vmatpush3.bf16.msra.mxu0 %v13118_v1  ;;  %12171 = vmatpush3.bf16.msra.mxu1 %v13119_v21  ;;  %v13136_v1 = vld [vmem:[#allocation13 + $0x180] sm:$0xff]  }
 0xd06   :  { %12176 = vmatprep.subr.bf16.mxu0 %v13709_v56  ;;  %12204 = vmatprep.subr.bf16.mxu1 %v13709_v56  ;;  %v13137_v21 = vld [vmem:[#allocation13 + $0x1c0] sm:$0xff]  }
 0xdb3   :  { %v7223_v48 = vpop.f32.mrb[20].mxu0  ;;  %v7311_v38 = vpop.f32.mrb[108].mxu1 }
 0xdb4   :  { %v15635_v22 = vadd.f32 %v7311_v38, %v7223_v48  ;;  %v12098_v34 = vpop.f32.mrb[21].mxu0  ;;  %v12118_v25 = vpop.f32.mrb[109].mxu1  ;;  %v13138_v48 = vld [vmem:[#allocation13 + $0x188] sm:$0xff]  }
 0xdb5   :  { %v7226_v61 = vpop.f32.mrb[22].mxu0  ;;  %v7314_v42 = vpop.f32.mrb[110].mxu1  ;;  %v13139_v38 = vld [vmem:[#allocation13 + $0x1c8] sm:$0xff]   ;;  %v13141_v34 = vld [vmem:[#allocation13 + $0x1d0] sm:$0xff]   ;;  %v13142_v25 = vld [vmem:[#allocation13 + $0x198] sm:$0xff]  }
 0xdb6   :  { %v12099_v55 = vpop.f32.mrb[23].mxu0  ;;  %v12119_v27 = vpop.f32.mrb[111].mxu1  ;;  %v13143_v61 = vld [vmem:[#allocation13 + $0x1d8] sm:$0xff]   ;;  %v13144_v42 = vld [vmem:[#allocation13 + $0x1a0] sm:$0xff]  }
 0xdb7   :  { %v13145_v55 = vld [vmem:[#allocation13 + $0x1e0] sm:$0xff]   ;;  %v13146_v27 = vld [vmem:[#allocation13 + $0x1a8] sm:$0xff]  }
 0xdbb   :  { %v7356_v11 = vpop.f32.mrb[24].mxu0  ;;  %v7508_v50 = vpop.f32.mrb[112].mxu1 }
 0xdbc   :  { %v7362_v36 = vpack.c.bf16 %v7356_v11, %v7356_v11  ;;  %v7514_v19 = vpack.c.bf16 %v7508_v50, %v7508_v50  ;;  %v12126_v29 = vpop.f32.mrb[25].mxu0  ;;  %v12154_v60 = vpop.f32.mrb[113].mxu1  ;;  %v13147_v11 = vld [vmem:[#allocation13 + $0x1e8] sm:$0xff]   ;;  %v13148_v50 = vld [vmem:[#allocation13 + $0x1b0] sm:$0xff]  }
 0xdbd   :  { %v7359_v59 = vpop.f32.mrb[26].mxu0  ;;  %v7511_v28 = vpop.f32.mrb[114].mxu1  ;;  %v13151_v29 = vld [vmem:[#allocation13 + $0x1f8] sm:$0xff]  }
 0xdbe   :  { %v12127_v37 = vpop.f32.mrb[27].mxu0  ;;  %12145 = vmatmul.mubr.bf16.vlgmr.msra.gmra.mrb[28].mxu0 %v7362_v36  ;;  %12173 = vmatmul.mubr.bf16.vlgmr.msra.gmra.mrb[116].mxu1 %v7514_v19  ;;  %v12155_v32 = vpop.f32.mrb[115].mxu1  ;;  %v13149_v36 = vld [vmem:[#allocation13 + $0x1f0] sm:$0xff]   ;;  %v13150_v19 = vld [vmem:[#allocation13 + $0x1b8] sm:$0xff]  }
 0xdbf   :  { %12177 = vmatpush3.bf16.msra.mxu0 %v15569_v13  ;;  %12205 = vmatpush3.bf16.msra.mxu1 %v15569_v13 }
 0xdc0   :  { %12178 = vmatprep.subr.bf16.mxu0 %v13709_v56  ;;  %12206 = vmatprep.subr.bf16.mxu1 %v13709_v56 }
 0xdc1   :  { %12180 = vmatprep.mubr.msk.bf16.mxu0 %vm13710_vm2, %v13709_v56  ;;  %12208 = vmatprep.mubr.msk.bf16.mxu1 %vm13710_vm2, %v13709_v56 }
 0xdc3   :  { %12179 = vmatpush3.bf16.msra.mxu0 %v15567_v52  ;;  %12207 = vmatpush3.bf16.msra.mxu1 %v15567_v52 }
 0xdc4   :  { %12184 = vmatprep.subr.bf16.mxu0 %v13709_v56  ;;  %12212 = vmatprep.subr.bf16.mxu1 %v13709_v56 }
 0xdc6   :  { %12181 = vmatmul.mubr.msk.bf16.vlgmr.msra.gmra.mrb[32].mxu0 %vm7017_vm3, %v7622_v18  ;;  %12209 = vmatmul.mubr.msk.bf16.vlgmr.msra.gmra.mrb[120].mxu1 %vm7017_vm3, %v7774_v2 }
 0xdc7   :  { %12185 = vmatpush3.bf16.msra.mxu0 %v13120_v43  ;;  %12213 = vmatpush3.bf16.msra.mxu1 %v13121_v10 }
 0xdc8   :  { %12186 = vmatprep.subr.bf16.mxu0 %v13709_v56  ;;  %12214 = vmatprep.subr.bf16.mxu1 %v13709_v56 }
 0xdc9   :  { %12200 = vmatprep.mubr.msk.bf16.mxu0 %vm13710_vm2, %v13709_v56  ;;  %12228 = vmatprep.mubr.msk.bf16.mxu1 %vm13710_vm2, %v13709_v56 }
 0xdcb   :  { %12187 = vmatpush3.bf16.msra.mxu0 %v13122_v8  ;;  %12215 = vmatpush3.bf16.msra.mxu1 %v13123_v63 }
 0xdcc   :  { %12188 = vmatprep.subr.bf16.mxu0 %v13709_v56  ;;  %12216 = vmatprep.subr.bf16.mxu1 %v13709_v56 }
 0xdcf   :  { %12189 = vmatpush3.bf16.msra.mxu0 %v13124_v39  ;;  %12217 = vmatpush3.bf16.msra.mxu1 %v13125_v47 }
 0xdd0   :  { %12190 = vmatprep.subr.bf16.mxu0 %v13709_v56  ;;  %12218 = vmatprep.subr.bf16.mxu1 %v13709_v56 }
 0xdd3   :  { %12191 = vmatpush3.bf16.msra.mxu0 %v13126_v40  ;;  %12219 = vmatpush3.bf16.msra.mxu1 %v13127_v44 }
 0xdd4   :  { %12192 = vmatprep.subr.bf16.mxu0 %v13709_v56  ;;  %12220 = vmatprep.subr.bf16.mxu1 %v13709_v56 }
 0xdd7   :  { %12193 = vmatpush3.bf16.msra.mxu0 %v13128_v7  ;;  %12221 = vmatpush3.bf16.msra.mxu1 %v13129_v23 }
 0xdd8   :  { %12194 = vmatprep.subr.bf16.mxu0 %v13709_v56  ;;  %12222 = vmatprep.subr.bf16.mxu1 %v13709_v56 }
 0xddb   :  { %12195 = vmatpush3.bf16.msra.mxu0 %v13130_v24  ;;  %12223 = vmatpush3.bf16.msra.mxu1 %v13131_v53 }
 0xddc   :  { %12196 = vmatprep.subr.bf16.mxu0 %v13709_v56  ;;  %12224 = vmatprep.subr.bf16.mxu1 %v13709_v56 }
 0xddf   :  { %12197 = vmatpush3.bf16.msra.mxu0 %v13132_v16  ;;  %12225 = vmatpush3.bf16.msra.mxu1 %v13133_v12  ;;  %v8230_v12 = vld [vmem:[#allocation12 + $0x20] sm:$0xf] }
 0xde0   :  { %12198 = vmatprep.subr.bf16.mxu0 %v13709_v56  ;;  %12226 = vmatprep.subr.bf16.mxu1 %v13709_v56 }
 0xde3   :  { %12199 = vmatpush3.bf16.msra.mxu0 %v13134_v3  ;;  %12227 = vmatpush3.bf16.msra.mxu1 %v13135_v46  ;;  %v13152_v3 = vld [vmem:[#allocation13 + $0x200] sm:$0xff]   ;;  %v13153_v46 = vld [vmem:[#allocation13 + $0x208] sm:$0xff]  }
 0xde4   :  { %12232 = vmatprep.subr.bf16.mxu0 %v13709_v56  ;;  %12260 = vmatprep.subr.bf16.mxu1 %v13709_v56 }
 0xe91   :  { %v7462_v58 = vpop.f32.mrb[28].mxu0  ;;  %v7614_v30 = vpop.f32.mrb[116].mxu1 }
 0xe92   :  { %v7468_v17 = vadd.f32 %v7462_v58, %v15635_v22  ;;  %v12146_v5 = vpop.f32.mrb[29].mxu0  ;;  %v12174_v15 = vpop.f32.mrb[117].mxu1  ;;  %v13140_v22 = vld [vmem:[#allocation13 + $0x190] sm:$0xff]   ;;  %v13155_v58 = vld [vmem:[#allocation13 + $0x218] sm:$0xff]  }
 0xe93   :  { %v7465_v31 = vpop.f32.mrb[30].mxu0  ;;  %v7617_v51 = vpop.f32.mrb[118].mxu1  ;;  %v13159_v5 = vld [vmem:[#allocation13 + $0x238] sm:$0xff]  }
 0xe94   :  { %v15672_v9 = vadd.f32 %v7614_v30, %v7468_v17  ;;  %v12147_v6 = vpop.f32.mrb[31].mxu0  ;;  %v12175_v62 = vpop.f32.mrb[119].mxu1  ;;  %v13157_v30 = vld [vmem:[#allocation13 + $0x228] sm:$0xff]   ;;  %v13158_v17 = vld [vmem:[#allocation13 + $0x230] sm:$0xff]  }
 0xe99   :  { %v7660_v14 = vpop.f32.mrb[32].mxu0  ;;  %v7812_v0 = vpop.f32.mrb[120].mxu1 }
 0xe9a   :  { %v7666_v41 = vpack.c.bf16 %v7660_v14, %v7660_v14  ;;  %v7818_v20 = vpack.c.bf16 %v7812_v0, %v7812_v0  ;;  %v12182_v33 = vpop.f32.mrb[33].mxu0  ;;  %v12210_v26 = vpop.f32.mrb[121].mxu1 }
 0xe9b   :  { %v7663_v45 = vpop.f32.mrb[34].mxu0  ;;  %v7815_v4 = vpop.f32.mrb[122].mxu1 }
 0xe9c   :  { %v12183_v54 = vpop.f32.mrb[35].mxu0  ;;  %12201 = vmatmul.mubr.bf16.vlgmr.msra.gmra.mrb[36].mxu0 %v7666_v41  ;;  %12229 = vmatmul.mubr.bf16.vlgmr.msra.gmra.mrb[124].mxu1 %v7818_v20  ;;  %v12211_v49 = vpop.f32.mrb[123].mxu1 }
 0xe9d   :  { %12233 = vmatpush3.bf16.msra.mxu0 %v15569_v13  ;;  %12261 = vmatpush3.bf16.msra.mxu1 %v15569_v13  ;;  %v13160_v49 = vld [vmem:[#allocation18] ss:$8 sps:$4 sm:$0xff]  }
 0xe9e   :  { %12234 = vmatprep.subr.bf16.mxu0 %v13709_v56  ;;  %12262 = vmatprep.subr.bf16.mxu1 %v13709_v56 }
 0xe9f   :  { %12236 = vmatprep.mubr.msk.bf16.mxu0 %vm13710_vm2, %v13709_v56  ;;  %12264 = vmatprep.mubr.msk.bf16.mxu1 %vm13710_vm2, %v13709_v56 }
 0xea1   :  { %12235 = vmatpush3.bf16.msra.mxu0 %v15567_v52  ;;  %12263 = vmatpush3.bf16.msra.mxu1 %v15567_v52 }
 0xea2   :  { %12240 = vmatprep.subr.bf16.mxu0 %v13709_v56  ;;  %12268 = vmatprep.subr.bf16.mxu1 %v13709_v56 }
 0xea4   :  { %12237 = vmatmul.mubr.msk.bf16.vlgmr.msra.gmra.mrb[40].mxu0 %vm7017_vm3, %v7926_v35  ;;  %12265 = vmatmul.mubr.msk.bf16.vlgmr.msra.gmra.mrb[128].mxu1 %vm7017_vm3, %v8078_v57  ;;  %v13162_v35 = vld [vmem:[#allocation18 + $0x4] ss:$8 sps:$4 sm:$0xff]   ;;  %v13165_v57 = vld [vmem:[#allocation18 + $0x14] ss:$8 sps:$4 sm:$0xff]  }
 0xea5   :  { %12241 = vmatpush3.bf16.msra.mxu0 %v13136_v1  ;;  %12269 = vmatpush3.bf16.msra.mxu1 %v13137_v21  ;;  %v13163_v1 = vld [vmem:[#allocation18 + $0x10] ss:$8 sps:$4 sm:$0xff]   ;;  %v13171_v21 = vld [vmem:[#allocation18 + $0x24] ss:$8 sps:$4 sm:$0xff]  }
 0xea6   :  { %12242 = vmatprep.subr.bf16.mxu0 %v13709_v56  ;;  %12270 = vmatprep.subr.bf16.mxu1 %v13709_v56 }
 0xea7   :  { %12256 = vmatprep.mubr.msk.bf16.mxu0 %vm13710_vm2, %v13709_v56  ;;  %12284 = vmatprep.mubr.msk.bf16.mxu1 %vm13710_vm2, %v13709_v56 }
 0xea9   :  { %12243 = vmatpush3.bf16.msra.mxu0 %v13138_v48  ;;  %12271 = vmatpush3.bf16.msra.mxu1 %v13139_v38  ;;  %v13169_v48 = vld [vmem:[#allocation18 + $0x20] ss:$8 sps:$4 sm:$0xff]   ;;  %v13177_v38 = vld [vmem:[#allocation18 + $0x34] ss:$8 sps:$4 sm:$0xff]  }
 0xeaa   :  { %12244 = vmatprep.subr.bf16.mxu0 %v13709_v56  ;;  %12272 = vmatprep.subr.bf16.mxu1 %v13709_v56 }
 0xead   :  { %12245 = vmatpush3.bf16.msra.mxu0 %v13140_v22  ;;  %12273 = vmatpush3.bf16.msra.mxu1 %v13141_v34  ;;  %v13175_v22 = vld [vmem:[#allocation18 + $0x30] ss:$8 sps:$4 sm:$0xff]   ;;  %v13183_v34 = vld [vmem:[#allocation18 + $0x44] ss:$8 sps:$4 sm:$0xff]  }
 0xeae   :  { %12246 = vmatprep.subr.bf16.mxu0 %v13709_v56  ;;  %12274 = vmatprep.subr.bf16.mxu1 %v13709_v56 }
 0xeb1   :  { %12247 = vmatpush3.bf16.msra.mxu0 %v13142_v25  ;;  %12275 = vmatpush3.bf16.msra.mxu1 %v13143_v61  ;;  %v13181_v25 = vld [vmem:[#allocation18 + $0x40] ss:$8 sps:$4 sm:$0xff]   ;;  %v13189_v61 = vld [vmem:[#allocation18 + $0x54] ss:$8 sps:$4 sm:$0xff]  }
 0xeb2   :  { %12248 = vmatprep.subr.bf16.mxu0 %v13709_v56  ;;  %12276 = vmatprep.subr.bf16.mxu1 %v13709_v56 }
 0xeb5   :  { %12249 = vmatpush3.bf16.msra.mxu0 %v13144_v42  ;;  %12277 = vmatpush3.bf16.msra.mxu1 %v13145_v55  ;;  %v13187_v42 = vld [vmem:[#allocation18 + $0x50] ss:$8 sps:$4 sm:$0xff]   ;;  %v13195_v55 = vld [vmem:[#allocation18 + $0x64] ss:$8 sps:$4 sm:$0xff]  }
 0xeb6   :  { %12250 = vmatprep.subr.bf16.mxu0 %v13709_v56  ;;  %12278 = vmatprep.subr.bf16.mxu1 %v13709_v56 }
 0xeb9   :  { %12251 = vmatpush3.bf16.msra.mxu0 %v13146_v27  ;;  %12279 = vmatpush3.bf16.msra.mxu1 %v13147_v11  ;;  %v13193_v27 = vld [vmem:[#allocation18 + $0x60] ss:$8 sps:$4 sm:$0xff]   ;;  %v13201_v11 = vld [vmem:[#allocation18 + $0x74] ss:$8 sps:$4 sm:$0xff]  }
 0xeba   :  { %12252 = vmatprep.subr.bf16.mxu0 %v13709_v56  ;;  %12280 = vmatprep.subr.bf16.mxu1 %v13709_v56 }
 0xebd   :  { %12253 = vmatpush3.bf16.msra.mxu0 %v13148_v50  ;;  %12281 = vmatpush3.bf16.msra.mxu1 %v13149_v36  ;;  %v13199_v50 = vld [vmem:[#allocation18 + $0x70] ss:$8 sps:$4 sm:$0xff]  }
 0xebe   :  { %12254 = vmatprep.subr.bf16.mxu0 %v13709_v56  ;;  %12282 = vmatprep.subr.bf16.mxu1 %v13709_v56 }
 0xec1   :  { %12255 = vmatpush3.bf16.msra.mxu0 %v13150_v19  ;;  %12283 = vmatpush3.bf16.msra.mxu1 %v13151_v29  ;;  %v9905_v19 = vld [vmem:[#allocation15] ss:$0 sm:$0xff] }
 0xec2   :  { %12288 = vmatprep.subr.bf16.mxu0 %v13709_v56  ;;  %12316 = vmatprep.subr.bf16.mxu1 %v13709_v56 }
 0xf6f   :  { %v7766_v60 = vpop.f32.mrb[36].mxu0  ;;  %v7918_v59 = vpop.f32.mrb[124].mxu1 }
 0xf70   :  { %v7772_v28 = vadd.f32 %v7766_v60, %v15672_v9  ;;  %v12202_v37 = vpop.f32.mrb[37].mxu0  ;;  %v12230_v32 = vpop.f32.mrb[125].mxu1 }
 0xf71   :  { %v7769_v18 = vpop.f32.mrb[38].mxu0  ;;  %v7921_v2 = vpop.f32.mrb[126].mxu1 }
 0xf72   :  { %v7924_v43 = vadd.f32 %v7918_v59, %v7772_v28  ;;  %v12203_v10 = vpop.f32.mrb[39].mxu0  ;;  %v12231_v8 = vpop.f32.mrb[127].mxu1 }
 0xf73   :  { %v13168_v10 = vld [vmem:[#allocation18 + $0x84] ss:$8 sps:$4 sm:$0xff]   ;;  %v8458_v8 = vld [vmem:[#allocation16 + $0x4] sm:$0xf] }
 0xf77   :  { %v7964_v63 = vpop.f32.mrb[40].mxu0  ;;  %v8116_v39 = vpop.f32.mrb[128].mxu1 }
 0xf78   :  { %v7970_v47 = vpack.c.bf16 %v7964_v63, %v7964_v63  ;;  %v12238_v40 = vpop.f32.mrb[41].mxu0  ;;  %v8122_v44 = vpack.c.bf16 %v8116_v39, %v8116_v39  ;;  %v12266_v7 = vpop.f32.mrb[129].mxu1  ;;  %v13166_v63 = vld [vmem:[#allocation18 + $0x80] ss:$8 sps:$4 sm:$0xff]   ;;  %v13174_v39 = vld [vmem:[#allocation18 + $0x94] ss:$8 sps:$4 sm:$0xff]  }
 0xf79   :  { %v7967_v23 = vpop.f32.mrb[42].mxu0  ;;  %v8119_v24 = vpop.f32.mrb[130].mxu1  ;;  %v13180_v40 = vld [vmem:[#allocation18 + $0xa4] ss:$8 sps:$4 sm:$0xff]   ;;  %v13186_v7 = vld [vmem:[#allocation18 + $0xb4] ss:$8 sps:$4 sm:$0xff]  }
 0xf7a   :  { %v12239_v53 = vpop.f32.mrb[43].mxu0  ;;  %12257 = vmatmul.mubr.bf16.vlgmr.msra.gmra.mrb[44].mxu0 %v7970_v47  ;;  %12285 = vmatmul.mubr.bf16.vlgmr.msra.gmra.mrb[132].mxu1 %v8122_v44  ;;  %v12267_v16 = vpop.f32.mrb[131].mxu1  ;;  %v13172_v47 = vld [vmem:[#allocation18 + $0x90] ss:$8 sps:$4 sm:$0xff]   ;;  %v13178_v44 = vld [vmem:[#allocation18 + $0xa0] ss:$8 sps:$4 sm:$0xff]  }
 0xf7b   :  { %12289 = vmatpush3.bf16.msra.mxu0 %v15569_v13  ;;  %12292 = vmatprep.mubr.msk.bf16.mxu0 %vm13710_vm2, %v13709_v56  ;;  %v13154_v13 = vld [vmem:[#allocation13 + $0x210] sm:$0xff]   ;;  %v13184_v23 = vld [vmem:[#allocation18 + $0xb0] ss:$8 sps:$4 sm:$0xff]  }
 0xf7c   :  { %12290 = vmatprep.subr.bf16.mxu0 %v13709_v56  ;;  %12318 = vmatprep.mubr.msk.bf16.mxu1 %vm13710_vm2, %v13709_v56  ;;  %v13192_v24 = vld [vmem:[#allocation18 + $0xc4] ss:$8 sps:$4 sm:$0xff]   ;;  %v13190_v53 = vld [vmem:[#allocation18 + $0xc0] ss:$8 sps:$4 sm:$0xff]   ;;  %v13198_v16 = vld [vmem:[#allocation18 + $0xd4] ss:$8 sps:$4 sm:$0xff]  }
 0xf7f   :  { %12291 = vmatpush3.bf16.msra.mxu0 %v15567_v52  ;;  %v13156_v52 = vld [vmem:[#allocation13 + $0x220] sm:$0xff]  }
 0xf80   :  { %12296 = vmatprep.subr.bf16.mxu0 %v13709_v56 }
 0xf82   :  { %12293 = vmatmul.mubr.msk.bf16.vlgmr.msra.gmra.mrb[48].mxu0 %vm7017_vm3, %v8230_v12  ;;  %v13196_v12 = vld [vmem:[#allocation18 + $0xd0] ss:$8 sps:$4 sm:$0xff]  }
 0xf83   :  { %12297 = vmatpush3.bf16.msra.mxu0 %v13152_v3  ;;  %12312 = vmatprep.mubr.msk.bf16.mxu0 %vm13710_vm2, %v13709_v56  ;;  %v13202_v3 = vld [vmem:[#allocation18 + $0xe0] ss:$8 sps:$4 sm:$0xff]  }
 0xf84   :  { %12298 = vmatprep.subr.bf16.mxu0 %v13709_v56 }
 0xf87   :  { %12299 = vmatpush3.bf16.msra.mxu0 %v13153_v46  ;;  %v13204_v46 = vld [vmem:[#allocation18 + $0xe4] ss:$8 sps:$4 sm:$0xff]  }
 0xf88   :  { %12300 = vmatprep.subr.bf16.mxu0 %v13709_v56 }
 0xf8b   :  { %12301 = vmatpush3.bf16.msra.mxu0 %v13154_v13  ;;  %v13711_v13 = vmov 0  }
 0xf8c   :  { %12302 = vmatprep.subr.bf16.mxu0 %v13709_v56 }
 0xf8f   :  { %12303 = vmatpush3.bf16.msra.mxu0 %v13155_v58  ;;  %v13207_v58 = vld [vmem:[#allocation18 + $0xf4] ss:$8 sps:$4 sm:$0xff]  }
 0xf90   :  { %12304 = vmatprep.subr.bf16.mxu0 %v13709_v56 }
 0xf93   :  { %12305 = vmatpush3.bf16.msra.mxu0 %v13156_v52  ;;  %v13205_v52 = vld [vmem:[#allocation18 + $0xf0] ss:$8 sps:$4 sm:$0xff]  }
 0xf94   :  { %12306 = vmatprep.subr.bf16.mxu0 %v13709_v56 }
 0xf97   :  { %12307 = vmatpush3.bf16.msra.mxu0 %v13157_v30  ;;  %v13210_v30 = vld [vmem:[#allocation18 + $0x104] ss:$8 sps:$4 sm:$0xff]  }
 0xf98   :  { %12308 = vmatprep.subr.bf16.mxu0 %v13709_v56 }
 0xf9b   :  { %12309 = vmatpush3.bf16.msra.mxu0 %v13158_v17 }
 0xf9c   :  { %12310 = vmatprep.subr.bf16.mxu0 %v13709_v56 }
 0xf9f   :  { %12311 = vmatpush3.bf16.msra.mxu0 %v13159_v5  ;;  %v13208_v5 = vld [vmem:[#allocation18 + $0x100] ss:$8 sps:$4 sm:$0xff]  }
 0xfa0   :  { %8721 = vmatprep.subr.bf16.mxu0 %v13162_v35  ;;  %v13219_v35 = vld [vmem:[#allocation18 + $0x184] ss:$8 sps:$4 sm:$0xff]  }
0x104d   :  { %v8070_v15 = vpop.f32.mrb[44].mxu0  ;;  %v8222_v31 = vpop.f32.mrb[132].mxu1 }
0x104e   :  { %v8076_v51 = vadd.f32 %v8070_v15, %v7924_v43  ;;  %v12258_v9 = vpop.f32.mrb[45].mxu0  ;;  %v12286_v6 = vpop.f32.mrb[133].mxu1  ;;  %v8391_v43 = vld [vmem:[#allocation16] sm:$0xf] }
0x104f   :  { %v8073_v62 = vpop.f32.mrb[46].mxu0  ;;  %v8225_v14 = vpop.f32.mrb[134].mxu1 }
0x1050   :  { %v8228_v0 = vadd.f32 %v8222_v31, %v8076_v51  ;;  %v12259_v41 = vpop.f32.mrb[47].mxu0  ;;  %v12287_v20 = vpop.f32.mrb[135].mxu1  ;;  %v13213_v51 = vld [vmem:[#allocation18 + $0x114] ss:$8 sps:$4 sm:$0xff]   ;;  %v13211_v62 = vld [vmem:[#allocation18 + $0x110] ss:$8 sps:$4 sm:$0xff]  }
0x1051   :  { %v13216_v14 = vld [vmem:[#allocation18 + $0x124] ss:$8 sps:$4 sm:$0xff]  }
0x1055   :  { %v8268_v33 = vpop.f32.mrb[48].mxu0 }
0x1056   :  { %v8274_v26 = vpack.c.bf16 %v8268_v33, %v8268_v33  ;;  %v12294_v45 = vpop.f32.mrb[49].mxu0  ;;  %v13214_v33 = vld [vmem:[#allocation18 + $0x120] ss:$8 sps:$4 sm:$0xff]  }
0x1057   :  { %v8271_v4 = vpop.f32.mrb[50].mxu0  ;;  %v13222_v45 = vld [vmem:[#allocation18 + $0x134] ss:$8 sps:$4 sm:$0xff]  }
0x1058   :  { %v12295_v54 = vpop.f32.mrb[51].mxu0  ;;  %12313 = vmatmul.mubr.bf16.vlgmr.msra.gmra.mrb[52].mxu0 %v8274_v26 }
0x1059   :  { %8722 = vmatpush1.bf16.msra.mxu0 %v13160_v49  ;;  %8753 = vmatprep.mubr.bf16.mxu0 %v13711_v13  ;;  %v13220_v54 = vld [vmem:[#allocation18 + $0x130] ss:$8 sps:$4 sm:$0xff]  }
0x105a   :  { %8723 = vmatprep.subr.bf16.mxu0 %v13165_v57  ;;  %v8763_v49 = vld [vmem:[#allocation16 + $0x8] sm:$0xf]  ;;  %v8949_v57 = vld [vmem:[#allocation16 + $0xc] sm:$0xf] }
0x105d   :  { %8724 = vmatpush1.bf16.msra.mxu0 %v13163_v1  ;;  %v13217_v1 = vld [vmem:[#allocation18 + $0x180] ss:$8 sps:$4 sm:$0xff]  }
0x105e   :  { %8725 = vmatprep.subr.bf16.mxu0 %v13171_v21  ;;  %v13225_v21 = vld [vmem:[#allocation18 + $0x194] ss:$8 sps:$4 sm:$0xff]  }
0x1061   :  { %8726 = vmatpush1.bf16.msra.mxu0 %v13169_v48  ;;  %v13223_v48 = vld [vmem:[#allocation18 + $0x190] ss:$8 sps:$4 sm:$0xff]  }
0x1062   :  { %8727 = vmatprep.subr.bf16.mxu0 %v13177_v38  ;;  %v13226_v38 = vld [vmem:[#allocation18 + $0x140] ss:$8 sps:$4 sm:$0xff]  }
0x1065   :  { %8728 = vmatpush1.bf16.msra.mxu0 %v13175_v22  ;;  %v13228_v22 = vld [vmem:[#allocation18 + $0x144] ss:$8 sps:$4 sm:$0xff]  }
0x1066   :  { %8729 = vmatprep.subr.bf16.mxu0 %v13183_v34  ;;  %v13229_v34 = vld [vmem:[#allocation18 + $0x1a0] ss:$8 sps:$4 sm:$0xff]  }
0x1069   :  { %8730 = vmatpush1.bf16.msra.mxu0 %v13181_v25  ;;  %v13231_v25 = vld [vmem:[#allocation18 + $0x1a4] ss:$8 sps:$4 sm:$0xff]  }
0x106a   :  { %8731 = vmatprep.subr.bf16.mxu0 %v13189_v61  ;;  %v13234_v61 = vld [vmem:[#allocation18 + $0x154] ss:$8 sps:$4 sm:$0xff]  }
0x106d   :  { %8732 = vmatpush1.bf16.msra.mxu0 %v13187_v42  ;;  %v13237_v42 = vld [vmem:[#allocation18 + $0x1b4] ss:$8 sps:$4 sm:$0xff]  }
0x106e   :  { %8733 = vmatprep.subr.bf16.mxu0 %v13195_v55  ;;  %v13235_v55 = vld [vmem:[#allocation18 + $0x1b0] ss:$8 sps:$4 sm:$0xff]  }
0x1071   :  { %8734 = vmatpush1.bf16.msra.mxu0 %v13193_v27  ;;  %v13238_v27 = vld [vmem:[#allocation18 + $0x160] ss:$8 sps:$4 sm:$0xff]  }
0x1072   :  { %8735 = vmatprep.subr.bf16.mxu0 %v13201_v11  ;;  %v13240_v11 = vld [vmem:[#allocation18 + $0x164] ss:$8 sps:$4 sm:$0xff]  }
0x1075   :  { %8736 = vmatpush1.bf16.msra.mxu0 %v13199_v50  ;;  %v13241_v50 = vld [vmem:[#allocation18 + $0x1c0] ss:$8 sps:$4 sm:$0xff]  }
0x1076   :  { %8905 = vmatprep.subr.bf16.mxu0 %v13210_v30 }
0x112b   :  { %v8374_v36 = vpop.f32.mrb[52].mxu0 }
0x112c   :  { %v8380_v29 = vadd.f32 %v8374_v36, %v8228_v0  ;;  %v12314_v60 = vpop.f32.mrb[53].mxu0  ;;  %v13243_v36 = vld [vmem:[#allocation18 + $0x1c4] ss:$8 sps:$4 sm:$0xff]  }
0x112d   :  { %v8377_v59 = vpop.f32.mrb[54].mxu0  ;;  %v13244_v60 = vld [vmem:[#allocation18 + $0x170] ss:$8 sps:$4 sm:$0xff]  }
0x112e   :  { %v8388_v28 = vadd.f32 %v9905_v19, %v8380_v29  ;;  %v12315_v37 = vpop.f32.mrb[55].mxu0  ;;  %v13246_v19 = vld [vmem:[#allocation18 + $0x174] ss:$8 sps:$4 sm:$0xff]   ;;  %v13247_v59 = vld [vmem:[#allocation18 + $0x1d0] ss:$8 sps:$4 sm:$0xff]  }
0x112f   :  { %v13249_v29 = vld [vmem:[#allocation18 + $0x1d4] ss:$8 sps:$4 sm:$0xff]   ;;  %v13250_v37 = vld [vmem:[#allocation18 + $0x1e0] ss:$8 sps:$4 sm:$0xff]  }
0x1130   :  { %v8389_v32 = vmax.f32 %v8388_v28, 0.0  ;;  %v13252_v28 = vld [vmem:[#allocation18 + $0x1e4] ss:$8 sps:$4 sm:$0xff]  }
0x1132   :  { %v8390_v18 = vpack.c.bf16 %v8389_v32, %v8389_v32  ;;  %v13255_v32 = vld [vmem:[#allocation18 + $0x1f4] ss:$8 sps:$4 sm:$0xff]  }
0x1134   :  { %v15727_v2 = vsel %vm8396_vm4, %v8390_v18, 0  ;;  %v13253_v18 = vld [vmem:[#allocation18 + $0x1f0] ss:$8 sps:$4 sm:$0xff]  }
0x1135   :  { %12317 = vmatpush3.bf16.msra.mxu1 %v15727_v2 }
0x1136   :  { %12322 = vmatprep.subr.bf16.mxu1 %v13709_v56 }
0x1138   :  { %12319 = vmatmul.mubr.msk.bf16.vlgmr.msra.gmra.mrb[136].mxu1 %vm8392_vm5, %v8391_v43 }
0x1139   :  { %12323 = vmatpush3.bf16.msra.mxu1 %v15727_v2  ;;  %12324 = vmatprep.mubr.msk.bf16.mxu1 %vm13710_vm2, %v13709_v56 }
0x113a   :  { %8600 = vmatprep.subr.bf16.mxu1 %v13168_v10 }
0x1140   :  { %12325 = vmatmul.mubr.msk.bf16.vlgmr.msra.gmra.mrb[140].mxu1 %vm8392_vm5, %v8458_v8 }
0x1141   :  { %8601 = vmatpush1.bf16.msra.mxu1 %v13166_v63  ;;  %8632 = vmatprep.mubr.bf16.mxu1 %v13711_v13 }
0x1142   :  { %8602 = vmatprep.subr.bf16.mxu1 %v13174_v39 }
0x1145   :  { %8603 = vmatpush1.bf16.msra.mxu1 %v13172_v47 }
0x1146   :  { %8604 = vmatprep.subr.bf16.mxu1 %v13180_v40 }
0x1149   :  { %8605 = vmatpush1.bf16.msra.mxu1 %v13178_v44 }
0x114a   :  { %8606 = vmatprep.subr.bf16.mxu1 %v13186_v7 }
0x114d   :  { %8607 = vmatpush1.bf16.msra.mxu1 %v13184_v23 }
0x114e   :  { %8608 = vmatprep.subr.bf16.mxu1 %v13192_v24 }
0x1151   :  { %8609 = vmatpush1.bf16.msra.mxu1 %v13190_v53  ;;  %v13257_v53 = vld [vmem:[#allocation21] sm:$0xff]  }
0x1152   :  { %8610 = vmatprep.subr.bf16.mxu1 %v13198_v16 }
0x1155   :  { %8611 = vmatpush1.bf16.msra.mxu1 %v13196_v12 }
0x1156   :  { %8612 = vmatprep.subr.bf16.mxu1 %v13204_v46 }
0x1159   :  { %8613 = vmatpush1.bf16.msra.mxu1 %v13202_v3  ;;  %v13258_v3 = vld [vmem:[#allocation21 + $0x48] sm:$0xff]  }
0x115a   :  { %8614 = vmatprep.subr.bf16.mxu1 %v13207_v58  ;;  %v13259_v58 = vld [vmem:[#allocation21 + $0x8] sm:$0xff]  }
0x115d   :  { %8615 = vmatpush1.bf16.msra.mxu1 %v13205_v52  ;;  %v13260_v52 = vld [vmem:[#allocation21 + $0x50] sm:$0xff]  }
0x115e   :  { %12328 = vmatprep.subr.bf16.mxu1 %v13709_v56 }
0x120b   :  { %v8434_v17 = vpop.f32.mrb[136].mxu1 }
0x120c   :  { %v8440_v15 = vpack.c.bf16 %v8434_v17, %v8434_v17  ;;  %v12320_v31 = vpop.f32.mrb[137].mxu1  ;;  %v13261_v17 = vld [vmem:[#allocation21 + $0x10] sm:$0xff]  }
0x120d   :  { %v8437_v9 = vpop.f32.mrb[138].mxu1  ;;  %v13262_v31 = vld [vmem:[#allocation21 + $0x58] sm:$0xff]  }
0x120e   :  { %v12321_v6 = vpop.f32.mrb[139].mxu1  ;;  %8754 = vmatmul.mubr.bf16.vlgmr.msra.gmra.mrb[56].mxu0 %v8440_v15 }
0x120f   :  { %8906 = vmatpush1.bf16.msra.mxu0 %v13208_v5  ;;  %8937 = vmatprep.mubr.bf16.mxu0 %v13711_v13  ;;  %v13263_v6 = vld [vmem:[#allocation21 + $0x18] sm:$0xff]  }
0x1210   :  { %8907 = vmatprep.subr.bf16.mxu0 %v13213_v51 }
0x1213   :  { %v8496_v0 = vpop.f32.mrb[140].mxu1  ;;  %8908 = vmatpush1.bf16.msra.mxu0 %v13211_v62  ;;  %v13264_v62 = vld [vmem:[#allocation21 + $0x60] sm:$0xff]  }
0x1214   :  { %v8502_v41 = vpack.c.bf16 %v8496_v0, %v8496_v0  ;;  %v12326_v20 = vpop.f32.mrb[141].mxu1  ;;  %8909 = vmatprep.subr.bf16.mxu0 %v13216_v14  ;;  %v13265_v14 = vld [vmem:[#allocation21 + $0x20] sm:$0xff]   ;;  %v13266_v0 = vld [vmem:[#allocation21 + $0x68] sm:$0xff]  }
0x1215   :  { %v8499_v26 = vpop.f32.mrb[142].mxu1  ;;  %v13268_v20 = vld [vmem:[#allocation21 + $0x70] sm:$0xff]  }
0x1216   :  { %8633 = vmatmul.mubr.bf16.vlgmr.msra.gmra.mrb[144].mxu1 %v8502_v41  ;;  %v12327_v4 = vpop.f32.mrb[143].mxu1  ;;  %v13267_v41 = vld [vmem:[#allocation21 + $0x28] sm:$0xff]   ;;  %v13270_v26 = vld [vmem:[#allocation21 + $0x78] sm:$0xff]  }
0x1217   :  { %12329 = vmatpush3.bf16.msra.mxu1 %v15727_v2  ;;  %12330 = vmatprep.mubr.msk.bf16.mxu1 %vm13710_vm2, %v13709_v56  ;;  %v9136_v4 = vlaneseq }
0x1218   :  { %12334 = vmatprep.subr.bf16.mxu1 %v13709_v56  ;;  %8910 = vmatpush1.bf16.msra.mxu0 %v13214_v33  ;;  %v13269_v33 = vld [vmem:[#allocation21 + $0x30] sm:$0xff]  }
0x1219   :  { %8911 = vmatprep.subr.bf16.mxu0 %v13222_v45  ;;  %v13271_v45 = vld [vmem:[#allocation21 + $0x38] sm:$0xff]  }
0x121c   :  { %8912 = vmatpush1.bf16.msra.mxu0 %v13220_v54  ;;  %v9137_v54 = vshrl.u32 %v9136_v4, 7 }
0x121d   :  { %8913 = vmatprep.subr.bf16.mxu0 %v13228_v22  ;;  %v9134_v22 = vld [vmem:[#allocation19] sm:$0x3] }
0x121e   :  { %12331 = vmatmul.mubr.msk.bf16.vlgmr.msra.gmra.mrb[148].mxu1 %vm8392_vm5, %v8763_v49 }
0x121f   :  { %12335 = vmatpush3.bf16.msra.mxu1 %v15727_v2  ;;  %12336 = vmatprep.mubr.msk.bf16.mxu1 %vm13710_vm2, %v13709_v56  ;;  %v13232_v56 = vld [vmem:[#allocation18 + $0x150] ss:$8 sps:$4 sm:$0xff]   ;;  %v13256_v2 = vld [vmem:[#allocation21 + $0x40] sm:$0xff]  }
0x1220   :  { %9091 = vmatprep.subr.bf16.mxu1 %v13219_v35  ;;  %8914 = vmatpush1.bf16.msra.mxu0 %v13226_v38  ;;  %v9138_v38 = vsub.s32 0, %v9137_v54 }
0x1221   :  { %8915 = vmatprep.subr.bf16.mxu0 %v13234_v61 }
0x1224   :  { %8916 = vmatpush1.bf16.msra.mxu0 %v13232_v56 }
0x1225   :  { %8917 = vmatprep.subr.bf16.mxu0 %v13240_v11 }
0x1226   :  { %12337 = vmatmul.mubr.msk.bf16.vlgmr.msra.gmra.mrb[152].mxu1 %vm8392_vm5, %v8949_v57 }
0x1227   :  { %9092 = vmatpush1.bf16.msra.mxu1 %v13217_v1  ;;  %9123 = vmatprep.mubr.bf16.mxu1 %v13711_v13 }
0x1228   :  { %9093 = vmatprep.subr.bf16.mxu1 %v13225_v21  ;;  %8918 = vmatpush1.bf16.msra.mxu0 %v13238_v27 }
0x1229   :  { %8919 = vmatprep.subr.bf16.mxu0 %v13246_v19 }
0x122b   :  { %9094 = vmatpush1.bf16.msra.mxu1 %v13223_v48 }
0x122c   :  { %9095 = vmatprep.subr.bf16.mxu1 %v13231_v25  ;;  %8920 = vmatpush1.bf16.msra.mxu0 %v13244_v60  ;;  %v9139_v25 = vrot.slane %v9134_v22, %v9138_v38 }
0x122d   :  { %11520 = vmatprep.subr.bf16.mxu0 %v13256_v2 }
0x122f   :  { %9096 = vmatpush1.bf16.msra.mxu1 %v13229_v34  ;;  %v9142_v34 = vsub.s32 1, %v9137_v54 }
0x1230   :  { %9097 = vmatprep.subr.bf16.mxu1 %v13237_v42 }
0x1231   :  { %v9143_v56 = vrot.slane %v9134_v22, %v9142_v34 }
0x1233   :  { %9098 = vmatpush1.bf16.msra.mxu1 %v13235_v55 }
0x1234   :  { %9099 = vmatprep.subr.bf16.mxu1 %v13243_v36 }
0x1237   :  { %9100 = vmatpush1.bf16.msra.mxu1 %v13241_v50 }
0x1238   :  { %9101 = vmatprep.subr.bf16.mxu1 %v13249_v29 }
0x123b   :  { %9102 = vmatpush1.bf16.msra.mxu1 %v13247_v59 }
0x123c   :  { %9103 = vmatprep.subr.bf16.mxu1 %v13252_v28 }
0x123f   :  { %9104 = vmatpush1.bf16.msra.mxu1 %v13250_v37 }
0x1240   :  { %9105 = vmatprep.subr.bf16.mxu1 %v13255_v32  ;;  %v9974_v32 = vld [vmem:[#allocation22] ss:$0 sm:$0xff] }
0x1243   :  { %9106 = vmatpush1.bf16.msra.mxu1 %v13253_v18 }
0x12e1   :  { %v8755_v43 = vpop.f32.mrb[56].mxu0 }
0x12e2   :  { %v8757_v10 = vpop.f32.mrb[57].mxu0 }
0x12e3   :  { %v8759_v8 = vpop.f32.mrb[58].mxu0 }
0x12e4   :  { %v8760_v63 = vpop.f32.mrb[59].mxu0 }
0x12e9   :  { %v8634_v39 = vpop.f32.mrb[144].mxu1 }
0x12ea   :  { %v8756_v47 = vadd.f32 %v8755_v43, %v8634_v39  ;;  %v8636_v40 = vpop.f32.mrb[145].mxu1 }
0x12eb   :  { %v8758_v44 = vadd.f32 %v8757_v10, %v8636_v40  ;;  %v8638_v7 = vpop.f32.mrb[146].mxu1 }
0x12ec   :  { %v8639_v23 = vpop.f32.mrb[147].mxu1 }
0x12f1   :  { %v8801_v24 = vpop.f32.mrb[148].mxu1 }
0x12f2   :  { %v8807_v16 = vpack.c.bf16 %v8801_v24, %v8801_v24  ;;  %v12332_v12 = vpop.f32.mrb[149].mxu1 }
0x12f3   :  { %v8804_v46 = vpop.f32.mrb[150].mxu1 }
0x12f4   :  { %8938 = vmatmul.mubr.bf16.vlgmr.msra.gmra.mrb[60].mxu0 %v8807_v16  ;;  %v12333_v13 = vpop.f32.mrb[151].mxu1 }
0x12f5   :  { %11521 = vmatpush3.bf16.msra.mxu0 %v13257_v53 }
0x12f6   :  { %11522 = vmatprep.subr.bf16.mxu0 %v13258_v3 }
0x12f9   :  { %v8987_v30 = vpop.f32.mrb[152].mxu1  ;;  %11523 = vmatpush3.bf16.msra.mxu0 %v13259_v58 }
0x12fa   :  { %v8993_v5 = vpack.c.bf16 %v8987_v30, %v8987_v30  ;;  %v12338_v15 = vpop.f32.mrb[153].mxu1  ;;  %11524 = vmatprep.subr.bf16.mxu0 %v13260_v52 }
0x12fb   :  { %v8990_v51 = vpop.f32.mrb[154].mxu1 }
0x12fc   :  { %9124 = vmatmul.mubr.bf16.vlgmr.msra.gmra.mrb[156].mxu1 %v8993_v5  ;;  %v12339_v9 = vpop.f32.mrb[155].mxu1 }
0x12fd   :  { %11525 = vmatpush3.bf16.msra.mxu0 %v13261_v17 }
0x12fe   :  { %11526 = vmatprep.subr.bf16.mxu0 %v13262_v31 }
0x1301   :  { %11527 = vmatpush3.bf16.msra.mxu0 %v13263_v6 }
0x1302   :  { %11528 = vmatprep.subr.bf16.mxu0 %v13264_v62 }
0x1305   :  { %11529 = vmatpush3.bf16.msra.mxu0 %v13265_v14 }
0x1306   :  { %11530 = vmatprep.subr.bf16.mxu0 %v13266_v0 }
0x1309   :  { %11531 = vmatpush3.bf16.msra.mxu0 %v13267_v41 }
0x130a   :  { %11532 = vmatprep.subr.bf16.mxu0 %v13268_v20 }
0x130d   :  { %11533 = vmatpush3.bf16.msra.mxu0 %v13269_v33 }
0x130e   :  { %11534 = vmatprep.subr.bf16.mxu0 %v13270_v26 }
0x1311   :  { %11535 = vmatpush3.bf16.msra.mxu0 %v13271_v45 }
0x13c7   :  { %v8939_v49 = vpop.f32.mrb[60].mxu0 }
0x13c8   :  { %v8946_v35 = vadd.f32 %v8939_v49, %v8756_v47  ;;  %v8941_v57 = vpop.f32.mrb[61].mxu0 }
0x13c9   :  { %v8947_v1 = vadd.f32 %v8941_v57, %v8758_v44  ;;  %v8943_v21 = vpop.f32.mrb[62].mxu0 }
0x13ca   :  { %v8944_v48 = vpop.f32.mrb[63].mxu0 }
0x13cf   :  { %v9125_v61 = vpop.f32.mrb[156].mxu1 }
0x13d0   :  { %v9132_v42 = vadd.f32 %v9125_v61, %v8946_v35  ;;  %v9127_v55 = vpop.f32.mrb[157].mxu1 }
0x13d1   :  { %v9133_v27 = vadd.f32 %v9127_v55, %v8947_v1  ;;  %v9129_v11 = vpop.f32.mrb[158].mxu1 }
0x13d2   :  { %v9146_v50 = vadd.f32 %v9139_v25, %v9132_v42  ;;  %v9130_v36 = vpop.f32.mrb[159].mxu1 }
0x13d3   :  { %v9147_v19 = vadd.f32 %v9143_v56, %v9133_v27 }
0x13d4   :  { %v9148_v29 = vmax.f32 %v9146_v50, 0.0 }
0x13d5   :  { %v9149_v60 = vmax.f32 %v9147_v19, 0.0 }
0x13d6   :  { %v9150_v28 = vpack.c.bf16 %v9148_v29, %v9148_v29 }
0x13d7   :  { %v9151_v59 = vpack.c.bf16 %v9149_v60, %v9149_v60 }
0x13d9   :  { %9319 = vmatprep.mubr.bf16.mxu0 %v9151_v59 }
0x13da   :  { %9320 = vmatmul.mubr.bf16.vlgmr.msra.gmra.mrb[80].mxu0 %v9150_v28 }
0x14ad   :  { %v11536_v37 = vpop.f32.mrb[80].mxu0 }
0x14ae   :  { %v11537_v18 = vpop.f32.mrb[81].mxu0 }
0x14af   :  { %v11538_v2 = vadd.f32 %v11537_v18, %v11536_v37  ;;  %v11539_v43 = vpop.f32.mrb[82].mxu0 }
0x14b0   :  { %v11540_v10 = vpop.f32.mrb[83].mxu0 }
0x14b1   :  { %v9322_v8 = vadd.f32 %v11538_v2, %v9974_v32 }
0x14b3   :  { %9327 = vst [vmem:[%s15764_s15] sm:$0xff] %v9322_v8 }
0x14b4   :  { %9332 = vsyncpa [#allocation3], 1 }
0x14b5   :  { %9333 = vsyncpa [#allocation5], 1 }
0x14b6   :  { %9334 = vsyncpa [#allocation8], 1 }
0x14b7   :  { %9335 = vsyncpa [#allocation11], 1 }
0x14b8   :  { %9336 = vsyncpa [#allocation14], 1 }
0x14b9   :  { %9337 = vsyncpa [#allocation17], 1 }
0x14ba   :  { %9338 = vsyncpa [#allocation20], 1 }
0x14bb   :  { %9339 = vsyncpa [#allocation23], 1 }

</bundles_post_ra>
